<compile_context>
chip_gen: v7x
topology: tpu7x:2x2x1
jax: 0.10.0
libtpu: 0.0.40
codegen_flags: <defaults>
</compile_context>

<pallas_src>
import functools

import jax
import jax.numpy as jnp
from jax.experimental import pallas as pl
from jax.experimental.pallas import tpu as pltpu


# --------------------------------------------------------------------------- #
# main per-tile kernel: fc + gated attention + online softmax accumulation
# --------------------------------------------------------------------------- #
def _clam_sb_bag_kernel(nvalid_ref,                                   # SMEM prefetch
                        h_ref, w1_ref, b1_ref, wab_ref, bab_ref, wc_ref, bc_ref,
                        araw_ref, m_out_ref, s_out_ref, macc_out_ref,
                        m_sc, s_sc, macc_sc,
                        *, tile_n, tiles_per_split, attn_dim):
    c = pl.program_id(0)            # bag half (TensorCore shard on v7x)
    i = pl.program_id(1)            # tile within the half
    n_inner = pl.num_programs(1)
    n_valid = nvalid_ref[0]

    tile_start = (c * tiles_per_split + i) * tile_n

    @pl.when(i == 0)
    def _init():
        m_sc[...] = jnp.full_like(m_sc, -1e30)
        s_sc[...] = jnp.zeros_like(s_sc)
        macc_sc[...] = jnp.zeros_like(macc_sc)

    # Skip fully out-of-range (redundant) steps entirely: their h / A_raw block
    # indices are clamped to the last valid tile (no new DMA) and the compute is
    # gated off, so they contribute nothing and cost ~nothing.
    @pl.when(tile_start < n_valid)
    def _compute():
        # fc: Linear(L0 -> L1) + ReLU.  h is cast to bf16 in-kernel (VPU work,
        # hidden under MXU/DMA); f32 accumulation via preferred_element_type.
        hp = jnp.dot(h_ref[...].astype(jnp.bfloat16), w1_ref[...],
                     preferred_element_type=jnp.float32) + b1_ref[...]
        hp = jnp.maximum(hp, 0.0)                                   # [TILE_N, L1]

        # Zero rows beyond the bag: the ragged last tile's unfilled VMEM rows are
        # stale (possibly NaN/Inf); where() keeps them out of every accumulator.
        row = tile_start + jax.lax.broadcasted_iota(jnp.int32, (tile_n, 1), 0)
        valid = row < n_valid
        hp = jnp.where(valid, hp, 0.0)

        # Attn_Net_Gated: fused Wa|Wb matmul, split into tanh / sigmoid halves.
        ab = jnp.dot(hp.astype(wab_ref.dtype), wab_ref[...],
                     preferred_element_type=jnp.float32) + bab_ref[...]
        a = jnp.tanh(ab[:, :attn_dim])
        b = jax.nn.sigmoid(ab[:, attn_dim:])
        g = a * b                                                   # [TILE_N, D]

        # attention score: VPU multiply + lane reduction (keeps the MXU free).
        scores = jnp.sum(g * wc_ref[...], axis=1, keepdims=True) + bc_ref[...]

        # Raw attention scores (Pallas clips the partial last block on write).
        # TODO(synk): could emit lane-dense [1, tile_n] rows (XLU transpose) to
        # avoid masked 1-lane stores; absolute cost is tiny so kept column form.
        araw_ref[...] = scores

        # online (flash-style) softmax update over the N axis.
        scores_m = jnp.where(valid, scores, -1e30)
        m_old = m_sc[...]
        m_new = jnp.maximum(m_old, jnp.max(scores_m, axis=0, keepdims=True))
        alpha = jnp.exp(m_old - m_new)
        p = jnp.exp(scores_m - m_new)                               # [TILE_N, 1]
        s_sc[...] = alpha * s_sc[...] + jnp.sum(p, axis=0, keepdims=True)
        # M accumulation: broadcast multiply + sublane reduce (VPU/XLU filler
        # under MXU slack; switch to an MXU matmul if a bundle dump shows
        # VALU/XLU saturating).
        macc_sc[...] = alpha * macc_sc[...] + jnp.sum(p * hp, axis=0, keepdims=True)
        m_sc[...] = m_new

    @pl.when(i == n_inner - 1)
    def _finalize():
        m_out_ref[0] = m_sc[...]
        s_out_ref[0] = s_sc[...]
        macc_out_ref[0] = macc_sc[...]


# --------------------------------------------------------------------------- #
# tiny combine kernel: merge per-half softmax partials + classifier + softmax
# --------------------------------------------------------------------------- #
def _combine_kernel(m_ref, s_ref, macc_ref, wcls_ref, bcls_ref,
                    logits_ref, yprob_ref):
    m_p = m_ref[...]                                   # [S, 1]
    m = jnp.max(m_p, axis=0, keepdims=True)            # [1, 1]
    w = jnp.exp(m_p - m)                               # [S, 1]
    s = jnp.sum(w * s_ref[...], axis=0, keepdims=True)             # [1, 1]
    macc = jnp.sum(w * macc_ref[...], axis=0, keepdims=True)       # [1, L1]
    M = macc / s                                        # exact division (runs once)
    logits = jnp.dot(M, wcls_ref[...],
                     preferred_element_type=jnp.float32) + bcls_ref[...]
    logits_ref[...] = logits
    lm = jnp.max(logits, axis=1, keepdims=True)
    le = jnp.exp(logits - lm)
    yprob_ref[...] = le / jnp.sum(le, axis=1, keepdims=True)


# --------------------------------------------------------------------------- #
# helpers
# --------------------------------------------------------------------------- #
def _round_up(x, m):
    return ((x + m - 1) // m) * m


def _tpu_vmem_capacity_bytes():
    try:
        return int(pltpu.get_tpu_info().vmem_capacity_bytes)
    except Exception:
        return 128 << 20


def _h_buffer_depth():
    # v7x (64 MiB VMEM, 2 TCs, 3.2 TB/s HBM): per-tile h DMA ~ per-core MXU time
    # after the 2-core split -> deepen the h pipeline. v5e/v6e: default depth 2.
    return 3 if _tpu_vmem_capacity_bytes() <= (96 << 20) else 2


def _make_h_spec(tile_n, l0, index_map):
    depth = _h_buffer_depth()
    if depth > 2:
        try:
            return pl.BlockSpec((tile_n, l0), index_map,
                                pipeline_mode=pl.Buffered(depth))
        except Exception:
            pass
    return pl.BlockSpec((tile_n, l0), index_map)


def _pick_tile_n(requested, n):
    if requested is not None:
        # sanitize: (tile_n, L0)/(tile_n, 1) blocks need tile_n % 8 == 0.
        return max(8, _round_up(int(requested), 8))
    # MXU/DMA amortized by ~512 rows; 1024 keeps per-step overhead small and fits
    # the flat 48 MiB VMEM limit on every generation (2048 would not).
    return min(1024, max(128, _round_up(n, 128)))


# --------------------------------------------------------------------------- #
# wrapper
# --------------------------------------------------------------------------- #
def clam_sb_forward(h, params, tile_n=None):
    """Returns (logits, Y_prob, Y_hat, A_raw, results_dict) like CLAM_SB.forward."""
    N, L0 = h.shape
    w1, b1, wa, ba, wb, bb, wc, bc, wcls, bcls = params
    L1 = w1.shape[1]
    D = wa.shape[1]
    n_classes = wcls.shape[1]

    tile_n = _pick_tile_n(tile_n, N)
    num_tiles = pl.cdiv(N, tile_n)
    # 2-way split of the bag (sharded across both TCs on v7x; sequential and
    # nearly free on single-core parts -- any redundant step is fully masked and
    # issues no new DMA because its block index is clamped to the last tile).
    num_splits = 2 if num_tiles >= 2 else 1
    tps = pl.cdiv(num_tiles, num_splits)        # tiles per split
    last_tile = num_tiles - 1

    # Small, one-time weight casts (h itself is streamed raw, cast in-kernel).
    w1b = w1.astype(jnp.bfloat16)
    wab = jnp.concatenate([wa, wb], axis=1).astype(jnp.bfloat16)    # [L1, 2D]
    bab = jnp.concatenate([ba, bb], axis=1).astype(jnp.float32)     # [1, 2D]
    wc_row = wc.reshape(1, D).astype(jnp.float32)                   # [1, D]
    bc_sc = bc.reshape(1, 1).astype(jnp.float32)                    # [1, 1]
    b1f = b1.astype(jnp.float32)
    wclsf = wcls.astype(jnp.float32)
    bclsf = bcls.astype(jnp.float32)

    n_valid_arr = jnp.array([N], dtype=jnp.int32)   # scalar-prefetch (SMEM)

    kernel = functools.partial(_clam_sb_bag_kernel, tile_n=tile_n,
                               tiles_per_split=tps, attn_dim=D)

    def tile_idx(c_, i_):
        # Clamp so a redundant trailing step never addresses an out-of-range
        # block (its compute is skipped inside the kernel via pl.when).
        return jnp.minimum(c_ * tps + i_, last_tile)

    def resident(shape):
        # weight/bias blocks: full array, constant index map -> VMEM-resident.
        return pl.BlockSpec(shape, lambda c, i, nv: (0, 0))

    grid_spec = pltpu.PrefetchScalarGridSpec(
        num_scalar_prefetch=1,
        grid=(num_splits, tps),
        in_specs=[
            _make_h_spec(tile_n, L0, lambda c, i, nv: (tile_idx(c, i), 0)),
            resident((L0, L1)),                             # W1 (bf16)
            resident((1, L1)),                              # b1
            resident((L1, 2 * D)),                          # Wa|Wb fused (bf16)
            resident((1, 2 * D)),                           # ba|bb fused
            resident((1, D)),                               # Wc as a row
            resident((1, 1)),                               # bc
        ],
        out_specs=(
            pl.BlockSpec((tile_n, 1), lambda c, i, nv: (tile_idx(c, i), 0)),  # A_raw col
            pl.BlockSpec((1, 1, 1), lambda c, i, nv: (c, 0, 0)),    # m partial
            pl.BlockSpec((1, 1, 1), lambda c, i, nv: (c, 0, 0)),    # s partial
            pl.BlockSpec((1, 1, L1), lambda c, i, nv: (c, 0, 0)),   # macc partial
        ),
        scratch_shapes=[
            pltpu.VMEM((1, 1), jnp.float32),    # running max
            pltpu.VMEM((1, 1), jnp.float32),    # running sum of exp
            pltpu.VMEM((1, L1), jnp.float32),   # un-normalized M accumulator
        ],
    )

    a_raw_col, m_parts, s_parts, macc_parts = pl.pallas_call(
        kernel,
        out_shape=(
            jax.ShapeDtypeStruct((N, 1), jnp.float32),                 # A_raw column
            jax.ShapeDtypeStruct((num_splits, 1, 1), jnp.float32),     # m partials
            jax.ShapeDtypeStruct((num_splits, 1, 1), jnp.float32),     # s partials
            jax.ShapeDtypeStruct((num_splits, 1, L1), jnp.float32),    # macc partials
        ),
        grid_spec=grid_spec,
        compiler_params=pltpu.CompilerParams(
            # leading split axis independent (megacore-shardable on v7x);
            # inner online-softmax carry is sequential.
            dimension_semantics=("parallel", "arbitrary"),
            vmem_limit_bytes=48 << 20,
        ),
    )(n_valid_arr, h, w1b, b1f, wab, bab, wc_row, bc_sc)

    # Tiny combine: merge the per-half online-softmax partials, classifier matmul
    # + softmax.  Whole arrays fit trivially in VMEM (no grid / BlockSpecs).
    logits, y_prob = pl.pallas_call(
        _combine_kernel,
        out_shape=(jax.ShapeDtypeStruct((1, n_classes), jnp.float32),
                   jax.ShapeDtypeStruct((1, n_classes), jnp.float32)),
    )(m_parts.reshape(num_splits, 1),
      s_parts.reshape(num_splits, 1),
      macc_parts.reshape(num_splits, L1),
      wclsf, bclsf)

    # glue: attention scores to [1, N] and argmax (torch.topk(..., 1)).
    A_raw = a_raw_col.reshape(1, N)
    Y_hat = jnp.argmax(logits, axis=1).reshape(1, 1).astype(jnp.int32)
    results_dict = {}
    return logits, y_prob, Y_hat, A_raw, results_dict


# --------------------------------------------------------------------------- #
# parameters / reference
# --------------------------------------------------------------------------- #
def init_params(key, L0=1792, L1=512, D=256, n_classes=2):
    """Deterministic synthetic parameters matching CLAM_SB's layer shapes."""
    ks = jax.random.split(key, 10)

    def lin(k, fan_in, fan_out):
        kw, kb = jax.random.split(k)
        w = jax.random.normal(kw, (fan_in, fan_out), jnp.float32) * (1.0 / jnp.sqrt(fan_in))
        b = jax.random.normal(kb, (1, fan_out), jnp.float32) * 0.01
        return w, b

    w1, b1 = lin(ks[0], L0, L1)             # fc: Linear(1792, 512)
    wa, ba = lin(ks[1], L1, D)              # attention_a: Linear(512, 256)
    wb, bb = lin(ks[2], L1, D)              # attention_b: Linear(512, 256)
    wc, bc = lin(ks[3], D, 1)               # attention_c: Linear(256, 1)
    wcls, bcls = lin(ks[4], L1, n_classes)  # classifiers: Linear(512, n_classes)
    # TODO(synk): instance_classifiers / instance-eval branch (top-k gather + CE
    # loss) is training-only control flow, not on the default forward path.
    return (w1, b1, wa, ba, wb, bb, wc, bc, wcls, bcls)


def _reference_forward(h, params):
    """Pure-JAX (f32) reference for a numerical sanity check."""
    w1, b1, wa, ba, wb, bb, wc, bc, wcls, bcls = params
    hp = jnp.maximum(h @ w1 + b1, 0.0)
    a = jnp.tanh(hp @ wa + ba)
    b = jax.nn.sigmoid(hp @ wb + bb)
    A = ((a * b) @ wc + bc).T                    # [1, N]
    A_sm = jax.nn.softmax(A, axis=1)
    M = A_sm @ hp
    logits = M @ wcls + bcls
    return logits, jax.nn.softmax(logits, axis=1), A


if __name__ == "__main__":
    key = jax.random.PRNGKey(0)
    k_h, k_p = jax.random.split(key)

    # N patches x 1792-dim features (CLAM_SB's hardcoded input width).
    # N=300 with tile_n=128 -> 3 tiles split 2-way (grid (2,2)): exercises the
    # ragged last tile, the clamped/skipped redundant step and the combine.
    N, L0 = 300, 1792
    h = jax.random.normal(k_h, (N, L0), jnp.float32)
    params = init_params(k_p, L0=L0, L1=512, D=256, n_classes=2)

    logits, y_prob, y_hat, a_raw, results = clam_sb_forward(h, params, tile_n=128)
    jax.block_until_ready((logits, y_prob, y_hat, a_raw))

    # sanity check against pure-JAX reference (tolerances loosened for bf16 matmuls)
    ref_logits, ref_prob, ref_A = _reference_forward(h, params)
    assert jnp.allclose(logits, ref_logits, atol=5e-2, rtol=5e-2)
    assert jnp.allclose(y_prob, ref_prob, atol=2e-2, rtol=2e-2)
    assert jnp.allclose(a_raw, ref_A, atol=5e-2, rtol=5e-2)
    assert logits.shape == (1, 2) and y_prob.shape == (1, 2)
    assert y_hat.shape == (1, 1) and a_raw.shape == (1, N)

    print("KERNEL_OK")
</pallas_src>

<mosaic_0001>
module attributes {stable_mosaic.version = 11 : i64} {
  func.func @_clam_sb_bag_kernel(%arg0: i32, %arg1: i32, %arg2: memref<1xi32, #tpu.memory_space<smem>>, %arg3: memref<128x1792xf32, #tpu.memory_space<vmem>>, %arg4: memref<1792x512xbf16, #tpu.memory_space<vmem>>, %arg5: memref<1x512xf32, #tpu.memory_space<vmem>>, %arg6: memref<512x512xbf16, #tpu.memory_space<vmem>>, %arg7: memref<1x512xf32, #tpu.memory_space<vmem>>, %arg8: memref<1x256xf32, #tpu.memory_space<vmem>>, %arg9: memref<1x1xf32, #tpu.memory_space<vmem>>, %arg10: memref<128x1xf32, #tpu.memory_space<vmem>>, %arg11: memref<1x1x1xf32, #tpu.memory_space<vmem>>, %arg12: memref<1x1x1xf32, #tpu.memory_space<vmem>>, %arg13: memref<1x1x512xf32, #tpu.memory_space<vmem>>, %arg14: memref<1x1xf32, #tpu.memory_space<vmem>>, %arg15: memref<1x1xf32, #tpu.memory_space<vmem>>, %arg16: memref<1x512xf32, #tpu.memory_space<vmem>>) attributes {dimension_semantics = [#tpu.dimension_semantics<parallel>, #tpu.dimension_semantics<arbitrary>], iteration_bounds = array<i64: 2, 2>, scalar_prefetch = 1 : i64, scratch_operands = 3 : i64, tpu.core_type = #tpu.core_type<tc>, window_params = [{transform_indices = @transform_0, window_bounds = array<i64: 128, 1792>}, {pipeline_mode = #tpu.pipeline_mode<synchronous>, transform_indices = @transform_1, window_bounds = array<i64: 1792, 512>}, {pipeline_mode = #tpu.pipeline_mode<synchronous>, transform_indices = @transform_2, window_bounds = array<i64: 1, 512>}, {pipeline_mode = #tpu.pipeline_mode<synchronous>, transform_indices = @transform_3, window_bounds = array<i64: 512, 512>}, {pipeline_mode = #tpu.pipeline_mode<synchronous>, transform_indices = @transform_4, window_bounds = array<i64: 1, 512>}, {pipeline_mode = #tpu.pipeline_mode<synchronous>, transform_indices = @transform_5, window_bounds = array<i64: 1, 256>}, {pipeline_mode = #tpu.pipeline_mode<synchronous>, transform_indices = @transform_6, window_bounds = array<i64: 1, 1>}, {transform_indices = @transform_7, window_bounds = array<i64: 128, 1>}, {transform_indices = @transform_8, window_bounds = array<i64: 1, 1, 1>}, {transform_indices = @transform_9, window_bounds = array<i64: 1, 1, 1>}, {transform_indices = @transform_10, window_bounds = array<i64: 1, 1, 512>}]} {
    %c0 = arith.constant 0 : index
    %0 = memref.load %arg2[%c0] : memref<1xi32, #tpu.memory_space<smem>>
    %c2_i32 = arith.constant 2 : i32
    %1 = arith.muli %arg0, %c2_i32 : i32
    %2 = arith.addi %1, %arg1 : i32
    %c128_i32 = arith.constant 128 : i32
    %3 = arith.muli %2, %c128_i32 : i32
    %c0_i32 = arith.constant 0 : i32
    %4 = arith.cmpi eq, %arg1, %c0_i32 : i32
    %5 = arith.extui %4 : i1 to i32
    %c0_i32_0 = arith.constant 0 : i32
    %6 = arith.cmpi ne, %5, %c0_i32_0 : i32
    scf.if %6 {
      %cst = arith.constant -1.000000e+30 : f32
      %13 = vector.broadcast %cst : f32 to vector<1x1xf32>
      %c0_3 = arith.constant 0 : index
      %c0_4 = arith.constant 0 : index
      %14 = vector.load %arg14[%c0_3, %c0_4] : memref<1x1xf32, #tpu.memory_space<vmem>>, vector<1x1xf32>
      tpu.vector_store %arg14[%c0_3, %c0_4], %13 {strides = array<i32>} : memref<1x1xf32, #tpu.memory_space<vmem>>, vector<1x1xf32>,
      %cst_5 = arith.constant 0.000000e+00 : f32
      %15 = vector.broadcast %cst_5 : f32 to vector<1x1xf32>
      %c0_6 = arith.constant 0 : index
      %c0_7 = arith.constant 0 : index
      %16 = vector.load %arg15[%c0_6, %c0_7] : memref<1x1xf32, #tpu.memory_space<vmem>>, vector<1x1xf32>
      tpu.vector_store %arg15[%c0_6, %c0_7], %15 {strides = array<i32>} : memref<1x1xf32, #tpu.memory_space<vmem>>, vector<1x1xf32>,
      %cst_8 = arith.constant 0.000000e+00 : f32
      %17 = vector.broadcast %cst_8 : f32 to vector<1x512xf32>
      %c0_9 = arith.constant 0 : index
      %c0_10 = arith.constant 0 : index
      %18 = vector.load %arg16[%c0_9, %c0_10] : memref<1x512xf32, #tpu.memory_space<vmem>>, vector<1x512xf32>
      tpu.vector_store %arg16[%c0_9, %c0_10], %17 {strides = array<i32>} : memref<1x512xf32, #tpu.memory_space<vmem>>, vector<1x512xf32>,
    } else {
    }
    %7 = arith.cmpi slt, %3, %0 : i32
    %8 = arith.extui %7 : i1 to i32
    %c0_i32_1 = arith.constant 0 : i32
    %9 = arith.cmpi ne, %8, %c0_i32_1 : i32
    scf.if %9 {
      %c0_3 = arith.constant 0 : index
      %c0_4 = arith.constant 0 : index
      %13 = vector.load %arg3[%c0_3, %c0_4] : memref<128x1792xf32, #tpu.memory_space<vmem>>, vector<128x1792xf32>
      %14 = arith.truncf %13 : vector<128x1792xf32> to vector<128x1792xbf16>
      %c0_5 = arith.constant 0 : index
      %c0_6 = arith.constant 0 : index
      %15 = vector.load %arg4[%c0_5, %c0_6] : memref<1792x512xbf16, #tpu.memory_space<vmem>>, vector<1792x512xbf16>
      %cst = arith.constant dense<0.000000e+00> : vector<128x512xf32>
      %16 = tpu.matmul %14, %15, %cst {dimension_numbers = #tpu.dot_dimension_numbers<[1], [0], [0], [1], [0, 0, 1, 1], [], []>} : vector<128x1792xbf16>, vector<1792x512xbf16>, vector<128x512xf32> -> vector<128x512xf32>
      %c0_7 = arith.constant 0 : index
      %c0_8 = arith.constant 0 : index
      %17 = vector.load %arg5[%c0_7, %c0_8] : memref<1x512xf32, #tpu.memory_space<vmem>>, vector<1x512xf32>
      %18 = vector.broadcast %17 : vector<1x512xf32> to vector<128x512xf32>
      %19 = arith.addf %16, %18 : vector<128x512xf32>
      %cst_9 = arith.constant 0.000000e+00 : f32
      %20 = vector.broadcast %cst_9 : f32 to vector<128x512xf32>
      %21 = arith.maximumf %19, %20 : vector<128x512xf32>
      %22 = tpu.iota {dimensions = array<i32: 0>} : vector<128x1xi32>
      %23 = vector.broadcast %3 : i32 to vector<128x1xi32>
      %24 = arith.addi %23, %22 : vector<128x1xi32>
      %25 = vector.broadcast %0 : i32 to vector<128x1xi32>
      %26 = arith.cmpi slt, %24, %25 : vector<128x1xi32>
      %cst_10 = arith.constant 0.000000e+00 : f32
      %27 = vector.shape_cast %26 : vector<128x1xi1> to vector<128x1xi1>
      %28 = vector.broadcast %27 : vector<128x1xi1> to vector<128x512xi1>
      %29 = vector.broadcast %cst_10 : f32 to vector<128x512xf32>
      %30 = arith.select %28, %21, %29 : vector<128x512xi1>, vector<128x512xf32>
      %31 = arith.truncf %30 : vector<128x512xf32> to vector<128x512xbf16>
      %c0_11 = arith.constant 0 : index
      %c0_12 = arith.constant 0 : index
      %32 = vector.load %arg6[%c0_11, %c0_12] : memref<512x512xbf16, #tpu.memory_space<vmem>>, vector<512x512xbf16>
      %cst_13 = arith.constant dense<0.000000e+00> : vector<128x512xf32>
      %33 = tpu.matmul %31, %32, %cst_13 {dimension_numbers = #tpu.dot_dimension_numbers<[1], [0], [0], [1], [0, 0, 1, 1], [], []>} : vector<128x512xbf16>, vector<512x512xbf16>, vector<128x512xf32> -> vector<128x512xf32>
      %c0_14 = arith.constant 0 : index
      %c0_15 = arith.constant 0 : index
      %34 = vector.load %arg7[%c0_14, %c0_15] : memref<1x512xf32, #tpu.memory_space<vmem>>, vector<1x512xf32>
      %35 = vector.broadcast %34 : vector<1x512xf32> to vector<128x512xf32>
      %36 = arith.addf %33, %35 : vector<128x512xf32>
      %37 = vector.extract_strided_slice %36 {offsets = [0, 0], sizes = [128, 256], strides = [1, 1]} : vector<128x512xf32> to vector<128x256xf32>
      %38 = math.tanh %37 : vector<128x256xf32>
      %39 = vector.extract_strided_slice %36 {offsets = [0, 256], sizes = [128, 256], strides = [1, 1]} : vector<128x512xf32> to vector<128x256xf32>
      %40 = arith.negf %39 : vector<128x256xf32>
      %41 = math.exp %40 : vector<128x256xf32>
      %cst_16 = arith.constant 1.000000e+00 : f32
      %42 = vector.broadcast %cst_16 : f32 to vector<128x256xf32>
      %43 = arith.addf %42, %41 : vector<128x256xf32>
      %44 = arith.divf %42, %43 : vector<128x256xf32>
      %45 = arith.mulf %38, %44 : vector<128x256xf32>
      %c0_17 = arith.constant 0 : index
      %c0_18 = arith.constant 0 : index
      %46 = vector.load %arg8[%c0_17, %c0_18] : memref<1x256xf32, #tpu.memory_space<vmem>>, vector<1x256xf32>
      %47 = vector.broadcast %46 : vector<1x256xf32> to vector<128x256xf32>
      %48 = arith.mulf %45, %47 : vector<128x256xf32>
      %cst_19 = arith.constant dense<0.000000e+00> : vector<128xf32>
      %49 = vector.multi_reduction <add>, %48, %cst_19 [1] : vector<128x256xf32> to vector<128xf32>
      %50 = vector.shape_cast %49 : vector<128xf32> to vector<128x1xf32>
      %c0_20 = arith.constant 0 : index
      %c0_21 = arith.constant 0 : index
      %51 = vector.load %arg9[%c0_20, %c0_21] : memref<1x1xf32, #tpu.memory_space<vmem>>, vector<1x1xf32>
      %52 = vector.broadcast %51 : vector<1x1xf32> to vector<128x1xf32>
      %53 = arith.addf %50, %52 : vector<128x1xf32>
      %c0_22 = arith.constant 0 : index
      %c0_23 = arith.constant 0 : index
      %54 = vector.load %arg10[%c0_22, %c0_23] : memref<128x1xf32, #tpu.memory_space<vmem>>, vector<128x1xf32>
      tpu.vector_store %arg10[%c0_22, %c0_23], %53 {strides = array<i32>} : memref<128x1xf32, #tpu.memory_space<vmem>>, vector<128x1xf32>,
      %cst_24 = arith.constant -1.000000e+30 : f32
      %55 = vector.broadcast %cst_24 : f32 to vector<128x1xf32>
      %56 = arith.select %26, %53, %55 : vector<128x1xi1>, vector<128x1xf32>
      %c0_25 = arith.constant 0 : index
      %c0_26 = arith.constant 0 : index
      %57 = vector.load %arg14[%c0_25, %c0_26] : memref<1x1xf32, #tpu.memory_space<vmem>>, vector<1x1xf32>
      %cst_27 = arith.constant dense<0xFF800000> : vector<1xf32>
      %58 = vector.multi_reduction <maximumf>, %56, %cst_27 [0] : vector<128x1xf32> to vector<1xf32>
      %59 = vector.shape_cast %58 : vector<1xf32> to vector<1x1xf32>
      %60 = arith.maximumf %57, %59 : vector<1x1xf32>
      %61 = arith.subf %57, %60 : vector<1x1xf32>
      %62 = math.exp %61 : vector<1x1xf32>
      %63 = vector.broadcast %60 : vector<1x1xf32> to vector<128x1xf32>
      %64 = arith.subf %56, %63 : vector<128x1xf32>
      %65 = math.exp %64 : vector<128x1xf32>
      %c0_28 = arith.constant 0 : index
      %c0_29 = arith.constant 0 : index
      %66 = vector.load %arg15[%c0_28, %c0_29] : memref<1x1xf32, #tpu.memory_space<vmem>>, vector<1x1xf32>
      %67 = arith.mulf %62, %66 : vector<1x1xf32>
      %cst_30 = arith.constant dense<0.000000e+00> : vector<1xf32>
      %68 = vector.multi_reduction <add>, %65, %cst_30 [0] : vector<128x1xf32> to vector<1xf32>
      %69 = vector.shape_cast %68 : vector<1xf32> to vector<1x1xf32>
      %70 = arith.addf %67, %69 : vector<1x1xf32>
      %c0_31 = arith.constant 0 : index
      %c0_32 = arith.constant 0 : index
      %71 = vector.load %arg15[%c0_31, %c0_32] : memref<1x1xf32, #tpu.memory_space<vmem>>, vector<1x1xf32>
      tpu.vector_store %arg15[%c0_31, %c0_32], %70 {strides = array<i32>} : memref<1x1xf32, #tpu.memory_space<vmem>>, vector<1x1xf32>,
      %c0_33 = arith.constant 0 : index
      %c0_34 = arith.constant 0 : index
      %72 = vector.load %arg16[%c0_33, %c0_34] : memref<1x512xf32, #tpu.memory_space<vmem>>, vector<1x512xf32>
      %73 = vector.broadcast %62 : vector<1x1xf32> to vector<1x512xf32>
      %74 = arith.mulf %73, %72 : vector<1x512xf32>
      %75 = vector.broadcast %65 : vector<128x1xf32> to vector<128x512xf32>
      %76 = arith.mulf %75, %30 : vector<128x512xf32>
      %cst_35 = arith.constant dense<0.000000e+00> : vector<512xf32>
      %77 = vector.multi_reduction <add>, %76, %cst_35 [0] : vector<128x512xf32> to vector<512xf32>
      %78 = vector.shape_cast %77 : vector<512xf32> to vector<1x512xf32>
      %79 = arith.addf %74, %78 : vector<1x512xf32>
      %c0_36 = arith.constant 0 : index
      %c0_37 = arith.constant 0 : index
      %80 = vector.load %arg16[%c0_36, %c0_37] : memref<1x512xf32, #tpu.memory_space<vmem>>, vector<1x512xf32>
      tpu.vector_store %arg16[%c0_36, %c0_37], %79 {strides = array<i32>} : memref<1x512xf32, #tpu.memory_space<vmem>>, vector<1x512xf32>,
      %c0_38 = arith.constant 0 : index
      %c0_39 = arith.constant 0 : index
      %81 = vector.load %arg14[%c0_38, %c0_39] : memref<1x1xf32, #tpu.memory_space<vmem>>, vector<1x1xf32>
      tpu.vector_store %arg14[%c0_38, %c0_39], %60 {strides = array<i32>} : memref<1x1xf32, #tpu.memory_space<vmem>>, vector<1x1xf32>,
    } else {
    }
    %c1_i32 = arith.constant 1 : i32
    %10 = arith.cmpi eq, %arg1, %c1_i32 : i32
    %11 = arith.extui %10 : i1 to i32
    %c0_i32_2 = arith.constant 0 : i32
    %12 = arith.cmpi ne, %11, %c0_i32_2 : i32
    scf.if %12 {
      %c0_3 = arith.constant 0 : index
      %c0_4 = arith.constant 0 : index
      %13 = vector.load %arg14[%c0_3, %c0_4] : memref<1x1xf32, #tpu.memory_space<vmem>>, vector<1x1xf32>
      %c0_5 = arith.constant 0 : index
      %c0_6 = arith.constant 0 : index
      %c0_7 = arith.constant 0 : index
      %14 = vector.load %arg11[%c0_5, %c0_6, %c0_7] : memref<1x1x1xf32, #tpu.memory_space<vmem>>, vector<1x1x1xf32>
      %15 = vector.shape_cast %14 : vector<1x1x1xf32> to vector<1x1xf32>
      %16 = vector.shape_cast %13 : vector<1x1xf32> to vector<1x1x1xf32>
      tpu.vector_store %arg11[%c0_5, %c0_6, %c0_7], %16 {strides = array<i32>} : memref<1x1x1xf32, #tpu.memory_space<vmem>>, vector<1x1x1xf32>,
      %c0_8 = arith.constant 0 : index
      %c0_9 = arith.constant 0 : index
      %17 = vector.load %arg15[%c0_8, %c0_9] : memref<1x1xf32, #tpu.memory_space<vmem>>, vector<1x1xf32>
      %c0_10 = arith.constant 0 : index
      %c0_11 = arith.constant 0 : index
      %c0_12 = arith.constant 0 : index
      %18 = vector.load %arg12[%c0_10, %c0_11, %c0_12] : memref<1x1x1xf32, #tpu.memory_space<vmem>>, vector<1x1x1xf32>
      %19 = vector.shape_cast %18 : vector<1x1x1xf32> to vector<1x1xf32>
      %20 = vector.shape_cast %17 : vector<1x1xf32> to vector<1x1x1xf32>
      tpu.vector_store %arg12[%c0_10, %c0_11, %c0_12], %20 {strides = array<i32>} : memref<1x1x1xf32, #tpu.memory_space<vmem>>, vector<1x1x1xf32>,
      %c0_13 = arith.constant 0 : index
      %c0_14 = arith.constant 0 : index
      %21 = vector.load %arg16[%c0_13, %c0_14] : memref<1x512xf32, #tpu.memory_space<vmem>>, vector<1x512xf32>
      %c0_15 = arith.constant 0 : index
      %c0_16 = arith.constant 0 : index
      %c0_17 = arith.constant 0 : index
      %22 = vector.load %arg13[%c0_15, %c0_16, %c0_17] : memref<1x1x512xf32, #tpu.memory_space<vmem>>, vector<1x1x512xf32>
      %23 = vector.shape_cast %22 : vector<1x1x512xf32> to vector<1x512xf32>
      %24 = vector.shape_cast %21 : vector<1x512xf32> to vector<1x1x512xf32>
      tpu.vector_store %arg13[%c0_15, %c0_16, %c0_17], %24 {strides = array<i32>} : memref<1x1x512xf32, #tpu.memory_space<vmem>>, vector<1x1x512xf32>,
    } else {
    }
    return
  }
  func.func @transform_0(%arg0: i32, %arg1: i32, %arg2: memref<1xi32, #tpu.memory_space<smem>>) -> (i32, i32) {
    %c2_i32 = arith.constant 2 : i32
    %0 = arith.muli %arg0, %c2_i32 : i32
    %1 = arith.addi %0, %arg1 : i32
    %c2_i32_0 = arith.constant 2 : i32
    %2 = arith.minsi %1, %c2_i32_0 : i32
    %c0_i32 = arith.constant 0 : i32
    %c0_i32_1 = arith.constant 0 : i32
    return %2, %c0_i32 : i32, i32
  }
  func.func @transform_1(%arg0: i32, %arg1: i32, %arg2: memref<1xi32, #tpu.memory_space<smem>>) -> (i32, i32) {
    %c0_i32 = arith.constant 0 : i32
    %c0_i32_0 = arith.constant 0 : i32
    %c0_i32_1 = arith.constant 0 : i32
    return %c0_i32, %c0_i32_0 : i32, i32
  }
  func.func @transform_2(%arg0: i32, %arg1: i32, %arg2: memref<1xi32, #tpu.memory_space<smem>>) -> (i32, i32) {
    %c0_i32 = arith.constant 0 : i32
    %c0_i32_0 = arith.constant 0 : i32
    %c0_i32_1 = arith.constant 0 : i32
    return %c0_i32, %c0_i32_0 : i32, i32
  }
  func.func @transform_3(%arg0: i32, %arg1: i32, %arg2: memref<1xi32, #tpu.memory_space<smem>>) -> (i32, i32) {
    %c0_i32 = arith.constant 0 : i32
    %c0_i32_0 = arith.constant 0 : i32
    %c0_i32_1 = arith.constant 0 : i32
    return %c0_i32, %c0_i32_0 : i32, i32
  }
  func.func @transform_4(%arg0: i32, %arg1: i32, %arg2: memref<1xi32, #tpu.memory_space<smem>>) -> (i32, i32) {
    %c0_i32 = arith.constant 0 : i32
    %c0_i32_0 = arith.constant 0 : i32
    %c0_i32_1 = arith.constant 0 : i32
    return %c0_i32, %c0_i32_0 : i32, i32
  }
  func.func @transform_5(%arg0: i32, %arg1: i32, %arg2: memref<1xi32, #tpu.memory_space<smem>>) -> (i32, i32) {
    %c0_i32 = arith.constant 0 : i32
    %c0_i32_0 = arith.constant 0 : i32
    %c0_i32_1 = arith.constant 0 : i32
    return %c0_i32, %c0_i32_0 : i32, i32
  }
  func.func @transform_6(%arg0: i32, %arg1: i32, %arg2: memref<1xi32, #tpu.memory_space<smem>>) -> (i32, i32) {
    %c0_i32 = arith.constant 0 : i32
    %c0_i32_0 = arith.constant 0 : i32
    %c0_i32_1 = arith.constant 0 : i32
    return %c0_i32, %c0_i32_0 : i32, i32
  }
  func.func @transform_7(%arg0: i32, %arg1: i32, %arg2: memref<1xi32, #tpu.memory_space<smem>>) -> (i32, i32) {
    %c2_i32 = arith.constant 2 : i32
    %0 = arith.muli %arg0, %c2_i32 : i32
    %1 = arith.addi %0, %arg1 : i32
    %c2_i32_0 = arith.constant 2 : i32
    %2 = arith.minsi %1, %c2_i32_0 : i32
    %c0_i32 = arith.constant 0 : i32
    %c0_i32_1 = arith.constant 0 : i32
    return %2, %c0_i32 : i32, i32
  }
  func.func @transform_8(%arg0: i32, %arg1: i32, %arg2: memref<1xi32, #tpu.memory_space<smem>>) -> (i32, i32, i32) {
    %c0_i32 = arith.constant 0 : i32
    %c0_i32_0 = arith.constant 0 : i32
    %c0_i32_1 = arith.constant 0 : i32
    return %arg0, %c0_i32, %c0_i32_0 : i32, i32, i32
  }
  func.func @transform_9(%arg0: i32, %arg1: i32, %arg2: memref<1xi32, #tpu.memory_space<smem>>) -> (i32, i32, i32) {
    %c0_i32 = arith.constant 0 : i32
    %c0_i32_0 = arith.constant 0 : i32
    %c0_i32_1 = arith.constant 0 : i32
    return %arg0, %c0_i32, %c0_i32_0 : i32, i32, i32
  }
  func.func @transform_10(%arg0: i32, %arg1: i32, %arg2: memref<1xi32, #tpu.memory_space<smem>>) -> (i32, i32, i32) {
    %c0_i32 = arith.constant 0 : i32
    %c0_i32_0 = arith.constant 0 : i32
    %c0_i32_1 = arith.constant 0 : i32
    return %arg0, %c0_i32, %c0_i32_0 : i32, i32, i32
  }
}

</mosaic_0001>

<bundles_post_ra>
// kernel: tpu_custom_call.1
= control target key start
LH: loop header
LB: loop body
LE: loop exit
PB: predicated region body
PF: predicated region fallthrough
CT: control target
= control target key end

     0   :  { %s13387_s0 = inlined_call_operand.<no memory space> [shape: s32[1], index: 0, kind: input, shape index: {}]   ;;  %s13388_s1 = inlined_call_operand.hbm [shape: f32[300,1792], index: 1, kind: input, shape index: {}]   ;;  %s13389_s2 = inlined_call_operand.hbm [shape: bf16[1792,512], index: 2, kind: input, shape index: {}]   ;;  %s13390_s3 = inlined_call_operand.hbm [shape: f32[1,512], index: 3, kind: input, shape index: {}]   ;;  %s13391_s4 = inlined_call_operand.hbm [shape: bf16[512,512], index: 4, kind: input, shape index: {}]   ;;  %s13392_s5 = inlined_call_operand.hbm [shape: f32[1,512], index: 5, kind: input, shape index: {}]   ;;  %s13393_s6 = inlined_call_operand.hbm [shape: f32[1,256], index: 6, kind: input, shape index: {}]   ;;  %s13394_s7 = inlined_call_operand.<no memory space> [shape: f32[1,1], index: 7, kind: input, shape index: {}]   ;;  %s13395_s8 = inlined_call_operand.vmem [shape: f32[300,1], index: 8, kind: output, shape index: {0}]   ;;  %s13396_s9 = inlined_call_operand.vmem [shape: f32[2,1,1], index: 9, kind: output, shape index: {1}]   ;;  %s13397_s10 = inlined_call_operand.vmem [shape: f32[2,1,1], index: 10, kind: output, shape index: {2}]   ;;  %s13398_s11 = inlined_call_operand.hbm [shape: f32[2,1,512], index: 11, kind: output, shape index: {3}]  }
   0x1   :  { %13566 = sst [smem:[#allocation106_spill]] %s13395_s8  ;;  %v18_v0 = vstv %s13394_s7 }
   0x2   :  { %13567 = sst [smem:[#allocation107_spill]] %s13396_s9  ;;  %19 = vst [vmem:[#allocation7] sm:$0x1] %v18_v0 }
   0x3   :  { %13568 = sst [smem:[#allocation108_spill]] %s13397_s10 }
   0x4   :  { %13569 = sst [smem:[#allocation109_spill]] %s13398_s11 }
   0x5   :  { %17 = sst [smem:[#allocation6]] %s13387_s0 }
   0x6   :  { %20 = vsyncpa [#allocation9], 0 }
   0x7   :  { %22 = vsyncpa [#allocation9 + $0x1], 0 }
   0x8   :  { %23 = vsyncpa [#allocation12], 0 }
   0x9   :  { %24 = vsyncpa [#allocation15], 0 }
   0xa   :  { %25 = vsyncpa [#allocation18], 0 }
   0xb   :  { %26 = vsyncpa [#allocation10], 0 }
   0xc   :  { %28 = vsyncpa [#allocation10 + $0x1], 0  ;;  %s11145_s21 = smov 0   ;;  %s11147_s22 = smov 0  }
   0xd   :  { %s11149_s23 = smov 0   ;;  %s11151_s24 = smov 0  }
   0xe   :  { %s11153_s0 = smov 0   ;;  %s11155_s25 = smov 0  }
   0xf   :  { %s11157_s7 = smov 0   ;;  %s11159_s26 = smov 0  }
  0x10   :  { %s11161_s27 = smov 0   ;;  %s11163_s28 = smov 0  }
  0x11   :  { %s11165_s29 = smov 0  }
  0x12 LB: > { %13570 = sst [smem:[#allocation26_spill]] %s10990_s21  ;;  %s7946_s30 = sadd.s32 4294967295, %s11030_s29   ;;  %s11030_s29 = sphi %s11165_s29, %s34_s29   ;;  %s11026_s28 = sphi %s11163_s28, %s13920_s28   ;;  %s11022_s27 = sphi %s11161_s27, %s13927_s27   ;;  %s11018_s26 = sphi %s11159_s26, %s13918_s26   ;;  %s11014_s7 = sphi %s11157_s7, %s13917_s7   ;;  %s11010_s25 = sphi %s11155_s25, %s13926_s25   ;;  %s11006_s0 = sphi %s11153_s0, %s13925_s0   ;;  %s11002_s24 = sphi %s11151_s24, %s13924_s24   ;;  %s10998_s23 = sphi %s11149_s23, %s13923_s23   ;;  %s10994_s22 = sphi %s11147_s22, %s13922_s22   ;;  %s10990_s21 = sphi %s11145_s21, %s13921_s21  }
  0x13   : > { %13571 = sst [smem:[#allocation27_spill]] %s10998_s23  ;;  %s43_s13 = sadd.s32 1, %s11022_s27 }
  0x14   : > { %13572 = sst [smem:[#allocation28_spill]] %s11014_s7  ;;  %s46_s14 = sadd.s32 1, %s11026_s28 }
  0x15   : > { %13573 = sst [smem:[#allocation29_spill]] %s11018_s26  ;;  %p44_p0 = scmp.ge.s32.totalorder %s43_s13, 2 }
  0x16   : > { %13574 = sst [smem:[#allocation30_spill]] %s11022_s27  ;;  %s7948_s15 = sshll.u32 %s11026_s28, 1 }
  0x17   : > { %13575 = sst [smem:[#allocation31_spill]] %s11026_s28  ;;  %s51_s16 = sadd.s32 %s11022_s27, %s7948_s15 }
  0x18   : > { %s61_s17 = sadd.s32 1, %s11010_s25  ;;  %s13929_s13 = smov (%p44_p0, %s43_s13), 0 }
  0x19   : > { %13576 = sst [smem:[#allocation32_spill]] %s13929_s13  ;;  %s13931_s14 = smov (!%p44_p0, %s46_s14), %s11026_s28 }
  0x1a   : > { %p52_p1 = scmp.lt.s32.totalorder %s51_s16, 2  ;;  %p68_p2 = scmp.ne.s32.totalorder %s11010_s25, %s11006_s0 }
  0x1b   : > { %p48_p3 = scmp.ge.s32.totalorder %s13931_s14, 2  ;;  %p69_p4 = scmp.eq.s32.totalorder %s11030_s29, 0 }
  0x1c   : > { %s13933_s16 = smov (!%p52_p1, %s51_s16), 2  ;;  %p74_p6 = scmp.ne.s32.totalorder %s11006_s0, %s11002_s24 }
  0x1d   : > { %s13935_s14 = smov (%p48_p3, %s13931_s14), 0  ;;  %p11220_p5 = por %p69_p4, %p68_p2 }
  0x1e   : > { %13577 = sst [smem:[#allocation33_spill]] %s13935_s14  ;;  %s7949_s19 = sshll.u32 %s13935_s14, 1 }
  0x1f   : > { %s13578_s18 = scalar_select %p11220_p5, 1, 0 }
  0x20   : > { %p11227_p7 = scmp.eq.s32.totalorder %s7946_s30, 0  ;;  %s55_s15 = sadd.s32 %s7949_s19, %s13929_s13 }
  0x21   : > { %p11232_p8 = scmp.eq.s32.totalorder %s7946_s30, 3  ;;  %p56_p9 = scmp.lt.s32.totalorder %s55_s15, 2 }
  0x22   : > { %s13579_s20 = scalar_select %p11227_p7, 1, 0 }
  0x23   : > { %p11238_p10 = por %p11227_p7, %p74_p6  ;;  %p11247_p11 = por %p11232_p8, %p68_p2 }
  0x24   : > { %s296_s30 = ssub.s32 %s11026_s28, %s13935_s14  ;;  %s13937_s15 = smov (!%p56_p9, %s55_s15), 2 }
  0x25   : > { %s13581_s24 = scalar_select %p11238_p10, 1, 0 }
  0x26   : > { %s13582_s27 = scalar_select %p11247_p11, 1, 0 }
  0x27   : > { %p297_p12 = scmp.eq.s32.totalorder %s296_s30, 0  ;;  %s299_s19 = sadd.s32 1, %s10998_s23 }
  0x28   : > { %13583 = sst [smem:[#allocation34_spill]] %s13582_s27  ;;  %s58_s13 = ssub.s32 %s13933_s16, %s13937_s15 }
  0x29   : > { %p309_p13 = scmp.ne.s32.totalorder %s10998_s23, %s10994_s22  ;;  %p59_p0 = scmp.eq.s32.totalorder %s58_s13, 0 }
  0x2a   : > { %p315_p1 = scmp.ne.s32.totalorder %s10994_s22, %s10990_s21  ;;  %s13588_s9 = sadd.s32 4294967294, %s11030_s29  }
  0x2b   : > { %s11260_s11 = scalar_select %p297_p12, %s10998_s23, %s299_s19  }
  0x2c   : > { %s11263_s8 = scalar_select %p59_p0, %s11010_s25, %s61_s17  }
  0x2d   : > { %13584 = sst [smem:[#allocation35_spill]] %s11260_s11  ;;  %p11267_p3 = por %p309_p13, %p11232_p8 }
  0x2e   : > { %13585 = sst [smem:[#allocation36_spill]] %s11263_s8  ;;  %p316_p2 = scmp.eq.s32.totalorder %s13588_s9, 3 }
  0x2f   : > { %s13586_s10 = scalar_select %p11267_p3, 1, 0 }
  0x30   : > { %p7952_p4 = scmp.ge.s32.totalorder %s11030_s29, 1  ;;  %p323_p6 = scmp.lt.s32.totalorder %s11030_s29, 5 }
  0x31   : > { %13587 = sst [smem:[#allocation37_spill]] %s13586_s10  ;;  %p11275_p9 = por %p316_p2, %p315_p1 }
  0x32   : > { %p11279_p11 = pnand %p7952_p4, %p323_p6  ;;  %s11064_s17 = smov [#allocation11]  }
  0x33   : > { %s13589_s30 = scalar_select %p11275_p9, 1, 0 }
  0x34   : > { %s13591_s13 = scalar_select %p11279_p11, 1, 0 }
  0x35   : > { %13590 = sst [smem:[#allocation38_spill]] %s13589_s30  ;;  %s335_s15 = sshll.u32 %s11064_s17, 4  ;;  %s11285_s15 = int_to_ptr.vmem [resolvable:$true] %s335_s15 }
  0x36   : > { %p9408_p8 = pneg %p11279_p11  ;;  %s11065_s12 = smov [#allocation14]  }
  0x37   : > { %s359_s19 = sshll.u32 %s11065_s12, 4  ;;  %s11066_s14 = smov [#allocation13]   ;;  %s11293_s19 = int_to_ptr.vmem [resolvable:$true] %s359_s19 }
  0x38   : > { %p11289_p12 = pnand %p9408_p8, %p11227_p7  ;;  %s11295_s28 = sshll.u32 %s11066_s14, 4  ;;  %s350_s28 = int_to_ptr.vmem [resolvable:$true] %s11295_s28 }
  0x39   : > { %s10696_s17 = scalar_lea.hbm %s13389_s2, 57344 }
  0x3a   : > { %p10697_p13 = scmp.ne.s32.totalorder %s13389_s2, %s10696_s17  ;;  %p11305_p0 = pneg %p11289_p12 }
  0x3b   : > { %p10703_p4 = scmp.lt.u32.totalorder %s10696_s17, %s13389_s2 }
  0x3c   : > { %p10699_p1 = pnand %p11305_p0, %p10697_p13 }
  0x3e   : > { %p10700_p2 = pneg %p10699_p1 }
  0x40   : > { %p10705_p6 = pnand %p10703_p4, %p10700_p2 }
  0x42   : > { %10708 = shalt.err (!%p10705_p6)
}
  0x43   : > { %s10709_s8 = scalar_lea.vmem %s11285_s15, 57344  ;;  %p10717_p7 = scmp.lt.s32.totalorder %s11285_s15, %s11285_s15 }
  0x44   : > { %p10710_p8 = scmp.ne.s32.totalorder %s11285_s15, %s10709_s8  ;;  %p10718_p10 = scmp.lt.s32.totalorder %s10709_s8, %s10709_s8 }
  0x46   : > { %p10712_p9 = pnand %p10710_p8, %p11305_p0  ;;  %p10719_p13 = por %p10718_p10, %p10717_p7 }
  0x48   : > { %p10713_p3 = pneg %p10712_p9 }
  0x4a   : > { %p10720_p1 = pnand %p10719_p13, %p10713_p3 }
  0x4c   : > { %10723 = shalt.err (!%p10720_p1)
}
  0x4d   : > { %s11067_s11 = smov 256   ;;  %s11068_s23 = smov 16  }
  0x4e   : > { %9411 = dma.hbm_to_vmem [thread:$0]  (!%p11289_p12), %s13389_s2, 57344, %s11285_s15, [#allocation12], %s11067_s11, %s11067_s11, %s11068_s23  }
  0x4f   : > { %s10724_s10 = scalar_lea.hbm %s13391_s4, 16384 }
  0x50   : > { %p10725_p7 = scmp.ne.s32.totalorder %s13391_s4, %s10724_s10  ;;  %p10731_p9 = scmp.lt.u32.totalorder %s10724_s10, %s13391_s4 }
  0x52   : > { %p10727_p10 = pnand %p10725_p7, %p11305_p0 }
  0x54   : > { %p10728_p3 = pneg %p10727_p10 }
  0x56   : > { %p10733_p2 = pnand %p10731_p9, %p10728_p3 }
  0x58   : > { %10736 = shalt.err (!%p10733_p2)
}
  0x59   : > { %s10737_s15 = scalar_lea.vmem %s11293_s19, 16384  ;;  %p10745_p13 = scmp.lt.s32.totalorder %s11293_s19, %s11293_s19 }
  0x5a   : > { %p10738_p4 = scmp.ne.s32.totalorder %s11293_s19, %s10737_s15  ;;  %p10746_p1 = scmp.lt.s32.totalorder %s10737_s15, %s10737_s15 }
  0x5c   : > { %p10740_p6 = pnand %p10738_p4, %p11305_p0  ;;  %p10747_p7 = por %p10746_p1, %p10745_p13 }
  0x5e   : > { %p10741_p8 = pneg %p10740_p6 }
  0x60   : > { %p10748_p10 = pnand %p10747_p7, %p10741_p8 }
  0x62   : > { %10751 = shalt.err (!%p10748_p10)
}
  0x63   : > { %9417 = dma.hbm_to_vmem [thread:$0]  (!%p11289_p12), %s13391_s4, 16384, %s11293_s19, [#allocation15], %s11067_s11, %s11067_s11, %s11068_s23  }
  0x64   : > { %s10752_s30 = scalar_lea.hbm %s13390_s3, 64 }
  0x65   : > { %p10753_p3 = scmp.ne.s32.totalorder %s13390_s3, %s10752_s30  ;;  %p10759_p4 = scmp.lt.u32.totalorder %s10752_s30, %s13390_s3 }
  0x67   : > { %p10755_p9 = pnand %p10753_p3, %p11305_p0 }
  0x69   : > { %p10756_p2 = pneg %p10755_p9 }
  0x6b   : > { %p10761_p6 = pnand %p10759_p4, %p10756_p2 }
  0x6d   : > { %10764 = shalt.err (!%p10761_p6)
}
  0x6e   : > { %s10765_s15 = scalar_lea.vmem %s350_s28, 64  ;;  %p10773_p7 = scmp.lt.s32.totalorder %s350_s28, %s350_s28 }
  0x6f   : > { %p10766_p8 = scmp.ne.s32.totalorder %s350_s28, %s10765_s15  ;;  %p10774_p10 = scmp.lt.s32.totalorder %s10765_s15, %s10765_s15 }
  0x71   : > { %p10768_p13 = pnand %p10766_p8, %p11305_p0  ;;  %p10775_p11 = por %p10774_p10, %p10773_p7 }
  0x73   : > { %p10769_p1 = pneg %p10768_p13 }
  0x75   : > { %p10776_p5 = pnand %p10775_p11, %p10769_p1 }
  0x77   : > { %10779 = shalt.err (!%p10776_p5)
}
  0x78   : > { %9414 = dma.hbm_to_vmem [thread:$0]  (!%p11289_p12), %s13390_s3, 64, %s350_s28, [#allocation12]  }
  0x79   : > { %s11069_s23 = smov [#allocation16]   ;;  %s11070_s7 = smov [#allocation17]  }
  0x7a   : > { %s373_s10 = sshll.u32 %s11069_s23, 4  ;;  %s384_s26 = sshll.u32 %s11070_s7, 4  ;;  %s374_s10 = int_to_ptr.vmem [resolvable:$true] %s373_s10  ;;  %s385_s26 = int_to_ptr.vmem [resolvable:$true] %s384_s26 }
  0x7b   : > { %s10780_s17 = scalar_lea.hbm %s13392_s5, 64 }
  0x7c   : > { %p10781_p5 = scmp.ne.s32.totalorder %s13392_s5, %s10780_s17  ;;  %p10787_p9 = scmp.lt.u32.totalorder %s10780_s17, %s13392_s5 }
  0x7e   : > { %p10783_p11 = pnand %p10781_p5, %p11305_p0 }
  0x80   : > { %p10784_p3 = pneg %p10783_p11 }
  0x82   : > { %p10789_p2 = pnand %p10787_p9, %p10784_p3 }
  0x84   : > { %10792 = shalt.err (!%p10789_p2)
}
  0x85   : > { %s10793_s28 = scalar_lea.vmem %s374_s10, 64  ;;  %p10801_p13 = scmp.lt.s32.totalorder %s374_s10, %s374_s10 }
  0x86   : > { %p10794_p4 = scmp.ne.s32.totalorder %s374_s10, %s10793_s28  ;;  %p10802_p1 = scmp.lt.s32.totalorder %s10793_s28, %s10793_s28 }
  0x88   : > { %p10796_p6 = pnand %p10794_p4, %p11305_p0  ;;  %p10803_p7 = por %p10802_p1, %p10801_p13 }
  0x8a   : > { %p10797_p8 = pneg %p10796_p6 }
  0x8c   : > { %p10804_p10 = pnand %p10803_p7, %p10797_p8 }
  0x8e   : > { %10807 = shalt.err (!%p10804_p10)
}
  0x8f   : > { %9420 = dma.hbm_to_vmem [thread:$0]  (!%p11289_p12), %s13392_s5, 64, %s374_s10, [#allocation15]  }
  0x90   : > { %s10808_s27 = scalar_lea.hbm %s13393_s6, 32 }
  0x91   : > { %p10809_p5 = scmp.ne.s32.totalorder %s13393_s6, %s10808_s27  ;;  %p10815_p9 = scmp.lt.u32.totalorder %s10808_s27, %s13393_s6 }
  0x93   : > { %p10811_p11 = pnand %p10809_p5, %p11305_p0 }
  0x95   : > { %p10812_p3 = pneg %p10811_p11 }
  0x97   : > { %p10817_p2 = pnand %p10815_p9, %p10812_p3 }
  0x99   : > { %10820 = shalt.err (!%p10817_p2)
}
  0x9a   : > { %s10821_s8 = scalar_lea.vmem %s385_s26, 32  ;;  %p10829_p13 = scmp.lt.s32.totalorder %s385_s26, %s385_s26 }
  0x9b   : > { %p10822_p4 = scmp.ne.s32.totalorder %s385_s26, %s10821_s8  ;;  %p10830_p1 = scmp.lt.s32.totalorder %s10821_s8, %s10821_s8 }
  0x9d   : > { %p10824_p6 = pnand %p10822_p4, %p11305_p0  ;;  %p10831_p7 = por %p10830_p1, %p10829_p13 }
  0x9f   : > { %p10825_p8 = pneg %p10824_p6 }
  0xa1   : > { %p10832_p10 = pnand %p10831_p7, %p10825_p8 }
  0xa3   : > { %10835 = shalt.err (!%p10832_p10)
}
  0xa4   : > { %9423 = dma.hbm_to_vmem [thread:$0]  (!%p11289_p12), %s13393_s6, 32, %s385_s26, [#allocation18]  }
  0xa5   : > { %p7958_p5 = scmp.ge.s32.totalorder %s11030_s29, 4 }
  0xa6   : > { %p13594_p11 = scmp.ne.s32.totalorder (!%p7958_p5), %s13578_s18, 0 }
  0xa7   : > { %394 = sbr.rel (%p7958_p5) target bundleno = 210 (0xd2), region = 40 }
  0xae   : > { %397 = sbr.rel (!%p13594_p11) target bundleno = 210 (0xd2), region = 44  ;;  %s398_s21 = sand.u32 (%p13594_p11), 1, %s11010_s25  }
  0xaf   : > { %s7960_s28 = sshll.u32 (%p13594_p11), %s13933_s16, 4  ;;  %s9382_s19 = smul.u32 (%p13594_p11), 1792, %s398_s21 }
  0xb0   : > { %s408_s11 = ssub.s32 (%p13594_p11), 38, %s7960_s28  ;;  %s11412_s7 = scalar_lea.sflag (%p13594_p11), [#allocation9], %s398_s21 }
  0xb1   : > { %p409_p0 = scmp.lt.s32.totalorder (%p13594_p11), %s408_s11, 16  ;;  %s402_s26 = scalar_lea.vmem (%p13594_p11), [#allocation8], %s9382_s19 }
  0xb5   : > { %s13939_s11 = smov (!%p409_p0, %s408_s11), 16 }
  0xb6   : > { %s11409_s23 = smul.u32 1792, %s13939_s11 }
  0xb8   : > { %s414_s9 = ssub.s32 28672, %s11409_s23 }
  0xb9   : > { %415 = vsyncadd %s11412_s7, %s414_s9  ;;  %p7963_p12 = scmp.ne.s32.totalorder %s11409_s23, 0  ;;  %s9383_s18 = smul.u32 28672, %s13933_s16 }
  0xba   : > { %s421_s27 = sshll.u32 %s402_s26, 4  ;;  %s10840_s16 = scalar_lea.hbm %s13388_s1, 68096  ;;  %s11422_s27 = int_to_ptr.vmem [resolvable:$true] %s421_s27 }
  0xbb   : > { %s11420_s12 = scalar_lea.hbm %s13388_s1, %s9383_s18 }
  0xbc   : > { %s10836_s14 = scalar_lea.hbm %s11420_s12, %s11409_s23  ;;  %p10841_p4 = scmp.lt.u32.totalorder %s11420_s12, %s13388_s1 }
  0xbd   : > { %p10837_p3 = scmp.ne.s32.totalorder %s11420_s12, %s10836_s14  ;;  %p10842_p6 = scmp.lt.u32.totalorder %s10840_s16, %s10836_s14 }
  0xbe   : > { %p10844_p13 = scmp.lt.u32.totalorder %s10836_s14, %s11420_s12 }
  0xbf   : > { %p10838_p9 = pnand %p10837_p3, %p7963_p12  ;;  %p10843_p8 = por %p10842_p6, %p10841_p4 }
  0xc1   : > { %p10839_p2 = pneg %p10838_p9  ;;  %p10845_p1 = por %p10844_p13, %p10843_p8 }
  0xc3   : > { %p10846_p7 = pnand %p10845_p1, %p10839_p2 }
  0xc5   : > { %10849 = shalt.err (!%p10846_p7)
}
  0xc6   : > { %s10850_s28 = scalar_lea.vmem %s11422_s27, %s11409_s23  ;;  %s11071_s19 = smov [#allocation8]  }
  0xc7   : > { %p10851_p10 = scmp.ne.s32.totalorder %s11422_s27, %s10850_s28  ;;  %s10854_s11 = sshll.u32 %s11071_s19, 4  ;;  %s10855_s11 = int_to_ptr.vmem [resolvable:$false] %s10854_s11 }
  0xc8   : > { %s10856_s9 = scalar_lea.vmem %s10855_s11, 57344  ;;  %p10857_p0 = scmp.lt.s32.totalorder %s11422_s27, %s10855_s11 }
  0xc9   : > { %p10852_p5 = pnand %p10851_p10, %p7963_p12  ;;  %p10858_p3 = scmp.lt.s32.totalorder %s10856_s9, %s10850_s28 }
  0xcb   : > { %p10853_p11 = pneg %p10852_p5  ;;  %p10859_p9 = por %p10858_p3, %p10857_p0 }
  0xcd   : > { %p10860_p4 = pnand %p10859_p9, %p10853_p11 }
  0xcf   : > { %10863 = shalt.err (!%p10860_p4)
}
  0xd0   : > { %s11072_s26 = smov 1792   ;;  %s11073_s18 = smov 112  }
  0xd1   : > { %427 = dma.hbm_to_vmem [thread:$0]  (%p7963_p12), %s11420_s12, %s11409_s23, %s11422_s27, %s11412_s7, %s11072_s26, %s11072_s26, %s11073_s18  }
  0xd2 PF: > { %p13595_p2 = scmp.ne.s32.totalorder %s13591_s13, 0 }
  0xd3   : > { %s435_s30 = sand.u32 (!%p13595_p2), 1, %s11006_s0   ;;  %p13596_p6 = scmp.ne.s32.totalorder (!%p13595_p2), %s13581_s24, 0 }
  0xd4   : > { %433 = sbr.rel (%p13595_p2) target bundleno = 1829 (0x725), region = 48  ;;  %s436_s14 = scalar_lea.sflag (!%p13595_p2), [#allocation9], %s435_s30 }
  0xd5   : > { %s9384_s17 = smul.u32 (!%p13595_p2), 1792, %s435_s30 }
  0xd7   : > { %s11452_s8 = scalar_lea.vmem (!%p13595_p2), [#allocation8], %s9384_s17 }
  0xdb   : > { %10969 = dma.done.wait (%p13596_p6), %s436_s14, 28672  }
  0xdc   : > { %10971 = vsyncadd (%p13596_p6), %s436_s14, 4294938624  ;;  %p13597_p8 = scmp.ne.s32.totalorder %s13579_s20, 0 }
  0xde   : > { %10973 = dma.done.wait (%p13597_p8), [#allocation12], 57408  }
  0xdf   : > { %10975 = vsyncadd (%p13597_p8), [#allocation12], 4294909888 }
  0xe0   : > { %10977 = dma.done.wait (%p13597_p8), [#allocation15], 16448  }
  0xe1   : > { %10979 = vsyncadd (%p13597_p8), [#allocation15], 4294950848 }
  0xe2   : > { %10981 = dma.done.wait (%p13597_p8), [#allocation18], 32  }
  0xe3   : > { %10983 = vsyncadd (%p13597_p8), [#allocation18], 4294967264  ;;  %s13598_s24 = sld [smem:[#allocation29_spill]]  ;;  %s13599_s13 = sld [smem:[#allocation28_spill]] }
  0xe4   : > { %s7973_s23 = sshll.u32 %s435_s30, 7  ;;  %s503_s7 = sand.u32 1, %s10994_s22  }
  0xe5   : > { %s11471_s27 = sld [smem:[#allocation6]]  ;;  %s11475_s12 = sshll.u32 %s503_s7, 2 }
  0xe6   : > { %s13600_s21 = sld [smem:[#allocation107_spill]]  ;;  %s13601_s9 = sld [smem:[#allocation108_spill]] }
  0xe7   : > { %s11494_s30 = scalar_lea.vmem [#allocation19], %s7973_s23   ;;  %s505_s17 = scalar_lea.vmem [#allocation20], %s11475_s12 }
  0xe9   : > { %p525_p12 = scmp.lt.s32.totalorder %s13598_s24, 1  ;;  %s7975_s10 = sshll.u32 %s13598_s24, 1 }
  0xea   : > { %s11483_s20 = sadd.s32 %s13599_s13, %s7975_s10  ;;  %p7977_p13 = scmp.ne.s32.totalorder %s13599_s13, 0 }
  0xeb   : > { %s13941_s24 = smov (!%p525_p12, %s13598_s24), 1  ;;  %s7976_s18 = sshll.u32 %s11483_s20, 7  ;;  %vm539_vm0 = vcmask (!%p7977_p13), 0   ;;  %v542_v1 = vlaneseq (!%p7977_p13)  ;;  %v11074_v2 = vmov (!%p7977_p13), -1e+30   ;;  %v11075_v3 = vmov (!%p7977_p13), 0.0  }
  0xec   : > { %s527_s28 = scalar_lea.vmem %s13600_s21, %s13941_s24  ;;  %s530_s26 = scalar_lea.vmem %s13601_s9, %s13941_s24  ;;  %540 = vst.msk [vmem:[#allocation2] sm:$0x1] (!%p7977_p13), %vm539_vm0, %v11074_v2  ;;  %541 = vst.msk [vmem:[#allocation3] sm:$0x1] (!%p7977_p13), %vm539_vm0, %v11075_v3 }
  0xed   : > { %538 = sbr.rel (%p7977_p13) target bundleno = 244 (0xf4), region = 76  ;;  %vm544_vm1 = vcmp.lt.s32.totalorder (!%p7977_p13), %v542_v1, 512 }
  0xee   : > { %546 = vst.msk [vmem:[#allocation4] sm:$0xf] (!%p7977_p13), %vm544_vm1, %v11075_v3 }
  0xf4 PF: > { %p7978_p1 = scmp.ge.s32.totalorder %s7976_s18, %s11471_s27 }
  0xf6   : > { %550 = sbr.rel (%p7978_p1) target bundleno = 1718 (0x6b6), region = 80 }
  0xfd   : > { %v9606_v4 = vld [vmem:[#allocation11 + $0x4] ss:$16 sps:$4 sm:$0xff]   ;;  %v9608_v5 = vld [vmem:[#allocation11 + $0xc] ss:$16 sps:$4 sm:$0xff]   ;;  %v9610_v6 = vld [vmem:[#allocation11] ss:$16 sps:$4 sm:$0xff]  }
  0xfe   : > { %3597 = vmatprep.subr.bf16.mxu0 %v9606_v4  ;;  %v9611_v7 = vld [vmem:[#allocation11 + $0x8] ss:$16 sps:$4 sm:$0xff]   ;;  %4388 = vmatprep.subr.bf16.mxu1 %v9608_v5  ;;  %v9612_v8 = vld [vmem:[#allocation11 + $0x24] ss:$16 sps:$4 sm:$0xff]   ;;  %v9614_v9 = vld [vmem:[#allocation11 + $0x2c] ss:$16 sps:$4 sm:$0xff]  }
  0xff   : > { %3598 = vmatpush1.bf16.msra.mxu0 %v9610_v6  ;;  %4389 = vmatpush1.bf16.msra.mxu1 %v9611_v7  ;;  %v9616_v10 = vld [vmem:[#allocation11 + $0x20] ss:$16 sps:$4 sm:$0xff]   ;;  %v9617_v11 = vld [vmem:[#allocation11 + $0x28] ss:$16 sps:$4 sm:$0xff]   ;;  %v9618_v12 = vld [vmem:[#allocation11 + $0x44] ss:$16 sps:$4 sm:$0xff]  }
 0x100   : > { %3599 = vmatprep.subr.bf16.mxu0 %v9612_v8  ;;  %4390 = vmatprep.subr.bf16.mxu1 %v9614_v9  ;;  %v9620_v13 = vld [vmem:[#allocation11 + $0x4c] ss:$16 sps:$4 sm:$0xff]   ;;  %v9622_v14 = vld [vmem:[#allocation11 + $0x40] ss:$16 sps:$4 sm:$0xff]   ;;  %v9623_v15 = vld [vmem:[#allocation11 + $0x48] ss:$16 sps:$4 sm:$0xff]  }
 0x101   : > { %v9624_v16 = vld [vmem:[#allocation11 + $0x64] ss:$16 sps:$4 sm:$0xff]   ;;  %v9626_v17 = vld [vmem:[#allocation11 + $0x6c] ss:$16 sps:$4 sm:$0xff]   ;;  %v9628_v18 = vld [vmem:[#allocation11 + $0x60] ss:$16 sps:$4 sm:$0xff]  }
 0x102   : > { %v9629_v19 = vld [vmem:[#allocation11 + $0x68] ss:$16 sps:$4 sm:$0xff]   ;;  %v9630_v20 = vld [vmem:[#allocation11 + $0x84] ss:$16 sps:$4 sm:$0xff]   ;;  %v9632_v21 = vld [vmem:[#allocation11 + $0x8c] ss:$16 sps:$4 sm:$0xff]  }
 0x103   : > { %3600 = vmatpush1.bf16.msra.mxu0 %v9616_v10  ;;  %4391 = vmatpush1.bf16.msra.mxu1 %v9617_v11  ;;  %v9634_v22 = vld [vmem:[#allocation11 + $0x80] ss:$16 sps:$4 sm:$0xff]   ;;  %v9635_v23 = vld [vmem:[#allocation11 + $0x88] ss:$16 sps:$4 sm:$0xff]   ;;  %v9636_v24 = vld [vmem:[#allocation11 + $0xa4] ss:$16 sps:$4 sm:$0xff]  }
 0x104   : > { %3601 = vmatprep.subr.bf16.mxu0 %v9618_v12  ;;  %4392 = vmatprep.subr.bf16.mxu1 %v9620_v13  ;;  %v9638_v25 = vld [vmem:[#allocation11 + $0xac] ss:$16 sps:$4 sm:$0xff]   ;;  %v9640_v26 = vld [vmem:[#allocation11 + $0xa0] ss:$16 sps:$4 sm:$0xff]   ;;  %v9641_v27 = vld [vmem:[#allocation11 + $0xa8] ss:$16 sps:$4 sm:$0xff]  }
 0x105   : > { %v9642_v28 = vld [vmem:[#allocation11 + $0xc4] ss:$16 sps:$4 sm:$0xff]   ;;  %v9644_v29 = vld [vmem:[#allocation11 + $0xcc] ss:$16 sps:$4 sm:$0xff]   ;;  %v9646_v30 = vld [vmem:[#allocation11 + $0xc0] ss:$16 sps:$4 sm:$0xff]  }
 0x106   : > { %v9647_v31 = vld [vmem:[#allocation11 + $0xc8] ss:$16 sps:$4 sm:$0xff]   ;;  %v9648_v32 = vld [vmem:[#allocation11 + $0xe4] ss:$16 sps:$4 sm:$0xff]   ;;  %v9650_v33 = vld [vmem:[#allocation11 + $0xec] ss:$16 sps:$4 sm:$0xff]  }
 0x107   : > { %3602 = vmatpush1.bf16.msra.mxu0 %v9622_v14  ;;  %4393 = vmatpush1.bf16.msra.mxu1 %v9623_v15  ;;  %v9652_v34 = vld [vmem:[#allocation11 + $0xe0] ss:$16 sps:$4 sm:$0xff]   ;;  %v9653_v35 = vld [vmem:[#allocation11 + $0xe8] ss:$16 sps:$4 sm:$0xff]   ;;  %v9654_v36 = vld [vmem:[#allocation11 + $0x104] ss:$16 sps:$4 sm:$0xff]  }
 0x108   : > { %3603 = vmatprep.subr.bf16.mxu0 %v9624_v16  ;;  %4394 = vmatprep.subr.bf16.mxu1 %v9626_v17  ;;  %v9656_v37 = vld [vmem:[#allocation11 + $0x10c] ss:$16 sps:$4 sm:$0xff]   ;;  %v9658_v38 = vld [vmem:[#allocation11 + $0x100] ss:$16 sps:$4 sm:$0xff]   ;;  %v9659_v39 = vld [vmem:[#allocation11 + $0x108] ss:$16 sps:$4 sm:$0xff]  }
 0x109   : > { %v9660_v40 = vld [vmem:[#allocation11 + $0x124] ss:$16 sps:$4 sm:$0xff]   ;;  %v9662_v41 = vld [vmem:[#allocation11 + $0x12c] ss:$16 sps:$4 sm:$0xff]   ;;  %v9664_v42 = vld [vmem:[#allocation11 + $0x120] ss:$16 sps:$4 sm:$0xff]  }
 0x10a   : > { %v9665_v43 = vld [vmem:[#allocation11 + $0x128] ss:$16 sps:$4 sm:$0xff]   ;;  %v9666_v44 = vld [vmem:[#allocation11 + $0x144] ss:$16 sps:$4 sm:$0xff]   ;;  %v9668_v45 = vld [vmem:[#allocation11 + $0x14c] ss:$16 sps:$4 sm:$0xff]  }
 0x10b   : > { %3604 = vmatpush1.bf16.msra.mxu0 %v9628_v18  ;;  %4395 = vmatpush1.bf16.msra.mxu1 %v9629_v19  ;;  %v9670_v46 = vld [vmem:[#allocation11 + $0x140] ss:$16 sps:$4 sm:$0xff]   ;;  %v9671_v47 = vld [vmem:[#allocation11 + $0x148] ss:$16 sps:$4 sm:$0xff]   ;;  %v9672_v48 = vld [vmem:[#allocation11 + $0x164] ss:$16 sps:$4 sm:$0xff]  }
 0x10c   : > { %3605 = vmatprep.subr.bf16.mxu0 %v9630_v20  ;;  %4396 = vmatprep.subr.bf16.mxu1 %v9632_v21  ;;  %v9674_v49 = vld [vmem:[#allocation11 + $0x16c] ss:$16 sps:$4 sm:$0xff]   ;;  %v9676_v51 = vld [vmem:[#allocation11 + $0x160] ss:$16 sps:$4 sm:$0xff]   ;;  %v9677_v52 = vld [vmem:[#allocation11 + $0x168] ss:$16 sps:$4 sm:$0xff]  }
 0x10d   : > { %v552_v50 = vld [vmem:[%s11452_s8 + $0x8] sm:$0xff]  ;;  %v566_v53 = vld [vmem:[%s11452_s8 + $0x78] sm:$0xff]  ;;  %v9678_v54 = vld [vmem:[#allocation11 + $0x184] ss:$16 sps:$4 sm:$0xff]  }
 0x10e   : > { %v776_v55 = vpack.c.bf16 %v566_v53, %v552_v50  ;;  %v9680_v56 = vld [vmem:[#allocation11 + $0x18c] ss:$16 sps:$4 sm:$0xff]   ;;  %v9682_v57 = vld [vmem:[#allocation11 + $0x180] ss:$16 sps:$4 sm:$0xff]   ;;  %v9683_v58 = vld [vmem:[#allocation11 + $0x188] ss:$16 sps:$4 sm:$0xff]  }
 0x10f   : > { %3606 = vmatpush1.bf16.msra.mxu0 %v9634_v22  ;;  %4397 = vmatpush1.bf16.msra.mxu1 %v9635_v23  ;;  %v9684_v59 = vld [vmem:[#allocation11 + $0x1a4] ss:$16 sps:$4 sm:$0xff]   ;;  %v9686_v60 = vld [vmem:[#allocation11 + $0x1ac] ss:$16 sps:$4 sm:$0xff]   ;;  %v9688_v61 = vld [vmem:[#allocation11 + $0x1a0] ss:$16 sps:$4 sm:$0xff]  }
 0x110   : > { %3607 = vmatprep.subr.bf16.mxu0 %v9636_v24  ;;  %4398 = vmatprep.subr.bf16.mxu1 %v9638_v25  ;;  %v9689_v62 = vld [vmem:[#allocation11 + $0x1a8] ss:$16 sps:$4 sm:$0xff]   ;;  %v9690_v63 = vld [vmem:[#allocation11 + $0x1c4] ss:$16 sps:$4 sm:$0xff]   ;;  %v9692_v0 = vld [vmem:[#allocation11 + $0x1cc] ss:$16 sps:$4 sm:$0xff]  }
 0x111   : > { %3629 = vmatprep.mubr.bf16.mxu0 %v776_v55  ;;  %4420 = vmatprep.mubr.bf16.mxu1 %v776_v55  ;;  %v9694_v1 = vld [vmem:[#allocation11 + $0x1c0] ss:$16 sps:$4 sm:$0xff]   ;;  %v9695_v2 = vld [vmem:[#allocation11 + $0x1c8] ss:$16 sps:$4 sm:$0xff]   ;;  %v9696_v3 = vld [vmem:[#allocation11 + $0x1e4] ss:$16 sps:$4 sm:$0xff]  }
 0x112   : > { %v9698_v4 = vld [vmem:[#allocation11 + $0x1ec] ss:$16 sps:$4 sm:$0xff]   ;;  %v9700_v5 = vld [vmem:[#allocation11 + $0x1e0] ss:$16 sps:$4 sm:$0xff]   ;;  %v9701_v6 = vld [vmem:[#allocation11 + $0x1e8] ss:$16 sps:$4 sm:$0xff]  }
 0x113   : > { %3608 = vmatpush1.bf16.msra.mxu0 %v9640_v26  ;;  %4399 = vmatpush1.bf16.msra.mxu1 %v9641_v27  ;;  %v551_v7 = vld [vmem:[%s11452_s8] sm:$0xff]  ;;  %v565_v8 = vld [vmem:[%s11452_s8 + $0x70] sm:$0xff]  ;;  %v9707_v10 = vld [vmem:[#allocation11 + $0x20c] ss:$16 sps:$4 sm:$0xff]  }
 0x114   : > { %3609 = vmatprep.subr.bf16.mxu0 %v9642_v28  ;;  %4400 = vmatprep.subr.bf16.mxu1 %v9644_v29  ;;  %v9704_v9 = vld [vmem:[#allocation11 + $0x204] ss:$16 sps:$4 sm:$0xff]   ;;  %v9702_v11 = vld [vmem:[#allocation11 + $0x200] ss:$16 sps:$4 sm:$0xff]   ;;  %v775_v12 = vpack.c.bf16 %v565_v8, %v551_v7  ;;  %v9705_v13 = vld [vmem:[#allocation11 + $0x208] ss:$16 sps:$4 sm:$0xff]  }
 0x115   : > { %v580_v14 = vld [vmem:[%s11452_s8 + $0xe8] sm:$0xff]  ;;  %v594_v15 = vld [vmem:[%s11452_s8 + $0x158] sm:$0xff]  ;;  %v9710_v16 = vld [vmem:[#allocation11 + $0x224] ss:$16 sps:$4 sm:$0xff]  }
 0x116   : > { %v9713_v17 = vld [vmem:[#allocation11 + $0x22c] ss:$16 sps:$4 sm:$0xff]   ;;  %v9708_v18 = vld [vmem:[#allocation11 + $0x220] ss:$16 sps:$4 sm:$0xff]   ;;  %v790_v19 = vpack.c.bf16 %v594_v15, %v580_v14  ;;  %v9711_v20 = vld [vmem:[#allocation11 + $0x228] ss:$16 sps:$4 sm:$0xff]  }
 0x117   : > { %3610 = vmatpush1.bf16.msra.mxu0 %v9646_v30  ;;  %4401 = vmatpush1.bf16.msra.mxu1 %v9647_v31  ;;  %v579_v21 = vld [vmem:[%s11452_s8 + $0xe0] sm:$0xff]  ;;  %v593_v22 = vld [vmem:[%s11452_s8 + $0x150] sm:$0xff]  ;;  %v9719_v24 = vld [vmem:[#allocation11 + $0x24c] ss:$16 sps:$4 sm:$0xff]  }
 0x118   : > { %3611 = vmatprep.subr.bf16.mxu0 %v9648_v32  ;;  %4402 = vmatprep.subr.bf16.mxu1 %v9650_v33  ;;  %v9716_v23 = vld [vmem:[#allocation11 + $0x244] ss:$16 sps:$4 sm:$0xff]   ;;  %v9714_v25 = vld [vmem:[#allocation11 + $0x240] ss:$16 sps:$4 sm:$0xff]   ;;  %v9717_v26 = vld [vmem:[#allocation11 + $0x248] ss:$16 sps:$4 sm:$0xff]   ;;  %v789_v27 = vpack.c.bf16 %v593_v22, %v579_v21 }
 0x119   : > { %v608_v28 = vld [vmem:[%s11452_s8 + $0x1c8] sm:$0xff]  ;;  %v622_v29 = vld [vmem:[%s11452_s8 + $0x238] sm:$0xff]  ;;  %v9722_v30 = vld [vmem:[#allocation11 + $0x264] ss:$16 sps:$4 sm:$0xff]  }
 0x11a   : > { %v9725_v31 = vld [vmem:[#allocation11 + $0x26c] ss:$16 sps:$4 sm:$0xff]   ;;  %v804_v32 = vpack.c.bf16 %v622_v29, %v608_v28  ;;  %v9720_v33 = vld [vmem:[#allocation11 + $0x260] ss:$16 sps:$4 sm:$0xff]   ;;  %v9753_v7 = vld [vmem:[#allocation11 + $0x308] ss:$16 sps:$4 sm:$0xff]  }
 0x11b   : > { %3612 = vmatpush1.bf16.msra.mxu0 %v9652_v34  ;;  %4403 = vmatpush1.bf16.msra.mxu1 %v9653_v35  ;;  %v9723_v34 = vld [vmem:[#allocation11 + $0x268] ss:$16 sps:$4 sm:$0xff]   ;;  %v607_v35 = vld [vmem:[%s11452_s8 + $0x1c0] sm:$0xff]  ;;  %v649_v50 = vld [vmem:[%s11452_s8 + $0x310] sm:$0xff] }
 0x11c   : > { %3613 = vmatprep.subr.bf16.mxu0 %v9654_v36  ;;  %4404 = vmatprep.subr.bf16.mxu1 %v9656_v37  ;;  %v621_v36 = vld [vmem:[%s11452_s8 + $0x230] sm:$0xff]  ;;  %v664_v55 = vld [vmem:[%s11452_s8 + $0x388] sm:$0xff]  ;;  %v734_v21 = vld [vmem:[%s11452_s8 + $0x5b8] sm:$0xff] }
 0x11d   : > { %v9728_v37 = vld [vmem:[#allocation11 + $0x284] ss:$16 sps:$4 sm:$0xff]   ;;  %v9738_v53 = vld [vmem:[#allocation11 + $0x2c0] ss:$16 sps:$4 sm:$0xff]  }
 0x11e   : > { %v9758_v8 = vld [vmem:[#allocation11 + $0x324] ss:$16 sps:$4 sm:$0xff]  }
 0x11f   : > { %3614 = vmatpush1.bf16.msra.mxu0 %v9658_v38  ;;  %4405 = vmatpush1.bf16.msra.mxu1 %v9659_v39  ;;  %v9731_v38 = vld [vmem:[#allocation11 + $0x28c] ss:$16 sps:$4 sm:$0xff]   ;;  %v9726_v39 = vld [vmem:[#allocation11 + $0x280] ss:$16 sps:$4 sm:$0xff]   ;;  %v9764_v15 = vld [vmem:[#allocation11 + $0x344] ss:$16 sps:$4 sm:$0xff]  }
 0x120   : > { %3615 = vmatprep.subr.bf16.mxu0 %v9660_v40  ;;  %4406 = vmatprep.subr.bf16.mxu1 %v9662_v41  ;;  %v9729_v40 = vld [vmem:[#allocation11 + $0x288] ss:$16 sps:$4 sm:$0xff]   ;;  %v803_v41 = vpack.c.bf16 %v621_v36, %v607_v35  ;;  %v705_v14 = vld [vmem:[%s11452_s8 + $0x4d0] sm:$0xff] }
 0x121   : > { %v9770_v22 = vld [vmem:[#allocation11 + $0x364] ss:$16 sps:$4 sm:$0xff]   ;;  %v762_v35 = vld [vmem:[%s11452_s8 + $0x698] sm:$0xff] }
 0x122   : > { %v733_v28 = vld [vmem:[%s11452_s8 + $0x5b0] sm:$0xff] }
 0x123   : > { %3616 = vmatpush1.bf16.msra.mxu0 %v9664_v42  ;;  %4407 = vmatpush1.bf16.msra.mxu1 %v9665_v43  ;;  %v636_v42 = vld [vmem:[%s11452_s8 + $0x2a8] sm:$0xff]  ;;  %v650_v43 = vld [vmem:[%s11452_s8 + $0x318] sm:$0xff]  ;;  %v9776_v29 = vld [vmem:[#allocation11 + $0x384] ss:$16 sps:$4 sm:$0xff]  }
 0x124   : > { %3617 = vmatprep.subr.bf16.mxu0 %v9666_v44  ;;  %4408 = vmatprep.subr.bf16.mxu1 %v9668_v45  ;;  %v9734_v44 = vld [vmem:[#allocation11 + $0x2a4] ss:$16 sps:$4 sm:$0xff]   ;;  %v9737_v45 = vld [vmem:[#allocation11 + $0x2ac] ss:$16 sps:$4 sm:$0xff]  }
 0x125   : > { %v9782_v36 = vld [vmem:[#allocation11 + $0x3a4] ss:$16 sps:$4 sm:$0xff]  }
 0x127   : > { %3618 = vmatpush1.bf16.msra.mxu0 %v9670_v46  ;;  %4409 = vmatpush1.bf16.msra.mxu1 %v9671_v47  ;;  %v9732_v46 = vld [vmem:[#allocation11 + $0x2a0] ss:$16 sps:$4 sm:$0xff]   ;;  %v818_v47 = vpack.c.bf16 %v650_v43, %v636_v42  ;;  %v9788_v43 = vld [vmem:[#allocation11 + $0x3c4] ss:$16 sps:$4 sm:$0xff]  }
 0x128   : > { %3619 = vmatprep.subr.bf16.mxu0 %v9672_v48  ;;  %4410 = vmatprep.subr.bf16.mxu1 %v9674_v49  ;;  %v9735_v48 = vld [vmem:[#allocation11 + $0x2a8] ss:$16 sps:$4 sm:$0xff]   ;;  %v635_v49 = vld [vmem:[%s11452_s8 + $0x2a0] sm:$0xff]  ;;  %v761_v42 = vld [vmem:[%s11452_s8 + $0x690] sm:$0xff] }
 0x12b   : > { %3620 = vmatpush1.bf16.msra.mxu0 %v9676_v51  ;;  %4411 = vmatpush1.bf16.msra.mxu1 %v9677_v52  ;;  %v9740_v51 = vld [vmem:[#allocation11 + $0x2c4] ss:$16 sps:$4 sm:$0xff]   ;;  %v9743_v52 = vld [vmem:[#allocation11 + $0x2cc] ss:$16 sps:$4 sm:$0xff]  }
 0x12c   : > { %3621 = vmatprep.subr.bf16.mxu0 %v9678_v54  ;;  %4412 = vmatprep.subr.bf16.mxu1 %v9680_v56  ;;  %v817_v54 = vpack.c.bf16 %v649_v50, %v635_v49  ;;  %v678_v56 = vld [vmem:[%s11452_s8 + $0x3f8] sm:$0xff]  ;;  %v568_v49 = vld [vmem:[%s11452_s8 + $0x88] sm:$0xff]  ;;  %v9794_v50 = vld [vmem:[#allocation11 + $0x3e4] ss:$16 sps:$4 sm:$0xff]  }
 0x12f   : > { %3622 = vmatpush1.bf16.msra.mxu0 %v9682_v57  ;;  %4413 = vmatpush1.bf16.msra.mxu1 %v9683_v58  ;;  %v9741_v57 = vld [vmem:[#allocation11 + $0x2c8] ss:$16 sps:$4 sm:$0xff]   ;;  %v9746_v58 = vld [vmem:[#allocation11 + $0x2e4] ss:$16 sps:$4 sm:$0xff]  }
 0x130   : > { %3623 = vmatprep.subr.bf16.mxu0 %v9684_v59  ;;  %4414 = vmatprep.subr.bf16.mxu1 %v9686_v60  ;;  %v9749_v59 = vld [vmem:[#allocation11 + $0x2ec] ss:$16 sps:$4 sm:$0xff]   ;;  %v9744_v60 = vld [vmem:[#allocation11 + $0x2e0] ss:$16 sps:$4 sm:$0xff]  }
 0x133   : > { %3624 = vmatpush1.bf16.msra.mxu0 %v9688_v61  ;;  %4415 = vmatpush1.bf16.msra.mxu1 %v9689_v62  ;;  %v9747_v61 = vld [vmem:[#allocation11 + $0x2e8] ss:$16 sps:$4 sm:$0xff]   ;;  %v832_v62 = vpack.c.bf16 %v678_v56, %v664_v55  ;;  %v553_v55 = vld [vmem:[%s11452_s8 + $0x10] sm:$0xff]  ;;  %v567_v56 = vld [vmem:[%s11452_s8 + $0x80] sm:$0xff] }
 0x134   : > { %3625 = vmatprep.subr.bf16.mxu0 %v9690_v63  ;;  %4416 = vmatprep.subr.bf16.mxu1 %v9692_v0  ;;  %v663_v63 = vld [vmem:[%s11452_s8 + $0x380] sm:$0xff]  ;;  %v677_v0 = vld [vmem:[%s11452_s8 + $0x3f0] sm:$0xff] }
 0x137   : > { %3626 = vmatpush1.bf16.msra.mxu0 %v9694_v1  ;;  %4417 = vmatpush1.bf16.msra.mxu1 %v9695_v2  ;;  %v9752_v1 = vld [vmem:[#allocation11 + $0x304] ss:$16 sps:$4 sm:$0xff]   ;;  %v9755_v2 = vld [vmem:[#allocation11 + $0x30c] ss:$16 sps:$4 sm:$0xff]  }
 0x138   : > { %3627 = vmatprep.subr.bf16.mxu0 %v9696_v3  ;;  %4418 = vmatprep.subr.bf16.mxu1 %v9698_v4  ;;  %v831_v3 = vpack.c.bf16 %v677_v0, %v663_v63  ;;  %v692_v4 = vld [vmem:[%s11452_s8 + $0x468] sm:$0xff]  ;;  %v9806_v0 = vld [vmem:[#allocation11 + $0x424] ss:$16 sps:$4 sm:$0xff]  }
 0x139   : > { %v9801_v63 = vld [vmem:[#allocation11 + $0x408] ss:$16 sps:$4 sm:$0xff]  }
 0x13b   : > { %3628 = vmatpush1.bf16.msra.mxu0 %v9700_v5  ;;  %4419 = vmatpush1.bf16.msra.mxu1 %v9701_v6  ;;  %v706_v5 = vld [vmem:[%s11452_s8 + $0x4d8] sm:$0xff]  ;;  %v9750_v6 = vld [vmem:[#allocation11 + $0x300] ss:$16 sps:$4 sm:$0xff]  }
 0x13c   : > { %3710 = vmatprep.subr.bf16.mxu0 %v9704_v9  ;;  %4501 = vmatprep.subr.bf16.mxu1 %v9707_v10  ;;  %v9761_v9 = vld [vmem:[#allocation11 + $0x32c] ss:$16 sps:$4 sm:$0xff]   ;;  %v9756_v10 = vld [vmem:[#allocation11 + $0x320] ss:$16 sps:$4 sm:$0xff]  }
 0x13e   : > { %3630 = vmatmul.mubr.bf16.vlgmr.msra.gmra.mrb[0].mxu0 %v775_v12  ;;  %4421 = vmatmul.mubr.bf16.vlgmr.msra.gmra.mrb[0].mxu1 %v775_v12  ;;  %v846_v12 = vpack.c.bf16 %v706_v5, %v692_v4  ;;  %v581_v5 = vld [vmem:[%s11452_s8 + $0xf0] sm:$0xff] }
 0x13f   : > { %3711 = vmatpush1.bf16.msra.mxu0 %v9702_v11  ;;  %4502 = vmatpush1.bf16.msra.mxu1 %v9705_v13  ;;  %v9759_v11 = vld [vmem:[#allocation11 + $0x328] ss:$16 sps:$4 sm:$0xff]   ;;  %v691_v13 = vld [vmem:[%s11452_s8 + $0x460] sm:$0xff] }
 0x140   : > { %3712 = vmatprep.subr.bf16.mxu0 %v9710_v16  ;;  %4503 = vmatprep.subr.bf16.mxu1 %v9713_v17  ;;  %v9767_v16 = vld [vmem:[#allocation11 + $0x34c] ss:$16 sps:$4 sm:$0xff]   ;;  %v9762_v17 = vld [vmem:[#allocation11 + $0x340] ss:$16 sps:$4 sm:$0xff]  }
 0x141   : > { %3639 = vmatprep.mubr.bf16.mxu0 %v790_v19  ;;  %4430 = vmatprep.mubr.bf16.mxu1 %v790_v19  ;;  %v9765_v19 = vld [vmem:[#allocation11 + $0x348] ss:$16 sps:$4 sm:$0xff]  }
 0x143   : > { %3713 = vmatpush1.bf16.msra.mxu0 %v9708_v18  ;;  %4504 = vmatpush1.bf16.msra.mxu1 %v9711_v20  ;;  %v845_v18 = vpack.c.bf16 %v705_v14, %v691_v13  ;;  %v720_v20 = vld [vmem:[%s11452_s8 + $0x548] sm:$0xff]  ;;  %v9818_v14 = vld [vmem:[#allocation11 + $0x464] ss:$16 sps:$4 sm:$0xff]  }
 0x144   : > { %3714 = vmatprep.subr.bf16.mxu0 %v9716_v23  ;;  %4505 = vmatprep.subr.bf16.mxu1 %v9719_v24  ;;  %v9773_v23 = vld [vmem:[#allocation11 + $0x36c] ss:$16 sps:$4 sm:$0xff]   ;;  %v9768_v24 = vld [vmem:[#allocation11 + $0x360] ss:$16 sps:$4 sm:$0xff]   ;;  %v9813_v13 = vld [vmem:[#allocation11 + $0x448] ss:$16 sps:$4 sm:$0xff]  }
 0x146   : > { %3640 = vmatmul.mubr.bf16.gmra.mrb[4].mxu0 %v789_v27  ;;  %4431 = vmatmul.mubr.bf16.gmra.mrb[4].mxu1 %v789_v27  ;;  %v719_v27 = vld [vmem:[%s11452_s8 + $0x540] sm:$0xff] }
 0x147   : > { %3715 = vmatpush1.bf16.msra.mxu0 %v9714_v25  ;;  %4506 = vmatpush1.bf16.msra.mxu1 %v9717_v26  ;;  %v860_v25 = vpack.c.bf16 %v734_v21, %v720_v20  ;;  %v9771_v26 = vld [vmem:[#allocation11 + $0x368] ss:$16 sps:$4 sm:$0xff]   ;;  %v623_v20 = vld [vmem:[%s11452_s8 + $0x240] sm:$0xff] }
 0x148   : > { %3716 = vmatprep.subr.bf16.mxu0 %v9722_v30  ;;  %4507 = vmatprep.subr.bf16.mxu1 %v9725_v31  ;;  %v9779_v30 = vld [vmem:[#allocation11 + $0x38c] ss:$16 sps:$4 sm:$0xff]   ;;  %v9774_v31 = vld [vmem:[#allocation11 + $0x380] ss:$16 sps:$4 sm:$0xff]   ;;  %v9824_v21 = vld [vmem:[#allocation11 + $0x484] ss:$16 sps:$4 sm:$0xff]  }
 0x149   : > { %3649 = vmatprep.mubr.bf16.mxu0 %v804_v32  ;;  %4440 = vmatprep.mubr.bf16.mxu1 %v804_v32  ;;  %v9777_v32 = vld [vmem:[#allocation11 + $0x388] ss:$16 sps:$4 sm:$0xff]  }
 0x14b   : > { %3717 = vmatpush1.bf16.msra.mxu0 %v9720_v33  ;;  %4508 = vmatpush1.bf16.msra.mxu1 %v9723_v34  ;;  %v859_v33 = vpack.c.bf16 %v733_v28, %v719_v27  ;;  %v748_v34 = vld [vmem:[%s11452_s8 + $0x628] sm:$0xff]  ;;  %v9830_v28 = vld [vmem:[#allocation11 + $0x4a4] ss:$16 sps:$4 sm:$0xff]  }
 0x14c   : > { %3718 = vmatprep.subr.bf16.mxu0 %v9728_v37  ;;  %4509 = vmatprep.subr.bf16.mxu1 %v9731_v38  ;;  %v9785_v37 = vld [vmem:[#allocation11 + $0x3ac] ss:$16 sps:$4 sm:$0xff]   ;;  %v874_v38 = vpack.c.bf16 %v762_v35, %v748_v34  ;;  %v651_v34 = vld [vmem:[%s11452_s8 + $0x320] sm:$0xff] }
 0x14d   : > { %v652_v27 = vld [vmem:[%s11452_s8 + $0x328] sm:$0xff]  ;;  %v9836_v35 = vld [vmem:[#allocation11 + $0x4c4] ss:$16 sps:$4 sm:$0xff]  }
 0x14e   : > { %3650 = vmatmul.mubr.bf16.gmra.mrb[8].mxu0 %v803_v41  ;;  %4441 = vmatmul.mubr.bf16.gmra.mrb[8].mxu1 %v803_v41  ;;  %v747_v41 = vld [vmem:[%s11452_s8 + $0x620] sm:$0xff] }
 0x14f   : > { %3719 = vmatpush1.bf16.msra.mxu0 %v9726_v39  ;;  %4510 = vmatpush1.bf16.msra.mxu1 %v9729_v40  ;;  %v9780_v39 = vld [vmem:[#allocation11 + $0x3a0] ss:$16 sps:$4 sm:$0xff]   ;;  %v9783_v40 = vld [vmem:[#allocation11 + $0x3a8] ss:$16 sps:$4 sm:$0xff]  }
 0x150   : > { %3720 = vmatprep.subr.bf16.mxu0 %v9734_v44  ;;  %4511 = vmatprep.subr.bf16.mxu1 %v9737_v45  ;;  %v9791_v44 = vld [vmem:[#allocation11 + $0x3cc] ss:$16 sps:$4 sm:$0xff]   ;;  %v9786_v45 = vld [vmem:[#allocation11 + $0x3c0] ss:$16 sps:$4 sm:$0xff]  }
 0x151   : > { %3659 = vmatprep.mubr.bf16.mxu0 %v818_v47  ;;  %4450 = vmatprep.mubr.bf16.mxu1 %v818_v47  ;;  %v873_v47 = vpack.c.bf16 %v761_v42, %v747_v41  ;;  %v680_v41 = vld [vmem:[%s11452_s8 + $0x408] sm:$0xff]  ;;  %v9842_v42 = vld [vmem:[#allocation11 + $0x4e4] ss:$16 sps:$4 sm:$0xff]  }
 0x153   : > { %3721 = vmatpush1.bf16.msra.mxu0 %v9732_v46  ;;  %4512 = vmatpush1.bf16.msra.mxu1 %v9735_v48  ;;  %v9789_v46 = vld [vmem:[#allocation11 + $0x3c8] ss:$16 sps:$4 sm:$0xff]  }
 0x154   : > { %3722 = vmatprep.subr.bf16.mxu0 %v9740_v51  ;;  %4513 = vmatprep.subr.bf16.mxu1 %v9743_v52  ;;  %v554_v48 = vld [vmem:[%s11452_s8 + $0x18] sm:$0xff]  ;;  %v9792_v52 = vld [vmem:[#allocation11 + $0x3e0] ss:$16 sps:$4 sm:$0xff]  }
 0x155   : > { %v9797_v51 = vld [vmem:[#allocation11 + $0x3ec] ss:$16 sps:$4 sm:$0xff]  }
 0x156   : > { %3660 = vmatmul.mubr.bf16.gmra.mrb[12].mxu0 %v817_v54  ;;  %4451 = vmatmul.mubr.bf16.gmra.mrb[12].mxu1 %v817_v54  ;;  %v9795_v54 = vld [vmem:[#allocation11 + $0x3e8] ss:$16 sps:$4 sm:$0xff]  }
 0x157   : > { %3723 = vmatpush1.bf16.msra.mxu0 %v9738_v53  ;;  %4514 = vmatpush1.bf16.msra.mxu1 %v9741_v57  ;;  %v778_v53 = vpack.c.bf16 %v568_v49, %v554_v48  ;;  %v9800_v57 = vld [vmem:[#allocation11 + $0x404] ss:$16 sps:$4 sm:$0xff]  }
 0x158   : > { %3724 = vmatprep.subr.bf16.mxu0 %v9746_v58  ;;  %4515 = vmatprep.subr.bf16.mxu1 %v9749_v59  ;;  %v9803_v58 = vld [vmem:[#allocation11 + $0x40c] ss:$16 sps:$4 sm:$0xff]   ;;  %v9798_v59 = vld [vmem:[#allocation11 + $0x400] ss:$16 sps:$4 sm:$0xff]   ;;  %v9848_v49 = vld [vmem:[#allocation11 + $0x504] ss:$16 sps:$4 sm:$0xff]  }
 0x159   : > { %3669 = vmatprep.mubr.bf16.mxu0 %v832_v62  ;;  %4460 = vmatprep.mubr.bf16.mxu1 %v832_v62  ;;  %v596_v62 = vld [vmem:[%s11452_s8 + $0x168] sm:$0xff]  ;;  %v679_v48 = vld [vmem:[%s11452_s8 + $0x400] sm:$0xff] }
 0x15b   : > { %3725 = vmatpush1.bf16.msra.mxu0 %v9744_v60  ;;  %4516 = vmatpush1.bf16.msra.mxu1 %v9747_v61  ;;  %v777_v60 = vpack.c.bf16 %v567_v56, %v553_v55  ;;  %v582_v61 = vld [vmem:[%s11452_s8 + $0xf8] sm:$0xff]  ;;  %v708_v55 = vld [vmem:[%s11452_s8 + $0x4e8] sm:$0xff]  ;;  %v9854_v56 = vld [vmem:[#allocation11 + $0x524] ss:$16 sps:$4 sm:$0xff]  }
 0x15c   : > { %3726 = vmatprep.subr.bf16.mxu0 %v9752_v1  ;;  %4517 = vmatprep.subr.bf16.mxu1 %v9755_v2  ;;  %v9809_v1 = vld [vmem:[#allocation11 + $0x42c] ss:$16 sps:$4 sm:$0xff]   ;;  %v9804_v2 = vld [vmem:[#allocation11 + $0x420] ss:$16 sps:$4 sm:$0xff]   ;;  %v792_v4 = vpack.c.bf16 %v596_v62, %v582_v61 }
 0x15d   : > { %v693_v61 = vld [vmem:[%s11452_s8 + $0x470] sm:$0xff]  ;;  %v707_v62 = vld [vmem:[%s11452_s8 + $0x4e0] sm:$0xff] }
 0x15e   : > { %3670 = vmatmul.mubr.bf16.gmra.mrb[16].mxu0 %v831_v3  ;;  %4461 = vmatmul.mubr.bf16.gmra.mrb[16].mxu1 %v831_v3  ;;  %v9807_v3 = vld [vmem:[#allocation11 + $0x428] ss:$16 sps:$4 sm:$0xff]  }
 0x15f   : > { %3727 = vmatpush1.bf16.msra.mxu0 %v9750_v6  ;;  %4518 = vmatpush1.bf16.msra.mxu1 %v9753_v7  ;;  %v595_v6 = vld [vmem:[%s11452_s8 + $0x160] sm:$0xff] }
 0x160   : > { %3728 = vmatprep.subr.bf16.mxu0 %v9758_v8  ;;  %4519 = vmatprep.subr.bf16.mxu1 %v9761_v9  ;;  %v9812_v7 = vld [vmem:[#allocation11 + $0x444] ss:$16 sps:$4 sm:$0xff]   ;;  %v9815_v8 = vld [vmem:[#allocation11 + $0x44c] ss:$16 sps:$4 sm:$0xff]   ;;  %v791_v9 = vpack.c.bf16 %v595_v6, %v581_v5  ;;  %v9861_v5 = vld [vmem:[#allocation11 + $0x548] ss:$16 sps:$4 sm:$0xff]  }
 0x161   : > { %3679 = vmatprep.mubr.bf16.mxu0 %v846_v12  ;;  %4470 = vmatprep.mubr.bf16.mxu1 %v846_v12  ;;  %v9810_v12 = vld [vmem:[#allocation11 + $0x440] ss:$16 sps:$4 sm:$0xff]   ;;  %v9866_v6 = vld [vmem:[#allocation11 + $0x564] ss:$16 sps:$4 sm:$0xff]  }
 0x163   : > { %3729 = vmatpush1.bf16.msra.mxu0 %v9756_v10  ;;  %4520 = vmatpush1.bf16.msra.mxu1 %v9759_v11  ;;  %v610_v10 = vld [vmem:[%s11452_s8 + $0x1d8] sm:$0xff]  ;;  %v624_v11 = vld [vmem:[%s11452_s8 + $0x248] sm:$0xff] }
 0x164   : > { %3730 = vmatprep.subr.bf16.mxu0 %v9764_v15  ;;  %4521 = vmatprep.subr.bf16.mxu1 %v9767_v16  ;;  %v9821_v15 = vld [vmem:[#allocation11 + $0x46c] ss:$16 sps:$4 sm:$0xff]   ;;  %v9816_v16 = vld [vmem:[#allocation11 + $0x460] ss:$16 sps:$4 sm:$0xff]  }
 0x166   : > { %3680 = vmatmul.mubr.bf16.gmra.mrb[20].mxu0 %v845_v18  ;;  %4471 = vmatmul.mubr.bf16.gmra.mrb[20].mxu1 %v845_v18  ;;  %v806_v18 = vpack.c.bf16 %v624_v11, %v610_v10  ;;  %v721_v11 = vld [vmem:[%s11452_s8 + $0x550] sm:$0xff] }
 0x167   : > { %3731 = vmatpush1.bf16.msra.mxu0 %v9762_v17  ;;  %4522 = vmatpush1.bf16.msra.mxu1 %v9765_v19  ;;  %v9819_v17 = vld [vmem:[#allocation11 + $0x468] ss:$16 sps:$4 sm:$0xff]   ;;  %v609_v19 = vld [vmem:[%s11452_s8 + $0x1d0] sm:$0xff] }
 0x168   : > { %3732 = vmatprep.subr.bf16.mxu0 %v9770_v22  ;;  %4523 = vmatprep.subr.bf16.mxu1 %v9773_v23  ;;  %v9827_v22 = vld [vmem:[#allocation11 + $0x48c] ss:$16 sps:$4 sm:$0xff]   ;;  %v9822_v23 = vld [vmem:[#allocation11 + $0x480] ss:$16 sps:$4 sm:$0xff]  }
 0x169   : > { %3689 = vmatprep.mubr.bf16.mxu0 %v860_v25  ;;  %4480 = vmatprep.mubr.bf16.mxu1 %v860_v25  ;;  %v9825_v25 = vld [vmem:[#allocation11 + $0x488] ss:$16 sps:$4 sm:$0xff]  }
 0x16b   : > { %3733 = vmatpush1.bf16.msra.mxu0 %v9768_v24  ;;  %4524 = vmatpush1.bf16.msra.mxu1 %v9771_v26  ;;  %v805_v24 = vpack.c.bf16 %v623_v20, %v609_v19  ;;  %v638_v26 = vld [vmem:[%s11452_s8 + $0x2b8] sm:$0xff]  ;;  %v9878_v20 = vld [vmem:[#allocation11 + $0x5a4] ss:$16 sps:$4 sm:$0xff]  }
 0x16c   : > { %3734 = vmatprep.subr.bf16.mxu0 %v9776_v29  ;;  %4525 = vmatprep.subr.bf16.mxu1 %v9779_v30  ;;  %v9833_v29 = vld [vmem:[#allocation11 + $0x4ac] ss:$16 sps:$4 sm:$0xff]   ;;  %v9828_v30 = vld [vmem:[#allocation11 + $0x4a0] ss:$16 sps:$4 sm:$0xff]   ;;  %v9873_v19 = vld [vmem:[#allocation11 + $0x588] ss:$16 sps:$4 sm:$0xff]  }
 0x16e   : > { %3690 = vmatmul.mubr.bf16.gmra.mrb[24].mxu0 %v859_v33  ;;  %4481 = vmatmul.mubr.bf16.gmra.mrb[24].mxu1 %v859_v33  ;;  %v637_v33 = vld [vmem:[%s11452_s8 + $0x2b0] sm:$0xff] }
 0x16f   : > { %3735 = vmatpush1.bf16.msra.mxu0 %v9774_v31  ;;  %4526 = vmatpush1.bf16.msra.mxu1 %v9777_v32  ;;  %v820_v31 = vpack.c.bf16 %v652_v27, %v638_v26  ;;  %v9831_v32 = vld [vmem:[#allocation11 + $0x4a8] ss:$16 sps:$4 sm:$0xff]   ;;  %v763_v26 = vld [vmem:[%s11452_s8 + $0x6a0] sm:$0xff] }
 0x170   : > { %3736 = vmatprep.subr.bf16.mxu0 %v9782_v36  ;;  %4527 = vmatprep.subr.bf16.mxu1 %v9785_v37  ;;  %v9839_v36 = vld [vmem:[#allocation11 + $0x4cc] ss:$16 sps:$4 sm:$0xff]   ;;  %v9834_v37 = vld [vmem:[#allocation11 + $0x4c0] ss:$16 sps:$4 sm:$0xff]   ;;  %v9884_v27 = vld [vmem:[#allocation11 + $0x5c4] ss:$16 sps:$4 sm:$0xff]  }
 0x171   : > { %3699 = vmatprep.mubr.bf16.mxu0 %v874_v38  ;;  %4490 = vmatprep.mubr.bf16.mxu1 %v874_v38  ;;  %v9837_v38 = vld [vmem:[#allocation11 + $0x4c8] ss:$16 sps:$4 sm:$0xff]  }
 0x173   : > { %3737 = vmatpush1.bf16.msra.mxu0 %v9780_v39  ;;  %4528 = vmatpush1.bf16.msra.mxu1 %v9783_v40  ;;  %v819_v39 = vpack.c.bf16 %v651_v34, %v637_v33  ;;  %v666_v40 = vld [vmem:[%s11452_s8 + $0x398] sm:$0xff]  ;;  %v9890_v34 = vld [vmem:[#allocation11 + $0x5e4] ss:$16 sps:$4 sm:$0xff]  }
 0x174   : > { %3738 = vmatprep.subr.bf16.mxu0 %v9788_v43  ;;  %4529 = vmatprep.subr.bf16.mxu1 %v9791_v44  ;;  %v9845_v43 = vld [vmem:[#allocation11 + $0x4ec] ss:$16 sps:$4 sm:$0xff]   ;;  %v834_v44 = vpack.c.bf16 %v680_v41, %v666_v40  ;;  %v569_v40 = vld [vmem:[%s11452_s8 + $0x90] sm:$0xff] }
 0x175   : > { %v570_v33 = vld [vmem:[%s11452_s8 + $0x98] sm:$0xff]  ;;  %v9896_v41 = vld [vmem:[#allocation11 + $0x604] ss:$16 sps:$4 sm:$0xff]  }
 0x176   : > { %3700 = vmatmul.mubr.bf16.gmra.mrb[28].mxu0 %v873_v47  ;;  %4491 = vmatmul.mubr.bf16.gmra.mrb[28].mxu1 %v873_v47  ;;  %v665_v47 = vld [vmem:[%s11452_s8 + $0x390] sm:$0xff] }
 0x177   : > { %3739 = vmatpush1.bf16.msra.mxu0 %v9786_v45  ;;  %4530 = vmatpush1.bf16.msra.mxu1 %v9789_v46  ;;  %v9840_v45 = vld [vmem:[#allocation11 + $0x4e0] ss:$16 sps:$4 sm:$0xff]   ;;  %v9843_v46 = vld [vmem:[#allocation11 + $0x4e8] ss:$16 sps:$4 sm:$0xff]  }
 0x178   : > { %3740 = vmatprep.subr.bf16.mxu0 %v9794_v50  ;;  %4531 = vmatprep.subr.bf16.mxu1 %v9797_v51  ;;  %v9851_v50 = vld [vmem:[#allocation11 + $0x50c] ss:$16 sps:$4 sm:$0xff]   ;;  %v9846_v51 = vld [vmem:[#allocation11 + $0x500] ss:$16 sps:$4 sm:$0xff]  }
 0x179   : > { %3742 = vmatprep.mubr.bf16.mxu0 %v778_v53  ;;  %4533 = vmatprep.mubr.bf16.mxu1 %v778_v53  ;;  %v833_v53 = vpack.c.bf16 %v679_v48, %v665_v47  ;;  %v598_v47 = vld [vmem:[%s11452_s8 + $0x178] sm:$0xff]  ;;  %v9902_v48 = vld [vmem:[#allocation11 + $0x624] ss:$16 sps:$4 sm:$0xff]  }
 0x17b   : > { %3741 = vmatpush1.bf16.msra.mxu0 %v9792_v52  ;;  %4532 = vmatpush1.bf16.msra.mxu1 %v9795_v54  ;;  %v9849_v52 = vld [vmem:[#allocation11 + $0x508] ss:$16 sps:$4 sm:$0xff]  }
 0x17c   : > { %3823 = vmatprep.subr.bf16.mxu0 %v9800_v57  ;;  %4614 = vmatprep.subr.bf16.mxu1 %v9803_v58  ;;  %v694_v54 = vld [vmem:[%s11452_s8 + $0x478] sm:$0xff]  ;;  %v9852_v58 = vld [vmem:[#allocation11 + $0x520] ss:$16 sps:$4 sm:$0xff]  }
 0x17d   : > { %v9857_v57 = vld [vmem:[#allocation11 + $0x52c] ss:$16 sps:$4 sm:$0xff]  }
 0x17e   : > { %3743 = vmatmul.mubr.bf16.vlgmr.msra.gmra.mrb[0].mxu0 %v777_v60  ;;  %4534 = vmatmul.mubr.bf16.vlgmr.msra.gmra.mrb[0].mxu1 %v777_v60  ;;  %v9855_v60 = vld [vmem:[#allocation11 + $0x528] ss:$16 sps:$4 sm:$0xff]  }
 0x17f   : > { %3824 = vmatpush1.bf16.msra.mxu0 %v9798_v59  ;;  %4615 = vmatpush1.bf16.msra.mxu1 %v9801_v63  ;;  %v848_v59 = vpack.c.bf16 %v708_v55, %v694_v54  ;;  %v9860_v63 = vld [vmem:[#allocation11 + $0x544] ss:$16 sps:$4 sm:$0xff]  }
 0x180   : > { %3825 = vmatprep.subr.bf16.mxu0 %v9806_v0  ;;  %4616 = vmatprep.subr.bf16.mxu1 %v9809_v1  ;;  %v9863_v0 = vld [vmem:[#allocation11 + $0x54c] ss:$16 sps:$4 sm:$0xff]   ;;  %v9858_v1 = vld [vmem:[#allocation11 + $0x540] ss:$16 sps:$4 sm:$0xff]   ;;  %v9908_v55 = vld [vmem:[#allocation11 + $0x644] ss:$16 sps:$4 sm:$0xff]  }
 0x181   : > { %3752 = vmatprep.mubr.bf16.mxu0 %v792_v4  ;;  %4543 = vmatprep.mubr.bf16.mxu1 %v792_v4  ;;  %v736_v4 = vld [vmem:[%s11452_s8 + $0x5c8] sm:$0xff]  ;;  %v597_v54 = vld [vmem:[%s11452_s8 + $0x170] sm:$0xff] }
 0x183   : > { %3826 = vmatpush1.bf16.msra.mxu0 %v9804_v2  ;;  %4617 = vmatpush1.bf16.msra.mxu1 %v9807_v3  ;;  %v847_v2 = vpack.c.bf16 %v707_v62, %v693_v61  ;;  %v722_v3 = vld [vmem:[%s11452_s8 + $0x558] sm:$0xff]  ;;  %v9914_v62 = vld [vmem:[#allocation11 + $0x664] ss:$16 sps:$4 sm:$0xff]  }
 0x184   : > { %3827 = vmatprep.subr.bf16.mxu0 %v9812_v7  ;;  %4618 = vmatprep.subr.bf16.mxu1 %v9815_v8  ;;  %v9869_v7 = vld [vmem:[#allocation11 + $0x56c] ss:$16 sps:$4 sm:$0xff]   ;;  %v9864_v8 = vld [vmem:[#allocation11 + $0x560] ss:$16 sps:$4 sm:$0xff]   ;;  %v862_v10 = vpack.c.bf16 %v736_v4, %v722_v3 }
 0x185   : > { %v626_v61 = vld [vmem:[%s11452_s8 + $0x258] sm:$0xff]  ;;  %v611_v3 = vld [vmem:[%s11452_s8 + $0x1e0] sm:$0xff]  ;;  %v625_v4 = vld [vmem:[%s11452_s8 + $0x250] sm:$0xff] }
 0x186   : > { %3753 = vmatmul.mubr.bf16.gmra.mrb[4].mxu0 %v791_v9  ;;  %4544 = vmatmul.mubr.bf16.gmra.mrb[4].mxu1 %v791_v9  ;;  %v9867_v9 = vld [vmem:[#allocation11 + $0x568] ss:$16 sps:$4 sm:$0xff]  }
 0x187   : > { %3828 = vmatpush1.bf16.msra.mxu0 %v9810_v12  ;;  %4619 = vmatpush1.bf16.msra.mxu1 %v9813_v13  ;;  %v735_v12 = vld [vmem:[%s11452_s8 + $0x5c0] sm:$0xff] }
 0x188   : > { %3829 = vmatprep.subr.bf16.mxu0 %v9818_v14  ;;  %4620 = vmatprep.subr.bf16.mxu1 %v9821_v15  ;;  %v9872_v13 = vld [vmem:[#allocation11 + $0x584] ss:$16 sps:$4 sm:$0xff]   ;;  %v9875_v14 = vld [vmem:[#allocation11 + $0x58c] ss:$16 sps:$4 sm:$0xff]   ;;  %v861_v15 = vpack.c.bf16 %v735_v12, %v721_v11  ;;  %v9921_v11 = vld [vmem:[#allocation11 + $0x688] ss:$16 sps:$4 sm:$0xff]  }
 0x189   : > { %3762 = vmatprep.mubr.bf16.mxu0 %v806_v18  ;;  %4553 = vmatprep.mubr.bf16.mxu1 %v806_v18  ;;  %v9870_v18 = vld [vmem:[#allocation11 + $0x580] ss:$16 sps:$4 sm:$0xff]   ;;  %v9926_v12 = vld [vmem:[#allocation11 + $0x6a4] ss:$16 sps:$4 sm:$0xff]  }
 0x18b   : > { %3830 = vmatpush1.bf16.msra.mxu0 %v9816_v16  ;;  %4621 = vmatpush1.bf16.msra.mxu1 %v9819_v17  ;;  %v750_v16 = vld [vmem:[%s11452_s8 + $0x638] sm:$0xff]  ;;  %v764_v17 = vld [vmem:[%s11452_s8 + $0x6a8] sm:$0xff] }
 0x18c   : > { %3831 = vmatprep.subr.bf16.mxu0 %v9824_v21  ;;  %4622 = vmatprep.subr.bf16.mxu1 %v9827_v22  ;;  %v9881_v21 = vld [vmem:[#allocation11 + $0x5ac] ss:$16 sps:$4 sm:$0xff]   ;;  %v9876_v22 = vld [vmem:[#allocation11 + $0x5a0] ss:$16 sps:$4 sm:$0xff]  }
 0x18e   : > { %3763 = vmatmul.mubr.bf16.gmra.mrb[8].mxu0 %v805_v24  ;;  %4554 = vmatmul.mubr.bf16.gmra.mrb[8].mxu1 %v805_v24  ;;  %v876_v24 = vpack.c.bf16 %v764_v17, %v750_v16  ;;  %v639_v17 = vld [vmem:[%s11452_s8 + $0x2c0] sm:$0xff] }
 0x18f   : > { %3832 = vmatpush1.bf16.msra.mxu0 %v9822_v23  ;;  %4623 = vmatpush1.bf16.msra.mxu1 %v9825_v25  ;;  %v9879_v23 = vld [vmem:[#allocation11 + $0x5a8] ss:$16 sps:$4 sm:$0xff]   ;;  %v749_v25 = vld [vmem:[%s11452_s8 + $0x630] sm:$0xff] }
 0x190   : > { %3833 = vmatprep.subr.bf16.mxu0 %v9830_v28  ;;  %4624 = vmatprep.subr.bf16.mxu1 %v9833_v29  ;;  %v9887_v28 = vld [vmem:[#allocation11 + $0x5cc] ss:$16 sps:$4 sm:$0xff]   ;;  %v9882_v29 = vld [vmem:[#allocation11 + $0x5c0] ss:$16 sps:$4 sm:$0xff]  }
 0x191   : > { %3772 = vmatprep.mubr.bf16.mxu0 %v820_v31  ;;  %4563 = vmatprep.mubr.bf16.mxu1 %v820_v31  ;;  %v9885_v31 = vld [vmem:[#allocation11 + $0x5c8] ss:$16 sps:$4 sm:$0xff]  }
 0x193   : > { %3834 = vmatpush1.bf16.msra.mxu0 %v9828_v30  ;;  %4625 = vmatpush1.bf16.msra.mxu1 %v9831_v32  ;;  %v875_v30 = vpack.c.bf16 %v763_v26, %v749_v25  ;;  %v556_v32 = vld [vmem:[%s11452_s8 + $0x28] sm:$0xff]  ;;  %v9938_v26 = vld [vmem:[#allocation11 + $0x6e4] ss:$16 sps:$4 sm:$0xff]  }
 0x194   : > { %3835 = vmatprep.subr.bf16.mxu0 %v9836_v35  ;;  %4626 = vmatprep.subr.bf16.mxu1 %v9839_v36  ;;  %v9893_v35 = vld [vmem:[#allocation11 + $0x5ec] ss:$16 sps:$4 sm:$0xff]   ;;  %v9888_v36 = vld [vmem:[#allocation11 + $0x5e0] ss:$16 sps:$4 sm:$0xff]   ;;  %v9933_v25 = vld [vmem:[#allocation11 + $0x6c8] ss:$16 sps:$4 sm:$0xff]  }
 0x196   : > { %3773 = vmatmul.mubr.bf16.gmra.mrb[12].mxu0 %v819_v39  ;;  %4564 = vmatmul.mubr.bf16.gmra.mrb[12].mxu1 %v819_v39  ;;  %v555_v39 = vld [vmem:[%s11452_s8 + $0x20] sm:$0xff] }
 0x197   : > { %3836 = vmatpush1.bf16.msra.mxu0 %v9834_v37  ;;  %4627 = vmatpush1.bf16.msra.mxu1 %v9837_v38  ;;  %v780_v37 = vpack.c.bf16 %v570_v33, %v556_v32  ;;  %v9891_v38 = vld [vmem:[#allocation11 + $0x5e8] ss:$16 sps:$4 sm:$0xff]   ;;  %v681_v32 = vld [vmem:[%s11452_s8 + $0x410] sm:$0xff] }
 0x198   : > { %3837 = vmatprep.subr.bf16.mxu0 %v9842_v42  ;;  %4628 = vmatprep.subr.bf16.mxu1 %v9845_v43  ;;  %v9899_v42 = vld [vmem:[#allocation11 + $0x60c] ss:$16 sps:$4 sm:$0xff]   ;;  %v9894_v43 = vld [vmem:[#allocation11 + $0x600] ss:$16 sps:$4 sm:$0xff]   ;;  %v9944_v33 = vld [vmem:[#allocation11 + $0x704] ss:$16 sps:$4 sm:$0xff]  }
 0x199   : > { %3782 = vmatprep.mubr.bf16.mxu0 %v834_v44  ;;  %4573 = vmatprep.mubr.bf16.mxu1 %v834_v44  ;;  %v9897_v44 = vld [vmem:[#allocation11 + $0x608] ss:$16 sps:$4 sm:$0xff]  }
 0x19b   : > { %3838 = vmatpush1.bf16.msra.mxu0 %v9840_v45  ;;  %4629 = vmatpush1.bf16.msra.mxu1 %v9843_v46  ;;  %v779_v45 = vpack.c.bf16 %v569_v40, %v555_v39  ;;  %v584_v46 = vld [vmem:[%s11452_s8 + $0x108] sm:$0xff]  ;;  %v710_v39 = vld [vmem:[%s11452_s8 + $0x4f8] sm:$0xff]  ;;  %v9950_v40 = vld [vmem:[#allocation11 + $0x724] ss:$16 sps:$4 sm:$0xff]  }
 0x19c   : > { %3839 = vmatprep.subr.bf16.mxu0 %v9848_v49  ;;  %4630 = vmatprep.subr.bf16.mxu1 %v9851_v50  ;;  %v9905_v49 = vld [vmem:[#allocation11 + $0x62c] ss:$16 sps:$4 sm:$0xff]   ;;  %v794_v50 = vpack.c.bf16 %v598_v47, %v584_v46  ;;  %v709_v46 = vld [vmem:[%s11452_s8 + $0x4f0] sm:$0xff] }
 0x19d   : > { %v9956_v47 = vld [vmem:[#allocation11 + $0x744] ss:$16 sps:$4 sm:$0xff]  }
 0x19e   : > { %3783 = vmatmul.mubr.bf16.gmra.mrb[16].mxu0 %v833_v53  ;;  %4574 = vmatmul.mubr.bf16.gmra.mrb[16].mxu1 %v833_v53  ;;  %v583_v53 = vld [vmem:[%s11452_s8 + $0x100] sm:$0xff] }
 0x19f   : > { %3840 = vmatpush1.bf16.msra.mxu0 %v9846_v51  ;;  %4631 = vmatpush1.bf16.msra.mxu1 %v9849_v52  ;;  %v9900_v51 = vld [vmem:[#allocation11 + $0x620] ss:$16 sps:$4 sm:$0xff]   ;;  %v9903_v52 = vld [vmem:[#allocation11 + $0x628] ss:$16 sps:$4 sm:$0xff]  }
 0x1a0   : > { %3841 = vmatprep.subr.bf16.mxu0 %v9854_v56  ;;  %4632 = vmatprep.subr.bf16.mxu1 %v9857_v57  ;;  %v9911_v56 = vld [vmem:[#allocation11 + $0x64c] ss:$16 sps:$4 sm:$0xff]   ;;  %v9906_v57 = vld [vmem:[#allocation11 + $0x640] ss:$16 sps:$4 sm:$0xff]  }
 0x1a1   : > { %3792 = vmatprep.mubr.bf16.mxu0 %v848_v59  ;;  %4583 = vmatprep.mubr.bf16.mxu1 %v848_v59  ;;  %v793_v59 = vpack.c.bf16 %v597_v54, %v583_v53  ;;  %v738_v53 = vld [vmem:[%s11452_s8 + $0x5d8] sm:$0xff]  ;;  %v9962_v54 = vld [vmem:[#allocation11 + $0x764] ss:$16 sps:$4 sm:$0xff]  }
 0x1a3   : > { %3842 = vmatpush1.bf16.msra.mxu0 %v9852_v58  ;;  %4633 = vmatpush1.bf16.msra.mxu1 %v9855_v60  ;;  %v9909_v58 = vld [vmem:[#allocation11 + $0x648] ss:$16 sps:$4 sm:$0xff]  }
 0x1a4   : > { %3843 = vmatprep.subr.bf16.mxu0 %v9860_v63  ;;  %4634 = vmatprep.subr.bf16.mxu1 %v9863_v0  ;;  %v612_v60 = vld [vmem:[%s11452_s8 + $0x1e8] sm:$0xff]  ;;  %v9912_v0 = vld [vmem:[#allocation11 + $0x660] ss:$16 sps:$4 sm:$0xff]  }
 0x1a5   : > { %v9917_v63 = vld [vmem:[#allocation11 + $0x66c] ss:$16 sps:$4 sm:$0xff]  }
 0x1a6   : > { %3793 = vmatmul.mubr.bf16.gmra.mrb[20].mxu0 %v847_v2  ;;  %4584 = vmatmul.mubr.bf16.gmra.mrb[20].mxu1 %v847_v2  ;;  %v9915_v2 = vld [vmem:[#allocation11 + $0x668] ss:$16 sps:$4 sm:$0xff]  }
 0x1a7   : > { %3844 = vmatpush1.bf16.msra.mxu0 %v9858_v1  ;;  %4635 = vmatpush1.bf16.msra.mxu1 %v9861_v5  ;;  %v808_v1 = vpack.c.bf16 %v626_v61, %v612_v60  ;;  %v9920_v5 = vld [vmem:[#allocation11 + $0x684] ss:$16 sps:$4 sm:$0xff]  }
 0x1a8   : > { %3845 = vmatprep.subr.bf16.mxu0 %v9866_v6  ;;  %4636 = vmatprep.subr.bf16.mxu1 %v9869_v7  ;;  %v9923_v6 = vld [vmem:[#allocation11 + $0x68c] ss:$16 sps:$4 sm:$0xff]   ;;  %v9918_v7 = vld [vmem:[#allocation11 + $0x680] ss:$16 sps:$4 sm:$0xff]   ;;  %v9968_v61 = vld [vmem:[#allocation11 + $0x784] ss:$16 sps:$4 sm:$0xff]  }
 0x1a9   : > { %3802 = vmatprep.mubr.bf16.mxu0 %v862_v10  ;;  %4593 = vmatprep.mubr.bf16.mxu1 %v862_v10  ;;  %v654_v10 = vld [vmem:[%s11452_s8 + $0x338] sm:$0xff]  ;;  %v737_v60 = vld [vmem:[%s11452_s8 + $0x5d0] sm:$0xff] }
 0x1ab   : > { %3846 = vmatpush1.bf16.msra.mxu0 %v9864_v8  ;;  %4637 = vmatpush1.bf16.msra.mxu1 %v9867_v9  ;;  %v807_v8 = vpack.c.bf16 %v625_v4, %v611_v3  ;;  %v640_v9 = vld [vmem:[%s11452_s8 + $0x2c8] sm:$0xff]  ;;  %v766_v3 = vld [vmem:[%s11452_s8 + $0x6b8] sm:$0xff]  ;;  %v9974_v4 = vld [vmem:[#allocation11 + $0x7a4] ss:$16 sps:$4 sm:$0xff]  }
 0x1ac   : > { %3847 = vmatprep.subr.bf16.mxu0 %v9872_v13  ;;  %4638 = vmatprep.subr.bf16.mxu1 %v9875_v14  ;;  %v9929_v13 = vld [vmem:[#allocation11 + $0x6ac] ss:$16 sps:$4 sm:$0xff]   ;;  %v9924_v14 = vld [vmem:[#allocation11 + $0x6a0] ss:$16 sps:$4 sm:$0xff]   ;;  %v822_v16 = vpack.c.bf16 %v654_v10, %v640_v9 }
 0x1ad   : > { %v751_v9 = vld [vmem:[%s11452_s8 + $0x640] sm:$0xff]  ;;  %v765_v10 = vld [vmem:[%s11452_s8 + $0x6b0] sm:$0xff] }
 0x1ae   : > { %3803 = vmatmul.mubr.bf16.gmra.mrb[24].mxu0 %v861_v15  ;;  %4594 = vmatmul.mubr.bf16.gmra.mrb[24].mxu1 %v861_v15  ;;  %v9927_v15 = vld [vmem:[#allocation11 + $0x6a8] ss:$16 sps:$4 sm:$0xff]  }
 0x1af   : > { %3848 = vmatpush1.bf16.msra.mxu0 %v9870_v18  ;;  %4639 = vmatpush1.bf16.msra.mxu1 %v9873_v19  ;;  %v653_v18 = vld [vmem:[%s11452_s8 + $0x330] sm:$0xff] }
 0x1b0   : > { %3849 = vmatprep.subr.bf16.mxu0 %v9878_v20  ;;  %4640 = vmatprep.subr.bf16.mxu1 %v9881_v21  ;;  %v9932_v19 = vld [vmem:[#allocation11 + $0x6c4] ss:$16 sps:$4 sm:$0xff]   ;;  %v9935_v20 = vld [vmem:[#allocation11 + $0x6cc] ss:$16 sps:$4 sm:$0xff]   ;;  %v821_v21 = vpack.c.bf16 %v653_v18, %v639_v17  ;;  %v9981_v17 = vld [vmem:[#allocation11 + $0x7c8] ss:$16 sps:$4 sm:$0xff]  }
 0x1b1   : > { %3812 = vmatprep.mubr.bf16.mxu0 %v876_v24  ;;  %4603 = vmatprep.mubr.bf16.mxu1 %v876_v24  ;;  %v9930_v24 = vld [vmem:[#allocation11 + $0x6c0] ss:$16 sps:$4 sm:$0xff]   ;;  %v9986_v18 = vld [vmem:[#allocation11 + $0x7e4] ss:$16 sps:$4 sm:$0xff]  }
 0x1b3   : > { %3850 = vmatpush1.bf16.msra.mxu0 %v9876_v22  ;;  %4641 = vmatpush1.bf16.msra.mxu1 %v9879_v23  ;;  %v668_v22 = vld [vmem:[%s11452_s8 + $0x3a8] sm:$0xff]  ;;  %v682_v23 = vld [vmem:[%s11452_s8 + $0x418] sm:$0xff] }
 0x1b4   : > { %3851 = vmatprep.subr.bf16.mxu0 %v9884_v27  ;;  %4642 = vmatprep.subr.bf16.mxu1 %v9887_v28  ;;  %v9941_v27 = vld [vmem:[#allocation11 + $0x6ec] ss:$16 sps:$4 sm:$0xff]   ;;  %v9936_v28 = vld [vmem:[#allocation11 + $0x6e0] ss:$16 sps:$4 sm:$0xff]  }
 0x1b6   : > { %3813 = vmatmul.mubr.bf16.gmra.mrb[28].mxu0 %v875_v30  ;;  %4604 = vmatmul.mubr.bf16.gmra.mrb[28].mxu1 %v875_v30  ;;  %v836_v30 = vpack.c.bf16 %v682_v23, %v668_v22  ;;  %v557_v23 = vld [vmem:[%s11452_s8 + $0x30] sm:$0xff] }
 0x1b7   : > { %3852 = vmatpush1.bf16.msra.mxu0 %v9882_v29  ;;  %4643 = vmatpush1.bf16.msra.mxu1 %v9885_v31  ;;  %v9939_v29 = vld [vmem:[#allocation11 + $0x6e8] ss:$16 sps:$4 sm:$0xff]   ;;  %v667_v31 = vld [vmem:[%s11452_s8 + $0x3a0] sm:$0xff] }
 0x1b8   : > { %3853 = vmatprep.subr.bf16.mxu0 %v9890_v34  ;;  %4644 = vmatprep.subr.bf16.mxu1 %v9893_v35  ;;  %v9947_v34 = vld [vmem:[#allocation11 + $0x70c] ss:$16 sps:$4 sm:$0xff]   ;;  %v9942_v35 = vld [vmem:[#allocation11 + $0x700] ss:$16 sps:$4 sm:$0xff]  }
 0x1b9   : > { %3855 = vmatprep.mubr.bf16.mxu0 %v780_v37  ;;  %4646 = vmatprep.mubr.bf16.mxu1 %v780_v37  ;;  %v9945_v37 = vld [vmem:[#allocation11 + $0x708] ss:$16 sps:$4 sm:$0xff]  }
 0x1bb   : > { %3854 = vmatpush1.bf16.msra.mxu0 %v9888_v36  ;;  %4645 = vmatpush1.bf16.msra.mxu1 %v9891_v38  ;;  %v835_v36 = vpack.c.bf16 %v681_v32, %v667_v31  ;;  %v696_v38 = vld [vmem:[%s11452_s8 + $0x488] sm:$0xff]  ;;  %v9998_v32 = vld [vmem:[#allocation11 + $0x824] ss:$16 sps:$4 sm:$0xff]  }
 0x1bc   : > { %3936 = vmatprep.subr.bf16.mxu0 %v9896_v41  ;;  %4727 = vmatprep.subr.bf16.mxu1 %v9899_v42  ;;  %v9953_v41 = vld [vmem:[#allocation11 + $0x72c] ss:$16 sps:$4 sm:$0xff]   ;;  %v9948_v42 = vld [vmem:[#allocation11 + $0x720] ss:$16 sps:$4 sm:$0xff]   ;;  %v9993_v31 = vld [vmem:[#allocation11 + $0x808] ss:$16 sps:$4 sm:$0xff]  }
 0x1be   : > { %3856 = vmatmul.mubr.bf16.vlgmr.msra.gmra.mrb[0].mxu0 %v779_v45  ;;  %4647 = vmatmul.mubr.bf16.vlgmr.msra.gmra.mrb[0].mxu1 %v779_v45  ;;  %v695_v45 = vld [vmem:[%s11452_s8 + $0x480] sm:$0xff] }
 0x1bf   : > { %3937 = vmatpush1.bf16.msra.mxu0 %v9894_v43  ;;  %4728 = vmatpush1.bf16.msra.mxu1 %v9897_v44  ;;  %v850_v43 = vpack.c.bf16 %v710_v39, %v696_v38  ;;  %v9951_v44 = vld [vmem:[#allocation11 + $0x728] ss:$16 sps:$4 sm:$0xff]   ;;  %v599_v38 = vld [vmem:[%s11452_s8 + $0x180] sm:$0xff] }
 0x1c0   : > { %3938 = vmatprep.subr.bf16.mxu0 %v9902_v48  ;;  %4729 = vmatprep.subr.bf16.mxu1 %v9905_v49  ;;  %v9959_v48 = vld [vmem:[#allocation11 + $0x74c] ss:$16 sps:$4 sm:$0xff]   ;;  %v9954_v49 = vld [vmem:[#allocation11 + $0x740] ss:$16 sps:$4 sm:$0xff]   ;;  %v10004_v39 = vld [vmem:[#allocation11 + $0x844] ss:$16 sps:$4 sm:$0xff]  }
 0x1c1   : > { %3865 = vmatprep.mubr.bf16.mxu0 %v794_v50  ;;  %4656 = vmatprep.mubr.bf16.mxu1 %v794_v50  ;;  %v9957_v50 = vld [vmem:[#allocation11 + $0x748] ss:$16 sps:$4 sm:$0xff]  }
 0x1c3   : > { %3939 = vmatpush1.bf16.msra.mxu0 %v9900_v51  ;;  %4730 = vmatpush1.bf16.msra.mxu1 %v9903_v52  ;;  %v849_v51 = vpack.c.bf16 %v709_v46, %v695_v45  ;;  %v724_v52 = vld [vmem:[%s11452_s8 + $0x568] sm:$0xff]  ;;  %v10010_v46 = vld [vmem:[#allocation11 + $0x864] ss:$16 sps:$4 sm:$0xff]  }
 0x1c4   : > { %3940 = vmatprep.subr.bf16.mxu0 %v9908_v55  ;;  %4731 = vmatprep.subr.bf16.mxu1 %v9911_v56  ;;  %v9965_v55 = vld [vmem:[#allocation11 + $0x76c] ss:$16 sps:$4 sm:$0xff]   ;;  %v864_v56 = vpack.c.bf16 %v738_v53, %v724_v52  ;;  %v627_v52 = vld [vmem:[%s11452_s8 + $0x260] sm:$0xff] }
 0x1c5   : > { %v628_v45 = vld [vmem:[%s11452_s8 + $0x268] sm:$0xff]  ;;  %v10016_v53 = vld [vmem:[#allocation11 + $0x884] ss:$16 sps:$4 sm:$0xff]  }
 0x1c6   : > { %3866 = vmatmul.mubr.bf16.gmra.mrb[4].mxu0 %v793_v59  ;;  %4657 = vmatmul.mubr.bf16.gmra.mrb[4].mxu1 %v793_v59  ;;  %v723_v59 = vld [vmem:[%s11452_s8 + $0x560] sm:$0xff] }
 0x1c7   : > { %3941 = vmatpush1.bf16.msra.mxu0 %v9906_v57  ;;  %4732 = vmatpush1.bf16.msra.mxu1 %v9909_v58  ;;  %v9960_v57 = vld [vmem:[#allocation11 + $0x760] ss:$16 sps:$4 sm:$0xff]   ;;  %v9963_v58 = vld [vmem:[#allocation11 + $0x768] ss:$16 sps:$4 sm:$0xff]  }
 0x1c8   : > { %3942 = vmatprep.subr.bf16.mxu0 %v9914_v62  ;;  %4733 = vmatprep.subr.bf16.mxu1 %v9917_v63  ;;  %v9971_v62 = vld [vmem:[#allocation11 + $0x78c] ss:$16 sps:$4 sm:$0xff]   ;;  %v9966_v63 = vld [vmem:[#allocation11 + $0x780] ss:$16 sps:$4 sm:$0xff]  }
 0x1c9   : > { %3875 = vmatprep.mubr.bf16.mxu0 %v808_v1  ;;  %4666 = vmatprep.mubr.bf16.mxu1 %v808_v1  ;;  %v863_v1 = vpack.c.bf16 %v737_v60, %v723_v59  ;;  %v656_v59 = vld [vmem:[%s11452_s8 + $0x348] sm:$0xff]  ;;  %v10022_v60 = vld [vmem:[#allocation11 + $0x8a4] ss:$16 sps:$4 sm:$0xff]  }
 0x1cb   : > { %3943 = vmatpush1.bf16.msra.mxu0 %v9912_v0  ;;  %4734 = vmatpush1.bf16.msra.mxu1 %v9915_v2  ;;  %v9969_v0 = vld [vmem:[#allocation11 + $0x788] ss:$16 sps:$4 sm:$0xff]  }
 0x1cc   : > { %3944 = vmatprep.subr.bf16.mxu0 %v9920_v5  ;;  %4735 = vmatprep.subr.bf16.mxu1 %v9923_v6  ;;  %v752_v2 = vld [vmem:[%s11452_s8 + $0x648] sm:$0xff]  ;;  %v9972_v6 = vld [vmem:[#allocation11 + $0x7a0] ss:$16 sps:$4 sm:$0xff]  }
 0x1cd   : > { %v9977_v5 = vld [vmem:[#allocation11 + $0x7ac] ss:$16 sps:$4 sm:$0xff]  }
 0x1ce   : > { %3876 = vmatmul.mubr.bf16.gmra.mrb[8].mxu0 %v807_v8  ;;  %4667 = vmatmul.mubr.bf16.gmra.mrb[8].mxu1 %v807_v8  ;;  %v9975_v8 = vld [vmem:[#allocation11 + $0x7a8] ss:$16 sps:$4 sm:$0xff]  }
 0x1cf   : > { %3945 = vmatpush1.bf16.msra.mxu0 %v9918_v7  ;;  %4736 = vmatpush1.bf16.msra.mxu1 %v9921_v11  ;;  %v878_v7 = vpack.c.bf16 %v766_v3, %v752_v2  ;;  %v9980_v11 = vld [vmem:[#allocation11 + $0x7c4] ss:$16 sps:$4 sm:$0xff]  }
 0x1d0   : > { %3946 = vmatprep.subr.bf16.mxu0 %v9926_v12  ;;  %4737 = vmatprep.subr.bf16.mxu1 %v9929_v13  ;;  %v9983_v12 = vld [vmem:[#allocation11 + $0x7cc] ss:$16 sps:$4 sm:$0xff]   ;;  %v9978_v13 = vld [vmem:[#allocation11 + $0x7c0] ss:$16 sps:$4 sm:$0xff]   ;;  %v10028_v3 = vld [vmem:[#allocation11 + $0x8c4] ss:$16 sps:$4 sm:$0xff]  }
 0x1d1   : > { %3885 = vmatprep.mubr.bf16.mxu0 %v822_v16  ;;  %4676 = vmatprep.mubr.bf16.mxu1 %v822_v16  ;;  %v572_v16 = vld [vmem:[%s11452_s8 + $0xa8] sm:$0xff]  ;;  %v655_v2 = vld [vmem:[%s11452_s8 + $0x340] sm:$0xff] }
 0x1d3   : > { %3947 = vmatpush1.bf16.msra.mxu0 %v9924_v14  ;;  %4738 = vmatpush1.bf16.msra.mxu1 %v9927_v15  ;;  %v877_v14 = vpack.c.bf16 %v765_v10, %v751_v9  ;;  %v558_v15 = vld [vmem:[%s11452_s8 + $0x38] sm:$0xff]  ;;  %v684_v9 = vld [vmem:[%s11452_s8 + $0x428] sm:$0xff]  ;;  %v10034_v10 = vld [vmem:[#allocation11 + $0x8e4] ss:$16 sps:$4 sm:$0xff]  }
 0x1d4   : > { %3948 = vmatprep.subr.bf16.mxu0 %v9932_v19  ;;  %4739 = vmatprep.subr.bf16.mxu1 %v9935_v20  ;;  %v9989_v19 = vld [vmem:[#allocation11 + $0x7ec] ss:$16 sps:$4 sm:$0xff]   ;;  %v9984_v20 = vld [vmem:[#allocation11 + $0x7e0] ss:$16 sps:$4 sm:$0xff]   ;;  %v782_v22 = vpack.c.bf16 %v572_v16, %v558_v15 }
 0x1d5   : > { %v669_v15 = vld [vmem:[%s11452_s8 + $0x3b0] sm:$0xff]  ;;  %v683_v16 = vld [vmem:[%s11452_s8 + $0x420] sm:$0xff] }
 0x1d6   : > { %3886 = vmatmul.mubr.bf16.gmra.mrb[12].mxu0 %v821_v21  ;;  %4677 = vmatmul.mubr.bf16.gmra.mrb[12].mxu1 %v821_v21  ;;  %v9987_v21 = vld [vmem:[#allocation11 + $0x7e8] ss:$16 sps:$4 sm:$0xff]  }
 0x1d7   : > { %3949 = vmatpush1.bf16.msra.mxu0 %v9930_v24  ;;  %4740 = vmatpush1.bf16.msra.mxu1 %v9933_v25  ;;  %v571_v24 = vld [vmem:[%s11452_s8 + $0xa0] sm:$0xff] }
 0x1d8   : > { %3950 = vmatprep.subr.bf16.mxu0 %v9938_v26  ;;  %4741 = vmatprep.subr.bf16.mxu1 %v9941_v27  ;;  %v9992_v25 = vld [vmem:[#allocation11 + $0x804] ss:$16 sps:$4 sm:$0xff]   ;;  %v9995_v26 = vld [vmem:[#allocation11 + $0x80c] ss:$16 sps:$4 sm:$0xff]   ;;  %v781_v27 = vpack.c.bf16 %v571_v24, %v557_v23  ;;  %v10041_v23 = vld [vmem:[#allocation11 + $0x908] ss:$16 sps:$4 sm:$0xff]  }
 0x1d9   : > { %3895 = vmatprep.mubr.bf16.mxu0 %v836_v30  ;;  %4686 = vmatprep.mubr.bf16.mxu1 %v836_v30  ;;  %v9990_v30 = vld [vmem:[#allocation11 + $0x800] ss:$16 sps:$4 sm:$0xff]   ;;  %v10046_v24 = vld [vmem:[#allocation11 + $0x924] ss:$16 sps:$4 sm:$0xff]  }
 0x1db   : > { %3951 = vmatpush1.bf16.msra.mxu0 %v9936_v28  ;;  %4742 = vmatpush1.bf16.msra.mxu1 %v9939_v29  ;;  %v586_v28 = vld [vmem:[%s11452_s8 + $0x118] sm:$0xff]  ;;  %v600_v29 = vld [vmem:[%s11452_s8 + $0x188] sm:$0xff] }
 0x1dc   : > { %3952 = vmatprep.subr.bf16.mxu0 %v9944_v33  ;;  %4743 = vmatprep.subr.bf16.mxu1 %v9947_v34  ;;  %v10001_v33 = vld [vmem:[#allocation11 + $0x82c] ss:$16 sps:$4 sm:$0xff]   ;;  %v9996_v34 = vld [vmem:[#allocation11 + $0x820] ss:$16 sps:$4 sm:$0xff]  }
 0x1de   : > { %3896 = vmatmul.mubr.bf16.gmra.mrb[16].mxu0 %v835_v36  ;;  %4687 = vmatmul.mubr.bf16.gmra.mrb[16].mxu1 %v835_v36  ;;  %v796_v36 = vpack.c.bf16 %v600_v29, %v586_v28  ;;  %v697_v29 = vld [vmem:[%s11452_s8 + $0x490] sm:$0xff] }
 0x1df   : > { %3953 = vmatpush1.bf16.msra.mxu0 %v9942_v35  ;;  %4744 = vmatpush1.bf16.msra.mxu1 %v9945_v37  ;;  %v9999_v35 = vld [vmem:[#allocation11 + $0x828] ss:$16 sps:$4 sm:$0xff]   ;;  %v585_v37 = vld [vmem:[%s11452_s8 + $0x110] sm:$0xff] }
 0x1e0   : > { %3954 = vmatprep.subr.bf16.mxu0 %v9950_v40  ;;  %4745 = vmatprep.subr.bf16.mxu1 %v9953_v41  ;;  %v10007_v40 = vld [vmem:[#allocation11 + $0x84c] ss:$16 sps:$4 sm:$0xff]   ;;  %v10002_v41 = vld [vmem:[#allocation11 + $0x840] ss:$16 sps:$4 sm:$0xff]  }
 0x1e1   : > { %3905 = vmatprep.mubr.bf16.mxu0 %v850_v43  ;;  %4696 = vmatprep.mubr.bf16.mxu1 %v850_v43  ;;  %v10005_v43 = vld [vmem:[#allocation11 + $0x848] ss:$16 sps:$4 sm:$0xff]  }
 0x1e3   : > { %3955 = vmatpush1.bf16.msra.mxu0 %v9948_v42  ;;  %4746 = vmatpush1.bf16.msra.mxu1 %v9951_v44  ;;  %v795_v42 = vpack.c.bf16 %v599_v38, %v585_v37  ;;  %v614_v44 = vld [vmem:[%s11452_s8 + $0x1f8] sm:$0xff]  ;;  %v10058_v38 = vld [vmem:[#allocation11 + $0x964] ss:$16 sps:$4 sm:$0xff]  }
 0x1e4   : > { %3956 = vmatprep.subr.bf16.mxu0 %v9956_v47  ;;  %4747 = vmatprep.subr.bf16.mxu1 %v9959_v48  ;;  %v10013_v47 = vld [vmem:[#allocation11 + $0x86c] ss:$16 sps:$4 sm:$0xff]   ;;  %v10008_v48 = vld [vmem:[#allocation11 + $0x860] ss:$16 sps:$4 sm:$0xff]   ;;  %v10053_v37 = vld [vmem:[#allocation11 + $0x948] ss:$16 sps:$4 sm:$0xff]  }
 0x1e6   : > { %3906 = vmatmul.mubr.bf16.gmra.mrb[20].mxu0 %v849_v51  ;;  %4697 = vmatmul.mubr.bf16.gmra.mrb[20].mxu1 %v849_v51  ;;  %v613_v51 = vld [vmem:[%s11452_s8 + $0x1f0] sm:$0xff] }
 0x1e7   : > { %3957 = vmatpush1.bf16.msra.mxu0 %v9954_v49  ;;  %4748 = vmatpush1.bf16.msra.mxu1 %v9957_v50  ;;  %v810_v49 = vpack.c.bf16 %v628_v45, %v614_v44  ;;  %v10011_v50 = vld [vmem:[#allocation11 + $0x868] ss:$16 sps:$4 sm:$0xff]   ;;  %v739_v44 = vld [vmem:[%s11452_s8 + $0x5e0] sm:$0xff] }
 0x1e8   : > { %3958 = vmatprep.subr.bf16.mxu0 %v9962_v54  ;;  %4749 = vmatprep.subr.bf16.mxu1 %v9965_v55  ;;  %v10019_v54 = vld [vmem:[#allocation11 + $0x88c] ss:$16 sps:$4 sm:$0xff]   ;;  %v10014_v55 = vld [vmem:[#allocation11 + $0x880] ss:$16 sps:$4 sm:$0xff]   ;;  %v10064_v45 = vld [vmem:[#allocation11 + $0x984] ss:$16 sps:$4 sm:$0xff]  }
 0x1e9   : > { %3915 = vmatprep.mubr.bf16.mxu0 %v864_v56  ;;  %4706 = vmatprep.mubr.bf16.mxu1 %v864_v56  ;;  %v10017_v56 = vld [vmem:[#allocation11 + $0x888] ss:$16 sps:$4 sm:$0xff]  }
 0x1eb   : > { %3959 = vmatpush1.bf16.msra.mxu0 %v9960_v57  ;;  %4750 = vmatpush1.bf16.msra.mxu1 %v9963_v58  ;;  %v809_v57 = vpack.c.bf16 %v627_v52, %v613_v51  ;;  %v642_v58 = vld [vmem:[%s11452_s8 + $0x2d8] sm:$0xff]  ;;  %v768_v51 = vld [vmem:[%s11452_s8 + $0x6c8] sm:$0xff]  ;;  %v10070_v52 = vld [vmem:[#allocation11 + $0x9a4] ss:$16 sps:$4 sm:$0xff]  }
 0x1ec   : > { %3960 = vmatprep.subr.bf16.mxu0 %v9968_v61  ;;  %4751 = vmatprep.subr.bf16.mxu1 %v9971_v62  ;;  %v10025_v61 = vld [vmem:[#allocation11 + $0x8ac] ss:$16 sps:$4 sm:$0xff]   ;;  %v824_v62 = vpack.c.bf16 %v656_v59, %v642_v58  ;;  %v767_v58 = vld [vmem:[%s11452_s8 + $0x6c0] sm:$0xff] }
 0x1ed   : > { %v10076_v59 = vld [vmem:[#allocation11 + $0x9c4] ss:$16 sps:$4 sm:$0xff]  }
 0x1ee   : > { %3916 = vmatmul.mubr.bf16.gmra.mrb[24].mxu0 %v863_v1  ;;  %4707 = vmatmul.mubr.bf16.gmra.mrb[24].mxu1 %v863_v1  ;;  %v641_v1 = vld [vmem:[%s11452_s8 + $0x2d0] sm:$0xff] }
 0x1ef   : > { %3961 = vmatpush1.bf16.msra.mxu0 %v9966_v63  ;;  %4752 = vmatpush1.bf16.msra.mxu1 %v9969_v0  ;;  %v10020_v63 = vld [vmem:[#allocation11 + $0x8a0] ss:$16 sps:$4 sm:$0xff]   ;;  %v10023_v0 = vld [vmem:[#allocation11 + $0x8a8] ss:$16 sps:$4 sm:$0xff]  }
 0x1f0   : > { %3962 = vmatprep.subr.bf16.mxu0 %v9974_v4  ;;  %4753 = vmatprep.subr.bf16.mxu1 %v9977_v5  ;;  %v10031_v4 = vld [vmem:[#allocation11 + $0x8cc] ss:$16 sps:$4 sm:$0xff]   ;;  %v10026_v5 = vld [vmem:[#allocation11 + $0x8c0] ss:$16 sps:$4 sm:$0xff]  }
 0x1f1   : > { %3925 = vmatprep.mubr.bf16.mxu0 %v878_v7  ;;  %4716 = vmatprep.mubr.bf16.mxu1 %v878_v7  ;;  %v823_v7 = vpack.c.bf16 %v655_v2, %v641_v1  ;;  %v574_v1 = vld [vmem:[%s11452_s8 + $0xb8] sm:$0xff]  ;;  %v10082_v2 = vld [vmem:[#allocation11 + $0x9e4] ss:$16 sps:$4 sm:$0xff]  }
 0x1f3   : > { %3963 = vmatpush1.bf16.msra.mxu0 %v9972_v6  ;;  %4754 = vmatpush1.bf16.msra.mxu1 %v9975_v8  ;;  %v10029_v6 = vld [vmem:[#allocation11 + $0x8c8] ss:$16 sps:$4 sm:$0xff]  }
 0x1f4   : > { %3964 = vmatprep.subr.bf16.mxu0 %v9980_v11  ;;  %4755 = vmatprep.subr.bf16.mxu1 %v9983_v12  ;;  %v670_v8 = vld [vmem:[%s11452_s8 + $0x3b8] sm:$0xff]  ;;  %v10032_v12 = vld [vmem:[#allocation11 + $0x8e0] ss:$16 sps:$4 sm:$0xff]  }
 0x1f5   : > { %v10037_v11 = vld [vmem:[#allocation11 + $0x8ec] ss:$16 sps:$4 sm:$0xff]  }
 0x1f6   : > { %3926 = vmatmul.mubr.bf16.gmra.mrb[28].mxu0 %v877_v14  ;;  %4717 = vmatmul.mubr.bf16.gmra.mrb[28].mxu1 %v877_v14  ;;  %v10035_v14 = vld [vmem:[#allocation11 + $0x8e8] ss:$16 sps:$4 sm:$0xff]  }
 0x1f7   : > { %3965 = vmatpush1.bf16.msra.mxu0 %v9978_v13  ;;  %4756 = vmatpush1.bf16.msra.mxu1 %v9981_v17  ;;  %v838_v13 = vpack.c.bf16 %v684_v9, %v670_v8  ;;  %v10040_v17 = vld [vmem:[#allocation11 + $0x904] ss:$16 sps:$4 sm:$0xff]  }
 0x1f8   : > { %3966 = vmatprep.subr.bf16.mxu0 %v9986_v18  ;;  %4757 = vmatprep.subr.bf16.mxu1 %v9989_v19  ;;  %v10043_v18 = vld [vmem:[#allocation11 + $0x90c] ss:$16 sps:$4 sm:$0xff]   ;;  %v10038_v19 = vld [vmem:[#allocation11 + $0x900] ss:$16 sps:$4 sm:$0xff]   ;;  %v10088_v9 = vld [vmem:[#allocation11 + $0xa04] ss:$16 sps:$4 sm:$0xff]  }
 0x1f9   : > { %3968 = vmatprep.mubr.bf16.mxu0 %v782_v22  ;;  %4759 = vmatprep.mubr.bf16.mxu1 %v782_v22  ;;  %v712_v22 = vld [vmem:[%s11452_s8 + $0x508] sm:$0xff]  ;;  %v573_v8 = vld [vmem:[%s11452_s8 + $0xb0] sm:$0xff] }
 0x1fb   : > { %3967 = vmatpush1.bf16.msra.mxu0 %v9984_v20  ;;  %4758 = vmatpush1.bf16.msra.mxu1 %v9987_v21  ;;  %v837_v20 = vpack.c.bf16 %v683_v16, %v669_v15  ;;  %v698_v21 = vld [vmem:[%s11452_s8 + $0x498] sm:$0xff]  ;;  %v10094_v16 = vld [vmem:[#allocation11 + $0xa24] ss:$16 sps:$4 sm:$0xff]  }
 0x1fc   : > { %4049 = vmatprep.subr.bf16.mxu0 %v9992_v25  ;;  %4840 = vmatprep.subr.bf16.mxu1 %v9995_v26  ;;  %v10049_v25 = vld [vmem:[#allocation11 + $0x92c] ss:$16 sps:$4 sm:$0xff]   ;;  %v10044_v26 = vld [vmem:[#allocation11 + $0x920] ss:$16 sps:$4 sm:$0xff]   ;;  %v852_v28 = vpack.c.bf16 %v712_v22, %v698_v21 }
 0x1fd   : > { %v602_v15 = vld [vmem:[%s11452_s8 + $0x198] sm:$0xff]  ;;  %v587_v21 = vld [vmem:[%s11452_s8 + $0x120] sm:$0xff]  ;;  %v601_v22 = vld [vmem:[%s11452_s8 + $0x190] sm:$0xff] }
 0x1fe   : > { %3969 = vmatmul.mubr.bf16.vlgmr.msra.gmra.mrb[0].mxu0 %v781_v27  ;;  %4760 = vmatmul.mubr.bf16.vlgmr.msra.gmra.mrb[0].mxu1 %v781_v27  ;;  %v10047_v27 = vld [vmem:[#allocation11 + $0x928] ss:$16 sps:$4 sm:$0xff]  }
 0x1ff   : > { %4050 = vmatpush1.bf16.msra.mxu0 %v9990_v30  ;;  %4841 = vmatpush1.bf16.msra.mxu1 %v9993_v31  ;;  %v711_v30 = vld [vmem:[%s11452_s8 + $0x500] sm:$0xff] }
 0x200   : > { %4051 = vmatprep.subr.bf16.mxu0 %v9998_v32  ;;  %4842 = vmatprep.subr.bf16.mxu1 %v10001_v33  ;;  %v10052_v31 = vld [vmem:[#allocation11 + $0x944] ss:$16 sps:$4 sm:$0xff]   ;;  %v10055_v32 = vld [vmem:[#allocation11 + $0x94c] ss:$16 sps:$4 sm:$0xff]   ;;  %v851_v33 = vpack.c.bf16 %v711_v30, %v697_v29  ;;  %v10101_v29 = vld [vmem:[#allocation11 + $0xa48] ss:$16 sps:$4 sm:$0xff]  }
 0x201   : > { %3978 = vmatprep.mubr.bf16.mxu0 %v796_v36  ;;  %4769 = vmatprep.mubr.bf16.mxu1 %v796_v36  ;;  %v10050_v36 = vld [vmem:[#allocation11 + $0x940] ss:$16 sps:$4 sm:$0xff]   ;;  %v10106_v30 = vld [vmem:[#allocation11 + $0xa64] ss:$16 sps:$4 sm:$0xff]  }
 0x203   : > { %4052 = vmatpush1.bf16.msra.mxu0 %v9996_v34  ;;  %4843 = vmatpush1.bf16.msra.mxu1 %v9999_v35  ;;  %v726_v34 = vld [vmem:[%s11452_s8 + $0x578] sm:$0xff]  ;;  %v740_v35 = vld [vmem:[%s11452_s8 + $0x5e8] sm:$0xff] }
 0x204   : > { %4053 = vmatprep.subr.bf16.mxu0 %v10004_v39  ;;  %4844 = vmatprep.subr.bf16.mxu1 %v10007_v40  ;;  %v10061_v39 = vld [vmem:[#allocation11 + $0x96c] ss:$16 sps:$4 sm:$0xff]   ;;  %v10056_v40 = vld [vmem:[#allocation11 + $0x960] ss:$16 sps:$4 sm:$0xff]  }
 0x206   : > { %3979 = vmatmul.mubr.bf16.gmra.mrb[4].mxu0 %v795_v42  ;;  %4770 = vmatmul.mubr.bf16.gmra.mrb[4].mxu1 %v795_v42  ;;  %v866_v42 = vpack.c.bf16 %v740_v35, %v726_v34  ;;  %v615_v35 = vld [vmem:[%s11452_s8 + $0x200] sm:$0xff] }
 0x207   : > { %4054 = vmatpush1.bf16.msra.mxu0 %v10002_v41  ;;  %4845 = vmatpush1.bf16.msra.mxu1 %v10005_v43  ;;  %v10059_v41 = vld [vmem:[#allocation11 + $0x968] ss:$16 sps:$4 sm:$0xff]   ;;  %v725_v43 = vld [vmem:[%s11452_s8 + $0x570] sm:$0xff] }
 0x208   : > { %4055 = vmatprep.subr.bf16.mxu0 %v10010_v46  ;;  %4846 = vmatprep.subr.bf16.mxu1 %v10013_v47  ;;  %v10067_v46 = vld [vmem:[#allocation11 + $0x98c] ss:$16 sps:$4 sm:$0xff]   ;;  %v10062_v47 = vld [vmem:[#allocation11 + $0x980] ss:$16 sps:$4 sm:$0xff]  }
 0x209   : > { %3988 = vmatprep.mubr.bf16.mxu0 %v810_v49  ;;  %4779 = vmatprep.mubr.bf16.mxu1 %v810_v49  ;;  %v10065_v49 = vld [vmem:[#allocation11 + $0x988] ss:$16 sps:$4 sm:$0xff]  }
 0x20b   : > { %4056 = vmatpush1.bf16.msra.mxu0 %v10008_v48  ;;  %4847 = vmatpush1.bf16.msra.mxu1 %v10011_v50  ;;  %v865_v48 = vpack.c.bf16 %v739_v44, %v725_v43  ;;  %v754_v50 = vld [vmem:[%s11452_s8 + $0x658] sm:$0xff]  ;;  %v10118_v44 = vld [vmem:[#allocation11 + $0xaa4] ss:$16 sps:$4 sm:$0xff]  }
 0x20c   : > { %4057 = vmatprep.subr.bf16.mxu0 %v10016_v53  ;;  %4848 = vmatprep.subr.bf16.mxu1 %v10019_v54  ;;  %v10073_v53 = vld [vmem:[#allocation11 + $0x9ac] ss:$16 sps:$4 sm:$0xff]   ;;  %v10068_v54 = vld [vmem:[#allocation11 + $0x9a0] ss:$16 sps:$4 sm:$0xff]   ;;  %v10113_v43 = vld [vmem:[#allocation11 + $0xa88] ss:$16 sps:$4 sm:$0xff]  }
 0x20e   : > { %3989 = vmatmul.mubr.bf16.gmra.mrb[8].mxu0 %v809_v57  ;;  %4780 = vmatmul.mubr.bf16.gmra.mrb[8].mxu1 %v809_v57  ;;  %v753_v57 = vld [vmem:[%s11452_s8 + $0x650] sm:$0xff] }
 0x20f   : > { %4058 = vmatpush1.bf16.msra.mxu0 %v10014_v55  ;;  %4849 = vmatpush1.bf16.msra.mxu1 %v10017_v56  ;;  %v880_v55 = vpack.c.bf16 %v768_v51, %v754_v50  ;;  %v10071_v56 = vld [vmem:[#allocation11 + $0x9a8] ss:$16 sps:$4 sm:$0xff]   ;;  %v657_v50 = vld [vmem:[%s11452_s8 + $0x350] sm:$0xff] }
 0x210   : > { %4059 = vmatprep.subr.bf16.mxu0 %v10022_v60  ;;  %4850 = vmatprep.subr.bf16.mxu1 %v10025_v61  ;;  %v10079_v60 = vld [vmem:[#allocation11 + $0x9cc] ss:$16 sps:$4 sm:$0xff]   ;;  %v10074_v61 = vld [vmem:[#allocation11 + $0x9c0] ss:$16 sps:$4 sm:$0xff]   ;;  %v10124_v51 = vld [vmem:[#allocation11 + $0xac4] ss:$16 sps:$4 sm:$0xff]  }
 0x211   : > { %3998 = vmatprep.mubr.bf16.mxu0 %v824_v62  ;;  %4789 = vmatprep.mubr.bf16.mxu1 %v824_v62  ;;  %v10077_v62 = vld [vmem:[#allocation11 + $0x9c8] ss:$16 sps:$4 sm:$0xff]  }
 0x213   : > { %4060 = vmatpush1.bf16.msra.mxu0 %v10020_v63  ;;  %4851 = vmatpush1.bf16.msra.mxu1 %v10023_v0  ;;  %v879_v63 = vpack.c.bf16 %v767_v58, %v753_v57  ;;  %v560_v0 = vld [vmem:[%s11452_s8 + $0x48] sm:$0xff]  ;;  %v686_v57 = vld [vmem:[%s11452_s8 + $0x438] sm:$0xff]  ;;  %v10130_v58 = vld [vmem:[#allocation11 + $0xae4] ss:$16 sps:$4 sm:$0xff]  }
 0x214   : > { %4061 = vmatprep.subr.bf16.mxu0 %v10028_v3  ;;  %4852 = vmatprep.subr.bf16.mxu1 %v10031_v4  ;;  %v10085_v3 = vld [vmem:[#allocation11 + $0x9ec] ss:$16 sps:$4 sm:$0xff]   ;;  %v784_v4 = vpack.c.bf16 %v574_v1, %v560_v0  ;;  %v685_v0 = vld [vmem:[%s11452_s8 + $0x430] sm:$0xff] }
 0x215   : > { %v10136_v1 = vld [vmem:[#allocation11 + $0xb04] ss:$16 sps:$4 sm:$0xff]  }
 0x216   : > { %3999 = vmatmul.mubr.bf16.gmra.mrb[12].mxu0 %v823_v7  ;;  %4790 = vmatmul.mubr.bf16.gmra.mrb[12].mxu1 %v823_v7  ;;  %v559_v7 = vld [vmem:[%s11452_s8 + $0x40] sm:$0xff] }
 0x217   : > { %4062 = vmatpush1.bf16.msra.mxu0 %v10026_v5  ;;  %4853 = vmatpush1.bf16.msra.mxu1 %v10029_v6  ;;  %v10080_v5 = vld [vmem:[#allocation11 + $0x9e0] ss:$16 sps:$4 sm:$0xff]   ;;  %v10083_v6 = vld [vmem:[#allocation11 + $0x9e8] ss:$16 sps:$4 sm:$0xff]  }
 0x218   : > { %4063 = vmatprep.subr.bf16.mxu0 %v10034_v10  ;;  %4854 = vmatprep.subr.bf16.mxu1 %v10037_v11  ;;  %v10091_v10 = vld [vmem:[#allocation11 + $0xa0c] ss:$16 sps:$4 sm:$0xff]   ;;  %v10086_v11 = vld [vmem:[#allocation11 + $0xa00] ss:$16 sps:$4 sm:$0xff]  }
 0x219   : > { %4008 = vmatprep.mubr.bf16.mxu0 %v838_v13  ;;  %4799 = vmatprep.mubr.bf16.mxu1 %v838_v13  ;;  %v783_v13 = vpack.c.bf16 %v573_v8, %v559_v7  ;;  %v714_v7 = vld [vmem:[%s11452_s8 + $0x518] sm:$0xff]  ;;  %v10142_v8 = vld [vmem:[#allocation11 + $0xb24] ss:$16 sps:$4 sm:$0xff]  }
 0x21b   : > { %4064 = vmatpush1.bf16.msra.mxu0 %v10032_v12  ;;  %4855 = vmatpush1.bf16.msra.mxu1 %v10035_v14  ;;  %v10089_v12 = vld [vmem:[#allocation11 + $0xa08] ss:$16 sps:$4 sm:$0xff]  }
 0x21c   : > { %4065 = vmatprep.subr.bf16.mxu0 %v10040_v17  ;;  %4856 = vmatprep.subr.bf16.mxu1 %v10043_v18  ;;  %v588_v14 = vld [vmem:[%s11452_s8 + $0x128] sm:$0xff]  ;;  %v10092_v18 = vld [vmem:[#allocation11 + $0xa20] ss:$16 sps:$4 sm:$0xff]  }
 0x21d   : > { %v10097_v17 = vld [vmem:[#allocation11 + $0xa2c] ss:$16 sps:$4 sm:$0xff]  }
 0x21e   : > { %4009 = vmatmul.mubr.bf16.gmra.mrb[16].mxu0 %v837_v20  ;;  %4800 = vmatmul.mubr.bf16.gmra.mrb[16].mxu1 %v837_v20  ;;  %v10095_v20 = vld [vmem:[#allocation11 + $0xa28] ss:$16 sps:$4 sm:$0xff]  }
 0x21f   : > { %4066 = vmatpush1.bf16.msra.mxu0 %v10038_v19  ;;  %4857 = vmatpush1.bf16.msra.mxu1 %v10041_v23  ;;  %v798_v19 = vpack.c.bf16 %v602_v15, %v588_v14  ;;  %v10100_v23 = vld [vmem:[#allocation11 + $0xa44] ss:$16 sps:$4 sm:$0xff]  }
 0x220   : > { %4067 = vmatprep.subr.bf16.mxu0 %v10046_v24  ;;  %4858 = vmatprep.subr.bf16.mxu1 %v10049_v25  ;;  %v10103_v24 = vld [vmem:[#allocation11 + $0xa4c] ss:$16 sps:$4 sm:$0xff]   ;;  %v10098_v25 = vld [vmem:[#allocation11 + $0xa40] ss:$16 sps:$4 sm:$0xff]   ;;  %v10148_v15 = vld [vmem:[#allocation11 + $0xb44] ss:$16 sps:$4 sm:$0xff]  }
 0x221   : > { %4018 = vmatprep.mubr.bf16.mxu0 %v852_v28  ;;  %4809 = vmatprep.mubr.bf16.mxu1 %v852_v28  ;;  %v630_v28 = vld [vmem:[%s11452_s8 + $0x278] sm:$0xff]  ;;  %v713_v14 = vld [vmem:[%s11452_s8 + $0x510] sm:$0xff] }
 0x223   : > { %4068 = vmatpush1.bf16.msra.mxu0 %v10044_v26  ;;  %4859 = vmatpush1.bf16.msra.mxu1 %v10047_v27  ;;  %v797_v26 = vpack.c.bf16 %v601_v22, %v587_v21  ;;  %v616_v27 = vld [vmem:[%s11452_s8 + $0x208] sm:$0xff]  ;;  %v742_v21 = vld [vmem:[%s11452_s8 + $0x5f8] sm:$0xff]  ;;  %v10154_v22 = vld [vmem:[#allocation11 + $0xb64] ss:$16 sps:$4 sm:$0xff]  }
 0x224   : > { %4069 = vmatprep.subr.bf16.mxu0 %v10052_v31  ;;  %4860 = vmatprep.subr.bf16.mxu1 %v10055_v32  ;;  %v10109_v31 = vld [vmem:[#allocation11 + $0xa6c] ss:$16 sps:$4 sm:$0xff]   ;;  %v10104_v32 = vld [vmem:[#allocation11 + $0xa60] ss:$16 sps:$4 sm:$0xff]   ;;  %v812_v34 = vpack.c.bf16 %v630_v28, %v616_v27 }
 0x225   : > { %v727_v27 = vld [vmem:[%s11452_s8 + $0x580] sm:$0xff]  ;;  %v741_v28 = vld [vmem:[%s11452_s8 + $0x5f0] sm:$0xff] }
 0x226   : > { %4019 = vmatmul.mubr.bf16.gmra.mrb[20].mxu0 %v851_v33  ;;  %4810 = vmatmul.mubr.bf16.gmra.mrb[20].mxu1 %v851_v33  ;;  %v10107_v33 = vld [vmem:[#allocation11 + $0xa68] ss:$16 sps:$4 sm:$0xff]  }
 0x227   : > { %4070 = vmatpush1.bf16.msra.mxu0 %v10050_v36  ;;  %4861 = vmatpush1.bf16.msra.mxu1 %v10053_v37  ;;  %v629_v36 = vld [vmem:[%s11452_s8 + $0x270] sm:$0xff] }
 0x228   : > { %4071 = vmatprep.subr.bf16.mxu0 %v10058_v38  ;;  %4862 = vmatprep.subr.bf16.mxu1 %v10061_v39  ;;  %v10112_v37 = vld [vmem:[#allocation11 + $0xa84] ss:$16 sps:$4 sm:$0xff]   ;;  %v10115_v38 = vld [vmem:[#allocation11 + $0xa8c] ss:$16 sps:$4 sm:$0xff]   ;;  %v811_v39 = vpack.c.bf16 %v629_v36, %v615_v35  ;;  %v10161_v35 = vld [vmem:[#allocation11 + $0xb88] ss:$16 sps:$4 sm:$0xff]  }
 0x229   : > { %4028 = vmatprep.mubr.bf16.mxu0 %v866_v42  ;;  %4819 = vmatprep.mubr.bf16.mxu1 %v866_v42  ;;  %v10110_v42 = vld [vmem:[#allocation11 + $0xa80] ss:$16 sps:$4 sm:$0xff]   ;;  %v10166_v36 = vld [vmem:[#allocation11 + $0xba4] ss:$16 sps:$4 sm:$0xff]  }
 0x22b   : > { %4072 = vmatpush1.bf16.msra.mxu0 %v10056_v40  ;;  %4863 = vmatpush1.bf16.msra.mxu1 %v10059_v41  ;;  %v644_v40 = vld [vmem:[%s11452_s8 + $0x2e8] sm:$0xff]  ;;  %v658_v41 = vld [vmem:[%s11452_s8 + $0x358] sm:$0xff] }
 0x22c   : > { %4073 = vmatprep.subr.bf16.mxu0 %v10064_v45  ;;  %4864 = vmatprep.subr.bf16.mxu1 %v10067_v46  ;;  %v10121_v45 = vld [vmem:[#allocation11 + $0xaac] ss:$16 sps:$4 sm:$0xff]   ;;  %v10116_v46 = vld [vmem:[#allocation11 + $0xaa0] ss:$16 sps:$4 sm:$0xff]  }
 0x22e   : > { %4029 = vmatmul.mubr.bf16.gmra.mrb[24].mxu0 %v865_v48  ;;  %4820 = vmatmul.mubr.bf16.gmra.mrb[24].mxu1 %v865_v48  ;;  %v826_v48 = vpack.c.bf16 %v658_v41, %v644_v40  ;;  %v10167_v40 = vld [vmem:[#allocation11 + $0xba8] ss:$16 sps:$4 sm:$0xff]   ;;  %v755_v41 = vld [vmem:[%s11452_s8 + $0x660] sm:$0xff] }
 0x22f   : > { %4074 = vmatpush1.bf16.msra.mxu0 %v10062_v47  ;;  %4865 = vmatpush1.bf16.msra.mxu1 %v10065_v49  ;;  %v10119_v47 = vld [vmem:[#allocation11 + $0xaa8] ss:$16 sps:$4 sm:$0xff]   ;;  %v643_v49 = vld [vmem:[%s11452_s8 + $0x2e0] sm:$0xff] }
 0x230   : > { %4075 = vmatprep.subr.bf16.mxu0 %v10070_v52  ;;  %4866 = vmatprep.subr.bf16.mxu1 %v10073_v53  ;;  %v10127_v52 = vld [vmem:[#allocation11 + $0xacc] ss:$16 sps:$4 sm:$0xff]   ;;  %v10122_v53 = vld [vmem:[#allocation11 + $0xac0] ss:$16 sps:$4 sm:$0xff]  }
 0x231   : > { %4038 = vmatprep.mubr.bf16.mxu0 %v880_v55  ;;  %4829 = vmatprep.mubr.bf16.mxu1 %v880_v55  ;;  %v10125_v55 = vld [vmem:[#allocation11 + $0xac8] ss:$16 sps:$4 sm:$0xff]  }
 0x233   : > { %4076 = vmatpush1.bf16.msra.mxu0 %v10068_v54  ;;  %4867 = vmatpush1.bf16.msra.mxu1 %v10071_v56  ;;  %v825_v54 = vpack.c.bf16 %v657_v50, %v643_v49  ;;  %v672_v56 = vld [vmem:[%s11452_s8 + $0x3c8] sm:$0xff]  ;;  %v10178_v50 = vld [vmem:[#allocation11 + $0xbe4] ss:$16 sps:$4 sm:$0xff]  }
 0x234   : > { %4077 = vmatprep.subr.bf16.mxu0 %v10076_v59  ;;  %4868 = vmatprep.subr.bf16.mxu1 %v10079_v60  ;;  %v10133_v59 = vld [vmem:[#allocation11 + $0xaec] ss:$16 sps:$4 sm:$0xff]   ;;  %v10128_v60 = vld [vmem:[#allocation11 + $0xae0] ss:$16 sps:$4 sm:$0xff]  }
 0x236   : > { %4039 = vmatmul.mubr.bf16.gmra.mrb[28].mxu0 %v879_v63  ;;  %4830 = vmatmul.mubr.bf16.gmra.mrb[28].mxu1 %v879_v63  ;;  %v671_v63 = vld [vmem:[%s11452_s8 + $0x3c0] sm:$0xff] }
 0x237   : > { %4078 = vmatpush1.bf16.msra.mxu0 %v10074_v61  ;;  %4869 = vmatpush1.bf16.msra.mxu1 %v10077_v62  ;;  %v840_v61 = vpack.c.bf16 %v686_v57, %v672_v56  ;;  %v10131_v62 = vld [vmem:[#allocation11 + $0xae8] ss:$16 sps:$4 sm:$0xff]   ;;  %v575_v56 = vld [vmem:[%s11452_s8 + $0xc0] sm:$0xff] }
 0x238   : > { %4079 = vmatprep.subr.bf16.mxu0 %v10082_v2  ;;  %4870 = vmatprep.subr.bf16.mxu1 %v10085_v3  ;;  %v10139_v2 = vld [vmem:[#allocation11 + $0xb0c] ss:$16 sps:$4 sm:$0xff]   ;;  %v10134_v3 = vld [vmem:[#allocation11 + $0xb00] ss:$16 sps:$4 sm:$0xff]   ;;  %v10184_v57 = vld [vmem:[#allocation11 + $0xc04] ss:$16 sps:$4 sm:$0xff]  }
 0x239   : > { %4081 = vmatprep.mubr.bf16.mxu0 %v784_v4  ;;  %4872 = vmatprep.mubr.bf16.mxu1 %v784_v4  ;;  %v10137_v4 = vld [vmem:[#allocation11 + $0xb08] ss:$16 sps:$4 sm:$0xff]  }
 0x23b   : > { %4080 = vmatpush1.bf16.msra.mxu0 %v10080_v5  ;;  %4871 = vmatpush1.bf16.msra.mxu1 %v10083_v6  ;;  %v839_v5 = vpack.c.bf16 %v685_v0, %v671_v63  ;;  %v700_v6 = vld [vmem:[%s11452_s8 + $0x4a8] sm:$0xff]  ;;  %v10190_v0 = vld [vmem:[#allocation11 + $0xc24] ss:$16 sps:$4 sm:$0xff]  }
 0x23c   : > { %4162 = vmatprep.subr.bf16.mxu0 %v10088_v9  ;;  %4953 = vmatprep.subr.bf16.mxu1 %v10091_v10  ;;  %v10145_v9 = vld [vmem:[#allocation11 + $0xb2c] ss:$16 sps:$4 sm:$0xff]   ;;  %v854_v10 = vpack.c.bf16 %v714_v7, %v700_v6  ;;  %v10185_v63 = vld [vmem:[#allocation11 + $0xc08] ss:$16 sps:$4 sm:$0xff]   ;;  %v603_v6 = vld [vmem:[%s11452_s8 + $0x1a0] sm:$0xff] }
 0x23d   : > { %v10196_v7 = vld [vmem:[#allocation11 + $0xc44] ss:$16 sps:$4 sm:$0xff]  }
 0x23e   : > { %4082 = vmatmul.mubr.bf16.vlgmr.msra.gmra.mrb[0].mxu0 %v783_v13  ;;  %4873 = vmatmul.mubr.bf16.vlgmr.msra.gmra.mrb[0].mxu1 %v783_v13  ;;  %v699_v13 = vld [vmem:[%s11452_s8 + $0x4a0] sm:$0xff] }
 0x23f   : > { %4163 = vmatpush1.bf16.msra.mxu0 %v10086_v11  ;;  %4954 = vmatpush1.bf16.msra.mxu1 %v10089_v12  ;;  %v10140_v11 = vld [vmem:[#allocation11 + $0xb20] ss:$16 sps:$4 sm:$0xff]   ;;  %v10143_v12 = vld [vmem:[#allocation11 + $0xb28] ss:$16 sps:$4 sm:$0xff]  }
 0x240   : > { %4164 = vmatprep.subr.bf16.mxu0 %v10094_v16  ;;  %4955 = vmatprep.subr.bf16.mxu1 %v10097_v17  ;;  %v10151_v16 = vld [vmem:[#allocation11 + $0xb4c] ss:$16 sps:$4 sm:$0xff]   ;;  %v10146_v17 = vld [vmem:[#allocation11 + $0xb40] ss:$16 sps:$4 sm:$0xff]  }
 0x241   : > { %4091 = vmatprep.mubr.bf16.mxu0 %v798_v19  ;;  %4882 = vmatprep.mubr.bf16.mxu1 %v798_v19  ;;  %v853_v19 = vpack.c.bf16 %v713_v14, %v699_v13  ;;  %v632_v13 = vld [vmem:[%s11452_s8 + $0x288] sm:$0xff]  ;;  %v10202_v14 = vld [vmem:[#allocation11 + $0xc64] ss:$16 sps:$4 sm:$0xff]  }
 0x243   : > { %4165 = vmatpush1.bf16.msra.mxu0 %v10092_v18  ;;  %4956 = vmatpush1.bf16.msra.mxu1 %v10095_v20  ;;  %v10149_v18 = vld [vmem:[#allocation11 + $0xb48] ss:$16 sps:$4 sm:$0xff]  }
 0x244   : > { %4166 = vmatprep.subr.bf16.mxu0 %v10100_v23  ;;  %4957 = vmatprep.subr.bf16.mxu1 %v10103_v24  ;;  %v728_v20 = vld [vmem:[%s11452_s8 + $0x588] sm:$0xff] }
 0x245   : > { %v10157_v23 = vld [vmem:[#allocation11 + $0xb6c] ss:$16 sps:$4 sm:$0xff]   ;;  %v868_v24 = vpack.c.bf16 %v742_v21, %v728_v20  ;;  %v631_v20 = vld [vmem:[%s11452_s8 + $0x280] sm:$0xff] }
 0x246   : > { %4092 = vmatmul.mubr.bf16.gmra.mrb[4].mxu0 %v797_v26  ;;  %4883 = vmatmul.mubr.bf16.gmra.mrb[4].mxu1 %v797_v26  ;;  %v10155_v26 = vld [vmem:[#allocation11 + $0xb68] ss:$16 sps:$4 sm:$0xff]   ;;  %v10208_v21 = vld [vmem:[#allocation11 + $0xc84] ss:$16 sps:$4 sm:$0xff]  }
 0x247   : > { %4167 = vmatpush1.bf16.msra.mxu0 %v10098_v25  ;;  %4958 = vmatpush1.bf16.msra.mxu1 %v10101_v29  ;;  %v10152_v25 = vld [vmem:[#allocation11 + $0xb60] ss:$16 sps:$4 sm:$0xff]   ;;  %v10160_v29 = vld [vmem:[#allocation11 + $0xb84] ss:$16 sps:$4 sm:$0xff]  }
 0x248   : > { %4168 = vmatprep.subr.bf16.mxu0 %v10106_v30  ;;  %4959 = vmatprep.subr.bf16.mxu1 %v10109_v31  ;;  %v10163_v30 = vld [vmem:[#allocation11 + $0xb8c] ss:$16 sps:$4 sm:$0xff]   ;;  %v867_v31 = vpack.c.bf16 %v741_v28, %v727_v27  ;;  %v10214_v28 = vld [vmem:[#allocation11 + $0xca4] ss:$16 sps:$4 sm:$0xff]  }
 0x249   : > { %4101 = vmatprep.mubr.bf16.mxu0 %v812_v34  ;;  %4892 = vmatprep.mubr.bf16.mxu1 %v812_v34  ;;  %v10158_v34 = vld [vmem:[#allocation11 + $0xb80] ss:$16 sps:$4 sm:$0xff]   ;;  %v660_v27 = vld [vmem:[%s11452_s8 + $0x368] sm:$0xff] }
 0x24b   : > { %4169 = vmatpush1.bf16.msra.mxu0 %v10104_v32  ;;  %4960 = vmatpush1.bf16.msra.mxu1 %v10107_v33  ;;  %v756_v32 = vld [vmem:[%s11452_s8 + $0x668] sm:$0xff]  ;;  %v770_v33 = vld [vmem:[%s11452_s8 + $0x6d8] sm:$0xff] }
 0x24c   : > { %4170 = vmatprep.subr.bf16.mxu0 %v10112_v37  ;;  %4961 = vmatprep.subr.bf16.mxu1 %v10115_v38  ;;  %v10169_v37 = vld [vmem:[#allocation11 + $0xbac] ss:$16 sps:$4 sm:$0xff]   ;;  %v882_v38 = vpack.c.bf16 %v770_v33, %v756_v32  ;;  %v645_v33 = vld [vmem:[%s11452_s8 + $0x2f0] sm:$0xff] }
 0x24e   : > { %4102 = vmatmul.mubr.bf16.gmra.mrb[8].mxu0 %v811_v39  ;;  %4893 = vmatmul.mubr.bf16.gmra.mrb[8].mxu1 %v811_v39  ;;  %v10164_v39 = vld [vmem:[#allocation11 + $0xba0] ss:$16 sps:$4 sm:$0xff]  }
 0x24f   : > { %4171 = vmatpush1.bf16.msra.mxu0 %v10110_v42  ;;  %4962 = vmatpush1.bf16.msra.mxu1 %v10113_v43  ;;  %v769_v42 = vld [vmem:[%s11452_s8 + $0x6d0] sm:$0xff] }
 0x250   : > { %4172 = vmatprep.subr.bf16.mxu0 %v10118_v44  ;;  %4963 = vmatprep.subr.bf16.mxu1 %v10121_v45  ;;  %v10172_v43 = vld [vmem:[#allocation11 + $0xbc4] ss:$16 sps:$4 sm:$0xff]   ;;  %v10175_v44 = vld [vmem:[#allocation11 + $0xbcc] ss:$16 sps:$4 sm:$0xff]   ;;  %v881_v49 = vpack.c.bf16 %v769_v42, %v755_v41 }
 0x251   : > { %4111 = vmatprep.mubr.bf16.mxu0 %v826_v48  ;;  %4902 = vmatprep.mubr.bf16.mxu1 %v826_v48  ;;  %v562_v45 = vld [vmem:[%s11452_s8 + $0x58] sm:$0xff]  ;;  %v688_v41 = vld [vmem:[%s11452_s8 + $0x448] sm:$0xff]  ;;  %v10226_v42 = vld [vmem:[#allocation11 + $0xce4] ss:$16 sps:$4 sm:$0xff]  }
 0x252   : > { %v10173_v48 = vld [vmem:[#allocation11 + $0xbc8] ss:$16 sps:$4 sm:$0xff]  }
 0x253   : > { %4173 = vmatpush1.bf16.msra.mxu0 %v10116_v46  ;;  %4964 = vmatpush1.bf16.msra.mxu1 %v10119_v47  ;;  %v576_v46 = vld [vmem:[%s11452_s8 + $0xc8] sm:$0xff]  ;;  %v10170_v47 = vld [vmem:[#allocation11 + $0xbc0] ss:$16 sps:$4 sm:$0xff]  }
 0x254   : > { %4174 = vmatprep.subr.bf16.mxu0 %v10124_v51  ;;  %4965 = vmatprep.subr.bf16.mxu1 %v10127_v52  ;;  %v10181_v51 = vld [vmem:[#allocation11 + $0xbec] ss:$16 sps:$4 sm:$0xff]   ;;  %v786_v52 = vpack.c.bf16 %v576_v46, %v562_v45  ;;  %v10227_v45 = vld [vmem:[#allocation11 + $0xce8] ss:$16 sps:$4 sm:$0xff]  }
 0x256   : > { %4112 = vmatmul.mubr.bf16.gmra.mrb[12].mxu0 %v825_v54  ;;  %4903 = vmatmul.mubr.bf16.gmra.mrb[12].mxu1 %v825_v54  ;;  %v10179_v54 = vld [vmem:[#allocation11 + $0xbe8] ss:$16 sps:$4 sm:$0xff]  }
 0x257   : > { %4175 = vmatpush1.bf16.msra.mxu0 %v10122_v53  ;;  %4966 = vmatpush1.bf16.msra.mxu1 %v10125_v55  ;;  %v10176_v53 = vld [vmem:[#allocation11 + $0xbe0] ss:$16 sps:$4 sm:$0xff]  }
 0x258   : > { %4176 = vmatprep.subr.bf16.mxu0 %v10130_v58  ;;  %4967 = vmatprep.subr.bf16.mxu1 %v10133_v59  ;;  %v561_v55 = vld [vmem:[%s11452_s8 + $0x50] sm:$0xff]  ;;  %v10187_v58 = vld [vmem:[#allocation11 + $0xc0c] ss:$16 sps:$4 sm:$0xff]  }
 0x259   : > { %4121 = vmatprep.mubr.bf16.mxu0 %v840_v61  ;;  %4912 = vmatprep.mubr.bf16.mxu1 %v840_v61  ;;  %v785_v59 = vpack.c.bf16 %v575_v56, %v561_v55  ;;  %v590_v61 = vld [vmem:[%s11452_s8 + $0x138] sm:$0xff]  ;;  %v10238_v56 = vld [vmem:[#allocation11 + $0xd24] ss:$16 sps:$4 sm:$0xff]  }
 0x25b   : > { %4177 = vmatpush1.bf16.msra.mxu0 %v10128_v60  ;;  %4968 = vmatpush1.bf16.msra.mxu1 %v10131_v62  ;;  %v10182_v60 = vld [vmem:[#allocation11 + $0xc00] ss:$16 sps:$4 sm:$0xff]   ;;  %v604_v62 = vld [vmem:[%s11452_s8 + $0x1a8] sm:$0xff] }
 0x25c   : > { %4178 = vmatprep.subr.bf16.mxu0 %v10136_v1  ;;  %4969 = vmatprep.subr.bf16.mxu1 %v10139_v2  ;;  %v10193_v1 = vld [vmem:[#allocation11 + $0xc2c] ss:$16 sps:$4 sm:$0xff]   ;;  %v10188_v2 = vld [vmem:[#allocation11 + $0xc20] ss:$16 sps:$4 sm:$0xff]  }
 0x25e   : > { %4122 = vmatmul.mubr.bf16.gmra.mrb[16].mxu0 %v839_v5  ;;  %4913 = vmatmul.mubr.bf16.gmra.mrb[16].mxu1 %v839_v5  ;;  %v589_v5 = vld [vmem:[%s11452_s8 + $0x130] sm:$0xff] }
 0x25f   : > { %4179 = vmatpush1.bf16.msra.mxu0 %v10134_v3  ;;  %4970 = vmatpush1.bf16.msra.mxu1 %v10137_v4  ;;  %v10191_v3 = vld [vmem:[#allocation11 + $0xc28] ss:$16 sps:$4 sm:$0xff]   ;;  %v800_v4 = vpack.c.bf16 %v604_v62, %v590_v61  ;;  %v701_v61 = vld [vmem:[%s11452_s8 + $0x4b0] sm:$0xff]  ;;  %v715_v62 = vld [vmem:[%s11452_s8 + $0x520] sm:$0xff] }
 0x260   : > { %4180 = vmatprep.subr.bf16.mxu0 %v10142_v8  ;;  %4971 = vmatprep.subr.bf16.mxu1 %v10145_v9  ;;  %v10199_v8 = vld [vmem:[#allocation11 + $0xc4c] ss:$16 sps:$4 sm:$0xff]   ;;  %v10194_v9 = vld [vmem:[#allocation11 + $0xc40] ss:$16 sps:$4 sm:$0xff]  }
 0x261   : > { %4131 = vmatprep.mubr.bf16.mxu0 %v854_v10  ;;  %4922 = vmatprep.mubr.bf16.mxu1 %v854_v10  ;;  %v10197_v10 = vld [vmem:[#allocation11 + $0xc48] ss:$16 sps:$4 sm:$0xff]  }
 0x263   : > { %4181 = vmatpush1.bf16.msra.mxu0 %v10140_v11  ;;  %4972 = vmatpush1.bf16.msra.mxu1 %v10143_v12  ;;  %v799_v11 = vpack.c.bf16 %v603_v6, %v589_v5  ;;  %v618_v12 = vld [vmem:[%s11452_s8 + $0x218] sm:$0xff]  ;;  %v855_v5 = vpack.c.bf16 %v715_v62, %v701_v61  ;;  %v10250_v6 = vld [vmem:[#allocation11 + $0xd64] ss:$16 sps:$4 sm:$0xff]  }
 0x264   : > { %4182 = vmatprep.subr.bf16.mxu0 %v10148_v15  ;;  %4973 = vmatprep.subr.bf16.mxu1 %v10151_v16  ;;  %v10205_v15 = vld [vmem:[#allocation11 + $0xc6c] ss:$16 sps:$4 sm:$0xff]   ;;  %v10200_v16 = vld [vmem:[#allocation11 + $0xc60] ss:$16 sps:$4 sm:$0xff]   ;;  %v10290_v61 = vld [vmem:[#allocation14 + $0x40] ss:$16 sps:$4 sm:$0xff]  }
 0x265   : > { %v10293_v62 = vld [vmem:[#allocation14 + $0x48] ss:$16 sps:$4 sm:$0xff]  }
 0x266   : > { %4132 = vmatmul.mubr.bf16.gmra.mrb[20].mxu0 %v853_v19  ;;  %4923 = vmatmul.mubr.bf16.gmra.mrb[20].mxu1 %v853_v19  ;;  %v617_v19 = vld [vmem:[%s11452_s8 + $0x210] sm:$0xff] }
 0x267   : > { %4183 = vmatpush1.bf16.msra.mxu0 %v10146_v17  ;;  %4974 = vmatpush1.bf16.msra.mxu1 %v10149_v18  ;;  %v10203_v17 = vld [vmem:[#allocation11 + $0xc68] ss:$16 sps:$4 sm:$0xff]   ;;  %v814_v18 = vpack.c.bf16 %v632_v13, %v618_v12  ;;  %v743_v12 = vld [vmem:[%s11452_s8 + $0x600] sm:$0xff] }
 0x268   : > { %4184 = vmatprep.subr.bf16.mxu0 %v10154_v22  ;;  %4975 = vmatprep.subr.bf16.mxu1 %v10157_v23  ;;  %v10211_v22 = vld [vmem:[#allocation11 + $0xc8c] ss:$16 sps:$4 sm:$0xff]   ;;  %v10206_v23 = vld [vmem:[#allocation11 + $0xc80] ss:$16 sps:$4 sm:$0xff]   ;;  %v10256_v13 = vld [vmem:[#allocation11 + $0xd84] ss:$16 sps:$4 sm:$0xff]  }
 0x269   : > { %4141 = vmatprep.mubr.bf16.mxu0 %v868_v24  ;;  %4932 = vmatprep.mubr.bf16.mxu1 %v868_v24  ;;  %v10209_v24 = vld [vmem:[#allocation11 + $0xc88] ss:$16 sps:$4 sm:$0xff]  }
 0x26b   : > { %4185 = vmatpush1.bf16.msra.mxu0 %v10152_v25  ;;  %4976 = vmatpush1.bf16.msra.mxu1 %v10155_v26  ;;  %v813_v25 = vpack.c.bf16 %v631_v20, %v617_v19  ;;  %v646_v26 = vld [vmem:[%s11452_s8 + $0x2f8] sm:$0xff]  ;;  %v10262_v20 = vld [vmem:[#allocation11 + $0xda4] ss:$16 sps:$4 sm:$0xff]  }
 0x26c   : > { %4186 = vmatprep.subr.bf16.mxu0 %v10160_v29  ;;  %4977 = vmatprep.subr.bf16.mxu1 %v10163_v30  ;;  %v10217_v29 = vld [vmem:[#allocation11 + $0xcac] ss:$16 sps:$4 sm:$0xff]   ;;  %v10212_v30 = vld [vmem:[#allocation11 + $0xca0] ss:$16 sps:$4 sm:$0xff]   ;;  %v828_v32 = vpack.c.bf16 %v660_v27, %v646_v26  ;;  %v10268_v27 = vld [vmem:[#allocation11 + $0xdc4] ss:$16 sps:$4 sm:$0xff]  }
 0x26d   : > { %v771_v26 = vld [vmem:[%s11452_s8 + $0x6e0] sm:$0xff] }
 0x26e   : > { %4142 = vmatmul.mubr.bf16.gmra.mrb[24].mxu0 %v867_v31  ;;  %4933 = vmatmul.mubr.bf16.gmra.mrb[24].mxu1 %v867_v31  ;;  %v10215_v31 = vld [vmem:[#allocation11 + $0xca8] ss:$16 sps:$4 sm:$0xff]  }
 0x26f   : > { %4187 = vmatpush1.bf16.msra.mxu0 %v10158_v34  ;;  %4978 = vmatpush1.bf16.msra.mxu1 %v10161_v35  ;;  %v659_v34 = vld [vmem:[%s11452_s8 + $0x360] sm:$0xff] }
 0x270   : > { %4188 = vmatprep.subr.bf16.mxu0 %v10166_v36  ;;  %4979 = vmatprep.subr.bf16.mxu1 %v10169_v37  ;;  %v10220_v35 = vld [vmem:[#allocation11 + $0xcc4] ss:$16 sps:$4 sm:$0xff]   ;;  %v10223_v36 = vld [vmem:[#allocation11 + $0xccc] ss:$16 sps:$4 sm:$0xff]   ;;  %v10218_v37 = vld [vmem:[#allocation11 + $0xcc0] ss:$16 sps:$4 sm:$0xff]  }
 0x271   : > { %4151 = vmatprep.mubr.bf16.mxu0 %v882_v38  ;;  %4942 = vmatprep.mubr.bf16.mxu1 %v882_v38  ;;  %v10221_v38 = vld [vmem:[#allocation11 + $0xcc8] ss:$16 sps:$4 sm:$0xff]  }
 0x273   : > { %4189 = vmatpush1.bf16.msra.mxu0 %v10164_v39  ;;  %4980 = vmatpush1.bf16.msra.mxu1 %v10167_v40  ;;  %v827_v39 = vpack.c.bf16 %v659_v34, %v645_v33  ;;  %v674_v40 = vld [vmem:[%s11452_s8 + $0x3d8] sm:$0xff]  ;;  %v10274_v34 = vld [vmem:[#allocation11 + $0xde4] ss:$16 sps:$4 sm:$0xff]  }
 0x274   : > { %4190 = vmatprep.subr.bf16.mxu0 %v10172_v43  ;;  %4981 = vmatprep.subr.bf16.mxu1 %v10175_v44  ;;  %v10229_v43 = vld [vmem:[#allocation11 + $0xcec] ss:$16 sps:$4 sm:$0xff]   ;;  %v10224_v44 = vld [vmem:[#allocation11 + $0xce0] ss:$16 sps:$4 sm:$0xff]   ;;  %v842_v46 = vpack.c.bf16 %v688_v41, %v674_v40  ;;  %v10269_v33 = vld [vmem:[#allocation11 + $0xdc8] ss:$16 sps:$4 sm:$0xff]  }
 0x275   : > { %v577_v40 = vld [vmem:[%s11452_s8 + $0xd0] sm:$0xff]  ;;  %v592_v41 = vld [vmem:[%s11452_s8 + $0x148] sm:$0xff] }
 0x276   : > { %4152 = vmatmul.mubr.bf16.gmra.mrb[28].mxu0 %v881_v49  ;;  %4943 = vmatmul.mubr.bf16.gmra.mrb[28].mxu1 %v881_v49  ;;  %v10232_v49 = vld [vmem:[#allocation11 + $0xd04] ss:$16 sps:$4 sm:$0xff]  }
 0x277   : > { %4191 = vmatpush1.bf16.msra.mxu0 %v10170_v47  ;;  %4982 = vmatpush1.bf16.msra.mxu1 %v10173_v48  ;;  %v673_v47 = vld [vmem:[%s11452_s8 + $0x3d0] sm:$0xff]  ;;  %v687_v48 = vld [vmem:[%s11452_s8 + $0x440] sm:$0xff] }
 0x278   : > { %4192 = vmatprep.subr.bf16.mxu0 %v10178_v50  ;;  %4983 = vmatprep.subr.bf16.mxu1 %v10181_v51  ;;  %v10235_v50 = vld [vmem:[#allocation11 + $0xd0c] ss:$16 sps:$4 sm:$0xff]   ;;  %v841_v55 = vpack.c.bf16 %v687_v48, %v673_v47  ;;  %v10278_v47 = vld [vmem:[#allocation14] ss:$16 sps:$4 sm:$0xff]  }
 0x279   : > { %4194 = vmatprep.mubr.bf16.mxu0 %v786_v52  ;;  %4985 = vmatprep.mubr.bf16.mxu1 %v786_v52  ;;  %v702_v51 = vld [vmem:[%s11452_s8 + $0x4b8] sm:$0xff]  ;;  %v716_v52 = vld [vmem:[%s11452_s8 + $0x528] sm:$0xff] }
 0x27a   : > { %v10281_v48 = vld [vmem:[#allocation14 + $0x8] ss:$16 sps:$4 sm:$0xff]  }
 0x27b   : > { %4193 = vmatpush1.bf16.msra.mxu0 %v10176_v53  ;;  %4984 = vmatpush1.bf16.msra.mxu1 %v10179_v54  ;;  %v10230_v53 = vld [vmem:[#allocation11 + $0xd00] ss:$16 sps:$4 sm:$0xff]   ;;  %v10233_v54 = vld [vmem:[#allocation11 + $0xd08] ss:$16 sps:$4 sm:$0xff]  }
 0x27c   : > { %4275 = vmatprep.subr.bf16.mxu0 %v10184_v57  ;;  %5066 = vmatprep.subr.bf16.mxu1 %v10187_v58  ;;  %v10241_v57 = vld [vmem:[#allocation11 + $0xd2c] ss:$16 sps:$4 sm:$0xff]   ;;  %v10236_v58 = vld [vmem:[#allocation11 + $0xd20] ss:$16 sps:$4 sm:$0xff]  }
 0x27e   : > { %4195 = vmatmul.mubr.bf16.vlgmr.msra.gmra.mrb[0].mxu0 %v785_v59  ;;  %4986 = vmatmul.mubr.bf16.vlgmr.msra.gmra.mrb[0].mxu1 %v785_v59  ;;  %v10239_v59 = vld [vmem:[#allocation11 + $0xd28] ss:$16 sps:$4 sm:$0xff]  }
 0x27f   : > { %4276 = vmatpush1.bf16.msra.mxu0 %v10182_v60  ;;  %5067 = vmatpush1.bf16.msra.mxu1 %v10185_v63  ;;  %v856_v60 = vpack.c.bf16 %v716_v52, %v702_v51  ;;  %v10244_v63 = vld [vmem:[#allocation11 + $0xd44] ss:$16 sps:$4 sm:$0xff]  }
 0x280   : > { %4277 = vmatprep.subr.bf16.mxu0 %v10190_v0  ;;  %5068 = vmatprep.subr.bf16.mxu1 %v10193_v1  ;;  %v10247_v0 = vld [vmem:[#allocation11 + $0xd4c] ss:$16 sps:$4 sm:$0xff]   ;;  %v591_v51 = vld [vmem:[%s11452_s8 + $0x140] sm:$0xff]  ;;  %v605_v52 = vld [vmem:[%s11452_s8 + $0x1b0] sm:$0xff] }
 0x281   : > { %4204 = vmatprep.mubr.bf16.mxu0 %v800_v4  ;;  %4995 = vmatprep.mubr.bf16.mxu1 %v800_v4  ;;  %v730_v1 = vld [vmem:[%s11452_s8 + $0x598] sm:$0xff] }
 0x282   : > { %v10245_v4 = vld [vmem:[#allocation11 + $0xd48] ss:$16 sps:$4 sm:$0xff]  }
 0x283   : > { %4278 = vmatpush1.bf16.msra.mxu0 %v10188_v2  ;;  %5069 = vmatpush1.bf16.msra.mxu1 %v10191_v3  ;;  %v744_v2 = vld [vmem:[%s11452_s8 + $0x608] sm:$0xff]  ;;  %v10242_v3 = vld [vmem:[#allocation11 + $0xd40] ss:$16 sps:$4 sm:$0xff]  }
 0x284   : > { %4279 = vmatprep.subr.bf16.mxu0 %v10196_v7  ;;  %5070 = vmatprep.subr.bf16.mxu1 %v10199_v8  ;;  %v10253_v7 = vld [vmem:[#allocation11 + $0xd6c] ss:$16 sps:$4 sm:$0xff]   ;;  %v10248_v8 = vld [vmem:[#allocation11 + $0xd60] ss:$16 sps:$4 sm:$0xff]  }
 0x286   : > { %4205 = vmatmul.mubr.bf16.gmra.mrb[4].mxu0 %v799_v11  ;;  %4996 = vmatmul.mubr.bf16.gmra.mrb[4].mxu1 %v799_v11  ;;  %v729_v11 = vld [vmem:[%s11452_s8 + $0x590] sm:$0xff] }
 0x287   : > { %4280 = vmatpush1.bf16.msra.mxu0 %v10194_v9  ;;  %5071 = vmatpush1.bf16.msra.mxu1 %v10197_v10  ;;  %v10251_v9 = vld [vmem:[#allocation11 + $0xd68] ss:$16 sps:$4 sm:$0xff]   ;;  %v870_v10 = vpack.c.bf16 %v744_v2, %v730_v1  ;;  %v869_v19 = vpack.c.bf16 %v743_v12, %v729_v11  ;;  %v619_v1 = vld [vmem:[%s11452_s8 + $0x220] sm:$0xff]  ;;  %v633_v2 = vld [vmem:[%s11452_s8 + $0x290] sm:$0xff] }
 0x288   : > { %4281 = vmatprep.subr.bf16.mxu0 %v10202_v14  ;;  %5072 = vmatprep.subr.bf16.mxu1 %v10205_v15  ;;  %v10259_v14 = vld [vmem:[#allocation11 + $0xd8c] ss:$16 sps:$4 sm:$0xff]   ;;  %v10302_v11 = vld [vmem:[#allocation14 + $0x80] ss:$16 sps:$4 sm:$0xff]  }
 0x289   : > { %4214 = vmatprep.mubr.bf16.mxu0 %v814_v18  ;;  %5005 = vmatprep.mubr.bf16.mxu1 %v814_v18  ;;  %v758_v15 = vld [vmem:[%s11452_s8 + $0x678] sm:$0xff] }
 0x28a   : > { %v10257_v18 = vld [vmem:[#allocation11 + $0xd88] ss:$16 sps:$4 sm:$0xff]   ;;  %v10305_v12 = vld [vmem:[#allocation14 + $0x88] ss:$16 sps:$4 sm:$0xff]  }
 0x28b   : > { %4282 = vmatpush1.bf16.msra.mxu0 %v10200_v16  ;;  %5073 = vmatpush1.bf16.msra.mxu1 %v10203_v17  ;;  %v772_v16 = vld [vmem:[%s11452_s8 + $0x6e8] sm:$0xff]  ;;  %v10254_v17 = vld [vmem:[#allocation11 + $0xd80] ss:$16 sps:$4 sm:$0xff]  }
 0x28c   : > { %4283 = vmatprep.subr.bf16.mxu0 %v10208_v21  ;;  %5074 = vmatprep.subr.bf16.mxu1 %v10211_v22  ;;  %v10265_v21 = vld [vmem:[#allocation11 + $0xdac] ss:$16 sps:$4 sm:$0xff]   ;;  %v884_v22 = vpack.c.bf16 %v772_v16, %v758_v15  ;;  %v647_v15 = vld [vmem:[%s11452_s8 + $0x300] sm:$0xff]  ;;  %v661_v16 = vld [vmem:[%s11452_s8 + $0x370] sm:$0xff] }
 0x28e   : > { %4215 = vmatmul.mubr.bf16.gmra.mrb[8].mxu0 %v813_v25  ;;  %5006 = vmatmul.mubr.bf16.gmra.mrb[8].mxu1 %v813_v25  ;;  %v757_v25 = vld [vmem:[%s11452_s8 + $0x670] sm:$0xff] }
 0x28f   : > { %4284 = vmatpush1.bf16.msra.mxu0 %v10206_v23  ;;  %5075 = vmatpush1.bf16.msra.mxu1 %v10209_v24  ;;  %v10260_v23 = vld [vmem:[#allocation11 + $0xda0] ss:$16 sps:$4 sm:$0xff]   ;;  %v10263_v24 = vld [vmem:[#allocation11 + $0xda8] ss:$16 sps:$4 sm:$0xff]  }
 0x290   : > { %4285 = vmatprep.subr.bf16.mxu0 %v10214_v28  ;;  %5076 = vmatprep.subr.bf16.mxu1 %v10217_v29  ;;  %v10271_v28 = vld [vmem:[#allocation11 + $0xdcc] ss:$16 sps:$4 sm:$0xff]   ;;  %v883_v29 = vpack.c.bf16 %v771_v26, %v757_v25  ;;  %v10314_v25 = vld [vmem:[#allocation14 + $0xc0] ss:$16 sps:$4 sm:$0xff]  }
 0x291   : > { %4224 = vmatprep.mubr.bf16.mxu0 %v828_v32  ;;  %5015 = vmatprep.mubr.bf16.mxu1 %v828_v32  ;;  %v10266_v32 = vld [vmem:[#allocation11 + $0xdc0] ss:$16 sps:$4 sm:$0xff]   ;;  %v10317_v26 = vld [vmem:[#allocation14 + $0xc8] ss:$16 sps:$4 sm:$0xff]  }
 0x293   : > { %4286 = vmatpush1.bf16.msra.mxu0 %v10212_v30  ;;  %5077 = vmatpush1.bf16.msra.mxu1 %v10215_v31  ;;  %v564_v30 = vld [vmem:[%s11452_s8 + $0x68] sm:$0xff]  ;;  %v578_v31 = vld [vmem:[%s11452_s8 + $0xd8] sm:$0xff] }
 0x294   : > { %4287 = vmatprep.subr.bf16.mxu0 %v10220_v35  ;;  %5078 = vmatprep.subr.bf16.mxu1 %v10223_v36  ;;  %v10277_v35 = vld [vmem:[#allocation11 + $0xdec] ss:$16 sps:$4 sm:$0xff]   ;;  %v788_v36 = vpack.c.bf16 %v578_v31, %v564_v30  ;;  %v689_v30 = vld [vmem:[%s11452_s8 + $0x450] sm:$0xff] }
 0x295   : > { %v704_v31 = vld [vmem:[%s11452_s8 + $0x4c8] sm:$0xff] }
 0x296   : > { %4225 = vmatmul.mubr.bf16.gmra.mrb[12].mxu0 %v827_v39  ;;  %5016 = vmatmul.mubr.bf16.gmra.mrb[12].mxu1 %v827_v39  ;;  %v563_v39 = vld [vmem:[%s11452_s8 + $0x60] sm:$0xff] }
 0x297   : > { %4288 = vmatpush1.bf16.msra.mxu0 %v10218_v37  ;;  %5079 = vmatpush1.bf16.msra.mxu1 %v10221_v38  ;;  %v10272_v37 = vld [vmem:[#allocation11 + $0xde0] ss:$16 sps:$4 sm:$0xff]   ;;  %v10275_v38 = vld [vmem:[#allocation11 + $0xde8] ss:$16 sps:$4 sm:$0xff]  }
 0x298   : > { %4289 = vmatprep.subr.bf16.mxu0 %v10226_v42  ;;  %5080 = vmatprep.subr.bf16.mxu1 %v10229_v43  ;;  %v606_v42 = vld [vmem:[%s11452_s8 + $0x1b8] sm:$0xff] }
 0x299   : > { %4234 = vmatprep.mubr.bf16.mxu0 %v842_v46  ;;  %5025 = vmatprep.mubr.bf16.mxu1 %v842_v46  ;;  %v10280_v43 = vld [vmem:[#allocation14 + $0x4] ss:$16 sps:$4 sm:$0xff]   ;;  %v802_v46 = vpack.c.bf16 %v606_v42, %v592_v41  ;;  %v10337_v42 = vld [vmem:[#allocation14 + $0x12c] ss:$16 sps:$4 sm:$0xff]  }
 0x29a   : > { %v10334_v41 = vld [vmem:[#allocation14 + $0x124] ss:$16 sps:$4 sm:$0xff]  }
 0x29b   : > { %4290 = vmatpush1.bf16.msra.mxu0 %v10224_v44  ;;  %5081 = vmatpush1.bf16.msra.mxu1 %v10227_v45  ;;  %v10283_v44 = vld [vmem:[#allocation14 + $0xc] ss:$16 sps:$4 sm:$0xff]   ;;  %v787_v45 = vpack.c.bf16 %v577_v40, %v563_v39  ;;  %v10326_v39 = vld [vmem:[#allocation14 + $0x100] ss:$16 sps:$4 sm:$0xff]   ;;  %v10329_v40 = vld [vmem:[#allocation14 + $0x108] ss:$16 sps:$4 sm:$0xff]  }
 0x29c   : > { %4291 = vmatprep.subr.bf16.mxu0 %v10232_v49  ;;  %5082 = vmatprep.subr.bf16.mxu1 %v10235_v50  ;;  %v10286_v49 = vld [vmem:[#allocation14 + $0x24] ss:$16 sps:$4 sm:$0xff]   ;;  %v10289_v50 = vld [vmem:[#allocation14 + $0x2c] ss:$16 sps:$4 sm:$0xff]  }
 0x29e   : > { %4235 = vmatmul.mubr.bf16.gmra.mrb[16].mxu0 %v841_v55  ;;  %5026 = vmatmul.mubr.bf16.gmra.mrb[16].mxu1 %v841_v55  ;;  %v10284_v55 = vld [vmem:[#allocation14 + $0x20] ss:$16 sps:$4 sm:$0xff]  }
 0x29f   : > { %4292 = vmatpush1.bf16.msra.mxu0 %v10230_v53  ;;  %5083 = vmatpush1.bf16.msra.mxu1 %v10233_v54  ;;  %v620_v53 = vld [vmem:[%s11452_s8 + $0x228] sm:$0xff]  ;;  %v634_v54 = vld [vmem:[%s11452_s8 + $0x298] sm:$0xff] }
 0x2a0   : > { %4293 = vmatprep.subr.bf16.mxu0 %v10238_v56  ;;  %5084 = vmatprep.subr.bf16.mxu1 %v10241_v57  ;;  %v10287_v56 = vld [vmem:[#allocation14 + $0x28] ss:$16 sps:$4 sm:$0xff]   ;;  %v10292_v57 = vld [vmem:[#allocation14 + $0x44] ss:$16 sps:$4 sm:$0xff]  }
 0x2a1   : > { %4244 = vmatprep.mubr.bf16.mxu0 %v856_v60  ;;  %5035 = vmatprep.mubr.bf16.mxu1 %v856_v60  ;;  %v816_v60 = vpack.c.bf16 %v634_v54, %v620_v53  ;;  %v10338_v53 = vld [vmem:[#allocation14 + $0x140] ss:$16 sps:$4 sm:$0xff]   ;;  %v10341_v54 = vld [vmem:[#allocation14 + $0x148] ss:$16 sps:$4 sm:$0xff]  }
 0x2a3   : > { %4294 = vmatpush1.bf16.msra.mxu0 %v10236_v58  ;;  %5085 = vmatpush1.bf16.msra.mxu1 %v10239_v59  ;;  %v10295_v58 = vld [vmem:[#allocation14 + $0x4c] ss:$16 sps:$4 sm:$0xff]   ;;  %v801_v59 = vpack.c.bf16 %v605_v52, %v591_v51 }
 0x2a4   : > { %4295 = vmatprep.subr.bf16.mxu0 %v10244_v63  ;;  %5086 = vmatprep.subr.bf16.mxu1 %v10247_v0  ;;  %v10298_v63 = vld [vmem:[#allocation14 + $0x64] ss:$16 sps:$4 sm:$0xff]   ;;  %v10301_v0 = vld [vmem:[#allocation14 + $0x6c] ss:$16 sps:$4 sm:$0xff]  }
 0x2a6   : > { %4245 = vmatmul.mubr.bf16.gmra.mrb[20].mxu0 %v855_v5  ;;  %5036 = vmatmul.mubr.bf16.gmra.mrb[20].mxu1 %v855_v5  ;;  %v10296_v5 = vld [vmem:[#allocation14 + $0x60] ss:$16 sps:$4 sm:$0xff]  }
 0x2a7   : > { %4296 = vmatpush1.bf16.msra.mxu0 %v10242_v3  ;;  %5087 = vmatpush1.bf16.msra.mxu1 %v10245_v4  ;;  %v648_v3 = vld [vmem:[%s11452_s8 + $0x308] sm:$0xff]  ;;  %v662_v4 = vld [vmem:[%s11452_s8 + $0x378] sm:$0xff] }
 0x2a8   : > { %4297 = vmatprep.subr.bf16.mxu0 %v10250_v6  ;;  %5088 = vmatprep.subr.bf16.mxu1 %v10253_v7  ;;  %v10299_v6 = vld [vmem:[#allocation14 + $0x68] ss:$16 sps:$4 sm:$0xff]   ;;  %v10304_v7 = vld [vmem:[#allocation14 + $0x84] ss:$16 sps:$4 sm:$0xff]  }
 0x2a9   : > { %4254 = vmatprep.mubr.bf16.mxu0 %v870_v10  ;;  %5045 = vmatprep.mubr.bf16.mxu1 %v870_v10  ;;  %v830_v10 = vpack.c.bf16 %v662_v4, %v648_v3  ;;  %v10350_v3 = vld [vmem:[#allocation14 + $0x180] ss:$16 sps:$4 sm:$0xff]   ;;  %v10353_v4 = vld [vmem:[#allocation14 + $0x188] ss:$16 sps:$4 sm:$0xff]  }
 0x2ab   : > { %4298 = vmatpush1.bf16.msra.mxu0 %v10248_v8  ;;  %5089 = vmatpush1.bf16.msra.mxu1 %v10251_v9  ;;  %v10307_v8 = vld [vmem:[#allocation14 + $0x8c] ss:$16 sps:$4 sm:$0xff]   ;;  %v815_v9 = vpack.c.bf16 %v633_v2, %v619_v1 }
 0x2ac   : > { %4299 = vmatprep.subr.bf16.mxu0 %v10256_v13  ;;  %5090 = vmatprep.subr.bf16.mxu1 %v10259_v14  ;;  %v10310_v13 = vld [vmem:[#allocation14 + $0xa4] ss:$16 sps:$4 sm:$0xff]   ;;  %v10313_v14 = vld [vmem:[#allocation14 + $0xac] ss:$16 sps:$4 sm:$0xff]  }
 0x2ae   : > { %4255 = vmatmul.mubr.bf16.gmra.mrb[24].mxu0 %v869_v19  ;;  %5046 = vmatmul.mubr.bf16.gmra.mrb[24].mxu1 %v869_v19  ;;  %v10308_v19 = vld [vmem:[#allocation14 + $0xa0] ss:$16 sps:$4 sm:$0xff]  }
 0x2af   : > { %4300 = vmatpush1.bf16.msra.mxu0 %v10254_v17  ;;  %5091 = vmatpush1.bf16.msra.mxu1 %v10257_v18  ;;  %v676_v17 = vld [vmem:[%s11452_s8 + $0x3e8] sm:$0xff]  ;;  %v690_v18 = vld [vmem:[%s11452_s8 + $0x458] sm:$0xff] }
 0x2b0   : > { %4301 = vmatprep.subr.bf16.mxu0 %v10262_v20  ;;  %5092 = vmatprep.subr.bf16.mxu1 %v10265_v21  ;;  %v10311_v20 = vld [vmem:[#allocation14 + $0xa8] ss:$16 sps:$4 sm:$0xff]   ;;  %v10316_v21 = vld [vmem:[#allocation14 + $0xc4] ss:$16 sps:$4 sm:$0xff]  }
 0x2b1   : > { %4264 = vmatprep.mubr.bf16.mxu0 %v884_v22  ;;  %5055 = vmatprep.mubr.bf16.mxu1 %v884_v22  ;;  %v10319_v22 = vld [vmem:[#allocation14 + $0xcc] ss:$16 sps:$4 sm:$0xff]  }
 0x2b3   : > { %4302 = vmatpush1.bf16.msra.mxu0 %v10260_v23  ;;  %5093 = vmatpush1.bf16.msra.mxu1 %v10263_v24  ;;  %v829_v23 = vpack.c.bf16 %v661_v16, %v647_v15  ;;  %v844_v24 = vpack.c.bf16 %v690_v18, %v676_v17  ;;  %v10365_v15 = vld [vmem:[#allocation14 + $0x1c8] ss:$16 sps:$4 sm:$0xff]   ;;  %v10370_v16 = vld [vmem:[#allocation14 + $0x1e4] ss:$16 sps:$4 sm:$0xff]   ;;  %v10373_v17 = vld [vmem:[#allocation14 + $0x1ec] ss:$16 sps:$4 sm:$0xff]  }
 0x2b4   : > { %4303 = vmatprep.subr.bf16.mxu0 %v10268_v27  ;;  %5094 = vmatprep.subr.bf16.mxu1 %v10271_v28  ;;  %v10322_v27 = vld [vmem:[#allocation14 + $0xe4] ss:$16 sps:$4 sm:$0xff]   ;;  %v10325_v28 = vld [vmem:[#allocation14 + $0xec] ss:$16 sps:$4 sm:$0xff]   ;;  %v10368_v18 = vld [vmem:[#allocation14 + $0x1e0] ss:$16 sps:$4 sm:$0xff]  }
 0x2b6   : > { %4265 = vmatmul.mubr.bf16.gmra.mrb[28].mxu0 %v883_v29  ;;  %5056 = vmatmul.mubr.bf16.gmra.mrb[28].mxu1 %v883_v29  ;;  %v675_v29 = vld [vmem:[%s11452_s8 + $0x3e0] sm:$0xff] }
 0x2b7   : > { %4304 = vmatpush1.bf16.msra.mxu0 %v10266_v32  ;;  %5095 = vmatpush1.bf16.msra.mxu1 %v10269_v33  ;;  %v718_v32 = vld [vmem:[%s11452_s8 + $0x538] sm:$0xff]  ;;  %v10320_v33 = vld [vmem:[#allocation14 + $0xe0] ss:$16 sps:$4 sm:$0xff]  }
 0x2b8   : > { %4305 = vmatprep.subr.bf16.mxu0 %v10274_v34  ;;  %5096 = vmatprep.subr.bf16.mxu1 %v10277_v35  ;;  %v10323_v34 = vld [vmem:[#allocation14 + $0xe8] ss:$16 sps:$4 sm:$0xff]   ;;  %v10328_v35 = vld [vmem:[#allocation14 + $0x104] ss:$16 sps:$4 sm:$0xff]  }
 0x2b9   : > { %4307 = vmatprep.mubr.bf16.mxu0 %v788_v36  ;;  %5098 = vmatprep.mubr.bf16.mxu1 %v788_v36  ;;  %v10331_v36 = vld [vmem:[#allocation14 + $0x10c] ss:$16 sps:$4 sm:$0xff]  }
 0x2bb   : > { %4306 = vmatpush1.bf16.msra.mxu0 %v10272_v37  ;;  %5097 = vmatpush1.bf16.msra.mxu1 %v10275_v38  ;;  %v843_v37 = vpack.c.bf16 %v689_v30, %v675_v29  ;;  %v858_v38 = vpack.c.bf16 %v718_v32, %v704_v31  ;;  %v11738_v29 = vstv %s7976_s18 }
 0x2bc   : > { %6212 = vmatprep.subr.bf16.mxu0 %v10280_v43  ;;  %6438 = vmatprep.subr.bf16.mxu1 %v10283_v44  ;;  %v703_v43 = vld [vmem:[%s11452_s8 + $0x4c0] sm:$0xff]  ;;  %v717_v44 = vld [vmem:[%s11452_s8 + $0x530] sm:$0xff] }
 0x2bd   : > { %v857_v51 = vpack.c.bf16 %v717_v44, %v703_v43 }
 0x2be   : > { %4308 = vmatmul.mubr.bf16.vlgmr.msra.gmra.mrb[0].mxu0 %v787_v45  ;;  %5099 = vmatmul.mubr.bf16.vlgmr.msra.gmra.mrb[0].mxu1 %v787_v45  ;;  %v732_v45 = vld [vmem:[%s11452_s8 + $0x5a8] sm:$0xff] }
 0x2bf   : > { %4317 = vmatprep.mubr.bf16.mxu0 %v802_v46  ;;  %5108 = vmatprep.mubr.bf16.mxu1 %v802_v46  ;;  %v746_v46 = vld [vmem:[%s11452_s8 + $0x618] sm:$0xff] }
 0x2c0   : > { %6213 = vmatpush1.bf16.msra.mxu0 %v10278_v47  ;;  %6439 = vmatpush1.bf16.msra.mxu1 %v10281_v48  ;;  %v10332_v47 = vld [vmem:[#allocation14 + $0x120] ss:$16 sps:$4 sm:$0xff]   ;;  %v10335_v48 = vld [vmem:[#allocation14 + $0x128] ss:$16 sps:$4 sm:$0xff]   ;;  %v872_v52 = vpack.c.bf16 %v746_v46, %v732_v45 }
 0x2c1   : > { %6214 = vmatprep.subr.bf16.mxu0 %v10286_v49  ;;  %6440 = vmatprep.subr.bf16.mxu1 %v10289_v50  ;;  %v10340_v49 = vld [vmem:[#allocation14 + $0x144] ss:$16 sps:$4 sm:$0xff]   ;;  %v10343_v50 = vld [vmem:[#allocation14 + $0x14c] ss:$16 sps:$4 sm:$0xff]  }
 0x2c4   : > { %6215 = vmatpush1.bf16.msra.mxu0 %v10284_v55  ;;  %6441 = vmatpush1.bf16.msra.mxu1 %v10287_v56  ;;  %v10346_v55 = vld [vmem:[#allocation14 + $0x164] ss:$16 sps:$4 sm:$0xff]   ;;  %v10349_v56 = vld [vmem:[#allocation14 + $0x16c] ss:$16 sps:$4 sm:$0xff]  }
 0x2c5   : > { %6216 = vmatprep.subr.bf16.mxu0 %v10292_v57  ;;  %6442 = vmatprep.subr.bf16.mxu1 %v10295_v58  ;;  %v731_v57 = vld [vmem:[%s11452_s8 + $0x5a0] sm:$0xff]  ;;  %v745_v58 = vld [vmem:[%s11452_s8 + $0x610] sm:$0xff] }
 0x2c6   : > { %4318 = vmatmul.mubr.bf16.gmra.mrb[4].mxu0 %v801_v59  ;;  %5109 = vmatmul.mubr.bf16.gmra.mrb[4].mxu1 %v801_v59  ;;  %v760_v59 = vld [vmem:[%s11452_s8 + $0x688] sm:$0xff]  ;;  %v871_v1 = vpack.c.bf16 %v745_v58, %v731_v57 }
 0x2c7   : > { %4327 = vmatprep.mubr.bf16.mxu0 %v816_v60  ;;  %5118 = vmatprep.mubr.bf16.mxu1 %v816_v60  ;;  %v774_v60 = vld [vmem:[%s11452_s8 + $0x6f8] sm:$0xff] }
 0x2c8   : > { %6217 = vmatpush1.bf16.msra.mxu0 %v10290_v61  ;;  %6443 = vmatpush1.bf16.msra.mxu1 %v10293_v62  ;;  %v10344_v61 = vld [vmem:[#allocation14 + $0x160] ss:$16 sps:$4 sm:$0xff]   ;;  %v10347_v62 = vld [vmem:[#allocation14 + $0x168] ss:$16 sps:$4 sm:$0xff]   ;;  %v886_v2 = vpack.c.bf16 %v774_v60, %v760_v59 }
 0x2c9   : > { %6218 = vmatprep.subr.bf16.mxu0 %v10298_v63  ;;  %6444 = vmatprep.subr.bf16.mxu1 %v10301_v0  ;;  %v10352_v63 = vld [vmem:[#allocation14 + $0x184] ss:$16 sps:$4 sm:$0xff]   ;;  %v10355_v0 = vld [vmem:[#allocation14 + $0x18c] ss:$16 sps:$4 sm:$0xff]  }
 0x2cc   : > { %6219 = vmatpush1.bf16.msra.mxu0 %v10296_v5  ;;  %6445 = vmatpush1.bf16.msra.mxu1 %v10299_v6  ;;  %v10358_v5 = vld [vmem:[#allocation14 + $0x1a4] ss:$16 sps:$4 sm:$0xff]   ;;  %v10361_v6 = vld [vmem:[#allocation14 + $0x1ac] ss:$16 sps:$4 sm:$0xff]  }
 0x2cd   : > { %6220 = vmatprep.subr.bf16.mxu0 %v10304_v7  ;;  %6446 = vmatprep.subr.bf16.mxu1 %v10307_v8  ;;  %v759_v7 = vld [vmem:[%s11452_s8 + $0x680] sm:$0xff]  ;;  %v773_v8 = vld [vmem:[%s11452_s8 + $0x6f0] sm:$0xff] }
 0x2ce   : > { %4328 = vmatmul.mubr.bf16.gmra.mrb[8].mxu0 %v815_v9  ;;  %5119 = vmatmul.mubr.bf16.gmra.mrb[8].mxu1 %v815_v9  ;;  %v10356_v9 = vld [vmem:[#allocation14 + $0x1a0] ss:$16 sps:$4 sm:$0xff]  }
 0x2cf   : > { %4337 = vmatprep.mubr.bf16.mxu0 %v830_v10  ;;  %5128 = vmatprep.mubr.bf16.mxu1 %v830_v10  ;;  %v10359_v10 = vld [vmem:[#allocation14 + $0x1a8] ss:$16 sps:$4 sm:$0xff]  }
 0x2d0   : > { %6221 = vmatpush1.bf16.msra.mxu0 %v10302_v11  ;;  %6447 = vmatpush1.bf16.msra.mxu1 %v10305_v12  ;;  %v885_v11 = vpack.c.bf16 %v773_v8, %v759_v7  ;;  %v10364_v12 = vld [vmem:[#allocation14 + $0x1c4] ss:$16 sps:$4 sm:$0xff]  }
 0x2d1   : > { %6222 = vmatprep.subr.bf16.mxu0 %v10310_v13  ;;  %6448 = vmatprep.subr.bf16.mxu1 %v10313_v14  ;;  %v10367_v13 = vld [vmem:[#allocation14 + $0x1cc] ss:$16 sps:$4 sm:$0xff]   ;;  %v10362_v14 = vld [vmem:[#allocation14 + $0x1c0] ss:$16 sps:$4 sm:$0xff]  }
 0x2d4   : > { %6223 = vmatpush1.bf16.msra.mxu0 %v10308_v19  ;;  %6449 = vmatpush1.bf16.msra.mxu1 %v10311_v20  ;;  %v10371_v19 = vld [vmem:[#allocation14 + $0x1e8] ss:$16 sps:$4 sm:$0xff]   ;;  %v10376_v20 = vld [vmem:[#allocation14 + $0x204] ss:$16 sps:$4 sm:$0xff]  }
 0x2d5   : > { %6224 = vmatprep.subr.bf16.mxu0 %v10316_v21  ;;  %6450 = vmatprep.subr.bf16.mxu1 %v10319_v22  ;;  %v10379_v21 = vld [vmem:[#allocation14 + $0x20c] ss:$16 sps:$4 sm:$0xff]   ;;  %v13417_v22 = vlaneseq }
 0x2d6   : > { %4338 = vmatmul.mubr.bf16.gmra.mrb[12].mxu0 %v829_v23  ;;  %5129 = vmatmul.mubr.bf16.gmra.mrb[12].mxu1 %v829_v23 }
 0x2d7   : > { %4347 = vmatprep.mubr.bf16.mxu0 %v844_v24  ;;  %5138 = vmatprep.mubr.bf16.mxu1 %v844_v24  ;;  %v11726_v23 = vshrl.u32 %v13417_v22, 7 }
 0x2d8   : > { %6225 = vmatpush1.bf16.msra.mxu0 %v10314_v25  ;;  %6451 = vmatpush1.bf16.msra.mxu1 %v10317_v26  ;;  %v1335_v26 = vld [vmem:[#allocation13] sm:$0xf] }
 0x2d9   : > { %6226 = vmatprep.subr.bf16.mxu0 %v10322_v27  ;;  %6452 = vmatprep.subr.bf16.mxu1 %v10325_v28  ;;  %13602 = vst [vmem:[#allocation39_spill] sm:$0xff] %v11726_v23  ;;  %v11729_v24 = vsub.s32 0, %v11726_v23  ;;  %v13439_v25 = vsub.s32 2, %v11726_v23  ;;  %v11733_v27 = vsub.s32 1, %v11726_v23  ;;  %v13434_v28 = vsub.s32 3, %v11726_v23 }
 0x2da   : > { %v5245_v30 = vadd.s32 8, %v11726_v23  ;;  %v5247_v57 = vadd.s32 24, %v11726_v23 }
 0x2db   : > { %v11742_v31 = vrot.slane %v1335_v26, %v11729_v24  ;;  %v11746_v32 = vrot.slane %v1335_v26, %v13439_v25  ;;  %v10398_v25 = vld [vmem:[#allocation14 + $0x280] ss:$16 sps:$4 sm:$0xff]  }
 0x2dc   : > { %6227 = vmatpush1.bf16.msra.mxu0 %v10320_v33  ;;  %6453 = vmatpush1.bf16.msra.mxu1 %v10323_v34  ;;  %v11749_v33 = vrot.slane %v1335_v26, %v11733_v27  ;;  %v11753_v34 = vrot.slane %v1335_v26, %v13434_v28  ;;  %v5550_v28 = vld [vmem:[#allocation16] sm:$0xf] }
 0x2dd   : > { %6228 = vmatprep.subr.bf16.mxu0 %v10328_v35  ;;  %6454 = vmatprep.subr.bf16.mxu1 %v10331_v36  ;;  %v5261_v35 = vadd.s32 %v11738_v29, %v11726_v23 }
 0x2de   : > { %4348 = vmatmul.mubr.bf16.gmra.mrb[16].mxu0 %v843_v37  ;;  %5139 = vmatmul.mubr.bf16.gmra.mrb[16].mxu1 %v843_v37  ;;  %v11758_v37 = vstv %s11471_s27 }
 0x2df   : > { %4357 = vmatprep.mubr.bf16.mxu0 %v858_v38  ;;  %5148 = vmatprep.mubr.bf16.mxu1 %v858_v38  ;;  %vm11774_vm2 = vcmp.lt.s32.totalorder %v5261_v35, %v11758_v37 }
 0x2e0   : > { %6229 = vmatpush1.bf16.msra.mxu0 %v10326_v39  ;;  %6455 = vmatpush1.bf16.msra.mxu1 %v10329_v40  ;;  %v5262_v39 = vadd.s32 %v11738_v29, %v5245_v30  ;;  %v13621_v30 = vmov 0 }
 0x2e1   : > { %6230 = vmatprep.subr.bf16.mxu0 %v10334_v41  ;;  %6456 = vmatprep.subr.bf16.mxu1 %v10337_v42 }
 0x2e2   : > { %vm11786_vm3 = vcmp.lt.s32.totalorder %v5262_v39, %v11758_v37 }
 0x2e3   : > { %vm11820_vm4 = vmpackc.low %vm11786_vm3, %vm11774_vm2 }
 0x2e4   : > { %6231 = vmatpush1.bf16.msra.mxu0 %v10332_v47  ;;  %6457 = vmatpush1.bf16.msra.mxu1 %v10335_v48 }
 0x2e5   : > { %6232 = vmatprep.subr.bf16.mxu0 %v10340_v49  ;;  %6458 = vmatprep.subr.bf16.mxu1 %v10343_v50 }
 0x2e6   : > { %4358 = vmatmul.mubr.bf16.gmra.mrb[20].mxu0 %v857_v51  ;;  %5149 = vmatmul.mubr.bf16.gmra.mrb[20].mxu1 %v857_v51 }
 0x2e7   : > { %4367 = vmatprep.mubr.bf16.mxu0 %v872_v52  ;;  %5158 = vmatprep.mubr.bf16.mxu1 %v872_v52 }
 0x2e8   : > { %6233 = vmatpush1.bf16.msra.mxu0 %v10338_v53  ;;  %6459 = vmatpush1.bf16.msra.mxu1 %v10341_v54  ;;  %v5246_v53 = vadd.s32 16, %v11726_v23 }
 0x2e9   : > { %6234 = vmatprep.subr.bf16.mxu0 %v10346_v55  ;;  %6460 = vmatprep.subr.bf16.mxu1 %v10349_v56 }
 0x2ec   : > { %6235 = vmatpush1.bf16.msra.mxu0 %v10344_v61  ;;  %6461 = vmatpush1.bf16.msra.mxu1 %v10347_v62 }
 0x2ed   : > { %6236 = vmatprep.subr.bf16.mxu0 %v10352_v63  ;;  %6462 = vmatprep.subr.bf16.mxu1 %v10355_v0 }
 0x2ee   : > { %4368 = vmatmul.mubr.bf16.gmra.mrb[24].mxu0 %v871_v1  ;;  %5159 = vmatmul.mubr.bf16.gmra.mrb[24].mxu1 %v871_v1 }
 0x2ef   : > { %4377 = vmatprep.mubr.bf16.mxu0 %v886_v2  ;;  %5168 = vmatprep.mubr.bf16.mxu1 %v886_v2 }
 0x2f0   : > { %6237 = vmatpush1.bf16.msra.mxu0 %v10350_v3  ;;  %6463 = vmatpush1.bf16.msra.mxu1 %v10353_v4  ;;  %v5263_v4 = vadd.s32 %v11738_v29, %v5246_v53  ;;  %v5249_v53 = vadd.s32 40, %v11726_v23 }
 0x2f1   : > { %6238 = vmatprep.subr.bf16.mxu0 %v10358_v5  ;;  %6464 = vmatprep.subr.bf16.mxu1 %v10361_v6  ;;  %v13726_v5 = vsub.s32 3, %v11726_v23 }
 0x2f2   : > { %vm11852_vm5 = vcmp.lt.s32.totalorder %v5263_v4, %v11758_v37  ;;  %v5266_v22 = vadd.s32 %v11738_v29, %v5249_v53 }
 0x2f3   : > { %v13622_v30 = vsel %vm11852_vm5, 4294967295, %v13621_v30 }
 0x2f4   : > { %6239 = vmatpush1.bf16.msra.mxu0 %v10356_v9  ;;  %6465 = vmatpush1.bf16.msra.mxu1 %v10359_v10  ;;  %v5264_v10 = vadd.s32 %v11738_v29, %v5247_v57  ;;  %v10388_v57 = vld [vmem:[#allocation14 + $0x244] ss:$16 sps:$4 sm:$0xff]   ;;  %vm11950_vm9 = vcmp.lt.s32.totalorder %v5266_v22, %v11758_v37 }
 0x2f5   : > { %6240 = vmatprep.subr.bf16.mxu0 %v10364_v12  ;;  %6466 = vmatprep.subr.bf16.mxu1 %v10367_v13  ;;  %v10377_v12 = vld [vmem:[#allocation14 + $0x208] ss:$16 sps:$4 sm:$0xff]  }
 0x2f6   : > { %4378 = vmatmul.mubr.bf16.gmra.mrb[28].mxu0 %v885_v11  ;;  %5169 = vmatmul.mubr.bf16.gmra.mrb[28].mxu1 %v885_v11  ;;  %v10374_v11 = vld [vmem:[#allocation14 + $0x200] ss:$16 sps:$4 sm:$0xff]   ;;  %vm11868_vm6 = vcmp.lt.s32.totalorder %v5264_v10, %v11758_v37 }
 0x2f7   : > { %vm11902_vm7 = vmpackc.low %vm11868_vm6, %vm11852_vm5 }
 0x2f8   : > { %6241 = vmatpush1.bf16.msra.mxu0 %v10362_v14  ;;  %6467 = vmatpush1.bf16.msra.mxu1 %v10365_v15 }
 0x2f9   : > { %6242 = vmatprep.subr.bf16.mxu0 %v10370_v16  ;;  %6468 = vmatprep.subr.bf16.mxu1 %v10373_v17  ;;  %v10382_v17 = vld [vmem:[#allocation14 + $0x224] ss:$16 sps:$4 sm:$0xff]  }
 0x2fc   : > { %6243 = vmatpush1.bf16.msra.mxu0 %v10368_v18  ;;  %6469 = vmatpush1.bf16.msra.mxu1 %v10371_v19  ;;  %v10385_v18 = vld [vmem:[#allocation14 + $0x22c] ss:$16 sps:$4 sm:$0xff]  }
 0x2fd   : > { %6325 = vmatprep.subr.bf16.mxu0 %v10376_v20  ;;  %6551 = vmatprep.subr.bf16.mxu1 %v10379_v21 }
 0x391   : > { %v4309_v36 = vpop.f32.mrb[0].mxu0  ;;  %v5100_v38 = vpop.f32.mrb[0].mxu1 }
 0x392   : > { %v11762_v40 = vadd.f32 %v4309_v36, %v11742_v31  ;;  %v11765_v41 = vadd.f32 %v5100_v38, %v11746_v32  ;;  %v4311_v42 = vpop.f32.mrb[1].mxu0  ;;  %v5102_v43 = vpop.f32.mrb[1].mxu1 }
 0x393   : > { %v11768_v44 = vadd.f32 %v4311_v42, %v11749_v33  ;;  %v11771_v45 = vadd.f32 %v5102_v43, %v11753_v34  ;;  %v4313_v46 = vpop.f32.mrb[2].mxu0  ;;  %v5104_v47 = vpop.f32.mrb[2].mxu1  ;;  %v10380_v42 = vld [vmem:[#allocation14 + $0x220] ss:$16 sps:$4 sm:$0xff]   ;;  %v5248_v43 = vadd.s32 32, %v11726_v23 }
 0x394   : > { %13603 = vst [vmem:[#allocation40_spill] sm:$0xff] %v11762_v40  ;;  %13604 = vst [vmem:[#allocation41_spill] sm:$0xff] %v11765_v41  ;;  %v11779_v49 = vadd.f32 %v4313_v46, %v11742_v31  ;;  %v11782_v50 = vadd.f32 %v5104_v47, %v11746_v32  ;;  %v4315_v51 = vpop.f32.mrb[3].mxu0  ;;  %v5106_v52 = vpop.f32.mrb[3].mxu1  ;;  %v13433_v58 = vmax.f32 %v11762_v40, 0.0  ;;  %v13432_v59 = vmax.f32 %v11765_v41, 0.0 }
 0x395   : > { %13605 = vst [vmem:[#allocation42_spill] sm:$0xff] %v11768_v44  ;;  %13606 = vst [vmem:[#allocation43_spill] sm:$0xff] %v11771_v45  ;;  %v11791_v55 = vadd.f32 %v4315_v51, %v11749_v33  ;;  %v11794_v56 = vadd.f32 %v5106_v52, %v11753_v34  ;;  %v13431_v62 = vmax.f32 %v11768_v44, 0.0  ;;  %v13430_v63 = vmax.f32 %v11771_v45, 0.0  ;;  %v10383_v52 = vld [vmem:[#allocation14 + $0x228] ss:$16 sps:$4 sm:$0xff]  }
 0x396   : > { %13609 = vst [vmem:[#allocation44_spill] sm:$0xff] %v11779_v49  ;;  %13610 = vst [vmem:[#allocation45_spill] sm:$0xff] %v11782_v50  ;;  %v13429_v60 = vmax.f32 %v11779_v49, 0.0  ;;  %v13428_v61 = vmax.f32 %v11782_v50, 0.0  ;;  %v13625_v46 = vmov 0 }
 0x397   : > { %13613 = vst [vmem:[#allocation46_spill] sm:$0xff] %v11791_v55  ;;  %13614 = vst [vmem:[#allocation47_spill] sm:$0xff] %v11794_v56  ;;  %v13427_v0 = vmax.f32 %v11791_v55, 0.0  ;;  %v13426_v1 = vmax.f32 %v11794_v56, 0.0  ;;  %v13626_v46 = vsel %vm11868_vm6, 4294967295, %v13625_v46 }
 0x398   : > { %v8559_v2 = vpack.c.bf16 %v13429_v60, %v13433_v58  ;;  %v11813_v3 = vpack.c.bf16 %v13428_v61, %v13432_v59  ;;  %v5251_v61 = vadd.s32 56, %v11726_v23 }
 0x399   : > { %v8556_v6 = vpack.c.bf16 %v13427_v0, %v13431_v62  ;;  %v11832_v7 = vpack.c.bf16 %v13426_v1, %v13430_v63  ;;  %v4319_v8 = vpop.f32.mrb[4].mxu0  ;;  %v5110_v9 = vpop.f32.mrb[4].mxu1  ;;  %v10395_v0 = vld [vmem:[#allocation14 + $0x268] ss:$16 sps:$4 sm:$0xff]  }
 0x39a   : > { %v11836_v13 = vadd.f32 %v4319_v8, %v11742_v31  ;;  %v11839_v14 = vadd.f32 %v5110_v9, %v11746_v32  ;;  %v4321_v15 = vpop.f32.mrb[5].mxu0  ;;  %v5112_v16 = vpop.f32.mrb[5].mxu1  ;;  %v10391_v9 = vld [vmem:[#allocation14 + $0x24c] ss:$16 sps:$4 sm:$0xff]  }
 0x39b   : > { %v11842_v19 = vadd.f32 %v4321_v15, %v11749_v33  ;;  %v11845_v20 = vadd.f32 %v5112_v16, %v11753_v34  ;;  %v4323_v21 = vpop.f32.mrb[6].mxu0  ;;  %v5114_v26 = vpop.f32.mrb[6].mxu1  ;;  %8557 = vmatprep.mubr.msk.bf16.mxu0 %vm11820_vm4, %v8556_v6  ;;  %8653 = vmatprep.mubr.msk.bf16.mxu1 %vm11820_vm4, %v8556_v6 }
 0x39c   : > { %13617 = vst [vmem:[#allocation48_spill] sm:$0xff] %v11836_v13  ;;  %13618 = vst [vmem:[#allocation49_spill] sm:$0xff] %v11839_v14  ;;  %v11857_v35 = vadd.f32 %v4323_v21, %v11742_v31  ;;  %v11860_v36 = vadd.f32 %v5114_v26, %v11746_v32  ;;  %v4325_v38 = vpop.f32.mrb[7].mxu0  ;;  %v5116_v39 = vpop.f32.mrb[7].mxu1  ;;  %8560 = vmatmul.mubr.msk.bf16.vlgmr.msra.gmra.mrb[32].mxu0 %vm11820_vm4, %v8559_v2  ;;  %8656 = vmatmul.mubr.msk.bf16.vlgmr.msra.gmra.mrb[32].mxu1 %vm11820_vm4, %v8559_v2  ;;  %v13421_v2 = vmax.f32 %v11836_v13, 0.0 }
 0x39d   : > { %13619 = vst [vmem:[#allocation50_spill] sm:$0xff] %v11842_v19  ;;  %13620 = vst [vmem:[#allocation51_spill] sm:$0xff] %v11845_v20  ;;  %v11873_v47 = vadd.f32 %v4325_v38, %v11749_v33  ;;  %v11876_v51 = vadd.f32 %v5116_v39, %v11753_v34  ;;  %6326 = vmatpush1.bf16.msra.mxu0 %v10374_v11  ;;  %6552 = vmatpush1.bf16.msra.mxu1 %v10377_v12  ;;  %v13420_v4 = vmax.f32 %v11839_v14, 0.0 }
 0x39e   : > { %13623 = vst [vmem:[#allocation52_spill] sm:$0xff] %v11857_v35  ;;  %13624 = vst [vmem:[#allocation53_spill] sm:$0xff] %v11860_v36  ;;  %v13419_v6 = vmax.f32 %v11857_v35, 0.0  ;;  %v13418_v8 = vmax.f32 %v11860_v36, 0.0  ;;  %6327 = vmatprep.subr.bf16.mxu0 %v10382_v17  ;;  %6553 = vmatprep.subr.bf16.mxu1 %v10385_v18  ;;  %v13423_v10 = vmax.f32 %v11842_v19, 0.0  ;;  %v13425_v11 = vmax.f32 %v11845_v20, 0.0 }
 0x39f   : > { %13627 = vst [vmem:[#allocation54_spill] sm:$0xff] %v11873_v47  ;;  %13628 = vst [vmem:[#allocation55_spill] sm:$0xff] %v11876_v51  ;;  %v13422_v12 = vmax.f32 %v11873_v47, 0.0  ;;  %v13424_v15 = vmax.f32 %v11876_v51, 0.0  ;;  %v5265_v18 = vadd.s32 %v11738_v29, %v5248_v43  ;;  %v12510_v21 = vrot.slane %v5550_v28, %v11729_v24 }
 0x3a0   : > { %v8565_v16 = vpack.c.bf16 %v13419_v6, %v13421_v2  ;;  %v11895_v17 = vpack.c.bf16 %v13418_v8, %v13420_v4  ;;  %v10386_v8 = vld [vmem:[#allocation14 + $0x240] ss:$16 sps:$4 sm:$0xff]   ;;  %v10389_v6 = vld [vmem:[#allocation14 + $0x248] ss:$16 sps:$4 sm:$0xff]  }
 0x3a1   : > { %v8562_v26 = vpack.c.bf16 %v13422_v12, %v13423_v10  ;;  %v11914_v38 = vpack.c.bf16 %v13424_v15, %v13425_v11  ;;  %v4329_v39 = vpop.f32.mrb[8].mxu0  ;;  %v5120_v43 = vpop.f32.mrb[8].mxu1  ;;  %6328 = vmatpush1.bf16.msra.mxu0 %v10380_v42  ;;  %6554 = vmatpush1.bf16.msra.mxu1 %v10383_v52  ;;  %v10394_v15 = vld [vmem:[#allocation14 + $0x264] ss:$16 sps:$4 sm:$0xff]   ;;  %v10397_v11 = vld [vmem:[#allocation14 + $0x26c] ss:$16 sps:$4 sm:$0xff]   ;;  %vm11934_vm8 = vcmp.lt.s32.totalorder %v5265_v18, %v11758_v37 }
 0x3a2   : > { %v11918_v4 = vadd.f32 %v4329_v39, %v11742_v31  ;;  %v11921_v2 = vadd.f32 %v5120_v43, %v11746_v32  ;;  %v4331_v12 = vpop.f32.mrb[9].mxu0  ;;  %v5122_v10 = vpop.f32.mrb[9].mxu1  ;;  %6329 = vmatprep.subr.bf16.mxu0 %v10388_v57  ;;  %6555 = vmatprep.subr.bf16.mxu1 %v10391_v9  ;;  %v5250_v18 = vadd.s32 48, %v11726_v23  ;;  %vm11984_vm10 = vmpackc.low %vm11950_vm9, %vm11934_vm8 }
 0x3a3   : > { %v11924_v1 = vadd.f32 %v4331_v12, %v11749_v33  ;;  %v11927_v42 = vadd.f32 %v5122_v10, %v11753_v34  ;;  %v4333_v52 = vpop.f32.mrb[10].mxu0  ;;  %v5124_v53 = vpop.f32.mrb[10].mxu1  ;;  %8563 = vmatprep.mubr.msk.bf16.mxu0 %vm11902_vm7, %v8562_v26  ;;  %8659 = vmatprep.mubr.msk.bf16.mxu1 %vm11902_vm7, %v8562_v26  ;;  %v10392_v26 = vld [vmem:[#allocation14 + $0x260] ss:$16 sps:$4 sm:$0xff]  }
 0x3a4   : > { %13631 = vst [vmem:[#allocation56_spill] sm:$0xff] %v11918_v4  ;;  %13632 = vst [vmem:[#allocation57_spill] sm:$0xff] %v11921_v2  ;;  %v11939_v9 = vadd.f32 %v4333_v52, %v11742_v31  ;;  %v11942_v12 = vadd.f32 %v5124_v53, %v11746_v32  ;;  %v4335_v10 = vpop.f32.mrb[11].mxu0  ;;  %v5126_v39 = vpop.f32.mrb[11].mxu1  ;;  %8566 = vmatmul.mubr.msk.bf16.gmra.mrb[36].mxu0 %vm11902_vm7, %v8565_v16  ;;  %8662 = vmatmul.mubr.msk.bf16.gmra.mrb[36].mxu1 %vm11902_vm7, %v8565_v16  ;;  %v10400_v16 = vld [vmem:[#allocation14 + $0x284] ss:$16 sps:$4 sm:$0xff]  }
 0x3a5   : > { %13633 = vst [vmem:[#allocation58_spill] sm:$0xff] %v11924_v1  ;;  %13634 = vst [vmem:[#allocation59_spill] sm:$0xff] %v11927_v42  ;;  %v11955_v52 = vadd.f32 %v4335_v10, %v11749_v33  ;;  %v11958_v53 = vadd.f32 %v5126_v39, %v11753_v34  ;;  %6330 = vmatpush1.bf16.msra.mxu0 %v10386_v8  ;;  %6556 = vmatpush1.bf16.msra.mxu1 %v10389_v6  ;;  %v13438_v60 = vmax.f32 %v11918_v4, 0.0  ;;  %v10403_v10 = vld [vmem:[#allocation14 + $0x28c] ss:$16 sps:$4 sm:$0xff]  }
 0x3a6   : > { %13637 = vst [vmem:[#allocation60_spill] sm:$0xff] %v11939_v9  ;;  %13638 = vst [vmem:[#allocation61_spill] sm:$0xff] %v11942_v12  ;;  %v13437_v63 = vmax.f32 %v11921_v2, 0.0  ;;  %v13435_v22 = vmax.f32 %v11939_v9, 0.0  ;;  %v13436_v62 = vmax.f32 %v11942_v12, 0.0  ;;  %6331 = vmatprep.subr.bf16.mxu0 %v10394_v15  ;;  %6557 = vmatprep.subr.bf16.mxu1 %v10397_v11  ;;  %v13444_v39 = vmax.f32 %v11924_v1, 0.0 }
 0x3a7   : > { %13641 = vst [vmem:[#allocation62_spill] sm:$0xff] %v11955_v52  ;;  %13642 = vst [vmem:[#allocation63_spill] sm:$0xff] %v11958_v53  ;;  %v13446_v8 = vmax.f32 %v11927_v42, 0.0  ;;  %v13443_v6 = vmax.f32 %v11955_v52, 0.0  ;;  %v13445_v59 = vmax.f32 %v11958_v53, 0.0  ;;  %v5267_v11 = vadd.s32 %v11738_v29, %v5250_v18 }
 0x3a8   : > { %v8571_v58 = vpack.c.bf16 %v13435_v22, %v13438_v60  ;;  %v11977_v15 = vpack.c.bf16 %v13436_v62, %v13437_v63  ;;  %v5268_v60 = vadd.s32 %v11738_v29, %v5251_v61  ;;  %v10401_v12 = vld [vmem:[#allocation14 + $0x288] ss:$16 sps:$4 sm:$0xff]   ;;  %v5253_v1 = vadd.s32 72, %v11726_v23 }
 0x3a9   : > { %v8568_v22 = vpack.c.bf16 %v13443_v6, %v13444_v39  ;;  %v11996_v62 = vpack.c.bf16 %v13445_v59, %v13446_v8  ;;  %v4339_v18 = vpop.f32.mrb[12].mxu0  ;;  %v5130_v63 = vpop.f32.mrb[12].mxu1  ;;  %6332 = vmatpush1.bf16.msra.mxu0 %v10392_v26  ;;  %6558 = vmatpush1.bf16.msra.mxu1 %v10395_v0  ;;  %v10406_v59 = vld [vmem:[#allocation14 + $0x2a4] ss:$16 sps:$4 sm:$0xff]   ;;  %v10409_v8 = vld [vmem:[#allocation14 + $0x2ac] ss:$16 sps:$4 sm:$0xff]   ;;  %vm12016_vm11 = vcmp.lt.s32.totalorder %v5267_v11, %v11758_v37 }
 0x3aa   : > { %v12000_v9 = vadd.f32 %v4339_v18, %v11742_v31  ;;  %v12003_v52 = vadd.f32 %v5130_v63, %v11746_v32  ;;  %v4341_v6 = vpop.f32.mrb[13].mxu0  ;;  %v5132_v39 = vpop.f32.mrb[13].mxu1  ;;  %6333 = vmatprep.subr.bf16.mxu0 %v10400_v16  ;;  %6559 = vmatprep.subr.bf16.mxu1 %v10403_v10  ;;  %v13649_v63 = vmov 0  ;;  %v5252_v11 = vadd.s32 64, %v11726_v23  ;;  %v10407_v42 = vld [vmem:[#allocation14 + $0x2a8] ss:$16 sps:$4 sm:$0xff]  }
 0x3ab   : > { %v12006_v53 = vadd.f32 %v4341_v6, %v11749_v33  ;;  %v12009_v0 = vadd.f32 %v5132_v39, %v11753_v34  ;;  %v4343_v61 = vpop.f32.mrb[14].mxu0  ;;  %v5134_v26 = vpop.f32.mrb[14].mxu1  ;;  %8569 = vmatprep.mubr.msk.bf16.mxu0 %vm11984_vm10, %v8568_v22  ;;  %8665 = vmatprep.mubr.msk.bf16.mxu1 %vm11984_vm10, %v8568_v22  ;;  %v13650_v63 = vsel %vm12016_vm11, 4294967295, %v13649_v63  ;;  %v10404_v22 = vld [vmem:[#allocation14 + $0x2a0] ss:$16 sps:$4 sm:$0xff]   ;;  %vm12032_vm12 = vcmp.lt.s32.totalorder %v5268_v60, %v11758_v37 }
 0x3ac   : > { %13645 = vst [vmem:[#allocation64_spill] sm:$0xff] %v12000_v9  ;;  %13646 = vst [vmem:[#allocation65_spill] sm:$0xff] %v12003_v52  ;;  %v12021_v16 = vadd.f32 %v4343_v61, %v11742_v31  ;;  %v12024_v10 = vadd.f32 %v5134_v26, %v11746_v32  ;;  %v4345_v39 = vpop.f32.mrb[15].mxu0  ;;  %v5136_v6 = vpop.f32.mrb[15].mxu1  ;;  %8572 = vmatmul.mubr.msk.bf16.gmra.mrb[40].mxu0 %vm11984_vm10, %v8571_v58  ;;  %8668 = vmatmul.mubr.msk.bf16.gmra.mrb[40].mxu1 %vm11984_vm10, %v8571_v58  ;;  %v13653_v18 = vmov 0  ;;  %v13456_v2 = vmax.f32 %v12000_v9, 0.0 }
 0x3ad   : > { %13647 = vst [vmem:[#allocation66_spill] sm:$0xff] %v12006_v53  ;;  %13648 = vst [vmem:[#allocation67_spill] sm:$0xff] %v12009_v0  ;;  %v13654_v18 = vsel %vm12032_vm12, 4294967295, %v13653_v18  ;;  %v12037_v61 = vadd.f32 %v4345_v39, %v11749_v33  ;;  %v12040_v26 = vadd.f32 %v5136_v6, %v11753_v34  ;;  %6334 = vmatpush1.bf16.msra.mxu0 %v10398_v25  ;;  %6560 = vmatpush1.bf16.msra.mxu1 %v10401_v12  ;;  %v10412_v58 = vld [vmem:[#allocation14 + $0x2c4] ss:$16 sps:$4 sm:$0xff]  }
 0x3ae   : > { %13651 = vst [vmem:[#allocation68_spill] sm:$0xff] %v12021_v16  ;;  %13652 = vst [vmem:[#allocation69_spill] sm:$0xff] %v12024_v10  ;;  %v13455_v60 = vmax.f32 %v12021_v16, 0.0  ;;  %v13457_v51 = vmax.f32 %v12024_v10, 0.0  ;;  %6335 = vmatprep.subr.bf16.mxu0 %v10406_v59  ;;  %6561 = vmatprep.subr.bf16.mxu1 %v10409_v8  ;;  %v10415_v39 = vld [vmem:[#allocation14 + $0x2cc] ss:$16 sps:$4 sm:$0xff]   ;;  %v5269_v8 = vadd.s32 %v11738_v29, %v5252_v11 }
 0x3af   : > { %13655 = vst [vmem:[#allocation70_spill] sm:$0xff] %v12037_v61  ;;  %13656 = vst [vmem:[#allocation71_spill] sm:$0xff] %v12040_v26  ;;  %v13464_v6 = vmax.f32 %v12006_v53, 0.0  ;;  %v13463_v12 = vmax.f32 %v12037_v61, 0.0  ;;  %v13465_v47 = vmax.f32 %v12040_v26, 0.0  ;;  %v13657_v36 = vmax.f32 %v12003_v52, 0.0 }
 0x3b0   : > { %v8577_v4 = vpack.c.bf16 %v13455_v60, %v13456_v2  ;;  %vm12066_vm13 = vmpackc.low %vm12032_vm12, %vm12016_vm11  ;;  %v13660_v2 = vmax.f32 %v12009_v0, 0.0  ;;  %v5270_v10 = vadd.s32 %v11738_v29, %v5253_v1  ;;  %v10410_v16 = vld [vmem:[#allocation14 + $0x2c0] ss:$16 sps:$4 sm:$0xff]   ;;  %v10413_v52 = vld [vmem:[#allocation14 + $0x2c8] ss:$16 sps:$4 sm:$0xff]   ;;  %vm12098_vm14 = vcmp.lt.s32.totalorder %v5269_v8, %v11758_v37 }
 0x3b1   : > { %v12059_v59 = vpack.c.bf16 %v13457_v51, %v13657_v36  ;;  %v8574_v60 = vpack.c.bf16 %v13463_v12, %v13464_v6  ;;  %v4349_v11 = vpop.f32.mrb[16].mxu0  ;;  %v5140_v51 = vpop.f32.mrb[16].mxu1  ;;  %6336 = vmatpush1.bf16.msra.mxu0 %v10404_v22  ;;  %6562 = vmatpush1.bf16.msra.mxu1 %v10407_v42  ;;  %v5254_v8 = vadd.s32 80, %v11726_v23  ;;  %v10419_v0 = vld [vmem:[#allocation14 + $0x2e8] ss:$16 sps:$4 sm:$0xff]   ;;  %v5255_v53 = vadd.s32 88, %v11726_v23 }
 0x3b2   : > { %v12078_v36 = vpack.c.bf16 %v13465_v47, %v13660_v2  ;;  %v12082_v9 = vadd.f32 %v4349_v11, %v11742_v31  ;;  %v12085_v61 = vadd.f32 %v5140_v51, %v11746_v32  ;;  %v4351_v12 = vpop.f32.mrb[17].mxu0  ;;  %v5142_v6 = vpop.f32.mrb[17].mxu1  ;;  %6337 = vmatprep.subr.bf16.mxu0 %v10412_v58  ;;  %6563 = vmatprep.subr.bf16.mxu1 %v10415_v39  ;;  %v10418_v2 = vld [vmem:[#allocation14 + $0x2e4] ss:$16 sps:$4 sm:$0xff]   ;;  %v10421_v47 = vld [vmem:[#allocation14 + $0x2ec] ss:$16 sps:$4 sm:$0xff]  }
 0x3b3   : > { %v12088_v26 = vadd.f32 %v4351_v12, %v11749_v33  ;;  %v12091_v42 = vadd.f32 %v5142_v6, %v11753_v34  ;;  %v4353_v1 = vpop.f32.mrb[18].mxu0  ;;  %v5144_v22 = vpop.f32.mrb[18].mxu1  ;;  %8575 = vmatprep.mubr.msk.bf16.mxu0 %vm12066_vm13, %v8574_v60  ;;  %8671 = vmatprep.mubr.msk.bf16.mxu1 %vm12066_vm13, %v8574_v60  ;;  %v13665_v51 = vmov 0  ;;  %v10416_v60 = vld [vmem:[#allocation14 + $0x2e0] ss:$16 sps:$4 sm:$0xff]   ;;  %vm12114_vm15 = vcmp.lt.s32.totalorder %v5270_v10, %v11758_v37 }
 0x3b4   : > { %13661 = vst [vmem:[#allocation72_spill] sm:$0xff] %v12082_v9  ;;  %13662 = vst [vmem:[#allocation73_spill] sm:$0xff] %v12085_v61  ;;  %v13666_v51 = vsel %vm12098_vm14, 4294967295, %v13665_v51  ;;  %v12103_v58 = vadd.f32 %v4353_v1, %v11742_v31  ;;  %v12106_v39 = vadd.f32 %v5144_v22, %v11746_v32  ;;  %v4355_v6 = vpop.f32.mrb[19].mxu0  ;;  %v5146_v12 = vpop.f32.mrb[19].mxu1  ;;  %8578 = vmatmul.mubr.msk.bf16.gmra.mrb[44].mxu0 %vm12066_vm13, %v8577_v4  ;;  %8674 = vmatmul.mubr.msk.bf16.gmra.mrb[44].mxu1 %vm12066_vm13, %v8577_v4  ;;  %v13669_v11 = vmov 0 }
 0x3b5   : > { %13663 = vst [vmem:[#allocation74_spill] sm:$0xff] %v12088_v26  ;;  %13664 = vst [vmem:[#allocation75_spill] sm:$0xff] %v12091_v42  ;;  %v13670_v11 = vsel %vm12114_vm15, 4294967295, %v13669_v11  ;;  %v12119_v1 = vadd.f32 %v4355_v6, %v11749_v33  ;;  %v12122_v22 = vadd.f32 %v5146_v12, %v11753_v34  ;;  %6338 = vmatpush1.bf16.msra.mxu0 %v10410_v16  ;;  %6564 = vmatpush1.bf16.msra.mxu1 %v10413_v52  ;;  %v10424_v4 = vld [vmem:[#allocation14 + $0x304] ss:$16 sps:$4 sm:$0xff]  }
 0x3b6   : > { %13667 = vst [vmem:[#allocation76_spill] sm:$0xff] %v12103_v58  ;;  %13668 = vst [vmem:[#allocation77_spill] sm:$0xff] %v12106_v39  ;;  %v13475_v35 = vmax.f32 %v12082_v9, 0.0  ;;  %v13474_v10 = vmax.f32 %v12103_v58, 0.0  ;;  %v13476_v19 = vmax.f32 %v12106_v39, 0.0  ;;  %6339 = vmatprep.subr.bf16.mxu0 %v10418_v2  ;;  %6565 = vmatprep.subr.bf16.mxu1 %v10421_v47  ;;  %v13483_v12 = vmax.f32 %v12088_v26, 0.0 }
 0x3b7   : > { %13671 = vst [vmem:[#allocation78_spill] sm:$0xff] %v12119_v1  ;;  %13672 = vst [vmem:[#allocation79_spill] sm:$0xff] %v12122_v22  ;;  %v10427_v6 = vld [vmem:[#allocation14 + $0x30c] ss:$16 sps:$4 sm:$0xff]   ;;  %v13482_v52 = vmax.f32 %v12119_v1, 0.0  ;;  %v13484_v14 = vmax.f32 %v12122_v22, 0.0  ;;  %v5271_v47 = vadd.s32 %v11738_v29, %v5254_v8  ;;  %v5272_v39 = vadd.s32 %v11738_v29, %v5255_v53 }
 0x3b8   : > { %v8583_v20 = vpack.c.bf16 %v13474_v10, %v13475_v35  ;;  %v13673_v13 = vmax.f32 %v12085_v61, 0.0  ;;  %vm12148_vm0 = vmpackc.low %vm12114_vm15, %vm12098_vm14  ;;  %v13676_v35 = vmax.f32 %v12091_v42, 0.0  ;;  %v10422_v58 = vld [vmem:[#allocation14 + $0x300] ss:$16 sps:$4 sm:$0xff]   ;;  %v10425_v61 = vld [vmem:[#allocation14 + $0x308] ss:$16 sps:$4 sm:$0xff]   ;;  %v12514_v16 = vrot.slane %v5550_v28, %v11733_v27 }
 0x3b9   : > { %v8580_v10 = vpack.c.bf16 %v13482_v52, %v13483_v12  ;;  %v4359_v8 = vpop.f32.mrb[20].mxu0  ;;  %6340 = vmatpush1.bf16.msra.mxu0 %v10416_v60  ;;  %6566 = vmatpush1.bf16.msra.mxu1 %v10419_v0  ;;  %vm12180_vm1 = vcmp.lt.s32.totalorder %v5271_v47, %v11758_v37  ;;  %v5256_v47 = vadd.s32 96, %v11726_v23  ;;  %vm12196_vm6 = vcmp.lt.s32.totalorder %v5272_v39, %v11758_v37  ;;  %v10431_v42 = vld [vmem:[#allocation14 + $0x328] ss:$16 sps:$4 sm:$0xff]  }
 0x3ba   : > { %v12141_v2 = vpack.c.bf16 %v13476_v19, %v13673_v13  ;;  %v12160_v13 = vpack.c.bf16 %v13484_v14, %v13676_v35  ;;  %v5150_v19 = vpop.f32.mrb[20].mxu1  ;;  %v12164_v9 = vadd.f32 %v4359_v8, %v11742_v31  ;;  %v4361_v52 = vpop.f32.mrb[21].mxu0  ;;  %6341 = vmatprep.subr.bf16.mxu0 %v10424_v4  ;;  %6567 = vmatprep.subr.bf16.mxu1 %v10427_v6  ;;  %v10430_v35 = vld [vmem:[#allocation14 + $0x324] ss:$16 sps:$4 sm:$0xff]   ;;  %v10433_v14 = vld [vmem:[#allocation14 + $0x32c] ss:$16 sps:$4 sm:$0xff]   ;;  %vm12230_vm5 = vmpackc.low %vm12196_vm6, %vm12180_vm1 }
 0x3bb   : > { %v12167_v1 = vadd.f32 %v5150_v19, %v11746_v32  ;;  %v5152_v12 = vpop.f32.mrb[21].mxu1  ;;  %v12170_v22 = vadd.f32 %v4361_v52, %v11749_v33  ;;  %v4363_v53 = vpop.f32.mrb[22].mxu0  ;;  %8581 = vmatprep.mubr.msk.bf16.mxu0 %vm12148_vm0, %v8580_v10  ;;  %8677 = vmatprep.mubr.msk.bf16.mxu1 %vm12148_vm0, %v8580_v10  ;;  %v13681_v19 = vmov 0  ;;  %v10428_v10 = vld [vmem:[#allocation14 + $0x320] ss:$16 sps:$4 sm:$0xff]   ;;  %v13686_v8 = vmov 0 }
 0x3bc   : > { %13677 = vst [vmem:[#allocation80_spill] sm:$0xff] %v12164_v9  ;;  %v12173_v0 = vadd.f32 %v5152_v12, %v11753_v34  ;;  %v5154_v60 = vpop.f32.mrb[22].mxu1  ;;  %v13682_v19 = vsel %vm12180_vm1, 4294967295, %v13681_v19  ;;  %v12185_v4 = vadd.f32 %v4363_v53, %v11742_v31  ;;  %v4365_v12 = vpop.f32.mrb[23].mxu0  ;;  %8584 = vmatmul.mubr.msk.bf16.gmra.mrb[48].mxu0 %vm12148_vm0, %v8583_v20  ;;  %8680 = vmatmul.mubr.msk.bf16.gmra.mrb[48].mxu1 %vm12148_vm0, %v8583_v20  ;;  %v13687_v8 = vsel %vm12196_vm6, 4294967295, %v13686_v8 }
 0x3bd   : > { %13678 = vst [vmem:[#allocation81_spill] sm:$0xff] %v12167_v1  ;;  %13679 = vst [vmem:[#allocation82_spill] sm:$0xff] %v12170_v22  ;;  %v12188_v6 = vadd.f32 %v5154_v60, %v11746_v32  ;;  %v5156_v52 = vpop.f32.mrb[23].mxu1  ;;  %v12201_v53 = vadd.f32 %v4365_v12, %v11749_v33  ;;  %6342 = vmatpush1.bf16.msra.mxu0 %v10422_v58  ;;  %6568 = vmatpush1.bf16.msra.mxu1 %v10425_v61  ;;  %v5257_v26 = vadd.s32 104, %v11726_v23  ;;  %v10436_v20 = vld [vmem:[#allocation14 + $0x344] ss:$16 sps:$4 sm:$0xff]  }
 0x3be   : > { %13680 = vst [vmem:[#allocation83_spill] sm:$0xff] %v12173_v0  ;;  %13683 = vst [vmem:[#allocation84_spill] sm:$0xff] %v13682_v19  ;;  %v12204_v60 = vadd.f32 %v5156_v52, %v11753_v34  ;;  %v13498_v56 = vmax.f32 %v12164_v9, 0.0  ;;  %v13497_v39 = vmax.f32 %v12185_v4, 0.0  ;;  %6343 = vmatprep.subr.bf16.mxu0 %v10430_v35  ;;  %6569 = vmatprep.subr.bf16.mxu1 %v10433_v14  ;;  %v10439_v12 = vld [vmem:[#allocation14 + $0x34c] ss:$16 sps:$4 sm:$0xff]  }
 0x3bf   : > { %13684 = vst [vmem:[#allocation85_spill] sm:$0xff] %v12185_v4  ;;  %13685 = vst [vmem:[#allocation86_spill] sm:$0xff] %v12188_v6  ;;  %v13499_v50 = vmax.f32 %v12188_v6, 0.0  ;;  %v13506_v52 = vmax.f32 %v12170_v22, 0.0  ;;  %v13505_v61 = vmax.f32 %v12201_v53, 0.0  ;;  %v13691_v45 = vmax.f32 %v12167_v1, 0.0 }
 0x3c0   : > { %13688 = vst [vmem:[#allocation87_spill] sm:$0xff] %v13687_v8  ;;  %13689 = vst [vmem:[#allocation88_spill] sm:$0xff] %v12201_v53  ;;  %v13507_v49 = vmax.f32 %v12204_v60, 0.0  ;;  %v8589_v55 = vpack.c.bf16 %v13497_v39, %v13498_v56  ;;  %v5273_v14 = vadd.s32 %v11738_v29, %v5256_v47  ;;  %v13694_v56 = vmax.f32 %v12173_v0, 0.0  ;;  %v10434_v4 = vld [vmem:[#allocation14 + $0x340] ss:$16 sps:$4 sm:$0xff]  }
 0x3c1   : > { %13690 = vst [vmem:[#allocation89_spill] sm:$0xff] %v12204_v60  ;;  %v12223_v35 = vpack.c.bf16 %v13499_v50, %v13691_v45  ;;  %v8586_v39 = vpack.c.bf16 %v13505_v61, %v13506_v52  ;;  %v4369_v47 = vpop.f32.mrb[24].mxu0  ;;  %v5160_v50 = vpop.f32.mrb[24].mxu1  ;;  %6344 = vmatpush1.bf16.msra.mxu0 %v10428_v10  ;;  %6570 = vmatpush1.bf16.msra.mxu1 %v10431_v42  ;;  %v10437_v1 = vld [vmem:[#allocation14 + $0x348] ss:$16 sps:$4 sm:$0xff]   ;;  %v5259_v22 = vadd.s32 120, %v11726_v23 }
 0x3c2   : > { %v12242_v45 = vpack.c.bf16 %v13507_v49, %v13694_v56  ;;  %v5274_v6 = vadd.s32 %v11738_v29, %v5257_v26  ;;  %v12246_v9 = vadd.f32 %v4369_v47, %v11742_v31  ;;  %v12249_v53 = vadd.f32 %v5160_v50, %v11746_v32  ;;  %v4371_v61 = vpop.f32.mrb[25].mxu0  ;;  %v5162_v52 = vpop.f32.mrb[25].mxu1  ;;  %6345 = vmatprep.subr.bf16.mxu0 %v10436_v20  ;;  %v10442_v56 = vld [vmem:[#allocation14 + $0x364] ss:$16 sps:$4 sm:$0xff]   ;;  %v10445_v49 = vld [vmem:[#allocation14 + $0x36c] ss:$16 sps:$4 sm:$0xff]  }
 0x3c3   : > { %6571 = vmatprep.subr.bf16.mxu1 %v10439_v12  ;;  %v12252_v60 = vadd.f32 %v4371_v61, %v11749_v33  ;;  %v12255_v42 = vadd.f32 %v5162_v52, %v11753_v34  ;;  %v4373_v26 = vpop.f32.mrb[26].mxu0  ;;  %v5164_v10 = vpop.f32.mrb[26].mxu1  ;;  %8587 = vmatprep.mubr.msk.bf16.mxu0 %vm12230_vm5, %v8586_v39  ;;  %vm12262_vm6 = vcmp.lt.s32.totalorder %v5273_v14, %v11758_v37  ;;  %v13699_v50 = vmov 0  ;;  %v10443_v0 = vld [vmem:[#allocation14 + $0x368] ss:$16 sps:$4 sm:$0xff]  }
 0x3c4   : > { %13695 = vst [vmem:[#allocation90_spill] sm:$0xff] %v12246_v9  ;;  %13696 = vst [vmem:[#allocation91_spill] sm:$0xff] %v12249_v53  ;;  %8683 = vmatprep.mubr.msk.bf16.mxu1 %vm12230_vm5, %v8586_v39  ;;  %v13700_v50 = vsel %vm12262_vm6, 4294967295, %v13699_v50  ;;  %v12267_v20 = vadd.f32 %v4373_v26, %v11742_v31  ;;  %v12270_v12 = vadd.f32 %v5164_v10, %v11746_v32  ;;  %v4375_v52 = vpop.f32.mrb[27].mxu0  ;;  %v5166_v61 = vpop.f32.mrb[27].mxu1  ;;  %8590 = vmatmul.mubr.msk.bf16.gmra.mrb[52].mxu0 %vm12230_vm5, %v8589_v55  ;;  %v13703_v47 = vmov 0 }
 0x3c5   : > { %13697 = vst [vmem:[#allocation92_spill] sm:$0xff] %v12252_v60  ;;  %13698 = vst [vmem:[#allocation93_spill] sm:$0xff] %v12255_v42  ;;  %8686 = vmatmul.mubr.msk.bf16.gmra.mrb[52].mxu1 %vm12230_vm5, %v8589_v55  ;;  %v10440_v39 = vld [vmem:[#allocation14 + $0x360] ss:$16 sps:$4 sm:$0xff]   ;;  %v5258_v14 = vadd.s32 112, %v11726_v23  ;;  %vm12278_vm1 = vcmp.lt.s32.totalorder %v5274_v6, %v11758_v37  ;;  %v12283_v26 = vadd.f32 %v4375_v52, %v11749_v33  ;;  %6346 = vmatpush1.bf16.msra.mxu0 %v10434_v4 }
 0x3c6   : > { %13701 = vst [vmem:[#allocation94_spill] sm:$0xff] %v12267_v20  ;;  %13702 = vst [vmem:[#allocation95_spill] sm:$0xff] %v12270_v12  ;;  %v13704_v47 = vsel %vm12278_vm1, 4294967295, %v13703_v47  ;;  %v12286_v10 = vadd.f32 %v5166_v61, %v11753_v34  ;;  %6572 = vmatpush1.bf16.msra.mxu1 %v10437_v1  ;;  %v10448_v55 = vld [vmem:[#allocation14 + $0x384] ss:$16 sps:$4 sm:$0xff]   ;;  %v13525_v44 = vmax.f32 %v12246_v9, 0.0  ;;  %6347 = vmatprep.subr.bf16.mxu0 %v10442_v56 }
 0x3c7   : > { %13705 = vst [vmem:[#allocation96_spill] sm:$0xff] %v12283_v26  ;;  %v13524_v6 = vmax.f32 %v12267_v20, 0.0  ;;  %v13526_v40 = vmax.f32 %v12270_v12, 0.0  ;;  %6573 = vmatprep.subr.bf16.mxu1 %v10445_v49  ;;  %v10451_v52 = vld [vmem:[#allocation14 + $0x38c] ss:$16 sps:$4 sm:$0xff]   ;;  %v13533_v61 = vmax.f32 %v12252_v60, 0.0  ;;  %v5275_v49 = vadd.s32 %v11738_v29, %v5258_v14  ;;  %vm12312_vm12 = vmpackc.low %vm12278_vm1, %vm12262_vm6 }
 0x3c8   : > { %13706 = vst [vmem:[#allocation97_spill] sm:$0xff] %v12286_v10  ;;  %v13532_v1 = vmax.f32 %v12283_v26, 0.0  ;;  %v13534_v8 = vmax.f32 %v12286_v10, 0.0  ;;  %v13707_v19 = vmax.f32 %v12249_v53, 0.0  ;;  %v5276_v12 = vadd.s32 %v11738_v29, %v5259_v22  ;;  %v10446_v20 = vld [vmem:[#allocation14 + $0x380] ss:$16 sps:$4 sm:$0xff]  }
 0x3c9   : > { %v8595_v41 = vpack.c.bf16 %v13524_v6, %v13525_v44  ;;  %v13710_v44 = vmax.f32 %v12255_v42, 0.0  ;;  %v4379_v14 = vpop.f32.mrb[28].mxu0  ;;  %6348 = vmatpush1.bf16.msra.mxu0 %v10440_v39  ;;  %v10449_v53 = vld [vmem:[#allocation14 + $0x388] ss:$16 sps:$4 sm:$0xff]   ;;  %vm12344_vm11 = vcmp.lt.s32.totalorder %v5275_v49, %v11758_v37 }
 0x3ca   : > { %v12305_v56 = vpack.c.bf16 %v13526_v40, %v13707_v19  ;;  %v8592_v6 = vpack.c.bf16 %v13532_v1, %v13533_v61  ;;  %v5170_v40 = vpop.f32.mrb[28].mxu1  ;;  %6574 = vmatpush1.bf16.msra.mxu1 %v10443_v0  ;;  %v12328_v9 = vadd.f32 %v4379_v14, %v11742_v31  ;;  %v4381_v1 = vpop.f32.mrb[29].mxu0  ;;  %6349 = vmatprep.subr.bf16.mxu0 %v10448_v55  ;;  %v10455_v49 = vld [vmem:[#allocation14 + $0x3a8] ss:$16 sps:$4 sm:$0xff]   ;;  %v10460_v14 = vld [vmem:[#allocation14 + $0x3c4] ss:$16 sps:$4 sm:$0xff]  }
 0x3cb   : > { %v12324_v19 = vpack.c.bf16 %v13534_v8, %v13710_v44  ;;  %v12331_v26 = vadd.f32 %v5170_v40, %v11746_v32  ;;  %v5172_v61 = vpop.f32.mrb[29].mxu1  ;;  %6575 = vmatprep.subr.bf16.mxu1 %v10451_v52  ;;  %v10454_v44 = vld [vmem:[#allocation14 + $0x3a4] ss:$16 sps:$4 sm:$0xff]   ;;  %v10457_v8 = vld [vmem:[#allocation14 + $0x3ac] ss:$16 sps:$4 sm:$0xff]   ;;  %v12334_v10 = vadd.f32 %v4381_v1, %v11749_v33  ;;  %v4383_v29 = vpop.f32.mrb[30].mxu0  ;;  %vm12359_vm1 = vcmp.lt.s32.totalorder %v5276_v12, %v11758_v37 }
 0x3cc   : > { %13711 = vst [vmem:[#allocation98_spill] sm:$0xff] %v12328_v9  ;;  %v12337_v0 = vadd.f32 %v5172_v61, %v11753_v34  ;;  %v5174_v22 = vpop.f32.mrb[30].mxu1  ;;  %8593 = vmatprep.mubr.msk.bf16.mxu0 %vm12312_vm12, %v8592_v6  ;;  %8689 = vmatprep.mubr.msk.bf16.mxu1 %vm12312_vm12, %v8592_v6  ;;  %v12349_v39 = vadd.f32 %v4383_v29, %v11742_v31  ;;  %v4385_v52 = vpop.f32.mrb[31].mxu0  ;;  %v13545_v29 = vmax.f32 %v12328_v9, 0.0  ;;  %vm12389_vm6 = vmpackc.low %vm12359_vm1, %vm12344_vm11 }
 0x3cd   : > { %13712 = vst [vmem:[#allocation99_spill] sm:$0xff] %v12331_v26  ;;  %13713 = vst [vmem:[#allocation100_spill] sm:$0xff] %v12334_v10  ;;  %v12352_v55 = vadd.f32 %v5174_v22, %v11746_v32  ;;  %v5176_v61 = vpop.f32.mrb[31].mxu1  ;;  %8596 = vmatmul.mubr.msk.bf16.gmra.mrb[56].mxu0 %vm12312_vm12, %v8595_v41  ;;  %8692 = vmatmul.mubr.msk.bf16.gmra.mrb[56].mxu1 %vm12312_vm12, %v8595_v41  ;;  %v12364_v1 = vadd.f32 %v4385_v52, %v11749_v33  ;;  %v10452_v32 = vld [vmem:[#allocation14 + $0x3a0] ss:$16 sps:$4 sm:$0xff]   ;;  %v13544_v41 = vmax.f32 %v12331_v26, 0.0 }
 0x3ce   : > { %13714 = vst [vmem:[#allocation101_spill] sm:$0xff] %v12337_v0  ;;  %13717 = vst [vmem:[#allocation102_spill] sm:$0xff] %v12349_v39  ;;  %v12367_v31 = vadd.f32 %v5176_v61, %v11753_v34  ;;  %6350 = vmatpush1.bf16.msra.mxu0 %v10446_v20  ;;  %6576 = vmatpush1.bf16.msra.mxu1 %v10449_v53  ;;  %v13542_v37 = vmax.f32 %v12349_v39, 0.0  ;;  %v10463_v33 = vld [vmem:[#allocation14 + $0x3cc] ss:$16 sps:$4 sm:$0xff]   ;;  %v13550_v22 = vmax.f32 %v12334_v10, 0.0 }
 0x3cf   : > { %13718 = vst [vmem:[#allocation103_spill] sm:$0xff] %v12352_v55  ;;  %13721 = vst [vmem:[#allocation104_spill] sm:$0xff] %v12364_v1  ;;  %v13543_v12 = vmax.f32 %v12352_v55, 0.0  ;;  %6351 = vmatprep.subr.bf16.mxu0 %v10454_v44  ;;  %6577 = vmatprep.subr.bf16.mxu1 %v10457_v8  ;;  %v13549_v34 = vmax.f32 %v12337_v0, 0.0  ;;  %v13548_v53 = vmax.f32 %v12364_v1, 0.0 }
 0x3d0   : > { %13722 = vst [vmem:[#allocation105_spill] sm:$0xff] %v12367_v31  ;;  %v13547_v20 = vmax.f32 %v12367_v31, 0.0  ;;  %v8601_v52 = vpack.c.bf16 %v13542_v37, %v13545_v29  ;;  %v10466_v29 = vld [vmem:[#allocation14 + $0x3e4] ss:$16 sps:$4 sm:$0xff]   ;;  %v10469_v1 = vld [vmem:[#allocation14 + $0x3ec] ss:$16 sps:$4 sm:$0xff]  }
 0x3d1   : > { %v8649_v44 = vpack.c.bf16 %v13543_v12, %v13544_v41  ;;  %v8598_v61 = vpack.c.bf16 %v13548_v53, %v13550_v22  ;;  %v10458_v12 = vld [vmem:[#allocation14 + $0x3c0] ss:$16 sps:$4 sm:$0xff]   ;;  %v10461_v41 = vld [vmem:[#allocation14 + $0x3c8] ss:$16 sps:$4 sm:$0xff]  }
 0x3d2   : > { %v8646_v37 = vpack.c.bf16 %v13547_v20, %v13549_v34  ;;  %6352 = vmatpush1.bf16.msra.mxu0 %v10452_v32  ;;  %6578 = vmatpush1.bf16.msra.mxu1 %v10455_v49  ;;  %v10464_v32 = vld [vmem:[#allocation14 + $0x3e0] ss:$16 sps:$4 sm:$0xff]   ;;  %v10467_v49 = vld [vmem:[#allocation14 + $0x3e8] ss:$16 sps:$4 sm:$0xff]  }
 0x3d3   : > { %6353 = vmatprep.subr.bf16.mxu0 %v10460_v14  ;;  %6579 = vmatprep.subr.bf16.mxu1 %v10463_v33 }
 0x3d4   : > { %8599 = vmatprep.mubr.msk.bf16.mxu0 %vm12389_vm6, %v8598_v61  ;;  %8695 = vmatprep.mubr.msk.bf16.mxu1 %vm12389_vm6, %v8598_v61 }
 0x3d5   : > { %8602 = vmatmul.mubr.msk.bf16.gmra.mrb[60].mxu0 %vm12389_vm6, %v8601_v52  ;;  %8698 = vmatmul.mubr.msk.bf16.gmra.mrb[60].mxu1 %vm12389_vm6, %v8601_v52 }
 0x3d6   : > { %6354 = vmatpush1.bf16.msra.mxu0 %v10458_v12  ;;  %8605 = vmatprep.mubr.msk.bf16.mxu0 %vm11820_vm4, %v11832_v7 }
 0x3d7   : > { %6580 = vmatpush1.bf16.msra.mxu1 %v10461_v41  ;;  %8701 = vmatprep.mubr.msk.bf16.mxu1 %vm11820_vm4, %v11832_v7  ;;  %v12507_v7 = vrot.slane %v5550_v28, %v13726_v5 }
 0x3d8   : > { %6355 = vmatprep.subr.bf16.mxu0 %v10466_v29  ;;  %6581 = vmatprep.subr.bf16.mxu1 %v10469_v1 }
 0x3da   : > { %6356 = vmatpush1.bf16.msra.mxu0 %v10464_v32 }
 0x3db   : > { %6582 = vmatpush1.bf16.msra.mxu1 %v10467_v49 }
 0x3dd   : > { %8608 = vmatmul.mubr.msk.bf16.vlgmr.msra.gmra.mrb[32].mxu0 %vm11820_vm4, %v11813_v3 }
 0x3de   : > { %8704 = vmatmul.mubr.msk.bf16.vlgmr.msra.gmra.mrb[32].mxu1 %vm11820_vm4, %v11813_v3  ;;  %8611 = vmatprep.mubr.msk.bf16.mxu0 %vm11902_vm7, %v11914_v38  ;;  %vm13561_vm4 = vcmask 7168  }
 0x3df   : > { %8707 = vmatprep.mubr.msk.bf16.mxu1 %vm11902_vm7, %v11914_v38 }
 0x3e5   : > { %8614 = vmatmul.mubr.msk.bf16.gmra.mrb[36].mxu0 %vm11902_vm7, %v11895_v17 }
 0x3e6   : > { %8710 = vmatmul.mubr.msk.bf16.gmra.mrb[36].mxu1 %vm11902_vm7, %v11895_v17  ;;  %8617 = vmatprep.mubr.msk.bf16.mxu0 %vm11984_vm10, %v11996_v62  ;;  %vm13729_vm7 = vnez %v13650_v63 }
 0x3e7   : > { %8713 = vmatprep.mubr.msk.bf16.mxu1 %vm11984_vm10, %v11996_v62  ;;  %v13725_v62 = vsub.s32 2, %v11726_v23 }
 0x3e9   : > { %v12503_v3 = vrot.slane %v5550_v28, %v13725_v62 }
 0x3ed   : > { %8620 = vmatmul.mubr.msk.bf16.gmra.mrb[40].mxu0 %vm11984_vm10, %v11977_v15 }
 0x3ee   : > { %8716 = vmatmul.mubr.msk.bf16.gmra.mrb[40].mxu1 %vm11984_vm10, %v11977_v15  ;;  %8623 = vmatprep.mubr.msk.bf16.mxu0 %vm12066_vm13, %v12078_v36  ;;  %vm13730_vm10 = vnez %v13654_v18 }
 0x3ef   : > { %8719 = vmatprep.mubr.msk.bf16.mxu1 %vm12066_vm13, %v12078_v36 }
 0x3f5   : > { %8626 = vmatmul.mubr.msk.bf16.gmra.mrb[44].mxu0 %vm12066_vm13, %v12059_v59 }
 0x3f6   : > { %8722 = vmatmul.mubr.msk.bf16.gmra.mrb[44].mxu1 %vm12066_vm13, %v12059_v59  ;;  %8629 = vmatprep.mubr.msk.bf16.mxu0 %vm12148_vm0, %v12160_v13  ;;  %vm13732_vm13 = vnez %v13626_v46 }
 0x3f7   : > { %8725 = vmatprep.mubr.msk.bf16.mxu1 %vm12148_vm0, %v12160_v13 }
 0x3fd   : > { %8632 = vmatmul.mubr.msk.bf16.gmra.mrb[48].mxu0 %vm12148_vm0, %v12141_v2 }
 0x3fe   : > { %8728 = vmatmul.mubr.msk.bf16.gmra.mrb[48].mxu1 %vm12148_vm0, %v12141_v2  ;;  %8635 = vmatprep.mubr.msk.bf16.mxu0 %vm12230_vm5, %v12242_v45 }
 0x3ff   : > { %8731 = vmatprep.mubr.msk.bf16.mxu1 %vm12230_vm5, %v12242_v45 }
 0x405   : > { %8638 = vmatmul.mubr.msk.bf16.gmra.mrb[52].mxu0 %vm12230_vm5, %v12223_v35 }
 0x406   : > { %8734 = vmatmul.mubr.msk.bf16.gmra.mrb[52].mxu1 %vm12230_vm5, %v12223_v35  ;;  %8641 = vmatprep.mubr.msk.bf16.mxu0 %vm12312_vm12, %v12324_v19  ;;  %vm13727_vm5 = vnez %v13700_v50 }
 0x407   : > { %8737 = vmatprep.mubr.msk.bf16.mxu1 %vm12312_vm12, %v12324_v19 }
 0x40d   : > { %8644 = vmatmul.mubr.msk.bf16.gmra.mrb[56].mxu0 %vm12312_vm12, %v12305_v56 }
 0x40e   : > { %8740 = vmatmul.mubr.msk.bf16.gmra.mrb[56].mxu1 %vm12312_vm12, %v12305_v56  ;;  %8647 = vmatprep.mubr.msk.bf16.mxu0 %vm12389_vm6, %v8646_v37  ;;  %vm13731_vm12 = vnez %v13622_v30 }
 0x40f   : > { %8743 = vmatprep.mubr.msk.bf16.mxu1 %vm12389_vm6, %v8646_v37 }
 0x415   : > { %8650 = vmatmul.mubr.msk.bf16.gmra.mrb[60].mxu0 %vm12389_vm6, %v8649_v44 }
 0x416   : > { %8746 = vmatmul.mubr.msk.bf16.gmra.mrb[60].mxu1 %vm12389_vm6, %v8649_v44  ;;  %vm13728_vm6 = vnez %v13704_v47 }
 0x4b0   : > { %v6359_v17 = vpop.f32.mrb[32].mxu0 }
 0x4b1   : > { %v6585_v38 = vpop.f32.mrb[32].mxu1  ;;  %v6361_v15 = vpop.f32.mrb[33].mxu0  ;;  %v8870_v56 = vadd.f32 %v6359_v17, %v12510_v21 }
 0x4b2   : > { %v8902_v25 = vadd.f32 %v6585_v38, %v12503_v3  ;;  %v6587_v59 = vpop.f32.mrb[33].mxu1  ;;  %v6363_v36 = vpop.f32.mrb[34].mxu0  ;;  %v8871_v29 = vadd.f32 %v6361_v15, %v12514_v16 }
 0x4b3   : > { %v8903_v2 = vadd.f32 %v6587_v59, %v12507_v7  ;;  %v6589_v13 = vpop.f32.mrb[34].mxu1  ;;  %v6365_v58 = vpop.f32.mrb[35].mxu0  ;;  %v8872_v37 = vadd.f32 %v6363_v36, %v12510_v21 }
 0x4b4   : > { %v8747_v35 = vmul.f32 -1.442695, %v8902_v25  ;;  %v8904_v45 = vadd.f32 %v6589_v13, %v12503_v3  ;;  %v6591_v4 = vpop.f32.mrb[35].mxu1  ;;  %v8873_v33 = vadd.f32 %v6365_v58, %v12514_v16 }
 0x4b5   : > { %v8748_v19 = vmul.f32 -1.442695, %v8903_v2  ;;  %v8905_v1 = vadd.f32 %v6591_v4, %v12507_v7 }
 0x4b6   : > { %10470 = vpow2.f32 %v8747_v35  ;;  %v8749_v14 = vmul.f32 -1.442695, %v8904_v45 }
 0x4b7   : > { %10472 = vpow2.f32 %v8748_v19  ;;  %v8750_v41 = vmul.f32 -1.442695, %v8905_v1 }
 0x4b8   : > { %10474 = vpow2.f32 %v8749_v14  ;;  %v6369_v12 = vpop.f32.mrb[36].mxu0 }
 0x4b9   : > { %10476 = vtanh.f32 %v8870_v56  ;;  %v6595_v52 = vpop.f32.mrb[36].mxu1  ;;  %v6371_v44 = vpop.f32.mrb[37].mxu0  ;;  %v8874_v15 = vadd.f32 %v6369_v12, %v12510_v21 }
 0x4ba   : > { %10478 = vpow2.f32 %v8750_v41  ;;  %v8906_v8 = vadd.f32 %v6595_v52, %v12503_v3  ;;  %v6597_v61 = vpop.f32.mrb[37].mxu1  ;;  %v6373_v32 = vpop.f32.mrb[38].mxu0  ;;  %v8875_v14 = vadd.f32 %v6371_v44, %v12514_v16 }
 0x4bb   : > { %10480 = vtanh.f32 %v8871_v29  ;;  %v8907_v49 = vadd.f32 %v6597_v61, %v12507_v7  ;;  %v6599_v28 = vpop.f32.mrb[38].mxu1  ;;  %v12525_v62 = vpop.f32.mrb[39].mxu0 }
 0x4bc   : > { %10482 = vtanh.f32 %v8872_v37  ;;  %v8751_v5 = vmul.f32 -1.442695, %v8906_v8  ;;  %v8908_v17 = vadd.f32 %v6599_v28, %v12503_v3  ;;  %v6601_v38 = vpop.f32.mrb[39].mxu1 }
 0x4bd   : > { %10484 = vtanh.f32 %v8873_v33  ;;  %v8752_v25 = vmul.f32 -1.442695, %v8907_v49  ;;  %v8909_v59 = vadd.f32 %v6601_v38, %v12507_v7  ;;  %v8876_v38 = vadd.f32 %v6373_v32, %v12510_v21 }
 0x4be   : > { %10486 = vpow2.f32 %v8751_v5  ;;  %v8753_v36 = vmul.f32 -1.442695, %v8908_v17 }
 0x4bf   : > { %10488 = vpow2.f32 %v8752_v25  ;;  %v8754_v2 = vmul.f32 -1.442695, %v8909_v59 }
 0x4c0   : > { %v10471_v13 = vpop.eup %10470  ;;  %10490 = vpow2.f32 %v8753_v36  ;;  %v12530_v58 = vpop.f32.mrb[40].mxu0 }
 0x4c1   : > { %v10473_v35 = vpop.eup %10472  ;;  %v6792_v45 = vadd.f32 1.0, %v10471_v13  ;;  %10492 = vtanh.f32 %v8874_v15  ;;  %v6605_v4 = vpop.f32.mrb[40].mxu1 }
 0x4c2   : > { %v12532_v56 = vpop.f32.mrb[41].mxu0  ;;  %v10475_v19 = vpop.eup %10474  ;;  %v6793_v1 = vadd.f32 1.0, %v10473_v35  ;;  %10494 = vpow2.f32 %v8754_v2  ;;  %v8910_v29 = vadd.f32 %v6605_v4, %v12503_v3 }
 0x4c3   : > { %v6607_v41 = vpop.f32.mrb[41].mxu1  ;;  %v12536_v37 = vpop.f32.mrb[42].mxu0  ;;  %10496 = vrcp.f32 %v6792_v45  ;;  %v6794_v33 = vadd.f32 1.0, %v10475_v19 }
 0x4c4   : > { %v10477_v12 = vpop.eup %10476  ;;  %v8911_v52 = vadd.f32 %v6607_v41, %v12507_v7  ;;  %v6609_v8 = vpop.f32.mrb[42].mxu1  ;;  %10498 = vrcp.f32 %v6793_v1  ;;  %v8755_v28 = vmul.f32 -1.442695, %v8910_v29 }
 0x4c5   : > { %v12539_v61 = vpop.f32.mrb[43].mxu0  ;;  %v10479_v49 = vpop.eup %10478  ;;  %10500 = vrcp.f32 %v6794_v33  ;;  %v8912_v2 = vadd.f32 %v6609_v8, %v12503_v3  ;;  %v8877_v8 = vadd.f32 %v12525_v62, %v12514_v16 }
 0x4c6   : > { %v6611_v5 = vpop.f32.mrb[43].mxu1  ;;  %v10481_v17 = vpop.eup %10480  ;;  %v6795_v44 = vadd.f32 1.0, %v10479_v49  ;;  %10502 = vtanh.f32 %v8875_v14  ;;  %v8756_v25 = vmul.f32 -1.442695, %v8911_v52 }
 0x4c7   : > { %v10483_v15 = vpop.eup %10482  ;;  %v8913_v32 = vadd.f32 %v6611_v5, %v12507_v7 }
 0x4c8   : > { %v10485_v59 = vpop.eup %10484  ;;  %10504 = vrcp.f32 %v6795_v44  ;;  %v12543_v13 = vpop.f32.mrb[44].mxu0  ;;  %v6920_v44 = vld [vmem:[#allocation17] sm:$0x3] }
 0x4c9   : > { %v10487_v36 = vpop.eup %10486  ;;  %10506 = vpow2.f32 %v8755_v28  ;;  %v6615_v4 = vpop.f32.mrb[44].mxu1  ;;  %v8758_v34 = vmul.f32 -1.442695, %v8913_v32  ;;  %v12561_v62 = vrot.slane %v6920_v44, %v11733_v27  ;;  %v8879_v27 = vadd.f32 %v12532_v56, %v12514_v16 }
 0x4ca   : > { %v10489_v35 = vpop.eup %10488  ;;  %v6796_v45 = vadd.f32 1.0, %v10487_v36  ;;  %10508 = vtanh.f32 %v8876_v38  ;;  %v12545_v19 = vpop.f32.mrb[45].mxu0  ;;  %v8757_v36 = vmul.f32 -1.442695, %v8912_v2  ;;  %v8878_v2 = vadd.f32 %v12530_v58, %v12510_v21 }
 0x4cb   : > { %v10491_v1 = vpop.eup %10490  ;;  %v6797_v29 = vadd.f32 1.0, %v10489_v35  ;;  %10510 = vpow2.f32 %v8756_v25  ;;  %v6617_v14 = vpop.f32.mrb[45].mxu1  ;;  %v8914_v25 = vadd.f32 %v6615_v4, %v12503_v3  ;;  %v8880_v56 = vadd.f32 %v12536_v37, %v12510_v21 }
 0x4cc   : > { %v12548_v41 = vpop.f32.mrb[46].mxu0  ;;  %v12550_v33 = vpop.eup %10492  ;;  %10512 = vrcp.f32 %v6796_v45  ;;  %v6798_v52 = vadd.f32 1.0, %v10491_v1  ;;  %v12558_v1 = vrot.slane %v6920_v44, %v11729_v24 }
 0x4cd   : > { %v6619_v49 = vpop.f32.mrb[46].mxu1  ;;  %v12554_v28 = vpop.f32.mrb[47].mxu0  ;;  %10514 = vrcp.f32 %v6797_v29  ;;  %v8759_v23 = vmul.f32 -1.442695, %v8914_v25 }
 0x4ce   : > { %v10495_v38 = vpop.eup %10494  ;;  %v6621_v5 = vpop.f32.mrb[47].mxu1  ;;  %10516 = vrcp.f32 %v6798_v52  ;;  %v8915_v52 = vadd.f32 %v6617_v14, %v12507_v7  ;;  %v8916_v44 = vadd.f32 %v6619_v49, %v12503_v3 }
 0x4cf   : > { %v10497_v35 = vpop.eup %10496  ;;  %v6799_v20 = vadd.f32 1.0, %v10495_v38  ;;  %10518 = vtanh.f32 %v8877_v8  ;;  %v8917_v49 = vadd.f32 %v6621_v5, %v12507_v7 }
 0x4d0   : > { %v10499_v53 = vpop.eup %10498  ;;  %v6888_v45 = vmul.f32 %v10497_v35, %v10477_v12  ;;  %10520 = vpow2.f32 %v8757_v36  ;;  %v12566_v38 = vpop.f32.mrb[48].mxu0  ;;  %v8760_v55 = vmul.f32 -1.442695, %v8915_v52 }
 0x4d1   : > { %v10501_v22 = vpop.eup %10500  ;;  %v6889_v29 = vmul.f32 %v10499_v53, %v10481_v17  ;;  %10522 = vrcp.f32 %v6799_v20  ;;  %v6625_v8 = vpop.f32.mrb[48].mxu1  ;;  %v8762_v0 = vmul.f32 -1.442695, %v8917_v49 }
 0x4d2   : > { %v10503_v4 = vpop.eup %10502  ;;  %v6890_v12 = vmul.f32 %v10501_v22, %v10483_v15  ;;  %v12571_v35 = vpop.f32.mrb[49].mxu0  ;;  %10524 = vpow2.f32 %v8758_v34  ;;  %v6932_v14 = vmul.f32 %v12558_v1, %v6888_v45 }
 0x4d3   : > { %v10505_v32 = vpop.eup %10504  ;;  %v6627_v53 = vpop.f32.mrb[49].mxu1  ;;  %v6933_v36 = vmul.f32 %v12561_v62, %v6889_v29  ;;  %10526 = vtanh.f32 %v8878_v2  ;;  %v8887_v26 = vadd.f32 %v12571_v35, %v12514_v16 }
 0x4d4   : > { %v10507_v58 = vpop.eup %10506  ;;  %v12573_v17 = vpop.f32.mrb[50].mxu0  ;;  %v6891_v22 = vmul.f32 %v10505_v32, %v10485_v59  ;;  %10528 = vpow2.f32 %v8759_v23  ;;  %v8881_v59 = vadd.f32 %v12539_v61, %v12514_v16  ;;  %v8761_v32 = vmul.f32 -1.442695, %v8916_v44 }
 0x4d5   : > { %v10509_v15 = vpop.eup %10508  ;;  %v6800_v20 = vadd.f32 1.0, %v10507_v58  ;;  %v6629_v25 = vpop.f32.mrb[50].mxu1  ;;  %v6964_v37 = vadd.f32 %v6933_v36, %v6932_v14  ;;  %v6934_v5 = vmul.f32 %v12558_v1, %v6890_v12  ;;  %v8919_v49 = vadd.f32 %v6627_v53, %v12507_v7 }
 0x4d6   : > { %v12580_v31 = vpop.f32.mrb[51].mxu0  ;;  %v10511_v34 = vpop.eup %10510  ;;  %v6935_v23 = vmul.f32 %v12561_v62, %v6891_v22  ;;  %v8882_v22 = vadd.f32 %v12543_v13, %v12510_v21  ;;  %v8883_v13 = vadd.f32 %v12545_v19, %v12514_v16  ;;  %v8920_v53 = vadd.f32 %v6629_v25, %v12503_v3 }
 0x4d7   : > { %v12582_v39 = vpop.f32.mrb[51].mxu1  ;;  %v10513_v45 = vpop.eup %10512  ;;  %10530 = vrcp.f32 %v6800_v20  ;;  %v6801_v29 = vadd.f32 1.0, %v10511_v34  ;;  %v8918_v20 = vadd.f32 %v6625_v8, %v12503_v3  ;;  %6965 = vadd.xlane.f32.xlu0 %v6964_v37 }
 0x4d8   : > { %v10515_v2 = vpop.eup %10514  ;;  %10532 = vtanh.f32 %v8879_v27  ;;  %v6892_v52 = vmul.f32 %v10513_v45, %v12550_v33  ;;  %v12590_v34 = vpop.f32.mrb[52].mxu0  ;;  %v6967_v12 = vadd.f32 %v6935_v23, %v6934_v5 }
 0x4d9   : > { %v10517_v58 = vpop.eup %10516  ;;  %10534 = vtanh.f32 %v8880_v56  ;;  %v6893_v61 = vmul.f32 %v10515_v2, %v10503_v4  ;;  %v12592_v44 = vpop.f32.mrb[52].mxu1 }
 0x4da   : > { %10536 = vpow2.f32 %v8760_v55  ;;  %v6894_v10 = vmul.f32 %v10517_v58, %v10509_v15  ;;  %v10519_v27 = vpop.eup %10518  ;;  %v12594_v14 = vpop.f32.mrb[53].mxu0  ;;  %v6936_v8 = vmul.f32 %v12558_v1, %v6892_v52  ;;  %v8885_v52 = vadd.f32 %v12554_v28, %v12514_v16 }
 0x4db   : > { %10538 = vrcp.f32 %v6801_v29  ;;  %v10521_v36 = vpop.eup %10520  ;;  %v12598_v55 = vpop.f32.mrb[53].mxu1  ;;  %v6937_v4 = vmul.f32 %v12561_v62, %v6893_v61  ;;  %6968 = vadd.xlane.f32.xlu0 %v6967_v12  ;;  %v8764_v12 = vmul.f32 -1.442695, %v8919_v49 }
 0x4dc   : > { %10540 = vpow2.f32 %v8761_v32  ;;  %v12600_v33 = vpop.f32.mrb[54].mxu0  ;;  %v10523_v15 = vpop.eup %10522  ;;  %v6802_v56 = vadd.f32 1.0, %v10521_v36  ;;  %v8763_v32 = vmul.f32 -1.442695, %v8918_v20  ;;  %v6938_v36 = vmul.f32 %v12558_v1, %v6894_v10 }
 0x4dd   : > { %10542 = vtanh.f32 %v8881_v59  ;;  %v12605_v45 = vpop.f32.mrb[54].mxu1  ;;  %v12607_v29 = vpop.f32.mrb[55].mxu0  ;;  %v8884_v59 = vadd.f32 %v12548_v41, %v12510_v21  ;;  %v6970_v61 = vadd.f32 %v6937_v4, %v6936_v8  ;;  %v6895_v19 = vmul.f32 %v10523_v15, %v10519_v27 }
 0x4de   : > { %v10525_v2 = vpop.eup %10524  ;;  %10544 = vpow2.f32 %v8762_v0  ;;  %v12611_v37 = vpop.f32.mrb[55].mxu1  ;;  %v8765_v27 = vmul.f32 -1.442695, %v8920_v53  ;;  %v8921_v8 = vadd.f32 %v12582_v39, %v12507_v7 }
 0x4df   : > { %v10527_v5 = vpop.eup %10526  ;;  %10546 = vrcp.f32 %v6802_v56  ;;  %v6803_v58 = vadd.f32 1.0, %v10525_v2  ;;  %v12621_v2 = vadd.f32 %v12566_v38, %v12510_v21  ;;  %6971 = vadd.xlane.f32.xlu1 %v6970_v61  ;;  %v6939_v25 = vmul.f32 %v12561_v62, %v6895_v19 }
 0x4e0   : > { %v10529_v23 = vpop.eup %10528  ;;  %10548 = vtanh.f32 %v8882_v22  ;;  %v6419_v41 = vpop.f32.mrb[56].mxu0 }
 0x4e1   : > { %v10531_v0 = vpop.eup %10530  ;;  %10550 = vrcp.f32 %v6803_v58  ;;  %v6804_v20 = vadd.f32 1.0, %v10529_v23  ;;  %v12627_v4 = vadd.f32 %v6419_v41, %v12510_v21  ;;  %v6645_v10 = vpop.f32.mrb[56].mxu1 }
 0x4e2   : > { %v10533_v56 = vpop.eup %10532  ;;  %10552 = vpow2.f32 %v8763_v32  ;;  %v6896_v22 = vmul.f32 %v10531_v0, %v10527_v5  ;;  %v6421_v15 = vpop.f32.mrb[57].mxu0  ;;  %v12630_v38 = vadd.f32 %v6645_v10, %v12503_v3  ;;  %v6973_v32 = vadd.f32 %v6939_v25, %v6938_v36 }
 0x4e3   : > { %v10535_v28 = vpop.eup %10534  ;;  %10554 = vtanh.f32 %v8883_v13  ;;  %v12633_v58 = vadd.f32 %v6421_v15, %v12514_v16  ;;  %v6647_v5 = vpop.f32.mrb[57].mxu1  ;;  %v8922_v36 = vadd.f32 %v12592_v44, %v12503_v3  ;;  %v8766_v44 = vmul.f32 -1.442695, %v8921_v8 }
 0x4e4   : > { %v10537_v49 = vpop.eup %10536  ;;  %10556 = vrcp.f32 %v6804_v20  ;;  %v6423_v13 = vpop.f32.mrb[58].mxu0  ;;  %v12636_v39 = vadd.f32 %v6647_v5, %v12507_v7  ;;  %6974 = vadd.xlane.f32.xlu1 %v6973_v32 }
 0x4e5   : > { %v10539_v53 = vpop.eup %10538  ;;  %v6805_v23 = vadd.f32 1.0, %v10537_v49  ;;  %10558 = vpow2.f32 %v8764_v12  ;;  %v12639_v61 = vadd.f32 %v6423_v13, %v12510_v21  ;;  %v6649_v19 = vpop.f32.mrb[58].mxu1  ;;  %v8923_v49 = vadd.f32 %v12598_v55, %v12507_v7 }
 0x4e6   : > { %v6425_v0 = vpop.f32.mrb[59].mxu0  ;;  %v10541_v20 = vpop.eup %10540  ;;  %10560 = vtanh.f32 %v8884_v59  ;;  %v12644_v41 = vadd.f32 %v6649_v19, %v12503_v3  ;;  %v6897_v32 = vmul.f32 %v10539_v53, %v10533_v56  ;;  %v6940_v13 = vmul.f32 %v12558_v1, %v6896_v22 }
 0x4e7   : > { %v12647_v25 = vadd.f32 %v6425_v0, %v12514_v16  ;;  %v6651_v12 = vpop.f32.mrb[59].mxu1  ;;  %v10543_v10 = vpop.eup %10542  ;;  %10562 = vrcp.f32 %v6805_v23  ;;  %v6806_v15 = vadd.f32 1.0, %v10541_v20  ;;  %v8888_v23 = vadd.f32 %v12573_v17, %v12510_v21 }
 0x4e8   : > { %v12652_v5 = vadd.f32 %v6651_v12, %v12507_v7  ;;  %v10545_v59 = vpop.eup %10544  ;;  %10564 = vpow2.f32 %v8765_v27  ;;  %v8767_v55 = vmul.f32 -1.442695, %v8922_v36  ;;  %v6941_v12 = vmul.f32 %v12561_v62, %v6897_v32  ;;  %v6429_v27 = vpop.f32.mrb[60].mxu0 }
 0x4e9   : > { %v10547_v19 = vpop.eup %10546  ;;  %10566 = vrcp.f32 %v6806_v15  ;;  %v6807_v0 = vadd.f32 1.0, %v10545_v59  ;;  %v8768_v56 = vmul.f32 -1.442695, %v8923_v49  ;;  %v8924_v22 = vadd.f32 %v12605_v45, %v12503_v3  ;;  %v6655_v35 = vpop.f32.mrb[60].mxu1 }
 0x4ea   : > { %v10549_v20 = vpop.eup %10548  ;;  %10568 = vtanh.f32 %v8885_v52  ;;  %v6898_v9 = vmul.f32 %v10547_v19, %v10535_v28  ;;  %v12663_v53 = vadd.f32 %v6429_v27, %v12510_v21  ;;  %v6431_v15 = vpop.f32.mrb[61].mxu0  ;;  %v6976_v17 = vadd.f32 %v6941_v12, %v6940_v13 }
 0x4eb   : > { %v10551_v8 = vpop.eup %10550  ;;  %10570 = vrcp.f32 %v6807_v0  ;;  %v6657_v32 = vpop.f32.mrb[61].mxu1  ;;  %v12668_v0 = vadd.f32 %v6655_v35, %v12503_v3  ;;  %v12671_v45 = vadd.f32 %v6431_v15, %v12514_v16  ;;  %v8925_v12 = vadd.f32 %v12611_v37, %v12507_v7 }
 0x4ec   : > { %v10553_v59 = vpop.eup %10552  ;;  %10572 = vpow2.f32 %v8766_v44  ;;  %v6899_v52 = vmul.f32 %v10551_v8, %v10543_v10  ;;  %v6942_v36 = vmul.f32 %v12558_v1, %v6898_v9  ;;  %v6433_v28 = vpop.f32.mrb[62].mxu0  ;;  %6977 = vadd.xlane.f32.xlu0 %v6976_v17  ;;  %v12675_v9 = vadd.f32 %v6657_v32, %v12507_v7 }
 0x4ed   : > { %v10555_v19 = vpop.eup %10554  ;;  %10574 = vtanh.f32 %v12621_v2  ;;  %v6808_v49 = vadd.f32 1.0, %v10553_v59  ;;  %v6659_v27 = vpop.f32.mrb[62].mxu1  ;;  %v12678_v44 = vadd.f32 %v6433_v28, %v12510_v21  ;;  %v8769_v59 = vmul.f32 -1.442695, %v8924_v22 }
 0x4ee   : > { %v6435_v42 = vpop.f32.mrb[63].mxu0  ;;  %v10557_v60 = vpop.eup %10556  ;;  %10576 = vpow2.f32 %v8767_v55  ;;  %v6943_v10 = vmul.f32 %v12561_v62, %v6899_v52  ;;  %v12683_v8 = vadd.f32 %v6659_v27, %v12503_v3  ;;  %v8889_v3 = vadd.f32 %v12580_v31, %v12514_v16 }
 0x4ef   : > { %v6661_v2 = vpop.f32.mrb[63].mxu1  ;;  %v10559_v13 = vpop.eup %10558  ;;  %10578 = vrcp.f32 %v6808_v49  ;;  %v12686_v55 = vadd.f32 %v6435_v42, %v12514_v16  ;;  %v6900_v28 = vmul.f32 %v10557_v60, %v10549_v20  ;;  %v8771_v31 = vmul.f32 -1.442695, %v12630_v38 }
 0x4f0   : > { %v10561_v35 = vpop.eup %10560  ;;  %10580 = vtanh.f32 %v8887_v26  ;;  %v6809_v15 = vadd.f32 1.0, %v10559_v13  ;;  %v6979_v17 = vadd.f32 %v6943_v10, %v6942_v36  ;;  %v12689_v32 = vadd.f32 %v6661_v2, %v12507_v7 }
 0x4f1   : > { %v10563_v52 = vpop.eup %10562  ;;  %10582 = vpow2.f32 %v8768_v56  ;;  %v8770_v26 = vmul.f32 -1.442695, %v8925_v12  ;;  %v6944_v22 = vmul.f32 %v12558_v1, %v6900_v28  ;;  %v8890_v56 = vadd.f32 %v12590_v34, %v12510_v21 }
 0x4f2   : > { %v10565_v49 = vpop.eup %10564  ;;  %10584 = vrcp.f32 %v6809_v15  ;;  %6980 = vadd.xlane.f32.xlu1 %v6979_v17  ;;  %v6901_v37 = vmul.f32 %v10563_v52, %v10555_v19  ;;  %v8891_v34 = vadd.f32 %v12594_v14, %v12514_v16  ;;  %v8772_v17 = vmul.f32 -1.442695, %v12636_v39 }
 0x4f3   : > { %v10567_v42 = vpop.eup %10566  ;;  %10586 = vtanh.f32 %v8888_v23  ;;  %v6810_v27 = vadd.f32 1.0, %v10565_v49 }
 0x4f4   : > { %v10569_v36 = vpop.eup %10568  ;;  %10588 = vpow2.f32 %v8769_v59  ;;  %v6945_v60 = vmul.f32 %v12561_v62, %v6901_v37  ;;  %v6902_v7 = vmul.f32 %v10567_v42, %v10561_v35  ;;  %v8892_v37 = vadd.f32 %v12600_v33, %v12510_v21 }
 0x4f5   : > { %v10571_v20 = vpop.eup %10570  ;;  %10590 = vrcp.f32 %v6810_v27  ;;  %v8773_v27 = vmul.f32 -1.442695, %v12644_v41  ;;  %v8774_v21 = vmul.f32 -1.442695, %v12652_v5 }
 0x4f6   : > { %v10573_v10 = vpop.eup %10572  ;;  %10592 = vtanh.f32 %v8889_v3  ;;  %v6982_v19 = vadd.f32 %v6945_v60, %v6944_v22  ;;  %v6903_v23 = vmul.f32 %v10571_v20, %v10569_v36  ;;  %v6946_v2 = vmul.f32 %v12558_v1, %v6902_v7 }
 0x4f7   : > { %v10575_v13 = vpop.eup %10574  ;;  %v6811_v12 = vadd.f32 1.0, %v10573_v10  ;;  %10594 = vpow2.f32 %v8770_v26 }
 0x4f8   : > { %v10577_v15 = vpop.eup %10576  ;;  %10596 = vtanh.f32 %v8890_v56  ;;  %6983 = vadd.xlane.f32.xlu0 %v6982_v19  ;;  %v6947_v35 = vmul.f32 %v12561_v62, %v6903_v23  ;;  %v8893_v56 = vadd.f32 %v12607_v29, %v12514_v16 }
 0x4f9   : > { %v10579_v59 = vpop.eup %10578  ;;  %10598 = vrcp.f32 %v6811_v12  ;;  %v6812_v38 = vadd.f32 1.0, %v10577_v15 }
 0x4fa   : > { %v10581_v52 = vpop.eup %10580  ;;  %10600 = vpow2.f32 %v8771_v31  ;;  %v6985_v28 = vadd.f32 %v6947_v35, %v6946_v2  ;;  %v6904_v49 = vmul.f32 %v10579_v59, %v10575_v13  ;;  %v8775_v2 = vmul.f32 -1.442695, %v12668_v0 }
 0x4fb   : > { %v10583_v3 = vpop.eup %10582  ;;  %10602 = vrcp.f32 %v6812_v38 }
 0x4fc   : > { %v10585_v42 = vpop.eup %10584  ;;  %10604 = vtanh.f32 %v8891_v34  ;;  %v6813_v14 = vadd.f32 1.0, %v10583_v3  ;;  %6986 = vadd.xlane.f32.xlu1 %v6985_v28  ;;  %v6948_v39 = vmul.f32 %v12558_v1, %v6904_v49  ;;  %v8776_v34 = vmul.f32 -1.442695, %v12675_v9 }
 0x4fd   : > { %v10587_v26 = vpop.eup %10586  ;;  %10606 = vpow2.f32 %v8772_v17  ;;  %v6905_v22 = vmul.f32 %v10585_v42, %v10581_v52  ;;  %v8777_v28 = vmul.f32 -1.442695, %v12683_v8 }
 0x4fe   : > { %v10589_v36 = vpop.eup %10588  ;;  %10608 = vrcp.f32 %v6813_v14 }
 0x4ff   : > { %v10591_v60 = vpop.eup %10590  ;;  %10610 = vtanh.f32 %v8892_v37  ;;  %v6814_v7 = vadd.f32 1.0, %v10589_v36  ;;  %v6949_v33 = vmul.f32 %v12561_v62, %v6905_v22 }
 0x500   : > { %v10593_v20 = vpop.eup %10592  ;;  %10612 = vpow2.f32 %v8773_v27  ;;  %v6906_v41 = vmul.f32 %v10591_v60, %v10587_v26  ;;  %v8778_v27 = vmul.f32 -1.442695, %v12689_v32 }
 0x501   : > { %v10595_v31 = vpop.eup %10594  ;;  %10614 = vrcp.f32 %v6814_v7  ;;  %v6988_v10 = vadd.f32 %v6949_v33, %v6948_v39 }
 0x502   : > { %v10597_v19 = vpop.eup %10596  ;;  %10616 = vtanh.f32 %v8893_v56  ;;  %v6815_v23 = vadd.f32 1.0, %v10595_v31  ;;  %v6950_v5 = vmul.f32 %v12558_v1, %v6906_v41 }
 0x503   : > { %v10599_v13 = vpop.eup %10598  ;;  %10618 = vpow2.f32 %v8774_v21  ;;  %6989 = vadd.xlane.f32.xlu0 %v6988_v10 }
 0x504   : > { %v10601_v16 = vpop.eup %10600  ;;  %10620 = vrcp.f32 %v6815_v23  ;;  %v6907_v29 = vmul.f32 %v10599_v13, %v10593_v20 }
 0x505   : > { %v10603_v12 = vpop.eup %10602  ;;  %10622 = vtanh.f32 %v12627_v4  ;;  %v6816_v15 = vadd.f32 1.0, %v10601_v16 }
 0x506   : > { %v10605_v35 = vpop.eup %10604  ;;  %10624 = vpow2.f32 %v8775_v2  ;;  %v6951_v59 = vmul.f32 %v12561_v62, %v6907_v29  ;;  %v6908_v38 = vmul.f32 %v10603_v12, %v10597_v19 }
 0x507   : > { %v10607_v0 = vpop.eup %10606  ;;  %10626 = vrcp.f32 %v6816_v15 }
 0x508   : > { %v10609_v17 = vpop.eup %10608  ;;  %10628 = vtanh.f32 %v12633_v58  ;;  %v6817_v52 = vadd.f32 1.0, %v10607_v0  ;;  %v6991_v49 = vadd.f32 %v6951_v59, %v6950_v5  ;;  %v6952_v37 = vmul.f32 %v12558_v1, %v6908_v38 }
 0x509   : > { %v10611_v3 = vpop.eup %10610  ;;  %10630 = vpow2.f32 %v8776_v34  ;;  %v6909_v4 = vmul.f32 %v10609_v17, %v10605_v35 }
 0x50a   : > { %v10613_v9 = vpop.eup %10612  ;;  %10632 = vrcp.f32 %v6817_v52  ;;  %6992 = vadd.xlane.f32.xlu1 %v6991_v49 }
 0x50b   : > { %v10615_v42 = vpop.eup %10614  ;;  %10634 = vtanh.f32 %v12639_v61  ;;  %v6818_v14 = vadd.f32 1.0, %v10613_v9  ;;  %v6953_v58 = vmul.f32 %v12561_v62, %v6909_v4 }
 0x50c   : > { %v10617_v26 = vpop.eup %10616  ;;  %10636 = vpow2.f32 %v8777_v28  ;;  %v6910_v8 = vmul.f32 %v10615_v42, %v10611_v3 }
 0x50d   : > { %v10619_v22 = vpop.eup %10618  ;;  %10638 = vrcp.f32 %v6818_v14  ;;  %v6994_v39 = vadd.f32 %v6953_v58, %v6952_v37 }
 0x50e   : > { %v10621_v36 = vpop.eup %10620  ;;  %10640 = vtanh.f32 %v12647_v25  ;;  %v6819_v56 = vadd.f32 1.0, %v10619_v22  ;;  %v6954_v61 = vmul.f32 %v12558_v1, %v6910_v8 }
 0x50f   : > { %v10623_v60 = vpop.eup %10622  ;;  %10642 = vpow2.f32 %v8778_v27  ;;  %6995 = vadd.xlane.f32.xlu0 %v6994_v39  ;;  %v6911_v7 = vmul.f32 %v10621_v36, %v10617_v26 }
 0x510   : > { %v10625_v21 = vpop.eup %10624  ;;  %10644 = vrcp.f32 %v6819_v56 }
 0x511   : > { %v10627_v32 = vpop.eup %10626  ;;  %v6820_v33 = vadd.f32 1.0, %v10625_v21  ;;  %v6955_v20 = vmul.f32 %v12561_v62, %v6911_v7  ;;  %10646 = vtanh.f32 %v12663_v53  ;;  %v12737_v7 = vld [vmem:[#allocation7] ss:$0 sm:$0xff] }
 0x512   : > { %v10629_v41 = vpop.eup %10628  ;;  %v6912_v31 = vmul.f32 %v10627_v32, %v10623_v60 }
 0x513   : > { %v10631_v10 = vpop.eup %10630  ;;  %10648 = vrcp.f32 %v6820_v33  ;;  %v6997_v25 = vadd.f32 %v6955_v20, %v6954_v61 }
 0x514   : > { %v10633_v19 = vpop.eup %10632  ;;  %v6821_v23 = vadd.f32 1.0, %v10631_v10  ;;  %10650 = vtanh.f32 %v12671_v45  ;;  %v6956_v16 = vmul.f32 %v12558_v1, %v6912_v31  ;;  %v11076_v31 = vmov 0  }
 0x515   : > { %v10635_v2 = vpop.eup %10634  ;;  %6998 = vadd.xlane.f32.xlu1 %v6997_v25  ;;  %v6913_v13 = vmul.f32 %v10633_v19, %v10629_v41  ;;  %9604 = vset.pattern.permute.xlu0 %v11076_v31 }
 0x516   : > { %v10637_v29 = vpop.eup %10636  ;;  %10652 = vrcp.f32 %v6821_v23  ;;  %9605 = vset.pattern.permute.xlu1 %v11076_v31 }
 0x517   : > { %v10639_v5 = vpop.eup %10638  ;;  %v6822_v12 = vadd.f32 1.0, %v10637_v29  ;;  %v6957_v15 = vmul.f32 %v12561_v62, %v6913_v13  ;;  %10654 = vtanh.f32 %v12678_v44 }
 0x518   : > { %v10641_v53 = vpop.eup %10640  ;;  %v6914_v34 = vmul.f32 %v10639_v5, %v10635_v2 }
 0x519   : > { %v10643_v35 = vpop.eup %10642  ;;  %10656 = vrcp.f32 %v6822_v12  ;;  %v7000_v59 = vadd.f32 %v6957_v15, %v6956_v16 }
 0x51a   : > { %v10645_v38 = vpop.eup %10644  ;;  %v6823_v0 = vadd.f32 1.0, %v10643_v35  ;;  %10658 = vtanh.f32 %v12686_v55  ;;  %v6958_v17 = vmul.f32 %v12558_v1, %v6914_v34 }
 0x51b   : > { %7001 = vadd.xlane.f32.xlu0 %v7000_v59  ;;  %v6915_v45 = vmul.f32 %v10645_v38, %v10641_v53  ;;  %v10647_v52 = vpop.eup %10646 }
 0x51c   : > { %10660 = vrcp.f32 %v6823_v0 }
 0x51d   : > { %v10649_v28 = vpop.eup %10648  ;;  %v6959_v49 = vmul.f32 %v12561_v62, %v6915_v45 }
 0x51e   : > { %v6916_v3 = vmul.f32 %v10649_v28, %v10647_v52  ;;  %v10651_v4 = vpop.eup %10650 }
 0x51f   : > { %v7003_v44 = vadd.f32 %v6959_v49, %v6958_v17 }
 0x520   : > { %v10653_v37 = vpop.eup %10652  ;;  %v6960_v42 = vmul.f32 %v12558_v1, %v6916_v3 }
 0x521   : > { %7004 = vadd.xlane.f32.xlu1 %v7003_v44  ;;  %v6917_v9 = vmul.f32 %v10653_v37, %v10651_v4  ;;  %v10655_v14 = vpop.eup %10654 }
 0x523   : > { %v10657_v27 = vpop.eup %10656  ;;  %v6961_v55 = vmul.f32 %v12561_v62, %v6917_v9 }
 0x524   : > { %v6918_v58 = vmul.f32 %v10657_v27, %v10655_v14  ;;  %v10659_v26 = vpop.eup %10658 }
 0x525   : > { %v7006_v8 = vadd.f32 %v6961_v55, %v6960_v42 }
 0x526   : > { %v10661_v22 = vpop.eup %10660  ;;  %v6962_v36 = vmul.f32 %v12558_v1, %v6918_v58 }
 0x527   : > { %7007 = vadd.xlane.f32.xlu0 %v7006_v8  ;;  %v6919_v39 = vmul.f32 %v10661_v22, %v10659_v26 }
 0x529   : > { %v6963_v56 = vmul.f32 %v12561_v62, %v6919_v39 }
 0x52b   : > { %v7009_v60 = vadd.f32 %v6963_v56, %v6962_v36 }
 0x52d   : > { %7010 = vadd.xlane.f32.xlu1 %v7009_v60 }
 0x564   : > { %v6966_v61 = vpop.xlane.xlu0 %6965 }
 0x565   : > { %v7019_v21 = vadd.f32 %v12737_v7, %v6966_v61 }
 0x567   : > { %7036 = vst.msk [vmem:[%s11494_s30] sm:$0xff] %vm13561_vm4, %v7019_v21  ;;  %v12792_v28 = vsel %vm11774_vm2, %v7019_v21, -1e+30 }
 0x568   : > { %v6969_v32 = vpop.xlane.xlu0 %6968  ;;  %v7069_v42 = vsel %vm13561_vm4, %v12792_v28, -inf }
 0x569   : > { %v7020_v33 = vadd.f32 %v12737_v7, %v6969_v32 }
 0x56b   : > { %7037 = vst.msk [vmem:[%s11494_s30 + $0x8] sm:$0xff] %vm13561_vm4, %v7020_v33  ;;  %v12796_v49 = vsel %vm11786_vm3, %v7020_v33, -1e+30 }
 0x56c   : > { %v6972_v1 = vpop.xlane.xlu1 %6971  ;;  %v7070_v14 = vsel %vm13561_vm4, %v12796_v49, -inf }
 0x56d   : > { %v12746_v62 = vadd.f32 %v12737_v7, %v6972_v1 }
 0x56f   : > { %7038 = vst.msk [vmem:[%s11494_s30 + $0x10] sm:$0xff] %vm13561_vm4, %v12746_v62 }
 0x571   : > { %v6975_v20 = vpop.xlane.xlu1 %6974 }
 0x572   : > { %v12752_v41 = vadd.f32 %v12737_v7, %v6975_v20 }
 0x574   : > { %7039 = vst.msk [vmem:[%s11494_s30 + $0x18] sm:$0xff] %vm13561_vm4, %v12752_v41 }
 0x579   : > { %v6978_v10 = vpop.xlane.xlu0 %6977 }
 0x57a   : > { %v7023_v25 = vadd.f32 %v12737_v7, %v6978_v10 }
 0x57c   : > { %7040 = vst.msk [vmem:[%s11494_s30 + $0x20] sm:$0xff] %vm13561_vm4, %v7023_v25  ;;  %v12783_v45 = vsel %vm11934_vm8, %v7023_v25, -1e+30  ;;  %v7054_v25 = vsel %vm13731_vm12, %v12746_v62, -1e+30 }
 0x57d   : > { %v7073_v44 = vsel %vm13561_vm4, %v12783_v45, -inf }
 0x57e   : > { %v7074_v26 = vmax.f32 %v7069_v42, %v7073_v44 }
 0x57f   : > { %v6981_v19 = vpop.xlane.xlu1 %6980 }
 0x580   : > { %v7024_v23 = vadd.f32 %v12737_v7, %v6981_v19  ;;  %v7055_v19 = vsel %vm13732_vm13, %v12752_v41, -1e+30 }
 0x582   : > { %7041 = vst.msk [vmem:[%s11494_s30 + $0x28] sm:$0xff] %vm13561_vm4, %v7024_v23  ;;  %v12787_v17 = vsel %vm11950_vm9, %v7024_v23, -1e+30  ;;  %v13733_v23 = vld [vmem:[#allocation84_spill] sm:$0xff] }
 0x583   : > { %v7075_v37 = vsel %vm13561_vm4, %v12787_v17, -inf  ;;  %vm13734_vm0 = vnez %v13733_v23 }
 0x584   : > { %v7076_v8 = vmax.f32 %v7070_v14, %v7075_v37 }
 0x585   : > { %v6984_v2 = vpop.xlane.xlu0 %6983 }
 0x586   : > { %v7025_v13 = vadd.f32 %v12737_v7, %v6984_v2 }
 0x588   : > { %7042 = vst.msk [vmem:[%s11494_s30 + $0x30] sm:$0xff] %vm13561_vm4, %v7025_v13  ;;  %v7058_v1 = vsel %vm13729_vm7, %v7025_v13, -1e+30  ;;  %v13735_v13 = vld [vmem:[#allocation87_spill] sm:$0xff] }
 0x589   : > { %v6987_v16 = vpop.xlane.xlu1 %6986 }
 0x58a   : > { %v7026_v29 = vadd.f32 %v12737_v7, %v6987_v16 }
 0x58c   : > { %7043 = vst.msk [vmem:[%s11494_s30 + $0x38] sm:$0xff] %vm13561_vm4, %v7026_v29  ;;  %v12839_v20 = vsel %vm13730_vm10, %v7026_v29, -1e+30 }
 0x590   : > { %v6990_v5 = vpop.xlane.xlu0 %6989 }
 0x591   : > { %v7027_v12 = vadd.f32 %v12737_v7, %v6990_v5 }
 0x593   : > { %7044 = vst.msk [vmem:[%s11494_s30 + $0x40] sm:$0xff] %vm13561_vm4, %v7027_v12  ;;  %v12800_v3 = vsel %vm12098_vm14, %v7027_v12, -1e+30 }
 0x594   : > { %v7081_v27 = vsel %vm13561_vm4, %v12800_v3, -inf }
 0x595   : > { %v7082_v36 = vmax.f32 %v7074_v26, %v7081_v27 }
 0x597   : > { %v6993_v15 = vpop.xlane.xlu1 %6992 }
 0x598   : > { %v7028_v53 = vadd.f32 %v12737_v7, %v6993_v15 }
 0x59a   : > { %7045 = vst.msk [vmem:[%s11494_s30 + $0x48] sm:$0xff] %vm13561_vm4, %v7028_v53  ;;  %v12804_v4 = vsel %vm12114_vm15, %v7028_v53, -1e+30 }
 0x59b   : > { %v7083_v55 = vsel %vm13561_vm4, %v12804_v4, -inf }
 0x59c   : > { %v6996_v34 = vpop.xlane.xlu0 %6995  ;;  %v7084_v56 = vmax.f32 %v7076_v8, %v7083_v55 }
 0x59d   : > { %v7029_v35 = vadd.f32 %v12737_v7, %v6996_v34 }
 0x59f   : > { %7046 = vst.msk [vmem:[%s11494_s30 + $0x50] sm:$0xff] %vm13561_vm4, %v7029_v35  ;;  %v12850_v2 = vsel %vm13734_vm0, %v7029_v35, -1e+30 }
 0x5a2   : > { %v6999_v59 = vpop.xlane.xlu1 %6998 }
 0x5a3   : > { %v7030_v38 = vadd.f32 %v12737_v7, %v6999_v59 }
 0x5a5   : > { %7047 = vst.msk [vmem:[%s11494_s30 + $0x58] sm:$0xff] %vm13561_vm4, %v7030_v38 }
 0x5a8   : > { %v7002_v0 = vpop.xlane.xlu0 %7001 }
 0x5a9   : > { %v7031_v52 = vadd.f32 %v12737_v7, %v7002_v0 }
 0x5ab   : > { %7048 = vst.msk [vmem:[%s11494_s30 + $0x60] sm:$0xff] %vm13561_vm4, %v7031_v52  ;;  %v12814_v9 = vsel %vm13727_vm5, %v7031_v52, -1e+30 }
 0x5ac   : > { %v7089_v39 = vsel %vm13561_vm4, %v12814_v9, -inf }
 0x5ad   : > { %v7090_v21 = vmax.f32 %v7082_v36, %v7089_v39  ;;  %v12882_v36 = vld [vmem:[#allocation2] sm:$0x1] }
 0x5ae   : > { %v7005_v58 = vpop.xlane.xlu1 %7004 }
 0x5af   : > { %v7032_v22 = vadd.f32 %v12737_v7, %v7005_v58 }
 0x5b1   : > { %7049 = vst.msk [vmem:[%s11494_s30 + $0x68] sm:$0xff] %vm13561_vm4, %v7032_v22  ;;  %v12831_v60 = vsel %vm13728_vm6, %v7032_v22, -1e+30  ;;  %vm13737_vm6 = vcmask 7168  }
 0x5b2   : > { %v7091_v61 = vsel %vm13561_vm4, %v12831_v60, -inf  ;;  %vm13736_vm4 = vnez %v13735_v13  ;;  %vm13738_vm5 = vmmov %vm13737_vm6 }
 0x5b3   : > { %v7092_v32 = vmax.f32 %v7084_v56, %v7091_v61  ;;  %v12854_v16 = vsel %vm13736_vm4, %v7030_v38, -1e+30  ;;  %v7077_v29 = vsel %vm13738_vm5, %v7058_v1, -inf  ;;  %vm13739_vm15 = vmmov %vm13738_vm5 }
 0x5b4   : > { %v7008_v33 = vpop.xlane.xlu0 %7007  ;;  %v7079_v62 = vsel %vm13739_vm15, %v12839_v20, -inf  ;;  %vm13740_vm14 = vmmov %vm13738_vm5 }
 0x5b5   : > { %v7097_v31 = vmax.f32 %v7090_v21, %v7092_v32  ;;  %v7033_v10 = vadd.f32 %v12737_v7, %v7008_v33  ;;  %v7071_v41 = vsel %vm13740_vm14, %v7054_v25, -inf  ;;  %vm13741_vm0 = vmmov %vm13738_vm5 }
 0x5b6   : > { %v7072_v12 = vsel %vm13741_vm0, %v7055_v19, -inf  ;;  %vm13742_vm10 = vmmov %vm13741_vm0  ;;  %v7078_v35 = vmax.f32 %v7071_v41, %v7077_v29 }
 0x5b7   : > { %7050 = vst.msk [vmem:[%s11494_s30 + $0x70] sm:$0xff] %vm13737_vm6, %v7033_v10  ;;  %v12863_v5 = vsel %vm12344_vm11, %v7033_v10, -1e+30  ;;  %v7085_v15 = vsel %vm13742_vm10, %v12850_v2, -inf  ;;  %vm13743_vm4 = vmmov %vm13741_vm0  ;;  %v7080_v59 = vmax.f32 %v7072_v12, %v7079_v62 }
 0x5b8   : > { %v7087_v53 = vsel %vm13743_vm4, %v12854_v16, -inf  ;;  %vm13744_vm15 = vmmov %vm13741_vm0  ;;  %v7086_v52 = vmax.f32 %v7078_v35, %v7085_v15  ;;  %vm7204_vm4 = vcmask 0  }
 0x5b9   : > { %v7093_v0 = vsel %vm13744_vm15, %v12863_v5, -inf  ;;  %v7088_v44 = vmax.f32 %v7080_v59, %v7087_v53  ;;  %vm13745_vm5 = vmmov %vm13741_vm0 }
 0x5ba   : > { %v7011_v34 = vpop.xlane.xlu1 %7010  ;;  %vm13746_vm14 = vmmov %vm13741_vm0  ;;  %v7094_v14 = vmax.f32 %v7086_v52, %v7093_v0 }
 0x5bb   : > { %v7034_v38 = vadd.f32 %v12737_v7, %v7011_v34  ;;  %vm13747_vm6 = vmmov %vm13741_vm0 }
 0x5bc   : > { %vm13748_vm10 = vmmov %vm13741_vm0 }
 0x5bd   : > { %7051 = vst.msk [vmem:[%s11494_s30 + $0x78] sm:$0xff] %vm13745_vm5, %v7034_v38  ;;  %v12878_v37 = vsel %vm12359_vm1, %v7034_v38, -1e+30  ;;  %vm13749_vm15 = vmmov %vm13741_vm0 }
 0x5be   : > { %v7095_v42 = vsel %vm13746_vm14, %v12878_v37, -inf  ;;  %vm13750_vm5 = vmmov %vm13741_vm0 }
 0x5bf   : > { %v7096_v27 = vmax.f32 %v7088_v44, %v7095_v42  ;;  %vm13751_vm14 = vmmov %vm13741_vm0 }
 0x5c1   : > { %v7098_v55 = vmax.f32 %v7094_v14, %v7096_v27 }
 0x5c3   : > { %v7099_v58 = vmax.f32 %v7097_v31, %v7098_v55 }
 0x5c5   : > { %v7100_v26 = vrot.slane %v7099_v58, 4 }
 0x5c7   : > { %v7101_v7 = vmax.f32 %v7099_v58, %v7100_v26 }
 0x5c9   : > { %v7102_v8 = vrot.slane %v7101_v7, 2 }
 0x5cb   : > { %v7103_v22 = vmax.f32 %v7101_v7, %v7102_v8 }
 0x5cd   : > { %v7104_v39 = vrot.slane %v7103_v22, 1 }
 0x5cf   : > { %v7105_v56 = vmax.f32 %v7103_v22, %v7104_v39 }
 0x5d1   : > { %v12885_v61 = vmax.f32 %v12882_v36, %v7105_v56 }
 0x5d3   : > { %v12889_v21 = vrot.slane %v12885_v61, %v11729_v24  ;;  %7480 = vst.msk [vmem:[#allocation2] sm:$0x1] %vm7204_vm4, %v12885_v61 }
 0x5d5   : > { %v7116_v32 = vsub.f32 %v12792_v28, %v12889_v21  ;;  %v7117_v33 = vsub.f32 %v12796_v49, %v12889_v21  ;;  %v7118_v31 = vsub.f32 %v7054_v25, %v12889_v21  ;;  %v7119_v10 = vsub.f32 %v7055_v19, %v12889_v21 }
 0x5d6   : > { %v7120_v29 = vsub.f32 %v12783_v45, %v12889_v21  ;;  %v7121_v12 = vsub.f32 %v12787_v17, %v12889_v21  ;;  %v7122_v34 = vsub.f32 %v7058_v1, %v12889_v21  ;;  %v7125_v28 = vsub.f32 %v12804_v4, %v12889_v21 }
 0x5d7   : > { %v7132_v62 = vmul.f32 1.442695, %v7116_v32  ;;  %v7134_v41 = vmul.f32 1.442695, %v7117_v33  ;;  %v7136_v15 = vmul.f32 1.442695, %v7118_v31  ;;  %v7123_v25 = vsub.f32 %v12839_v20, %v12889_v21 }
 0x5d8   : > { %v7138_v53 = vmul.f32 1.442695, %v7119_v10  ;;  %v7140_v49 = vmul.f32 1.442695, %v7120_v29  ;;  %v7142_v45 = vmul.f32 1.442695, %v7121_v12  ;;  %v7124_v19 = vsub.f32 %v12800_v3, %v12889_v21 }
 0x5d9   : > { %10662 = vpow2.f32 %v7132_v62  ;;  %v7144_v17 = vmul.f32 1.442695, %v7122_v34  ;;  %v7127_v35 = vsub.f32 %v12854_v16, %v12889_v21  ;;  %v7150_v1 = vmul.f32 1.442695, %v7125_v28 }
 0x5da   : > { %10664 = vpow2.f32 %v7134_v41  ;;  %v7146_v59 = vmul.f32 1.442695, %v7123_v25  ;;  %v7126_v4 = vsub.f32 %v12850_v2, %v12889_v21  ;;  %v7148_v38 = vmul.f32 1.442695, %v7124_v19 }
 0x5db   : > { %10666 = vpow2.f32 %v7136_v15  ;;  %v7129_v20 = vsub.f32 %v12831_v60, %v12889_v21  ;;  %v7154_v0 = vmul.f32 1.442695, %v7127_v35  ;;  %v7128_v42 = vsub.f32 %v12814_v9, %v12889_v21 }
 0x5dc   : > { %10668 = vpow2.f32 %v7138_v53  ;;  %v7152_v14 = vmul.f32 1.442695, %v7126_v4  ;;  %v7131_v60 = vsub.f32 %v12878_v37, %v12889_v21  ;;  %v7130_v56 = vsub.f32 %v12863_v5, %v12889_v21 }
 0x5dd   : > { %10670 = vpow2.f32 %v7140_v49  ;;  %v7158_v55 = vmul.f32 1.442695, %v7129_v20  ;;  %v7156_v22 = vmul.f32 1.442695, %v7128_v42 }
 0x5de   : > { %10672 = vpow2.f32 %v7142_v45  ;;  %v7162_v32 = vmul.f32 1.442695, %v7131_v60  ;;  %v7160_v12 = vmul.f32 1.442695, %v7130_v56 }
 0x5df   : > { %10674 = vpow2.f32 %v7144_v17 }
 0x5e0   : > { %10676 = vpow2.f32 %v7150_v1 }
 0x5e1   : > { %10678 = vpow2.f32 %v7146_v59 }
 0x5e2   : > { %10680 = vpow2.f32 %v7148_v38 }
 0x5e3   : > { %v10663_v52 = vpop.eup %10662  ;;  %10682 = vpow2.f32 %v7154_v0  ;;  %v7107_v0 = vsub.f32 %v12882_v36, %v12885_v61 }
 0x5e4   : > { %v10665_v3 = vpop.eup %10664  ;;  %v7166_v44 = vsel %vm13747_vm6, %v10663_v52, 0.0  ;;  %7219 = vperm.xlu0 %9604, %v10663_v52   ;;  %10684 = vpow2.f32 %v7152_v14  ;;  %vm13752_vm6 = vmmov %vm13741_vm0 }
 0x5e5   : > { %v10667_v16 = vpop.eup %10666  ;;  %v7167_v2 = vsel %vm13748_vm10, %v10665_v3, 0.0  ;;  %7224 = vperm.xlu1 %9605, %v10665_v3   ;;  %10686 = vpow2.f32 %v7158_v55  ;;  %vm13753_vm10 = vmmov %vm13741_vm0  ;;  %v7108_v14 = vmul.f32 1.442695, %v7107_v0 }
 0x5e6   : > { %v10669_v27 = vpop.eup %10668  ;;  %v7168_v58 = vadd.f32 %v7167_v2, %v7166_v44  ;;  %v7169_v26 = vsel %vm13741_vm0, %v10667_v16, 0.0  ;;  %10688 = vpow2.f32 %v7156_v22 }
 0x5e7   : > { %v10671_v7 = vpop.eup %10670  ;;  %v7171_v9 = vsel %vm13749_vm15, %v10669_v27, 0.0  ;;  %10690 = vpow2.f32 %v7162_v32  ;;  %vm13754_vm15 = vmmov %vm13741_vm0 }
 0x5e8   : > { %v7170_v8 = vadd.f32 %v7169_v26, %v7168_v58  ;;  %v10673_v39 = vpop.eup %10672  ;;  %v7173_v31 = vsel %vm13750_vm5, %v10671_v7, 0.0  ;;  %10692 = vpow2.f32 %v7160_v12  ;;  %vm13755_vm5 = vmmov %vm13741_vm0  ;;  %v13764_v12 = vld [vmem:[#allocation42_spill] sm:$0xff] }
 0x5e9   : > { %7229 = vperm.xlu1 %9605, %v10667_v16   ;;  %v10675_v37 = vpop.eup %10674  ;;  %v7175_v62 = vsel %vm13751_vm14, %v10673_v39, 0.0  ;;  %vm13756_vm14 = vmmov %vm13741_vm0  ;;  %10694 = vpow2.f32 %v7108_v14 }
 0x5ea   : > { %v7172_v33 = vadd.f32 %v7171_v9, %v7170_v8  ;;  %v10677_v10 = vpop.eup %10676  ;;  %v7177_v5 = vsel %vm13752_vm6, %v10675_v37, 0.0  ;;  %vm13757_vm6 = vmmov %vm13741_vm0  ;;  %v7164_v9 = vld [vmem:[#allocation3] sm:$0x1] }
 0x5eb   : > { %7264 = vperm.xlu0 %9604, %v10677_v10   ;;  %v10679_v41 = vpop.eup %10678  ;;  %v7183_v35 = vsel %vm13754_vm15, %v10677_v10, 0.0  ;;  %vm13759_vm15 = vmmov %vm13741_vm0 }
 0x5ec   : > { %v7174_v29 = vadd.f32 %v7173_v31, %v7172_v33  ;;  %v10681_v53 = vpop.eup %10680  ;;  %v7179_v28 = vsel %vm13753_vm10, %v10679_v41, 0.0  ;;  %vm13758_vm10 = vmmov %vm13741_vm0 }
 0x5ed   : > { %7234 = vperm.xlu1 %9605, %v10669_v27   ;;  %v10683_v21 = vpop.eup %10682  ;;  %v7181_v45 = vsel %vm13741_vm0, %v10681_v53, 0.0 }
 0x5ee   : > { %v7176_v15 = vadd.f32 %v7175_v62, %v7174_v29  ;;  %v10685_v25 = vpop.eup %10684  ;;  %v7187_v52 = vsel %vm13756_vm14, %v10683_v21, 0.0  ;;  %v13762_v29 = vld [vmem:[#allocation41_spill] sm:$0xff] }
 0x5ef   : > { %7274 = vperm.xlu0 %9604, %v10683_v21   ;;  %v10687_v19 = vpop.eup %10686  ;;  %v7185_v4 = vsel %vm13755_vm5, %v10685_v25, 0.0  ;;  %v13763_v62 = vmax.f32 %v13762_v29, 0.0 }
 0x5f0   : > { %v7178_v34 = vadd.f32 %v7177_v5, %v7176_v15  ;;  %v10689_v59 = vpop.eup %10688  ;;  %v7191_v2 = vsel %vm13758_vm10, %v10687_v19, 0.0  ;;  %v13765_v15 = vmax.f32 %v13764_v12, 0.0  ;;  %v13766_v5 = vld [vmem:[#allocation43_spill] sm:$0xff]  ;;  %v13784_v12 = vld [vmem:[#allocation52_spill] sm:$0xff] }
 0x5f1   : > { %7239 = vperm.xlu1 %9605, %v10671_v7   ;;  %v10691_v38 = vpop.eup %10690  ;;  %v7189_v44 = vsel %vm13757_vm6, %v10689_v59, 0.0  ;;  %v13767_v21 = vmax.f32 %v13766_v5, 0.0  ;;  %v13786_v5 = vld [vmem:[#allocation53_spill] sm:$0xff] }
 0x5f2   : > { %v7180_v49 = vadd.f32 %v7179_v28, %v7178_v34  ;;  %v10693_v16 = vpop.eup %10692  ;;  %v7195_v36 = vsel %vm13759_vm15, %v10691_v38, 0.0  ;;  %v13768_v28 = vld [vmem:[#allocation44_spill] sm:$0xff] }
 0x5f3   : > { %7284 = vperm.xlu0 %9604, %v10687_v19   ;;  %v7193_v60 = vsel %vm13741_vm0, %v10693_v16, 0.0  ;;  %v10695_v22 = vpop.eup %10694  ;;  %v5329_v34 = vsel %vm11774_vm2, %v13767_v21, 0.0  ;;  %v13787_v21 = vmax.f32 %v13786_v5, 0.0 }
 0x5f4   : > { %v7182_v17 = vadd.f32 %v7181_v45, %v7180_v49  ;;  %v7165_v56 = vmul.f32 %v10695_v22, %v7164_v9  ;;  %v13769_v49 = vmax.f32 %v13768_v28, 0.0  ;;  %v13770_v45 = vld [vmem:[#allocation45_spill] sm:$0xff]  ;;  %v13780_v9 = vld [vmem:[#allocation50_spill] sm:$0xff] }
 0x5f5   : > { %7244 = vperm.xlu1 %9605, %v10673_v39   ;;  %v13771_v19 = vmax.f32 %v13770_v45, 0.0  ;;  %v13788_v28 = vld [vmem:[#allocation54_spill] sm:$0xff] }
 0x5f6   : > { %v7184_v1 = vadd.f32 %v7183_v35, %v7182_v17  ;;  %v13772_v35 = vld [vmem:[#allocation46_spill] sm:$0xff] }
 0x5f7   : > { %7294 = vperm.xlu0 %9604, %v10691_v38   ;;  %v5332_v17 = vsel %vm11786_vm3, %v13771_v19, 0.0 }
 0x5f8   : > { %v7186_v20 = vadd.f32 %v7185_v4, %v7184_v1  ;;  %v13773_v1 = vmax.f32 %v13772_v35, 0.0  ;;  %v13774_v4 = vld [vmem:[#allocation47_spill] sm:$0xff] }
 0x5f9   : > { %7249 = vperm.xlu1 %9605, %v10675_v37   ;;  %v13760_v37 = vld [vmem:[#allocation40_spill] sm:$0xff]  ;;  %v13775_v38 = vmax.f32 %v13774_v4, 0.0 }
 0x5fa   : > { %v7188_v3 = vadd.f32 %v7187_v52, %v7186_v20  ;;  %v13761_v31 = vmax.f32 %v13760_v37, 0.0  ;;  %v13792_v4 = vld [vmem:[#allocation56_spill] sm:$0xff] }
 0x5fb   : > { %v5333_v48 = vsel %vm11786_vm3, %v13775_v38, 0.0  ;;  %v13793_v38 = vmax.f32 %v13792_v4, 0.0  ;;  %v13819_v4 = vld [vmem:[#allocation69_spill] sm:$0xff] }
 0x5fc   : > { %v7190_v42 = vadd.f32 %v7189_v44, %v7188_v3  ;;  %v5326_v10 = vsel %vm11774_vm2, %v13761_v31, 0.0 }
 0x5fd   : > { %7254 = vperm.xlu1 %9605, %v10679_v41   ;;  %v5328_v41 = vsel %vm11774_vm2, %v13763_v62, 0.0 }
 0x5fe   : > { %v7192_v27 = vadd.f32 %v7191_v2, %v7190_v42 }
 0x600   : > { %v7194_v55 = vadd.f32 %v7193_v60, %v7192_v27 }
 0x601   : > { %7259 = vperm.xlu1 %9605, %v10681_v53   ;;  %v5327_v53 = vsel %vm11774_vm2, %v13765_v15, 0.0  ;;  %v13785_v15 = vmax.f32 %v13784_v12, 0.0  ;;  %vm13818_vm2 = vnez %v13654_v18 }
 0x602   : > { %v7196_v61 = vadd.f32 %v7195_v36, %v7194_v55 }
 0x604   : > { %v7197_v58 = vrot.slane %v7196_v61, 4 }
 0x605   : > { %7269 = vperm.xlu1 %9605, %v10685_v25   ;;  %v5330_v25 = vsel %vm11786_vm3, %v13769_v49, 0.0  ;;  %v13789_v49 = vmax.f32 %v13788_v28, 0.0 }
 0x606   : > { %v7198_v26 = vadd.f32 %v7197_v58, %v7196_v61  ;;  %v13776_v58 = vld [vmem:[#allocation48_spill] sm:$0xff] }
 0x607   : > { %v5339_v30 = vsel %vm13732_vm13, %v13789_v49, 0.0 }
 0x608   : > { %v7199_v7 = vrot.slane %v7198_v26, 2 }
 0x609   : > { %7279 = vperm.xlu1 %9605, %v10689_v59   ;;  %v5331_v59 = vsel %vm11786_vm3, %v13773_v1, 0.0  ;;  %vm13827_vm3 = vnez %v13666_v51 }
 0x60a   : > { %v7200_v8 = vadd.f32 %v7199_v7, %v7198_v26  ;;  %v13777_v26 = vmax.f32 %v13776_v58, 0.0  ;;  %v13778_v7 = vld [vmem:[#allocation49_spill] sm:$0xff] }
 0x60c   : > { %v7201_v39 = vrot.slane %v7200_v8, 1  ;;  %v5334_v54 = vsel %vm13731_vm12, %v13777_v26, 0.0  ;;  %v13804_v26 = vld [vmem:[#allocation62_spill] sm:$0xff] }
 0x60d   : > { %7289 = vperm.xlu1 %9605, %v10693_v16  }
 0x60e   : > { %v7202_v32 = vadd.f32 %v7201_v39, %v7200_v8  ;;  %v13779_v8 = vmax.f32 %v13778_v7, 0.0  ;;  %v13781_v39 = vmax.f32 %v13780_v9, 0.0 }
 0x610   : > { %v7203_v33 = vadd.f32 %v7202_v32, %v7165_v56  ;;  %v5335_v56 = vsel %vm13731_vm12, %v13781_v39, 0.0  ;;  %v13782_v32 = vld [vmem:[#allocation51_spill] sm:$0xff] }
 0x611   : > { %7209 = vperm.xlu1 %9605, %v10695_v22   ;;  %v5336_v22 = vsel %vm13731_vm12, %v13779_v8, 0.0  ;;  %v13806_v8 = vld [vmem:[#allocation63_spill] sm:$0xff] }
 0x612   : > { %7205 = vst.msk [vmem:[#allocation3] sm:$0x1] %vm7204_vm4, %v7203_v33  ;;  %v13783_v33 = vmax.f32 %v13782_v32, 0.0 }
 0x614   : > { %v5337_v37 = vsel %vm13731_vm12, %v13783_v33, 0.0  ;;  %v13808_v33 = vld [vmem:[#allocation64_spill] sm:$0xff]  ;;  %vm13863_vm12 = vnez %v13700_v50 }
 0x663   : > { %v7220_v20 = vpop.permute.xlu0 %7219 }
 0x664   : > { %v7225_v0 = vpop.permute.xlu1 %7224  ;;  %v7297_v52 = vmul.f32 %v7220_v20, %v5326_v10  ;;  %v7298_v3 = vmul.f32 %v7220_v20, %v5327_v53  ;;  %v7299_v44 = vmul.f32 %v7220_v20, %v5328_v41  ;;  %v7300_v16 = vmul.f32 %v7220_v20, %v5329_v34  ;;  %v13794_v20 = vld [vmem:[#allocation57_spill] sm:$0xff] }
 0x665   : > { %v7301_v42 = vmul.f32 %v7225_v0, %v5330_v25  ;;  %v7302_v14 = vmul.f32 %v7225_v0, %v5331_v59  ;;  %v7303_v2 = vmul.f32 %v7225_v0, %v5332_v17  ;;  %v7304_v27 = vmul.f32 %v7225_v0, %v5333_v48  ;;  %v13790_v25 = vld [vmem:[#allocation55_spill] sm:$0xff] }
 0x666   : > { %v5338_v53 = vsel %vm13732_vm13, %v13785_v15, 0.0  ;;  %v5340_v34 = vsel %vm13732_vm13, %v13787_v21, 0.0  ;;  %v13791_v45 = vmax.f32 %v13790_v25, 0.0  ;;  %v5342_v48 = vsel %vm11934_vm8, %v13793_v38, 0.0  ;;  %v13814_v15 = vld [vmem:[#allocation67_spill] sm:$0xff]  ;;  %v13816_v25 = vld [vmem:[#allocation68_spill] sm:$0xff] }
 0x667   : > { %v7361_v60 = vadd.f32 %v7301_v42, %v7297_v52  ;;  %v7382_v55 = vadd.f32 %v7302_v14, %v7298_v3  ;;  %v7403_v36 = vadd.f32 %v7303_v2, %v7299_v44  ;;  %v7424_v61 = vadd.f32 %v7304_v27, %v7300_v16  ;;  %v13796_v3 = vld [vmem:[#allocation58_spill] sm:$0xff]  ;;  %v13798_v16 = vld [vmem:[#allocation59_spill] sm:$0xff]  ;;  %v13800_v27 = vld [vmem:[#allocation60_spill] sm:$0xff] }
 0x668   : > { %v7230_v31 = vpop.permute.xlu1 %7229  ;;  %v5341_v19 = vsel %vm13732_vm13, %v13791_v45, 0.0  ;;  %v13795_v0 = vmax.f32 %v13794_v20, 0.0  ;;  %v13797_v44 = vmax.f32 %v13796_v3, 0.0  ;;  %v13799_v42 = vmax.f32 %v13798_v16, 0.0 }
 0x669   : > { %v7305_v10 = vmul.f32 %v7230_v31, %v5334_v54  ;;  %v7306_v29 = vmul.f32 %v7230_v31, %v5335_v56  ;;  %v7307_v62 = vmul.f32 %v7230_v31, %v5336_v22  ;;  %v7308_v41 = vmul.f32 %v7230_v31, %v5337_v37 }
 0x66a   : > { %v5344_v52 = vsel %vm11934_vm8, %v13795_v0, 0.0  ;;  %v5343_v46 = vsel %vm11934_vm8, %v13797_v44, 0.0  ;;  %v5345_v14 = vsel %vm11934_vm8, %v13799_v42, 0.0  ;;  %v13805_v54 = vmax.f32 %v13804_v26, 0.0  ;;  %v13821_v0 = vld [vmem:[#allocation70_spill] sm:$0xff] }
 0x66b   : > { %v7362_v17 = vadd.f32 %v7361_v60, %v7305_v10  ;;  %v7383_v35 = vadd.f32 %v7382_v55, %v7306_v29  ;;  %v7404_v1 = vadd.f32 %v7403_v36, %v7307_v62  ;;  %v7425_v59 = vadd.f32 %v7424_v61, %v7308_v41  ;;  %v13802_v36 = vld [vmem:[#allocation61_spill] sm:$0xff]  ;;  %v13812_v41 = vld [vmem:[#allocation66_spill] sm:$0xff] }
 0x66c   : > { %v7235_v2 = vpop.permute.xlu1 %7234  ;;  %v13801_v60 = vmax.f32 %v13800_v27, 0.0  ;;  %v13803_v61 = vmax.f32 %v13802_v36, 0.0  ;;  %v5347_v7 = vsel %vm11950_vm9, %v13805_v54, 0.0  ;;  %v13807_v22 = vmax.f32 %v13806_v8, 0.0  ;;  %v13810_v10 = vld [vmem:[#allocation65_spill] sm:$0xff]  ;;  %v13830_v54 = vld [vmem:[#allocation74_spill] sm:$0xff] }
 0x66d   : > { %v7309_v9 = vmul.f32 %v7235_v2, %v5338_v53  ;;  %v7310_v39 = vmul.f32 %v7235_v2, %v5339_v30  ;;  %v7311_v56 = vmul.f32 %v7235_v2, %v5340_v34  ;;  %v7312_v32 = vmul.f32 %v7235_v2, %v5341_v19  ;;  %v13825_v2 = vld [vmem:[#allocation72_spill] sm:$0xff]  ;;  %v13828_v36 = vld [vmem:[#allocation73_spill] sm:$0xff] }
 0x66e   : > { %v5346_v55 = vsel %vm11950_vm9, %v13801_v60, 0.0  ;;  %v5348_v58 = vsel %vm11950_vm9, %v13803_v61, 0.0  ;;  %v5349_v57 = vsel %vm11950_vm9, %v13807_v22, 0.0  ;;  %v13809_v37 = vmax.f32 %v13808_v33, 0.0 }
 0x66f   : > { %v13811_v29 = vmax.f32 %v13810_v10, 0.0  ;;  %v13813_v12 = vmax.f32 %v13812_v41, 0.0  ;;  %v13815_v53 = vmax.f32 %v13814_v15, 0.0  ;;  %v7363_v21 = vadd.f32 %v7362_v17, %v7309_v9  ;;  %v13823_v17 = vld [vmem:[#allocation71_spill] sm:$0xff]  ;;  %v13837_v10 = vld [vmem:[#allocation77_spill] sm:$0xff] }
 0x670   : > { %v5350_v31 = vsel %vm13729_vm7, %v13809_v37, 0.0  ;;  %v7384_v34 = vadd.f32 %v7383_v35, %v7310_v39  ;;  %v7405_v28 = vadd.f32 %v7404_v1, %v7311_v56  ;;  %v7426_v49 = vadd.f32 %v7425_v59, %v7312_v32  ;;  %v7240_v30 = vpop.permute.xlu1 %7239  ;;  %v13834_v32 = vld [vmem:[#allocation76_spill] sm:$0xff] }
 0x671   : > { %v5352_v62 = vsel %vm13729_vm7, %v13811_v29, 0.0  ;;  %v5351_v43 = vsel %vm13729_vm7, %v13813_v12, 0.0  ;;  %v5353_v5 = vsel %vm13729_vm7, %v13815_v53, 0.0  ;;  %v13817_v45 = vmax.f32 %v13816_v25, 0.0  ;;  %v13839_v12 = vld [vmem:[#allocation78_spill] sm:$0xff]  ;;  %v13841_v53 = vld [vmem:[#allocation79_spill] sm:$0xff] }
 0x672   : > { %v13820_v38 = vmax.f32 %v13819_v4, 0.0  ;;  %v13822_v3 = vmax.f32 %v13821_v0, 0.0  ;;  %v13824_v35 = vmax.f32 %v13823_v17, 0.0  ;;  %v7313_v59 = vmul.f32 %v7240_v30, %v5342_v48  ;;  %v13832_v48 = vld [vmem:[#allocation75_spill] sm:$0xff]  ;;  %v13846_v0 = vld [vmem:[#allocation81_spill] sm:$0xff] }
 0x673   : > { %v5354_v19 = vsel %vm13818_vm2, %v13817_v45, 0.0  ;;  %v7314_v44 = vmul.f32 %v7240_v30, %v5343_v46  ;;  %v7315_v16 = vmul.f32 %v7240_v30, %v5344_v52  ;;  %v7316_v42 = vmul.f32 %v7240_v30, %v5345_v14  ;;  %v13843_v45 = vld [vmem:[#allocation80_spill] sm:$0xff] }
 0x674   : > { %v5356_v20 = vsel %vm13818_vm2, %v13820_v38, 0.0  ;;  %v5355_v63 = vsel %vm13818_vm2, %v13822_v3, 0.0  ;;  %v5357_v1 = vsel %vm13818_vm2, %v13824_v35, 0.0  ;;  %v13826_v27 = vmax.f32 %v13825_v2, 0.0  ;;  %v7245_v56 = vpop.permute.xlu1 %7244  ;;  %v13848_v35 = vld [vmem:[#allocation82_spill] sm:$0xff] }
 0x675   : > { %v13829_v61 = vmax.f32 %v13828_v36, 0.0  ;;  %v13831_v8 = vmax.f32 %v13830_v54, 0.0  ;;  %v13833_v46 = vmax.f32 %v13832_v48, 0.0  ;;  %v7364_v14 = vadd.f32 %v7363_v21, %v7313_v59  ;;  %v13855_v54 = vld [vmem:[#allocation86_spill] sm:$0xff] }
 0x676   : > { %v5358_v60 = vsel %vm13827_vm3, %v13826_v27, 0.0  ;;  %v7385_v22 = vadd.f32 %v7384_v34, %v7314_v44  ;;  %v7406_v9 = vadd.f32 %v7405_v28, %v7315_v16  ;;  %v7427_v39 = vadd.f32 %v7426_v49, %v7316_v42  ;;  %v13852_v27 = vld [vmem:[#allocation85_spill] sm:$0xff] }
 0x677   : > { %v13077_v26 = vsel %vm13827_vm3, %v13829_v61, 0.0  ;;  %v5359_v18 = vsel %vm13827_vm3, %v13831_v8, 0.0  ;;  %v5361_v52 = vsel %vm13827_vm3, %v13833_v46, 0.0  ;;  %v13835_v33 = vmax.f32 %v13834_v32, 0.0  ;;  %v13857_v46 = vld [vmem:[#allocation88_spill] sm:$0xff] }
 0x678   : > { %vm13836_vm8 = vnez %v13670_v11  ;;  %v13838_v29 = vmax.f32 %v13837_v10, 0.0  ;;  %v13840_v51 = vmax.f32 %v13839_v12, 0.0  ;;  %v13842_v21 = vmax.f32 %v13841_v53, 0.0  ;;  %v7250_v2 = vpop.permute.xlu1 %7249  ;;  %v13861_v12 = vld [vmem:[#allocation90_spill] sm:$0xff] }
 0x679   : > { %v13091_v37 = vsel %vm13836_vm8, %v13835_v33, 0.0  ;;  %v7317_v28 = vmul.f32 %v7245_v56, %v5346_v55  ;;  %v7318_v49 = vmul.f32 %v7245_v56, %v5347_v7  ;;  %v7319_v30 = vmul.f32 %v7245_v56, %v5348_v58  ;;  %v13850_v55 = vld [vmem:[#allocation83_spill] sm:$0xff] }
 0x67a   : > { %v13097_v41 = vsel %vm13836_vm8, %v13838_v29, 0.0  ;;  %v13103_v15 = vsel %vm13836_vm8, %v13840_v51, 0.0  ;;  %v13109_v34 = vsel %vm13836_vm8, %v13842_v21, 0.0  ;;  %v7320_v25 = vmul.f32 %v7245_v56, %v5349_v57  ;;  %v13864_v21 = vld [vmem:[#allocation91_spill] sm:$0xff] }
 0x67b   : > { %v13844_v4 = vmax.f32 %v13843_v45, 0.0  ;;  %vm13845_vm9 = vnez %v13733_v23  ;;  %v13847_v3 = vmax.f32 %v13846_v0, 0.0  ;;  %v13849_v59 = vmax.f32 %v13848_v35, 0.0 }
 0x67c   : > { %v13851_v7 = vmax.f32 %v13850_v55, 0.0  ;;  %v7365_v57 = vadd.f32 %v7364_v14, %v7317_v28  ;;  %v7386_v44 = vadd.f32 %v7385_v22, %v7318_v49  ;;  %v7407_v16 = vadd.f32 %v7406_v9, %v7319_v30  ;;  %v13859_v14 = vld [vmem:[#allocation89_spill] sm:$0xff]  ;;  %v13866_v30 = vld [vmem:[#allocation92_spill] sm:$0xff] }
 0x67d   : > { %v5366_v38 = vsel %vm13845_vm9, %v13844_v4, 0.0  ;;  %v13119_v17 = vsel %vm13845_vm9, %v13847_v3, 0.0  ;;  %v5367_v11 = vsel %vm13845_vm9, %v13849_v59, 0.0  ;;  %v7428_v42 = vadd.f32 %v7427_v39, %v7320_v25  ;;  %v7265_v39 = vpop.permute.xlu0 %7264  ;;  %v7255_v3 = vpop.permute.xlu1 %7254 }
 0x67e   : > { %v5369_v58 = vsel %vm13845_vm9, %v13851_v7, 0.0  ;;  %v13853_v36 = vmax.f32 %v13852_v27, 0.0  ;;  %vm13854_vm7 = vnez %v13735_v13  ;;  %v13856_v8 = vmax.f32 %v13855_v54, 0.0  ;;  %v13873_v54 = vld [vmem:[#allocation95_spill] sm:$0xff] }
 0x67f   : > { %v13858_v56 = vmax.f32 %v13857_v46, 0.0  ;;  %v13860_v22 = vmax.f32 %v13859_v14, 0.0  ;;  %v7321_v32 = vmul.f32 %v7250_v2, %v5350_v31  ;;  %v7322_v33 = vmul.f32 %v7250_v2, %v5351_v43  ;;  %v13868_v31 = vld [vmem:[#allocation93_spill] sm:$0xff]  ;;  %v13875_v46 = vld [vmem:[#allocation96_spill] sm:$0xff]  ;;  %v13879_v14 = vld [vmem:[#allocation98_spill] sm:$0xff] }
 0x680   : > { %v5370_v61 = vsel %vm13854_vm7, %v13853_v36, 0.0  ;;  %v13137_v48 = vsel %vm13854_vm7, %v13856_v8, 0.0  ;;  %v7323_v10 = vmul.f32 %v7250_v2, %v5352_v62  ;;  %v7324_v29 = vmul.f32 %v7250_v2, %v5353_v5  ;;  %v13870_v2 = vld [vmem:[#allocation94_spill] sm:$0xff] }
 0x681   : > { %v5371_v23 = vsel %vm13854_vm7, %v13858_v56, 0.0  ;;  %v5373_v9 = vsel %vm13854_vm7, %v13860_v22, 0.0  ;;  %v13862_v51 = vmax.f32 %v13861_v12, 0.0  ;;  %v13865_v28 = vmax.f32 %v13864_v21, 0.0  ;;  %v13883_v12 = vld [vmem:[#allocation100_spill] sm:$0xff]  ;;  %v13885_v21 = vld [vmem:[#allocation101_spill] sm:$0xff] }
 0x682   : > { %v13867_v25 = vmax.f32 %v13866_v30, 0.0  ;;  %v13869_v43 = vmax.f32 %v13868_v31, 0.0  ;;  %v7366_v5 = vadd.f32 %v7365_v57, %v7321_v32  ;;  %v7387_v45 = vadd.f32 %v7386_v44, %v7322_v33  ;;  %v13881_v33 = vld [vmem:[#allocation99_spill] sm:$0xff]  ;;  %v7260_v31 = vpop.permute.xlu1 %7259 }
 0x683   : > { %v5374_v53 = vsel %vm13863_vm12, %v13862_v51, 0.0  ;;  %v13155_v49 = vsel %vm13863_vm12, %v13865_v28, 0.0  ;;  %v7408_v4 = vadd.f32 %v7407_v16, %v7323_v10  ;;  %v7429_v0 = vadd.f32 %v7428_v42, %v7324_v29  ;;  %v13877_v16 = vld [vmem:[#allocation97_spill] sm:$0xff] }
 0x684   : > { %v5375_v13 = vsel %vm13863_vm12, %v13867_v25, 0.0  ;;  %v5377_v62 = vsel %vm13863_vm12, %v13869_v43, 0.0  ;;  %v7325_v35 = vmul.f32 %v7255_v3, %v5354_v19  ;;  %v7326_v59 = vmul.f32 %v7255_v3, %v5355_v63  ;;  %v7275_v25 = vpop.permute.xlu0 %7274 }
 0x685   : > { %v7327_v55 = vmul.f32 %v7255_v3, %v5356_v20  ;;  %v7328_v7 = vmul.f32 %v7255_v3, %v5357_v1  ;;  %v13871_v27 = vmax.f32 %v13870_v2, 0.0  ;;  %vm13872_vm13 = vnez %v13704_v47  ;;  %v13891_v2 = vld [vmem:[#allocation104_spill] sm:$0xff] }
 0x686   : > { %v13874_v8 = vmax.f32 %v13873_v54, 0.0  ;;  %v13876_v57 = vmax.f32 %v13875_v46, 0.0  ;;  %v13878_v19 = vmax.f32 %v13877_v16, 0.0  ;;  %v7367_v63 = vadd.f32 %v7366_v5, %v7325_v35 }
 0x687   : > { %v5378_v36 = vsel %vm13872_vm13, %v13871_v27, 0.0  ;;  %v7388_v1 = vadd.f32 %v7387_v45, %v7326_v59  ;;  %v7409_v42 = vadd.f32 %v7408_v4, %v7327_v55  ;;  %v7430_v56 = vadd.f32 %v7429_v0, %v7328_v7  ;;  %v13887_v0 = vld [vmem:[#allocation102_spill] sm:$0xff]  ;;  %v13889_v59 = vld [vmem:[#allocation103_spill] sm:$0xff] }
 0x688   : > { %v5380_v50 = vsel %vm13872_vm13, %v13874_v8, 0.0  ;;  %v5379_v44 = vsel %vm13872_vm13, %v13876_v57, 0.0  ;;  %v5381_v20 = vsel %vm13872_vm13, %v13878_v19, 0.0  ;;  %v13880_v22 = vmax.f32 %v13879_v14, 0.0  ;;  %v7285_v6 = vpop.permute.xlu0 %7284 }
 0x689   : > { %v13882_v10 = vmax.f32 %v13881_v33, 0.0  ;;  %v13884_v51 = vmax.f32 %v13883_v12, 0.0  ;;  %v13886_v28 = vmax.f32 %v13885_v21, 0.0  ;;  %v7329_v43 = vmul.f32 %v7260_v31, %v5358_v60  ;;  %v13893_v60 = vld [vmem:[#allocation105_spill] sm:$0xff] }
 0x68a   : > { %v5382_v32 = vsel %vm12344_vm11, %v13880_v22, 0.0  ;;  %v7330_v5 = vmul.f32 %v7260_v31, %v5359_v18  ;;  %v7331_v45 = vmul.f32 %v7260_v31, %v13077_v26  ;;  %v7332_v4 = vmul.f32 %v7260_v31, %v5361_v52  ;;  %v7270_v22 = vpop.permute.xlu1 %7269 }
 0x68b   : > { %v5384_v29 = vsel %vm12344_vm11, %v13882_v10, 0.0  ;;  %v5383_v47 = vsel %vm12344_vm11, %v13884_v51, 0.0  ;;  %v5385_v30 = vsel %vm12344_vm11, %v13886_v28, 0.0  ;;  %v13888_v3 = vmax.f32 %v13887_v0, 0.0 }
 0x68c   : > { %v13890_v55 = vmax.f32 %v13889_v59, 0.0  ;;  %v13892_v40 = vmax.f32 %v13891_v2, 0.0  ;;  %v13894_v18 = vmax.f32 %v13893_v60, 0.0  ;;  %v7368_v52 = vadd.f32 %v7367_v63, %v7329_v43 }
 0x68d   : > { %v5386_v35 = vsel %vm12359_vm1, %v13888_v3, 0.0  ;;  %v7389_v54 = vadd.f32 %v7388_v1, %v7330_v5  ;;  %v7410_v8 = vadd.f32 %v7409_v42, %v7331_v45  ;;  %v7431_v46 = vadd.f32 %v7430_v56, %v7332_v4 }
 0x68e   : > { %v5388_v7 = vsel %vm12359_vm1, %v13890_v55, 0.0  ;;  %v5387_v27 = vsel %vm12359_vm1, %v13892_v40, 0.0  ;;  %v5389_v26 = vsel %vm12359_vm1, %v13894_v18, 0.0  ;;  %v7333_v57 = vmul.f32 %v7265_v39, %v13091_v37 }
 0x68f   : > { %v7334_v16 = vmul.f32 %v7265_v39, %v13103_v15  ;;  %v7335_v19 = vmul.f32 %v7265_v39, %v13097_v41  ;;  %v7336_v14 = vmul.f32 %v7265_v39, %v13109_v34  ;;  %v7337_v33 = vmul.f32 %v7270_v22, %v5366_v38  ;;  %v7280_v39 = vpop.permute.xlu1 %7279 }
 0x690   : > { %v7338_v10 = vmul.f32 %v7270_v22, %v5367_v11  ;;  %v7339_v12 = vmul.f32 %v7270_v22, %v13119_v17  ;;  %v7340_v51 = vmul.f32 %v7270_v22, %v5369_v58  ;;  %v7369_v21 = vadd.f32 %v7368_v52, %v7333_v57 }
 0x691   : > { %v7390_v63 = vadd.f32 %v7389_v54, %v7334_v16  ;;  %v7411_v1 = vadd.f32 %v7410_v8, %v7335_v19  ;;  %v7432_v42 = vadd.f32 %v7431_v46, %v7336_v14  ;;  %v7341_v56 = vmul.f32 %v7275_v25, %v5370_v61 }
 0x692   : > { %v7342_v28 = vmul.f32 %v7275_v25, %v5371_v23  ;;  %v7343_v37 = vmul.f32 %v7275_v25, %v13137_v48  ;;  %v7344_v15 = vmul.f32 %v7275_v25, %v5373_v9  ;;  %v7370_v31 = vadd.f32 %v7369_v21, %v7337_v33  ;;  %v7295_v48 = vpop.permute.xlu0 %7294 }
 0x693   : > { %v7391_v41 = vadd.f32 %v7390_v63, %v7338_v10  ;;  %v7412_v43 = vadd.f32 %v7411_v1, %v7339_v12  ;;  %v7433_v34 = vadd.f32 %v7432_v42, %v7340_v51  ;;  %v7345_v38 = vmul.f32 %v7280_v39, %v5374_v53  ;;  %v7290_v40 = vpop.permute.xlu1 %7289 }
 0x694   : > { %v7346_v11 = vmul.f32 %v7280_v39, %v5375_v13  ;;  %v7347_v17 = vmul.f32 %v7280_v39, %v13155_v49  ;;  %v7348_v58 = vmul.f32 %v7280_v39, %v5377_v62  ;;  %v7371_v5 = vadd.f32 %v7370_v31, %v7341_v56 }
 0x695   : > { %v7392_v45 = vadd.f32 %v7391_v41, %v7342_v28  ;;  %v7413_v4 = vadd.f32 %v7412_v43, %v7343_v37  ;;  %v7434_v0 = vadd.f32 %v7433_v34, %v7344_v15  ;;  %v7349_v3 = vmul.f32 %v7285_v6, %v5378_v36  ;;  %v13895_v34 = vld [vmem:[#allocation39_spill] sm:$0xff] }
 0x696   : > { %v7350_v61 = vmul.f32 %v7285_v6, %v5379_v44  ;;  %v7351_v23 = vmul.f32 %v7285_v6, %v5380_v50  ;;  %v7352_v59 = vmul.f32 %v7285_v6, %v5381_v20  ;;  %v7372_v9 = vadd.f32 %v7371_v5, %v7345_v38 }
 0x697   : > { %v7393_v25 = vadd.f32 %v7392_v45, %v7346_v11  ;;  %v7414_v55 = vadd.f32 %v7413_v4, %v7347_v17  ;;  %v7435_v2 = vadd.f32 %v7434_v0, %v7348_v58  ;;  %v7353_v60 = vmul.f32 %v7290_v40, %v5382_v32  ;;  %v7210_v5 = vpop.permute.xlu1 %7209 }
 0x698   : > { %v7354_v53 = vmul.f32 %v7290_v40, %v5383_v47  ;;  %v7355_v13 = vmul.f32 %v7290_v40, %v5384_v29  ;;  %v7356_v18 = vmul.f32 %v7290_v40, %v5385_v30  ;;  %v7373_v49 = vadd.f32 %v7372_v9, %v7349_v3 }
 0x699   : > { %v7394_v62 = vadd.f32 %v7393_v25, %v7350_v61  ;;  %v7415_v52 = vadd.f32 %v7414_v55, %v7351_v23  ;;  %v7436_v54 = vadd.f32 %v7435_v2, %v7352_v59  ;;  %v7357_v8 = vmul.f32 %v7295_v48, %v5386_v35  ;;  %v7206_v23 = vld [vmem:[#allocation4] sm:$0xf] }
 0x69a   : > { %v7358_v46 = vmul.f32 %v7295_v48, %v5387_v27  ;;  %v7359_v36 = vmul.f32 %v7295_v48, %v5388_v7  ;;  %v7360_v44 = vmul.f32 %v7295_v48, %v5389_v26  ;;  %v7374_v50 = vadd.f32 %v7373_v49, %v7353_v60 }
 0x69b   : > { %v7395_v20 = vadd.f32 %v7394_v62, %v7354_v53  ;;  %v7416_v57 = vadd.f32 %v7415_v52, %v7355_v13  ;;  %v7437_v16 = vadd.f32 %v7436_v54, %v7356_v18  ;;  %v11077_v10 = vmov 1966171168  }
 0x69c   : > { %v7375_v19 = vadd.f32 %v7374_v50, %v7357_v8  ;;  %v7452_v12 = vunpack.c.l.s4 %v11077_v10  ;;  %v7215_v3 = vrot.slane %v7210_v5, %v11729_v24  ;;  %v13896_v25 = vlaneseq }
 0x69d   : > { %v7396_v14 = vadd.f32 %v7395_v20, %v7358_v46  ;;  %v7417_v22 = vadd.f32 %v7416_v57, %v7359_v36  ;;  %v7438_v33 = vadd.f32 %v7437_v16, %v7360_v44 }
 0x69e   : > { %v7376_v32 = vrot.slane %v7375_v19, 4  ;;  %v7453_v1 = vunpack.c.0.s8 %v7452_v12  ;;  %v7216_v48 = vmul.f32 %v7215_v3, %v7206_v23  ;;  %vm7477_vm11 = vcmp.lt.s32.totalorder %v13896_v25, 512 }
 0x69f   : > { %v7397_v47 = vrot.slane %v7396_v14, 4  ;;  %v7418_v29 = vrot.slane %v7417_v22, 4  ;;  %v7439_v30 = vrot.slane %v7438_v33, 4 }
 0x6a0   : > { %v7377_v51 = vadd.f32 %v7376_v32, %v7375_v19  ;;  %v7456_v39 = vsub.s32 %v7453_v1, %v13895_v34 }
 0x6a1   : > { %v7398_v6 = vadd.f32 %v7397_v47, %v7396_v14  ;;  %v7419_v35 = vadd.f32 %v7418_v29, %v7417_v22  ;;  %v7440_v27 = vadd.f32 %v7439_v30, %v7438_v33 }
 0x6a2   : > { %v7378_v7 = vrot.slane %v7377_v51, 2 }
 0x6a3   : > { %v7399_v26 = vrot.slane %v7398_v6, 2  ;;  %v7420_v21 = vrot.slane %v7419_v35, 2  ;;  %v7441_v63 = vrot.slane %v7440_v27, 2 }
 0x6a4   : > { %v7379_v42 = vadd.f32 %v7378_v7, %v7377_v51 }
 0x6a5   : > { %v7400_v56 = vadd.f32 %v7399_v26, %v7398_v6  ;;  %v7421_v28 = vadd.f32 %v7420_v21, %v7419_v35  ;;  %v7442_v37 = vadd.f32 %v7441_v63, %v7440_v27 }
 0x6a6   : > { %v7380_v15 = vrot.slane %v7379_v42, 1 }
 0x6a7   : > { %v7401_v31 = vrot.slane %v7400_v56, 1  ;;  %v7422_v41 = vrot.slane %v7421_v28, 1  ;;  %v7443_v43 = vrot.slane %v7442_v37, 1 }
 0x6a8   : > { %v7381_v58 = vadd.f32 %v7380_v15, %v7379_v42 }
 0x6a9   : > { %v7402_v38 = vadd.f32 %v7401_v31, %v7400_v56  ;;  %v7423_v11 = vadd.f32 %v7422_v41, %v7421_v28  ;;  %v7444_v17 = vadd.f32 %v7443_v43, %v7442_v37 }
 0x6ab   : > { %v7450_v45 = vcombine.low %v7423_v11, %v7444_v17  ;;  %v7449_v4 = vcombine.low %v7381_v58, %v7402_v38 }
 0x6ad   : > { %v7464_v0 = vrot.slane %v7450_v45, %v7456_v39  ;;  %v7457_v61 = vrot.slane %v7449_v4, %v7456_v39 }
 0x6af   : > { %v7465_v59 = vcombine.low %v7457_v61, %v7464_v0 }
 0x6b1   : > { %v7472_v9 = vrot.slane %v7465_v59, %v7456_v39 }
 0x6b3   : > { %v7474_v55 = vadd.f32 %v7472_v9, %v7216_v48 }
 0x6b5   : > { %7479 = vst.msk [vmem:[#allocation4] sm:$0xf] %vm7477_vm11, %v7474_v55 }
 0x6b6 PF: > { %s13897_s14 = sld [smem:[#allocation28_spill]] }
 0x6bc   : > { %p8780_p7 = scmp.ne.s32.totalorder %s13897_s14, 1 }
 0x6bd   : > { %v7485_v2 = vld [vmem:[#allocation2] sm:$0x1] (!%p8780_p7)  ;;  %vm7486_vm1 = vcmask (!%p8780_p7), 0   ;;  %v7488_v40 = vld [vmem:[#allocation3] sm:$0x1] (!%p8780_p7)  ;;  %v7491_v24 = vlaneseq (!%p8780_p7) }
 0x6be   : > { %7484 = sbr.rel (%p8780_p7) target bundleno = 1733 (0x6c5), region = 84  ;;  %7487 = vst.msk [vmem:[%s527_s28] sm:$0x1] (!%p8780_p7), %vm7486_vm1, %v7485_v2  ;;  %7489 = vst.msk [vmem:[%s530_s26] sm:$0x1] (!%p8780_p7), %vm7486_vm1, %v7488_v40 }
 0x6bf   : > { %v7490_v60 = vld [vmem:[#allocation4] sm:$0xf] (!%p8780_p7)  ;;  %vm7493_vm4 = vcmp.lt.s32.totalorder (!%p8780_p7), %v7491_v24, 512 }
 0x6c0   : > { %7495 = vst.msk [vmem:[%s505_s17] sm:$0xf] (!%p8780_p7), %vm7493_vm4, %v7490_v60 }
 0x6c5 PF: > { %s13239_s15 = scalar_lea.sflag [#allocation10], %s503_s7  ;;  %s13900_s21 = sld [smem:[#allocation34_spill]] }
 0x6cb   : > { %p13901_p10 = scmp.ne.s32.totalorder %s13900_s21, 0 }
 0x6cc   : > { %p7516_p5 = scmp.lt.s32.totalorder (%p13901_p10), %s11483_s20, 2  ;;  %s13902_s26 = sld [smem:[#allocation106_spill]] (%p13901_p10) }
 0x6cd   : > { %7513 = sbr.rel (!%p13901_p10) target bundleno = 1802 (0x70a), region = 88 }
 0x6d4   : > { %s13943_s20 = smov (!%p7516_p5, %s11483_s20), 2 }
 0x6d5   : > { %s8784_s28 = sshll.u32 %s13943_s20, 4  ;;  %s8802_s19 = sshll.u32 %s13943_s20, 7 }
 0x6d6   : > { %s7519_s24 = ssub.s32 38, %s8784_s28  ;;  %s13248_s18 = scalar_lea.vmem %s13902_s26, %s8802_s19  }
 0x6d7   : > { %p7520_p11 = scmp.lt.s32.totalorder %s7519_s24, 16 }
 0x6d9   : > { %s13945_s24 = smov (!%p7520_p11, %s7519_s24), 16 }
 0x6da   : > { %s8785_s7 = sshll.u32 %s13945_s24, 7 }
 0x6db   : > { %p8788_p0 = scmp.eq.s32.totalorder %s8785_s7, 0 }
 0x6dc   : > { %s13254_s14 = sshrl.u32 (!%p8788_p0), %s13945_s24, 4 }
 0x6dd   : > { %7528 = sbr.rel (%p8788_p0) target bundleno = 1802 (0x70a), region = 92  ;;  %p8789_p3 = scmp.le.s32.totalorder (!%p8788_p0), %s13254_s14, 0 }
 0x6e4   : > { %7816 = sbr.rel (%p8789_p3) target bundleno = 1781 (0x6f5), region = 215  ;;  %s13903_s20 = smov (!%p8789_p3), %s13248_s18 }
 0x6e5   : > { %s13904_s8 = smov (!%p8789_p3), %s11494_s30  ;;  %s13263_s13 = smov (!%p8789_p3), 0  }
 0x6e6   : > { %s13265_s23 = smov (!%p8789_p3), 0  }
 0x6eb LB: >> { %v7620_v53 = vld [vmem:[%s11038_s8] sm:$0xff]  ;;  %v7622_v13 = vld [vmem:[%s11038_s8 + $0x8] sm:$0xff]  ;;  %v7624_v18 = vld [vmem:[%s11038_s8 + $0x10] sm:$0xff]  ;;  %s7652_s27 = sadd.s32 1, %s11042_s13  ;;  %s7614_s23 = sadd.s32 1, %s11046_s23   ;;  %s11046_s23 = sphi %s13265_s23, %s7614_s23   ;;  %s11042_s13 = sphi %s13263_s13, %s13905_s13   ;;  %s11038_s8 = sphi %s13904_s8, %s7657_s8   ;;  %s11034_s20 = sphi %s13903_s20, %s7658_s20  }
 0x6ec   : >> { %7621 = vst [vmem:[%s11034_s20] sm:$0xff] %v7620_v53  ;;  %7623 = vst [vmem:[%s11034_s20 + $0x8] sm:$0xff] %v7622_v13  ;;  %v7626_v49 = vld [vmem:[%s11038_s8 + $0x18] sm:$0xff]  ;;  %v7628_v62 = vld [vmem:[%s11038_s8 + $0x20] sm:$0xff]  ;;  %p7653_p9 = scmp.ge.s32.totalorder %s7652_s27, %s13254_s14  ;;  %p7613_p4 = scmp.ge.s32.totalorder %s7614_s23, %s13254_s14 }
 0x6ed   : >> { %7625 = vst [vmem:[%s11034_s20 + $0x10] sm:$0xff] %v7624_v18  ;;  %v7630_v52 = vld [vmem:[%s11038_s8 + $0x28] sm:$0xff]  ;;  %7627 = vst [vmem:[%s11034_s20 + $0x18] sm:$0xff] %v7626_v49  ;;  %v7632_v54 = vld [vmem:[%s11038_s8 + $0x30] sm:$0xff] }
 0x6ee   : >> { %7629 = vst [vmem:[%s11034_s20 + $0x20] sm:$0xff] %v7628_v62  ;;  %7631 = vst [vmem:[%s11034_s20 + $0x28] sm:$0xff] %v7630_v52  ;;  %v7634_v8 = vld [vmem:[%s11038_s8 + $0x38] sm:$0xff]  ;;  %v7636_v46 = vld [vmem:[%s11038_s8 + $0x40] sm:$0xff]  ;;  %s13947_s27 = smov (%p7653_p9, %s7652_s27), 0  ;;  %7616 = sbr.rel (!%p7613_p4) target bundleno = 1771 (0x6eb), region = 221 }
 0x6ef   : >> { %7633 = vst [vmem:[%s11034_s20 + $0x30] sm:$0xff] %v7632_v54  ;;  %7635 = vst [vmem:[%s11034_s20 + $0x38] sm:$0xff] %v7634_v8  ;;  %v7638_v36 = vld [vmem:[%s11038_s8 + $0x48] sm:$0xff]  ;;  %v7640_v44 = vld [vmem:[%s11038_s8 + $0x50] sm:$0xff]  ;;  %s8790_s10 = sshll.u32 %s13947_s27, 7  ;;  %s13905_s13 = smov %s13947_s27 }
 0x6f0   : >> { %7637 = vst [vmem:[%s11034_s20 + $0x40] sm:$0xff] %v7636_v46  ;;  %v7642_v50 = vld [vmem:[%s11038_s8 + $0x58] sm:$0xff]  ;;  %7639 = vst [vmem:[%s11034_s20 + $0x48] sm:$0xff] %v7638_v36  ;;  %v7644_v20 = vld [vmem:[%s11038_s8 + $0x60] sm:$0xff] }
 0x6f1   : >> { %7641 = vst [vmem:[%s11034_s20 + $0x50] sm:$0xff] %v7640_v44  ;;  %7643 = vst [vmem:[%s11034_s20 + $0x58] sm:$0xff] %v7642_v50  ;;  %v7646_v57 = vld [vmem:[%s11038_s8 + $0x68] sm:$0xff]  ;;  %v7648_v16 = vld [vmem:[%s11038_s8 + $0x70] sm:$0xff] }
 0x6f2   : >> { %7645 = vst [vmem:[%s11034_s20 + $0x60] sm:$0xff] %v7644_v20  ;;  %7647 = vst [vmem:[%s11034_s20 + $0x68] sm:$0xff] %v7646_v57  ;;  %v7650_v19 = vld [vmem:[%s11038_s8 + $0x78] sm:$0xff]  ;;  %s7657_s8 = scalar_lea.vmem %s11494_s30, %s8790_s10 [#allocation19]  }
 0x6f3   : >> { %7649 = vst [vmem:[%s11034_s20 + $0x70] sm:$0xff] %v7648_v16  ;;  %7651 = vst [vmem:[%s11034_s20 + $0x78] sm:$0xff] %v7650_v19  ;;  %s7658_s20 = scalar_lea.vmem %s13248_s18, %s8790_s10  }
 0x6f5 PF: > { %s13323_s16 = sand.u32 15, %s13945_s24   ;;  %s8803_s21 = sshll.u32 %s13254_s14, 7 }
 0x6f6   : > { %s7663_s28 = scalar_lea.vmem %s11494_s30, %s8803_s21 [#allocation19]   ;;  %s7665_s19 = scalar_lea.vmem %s13248_s18, %s8803_s21  }
 0x6f7   : > { %p8795_p2 = scmp.le.s32.totalorder %s13323_s16, 0 }
 0x6f8   : > { %s11048_s11 = smov (!%p8795_p2), %s7665_s19   ;;  %s11052_s9 = smov (!%p8795_p2), %s7663_s28  }
 0x6f9   : > { %7830 = sbr.rel (%p8795_p2) target bundleno = 1802 (0x70a), region = 226  ;;  %s11056_s26 = smov (!%p8795_p2), 0  }
 0x6fa   : > { %s11060_s7 = smov (!%p8795_p2), 0  }
 0x700 LB: >> { %v7675_v14 = vld [vmem:[%s11054_s9] sm:$0xff]  ;;  %s7677_s24 = sadd.s32 1, %s11058_s26  ;;  %s7669_s7 = sadd.s32 1, %s11062_s7   ;;  %s11062_s7 = sphi %s11060_s7, %s7669_s7   ;;  %s11058_s26 = sphi %s11056_s26, %s11057_s26   ;;  %s11054_s9 = sphi %s11052_s9, %s7682_s9   ;;  %s11050_s11 = sphi %s11048_s11, %s7683_s11  }
 0x701   : >> { %7676 = vst [vmem:[%s11050_s11] sm:$0xff] %v7675_v14  ;;  %p7678_p6 = scmp.ge.s32.totalorder %s7677_s24, %s13323_s16  ;;  %p7668_p8 = scmp.ge.s32.totalorder %s7669_s7, %s13323_s16 }
 0x703   : >> { %s13949_s24 = smov (%p7678_p6, %s7677_s24), 0  ;;  %7671 = sbr.rel (!%p7668_p8) target bundleno = 1792 (0x700), region = 232 }
 0x704   : >> { %s8796_s30 = sshll.u32 %s13949_s24, 3  ;;  %s11057_s26 = smov %s13949_s24  }
 0x705   : >> { %s7682_s9 = scalar_lea.vmem %s7663_s28, %s8796_s30 [#allocation19]   ;;  %s7683_s11 = scalar_lea.vmem %s7665_s19, %s8796_s30  }
 0x70a PF: > { %s13906_s18 = sld [smem:[#allocation29_spill]]  ;;  %s13907_s14 = sld [smem:[#allocation37_spill]] }
 0x70b   : > { %s7703_s8 = sshll.u32 %s505_s17, 4  ;;  %s13908_s27 = sld [smem:[#allocation109_spill]]  ;;  %s7704_s8 = int_to_ptr.vmem [resolvable:$true] %s7703_s8 }
 0x70c   : > { %s10864_s26 = scalar_lea.vmem %s7704_s8, 64  ;;  %s11078_s11 = smov [#allocation20]  }
 0x70d   : > { %p10865_p12 = scmp.ne.s32.totalorder %s7704_s8, %s10864_s26  ;;  %s10868_s16 = sshll.u32 %s11078_s11, 4  ;;  %s10869_s16 = int_to_ptr.vmem [resolvable:$false] %s10868_s16 }
 0x70e   : > { %s10870_s28 = scalar_lea.vmem %s10869_s16, 128  ;;  %p10871_p10 = scmp.lt.s32.totalorder %s7704_s8, %s10869_s16 }
 0x70f   : > { %p10872_p5 = scmp.lt.s32.totalorder %s10870_s28, %s10864_s26 }
 0x710   : > { %s8805_s20 = sshll.u32 %s13906_s18, 6  ;;  %p13910_p13 = scmp.ne.s32.totalorder %s13907_s14, 0 }
 0x711   : > { %s13909_s10 = smov %s13908_s27  ;;  %s7701_s21 = scalar_lea.hbm %s13908_s27, %s8805_s20 }
 0x712   : > { %p10866_p1 = pnand %p10865_p12, %p13910_p13  ;;  %p10873_p11 = por %p10872_p5, %p10871_p10 }
 0x714   : > { %p10867_p7 = pneg %p10866_p1 }
 0x716   : > { %p10874_p0 = pnand %p10873_p11, %p10867_p7 }
 0x718   : > { %10877 = shalt.err (!%p10874_p0)
}
 0x719   : > { %s10878_s12 = scalar_lea.hbm %s7701_s21, 64  ;;  %s10882_s9 = scalar_lea.hbm %s13909_s10, 128 }
 0x71a   : > { %p10879_p3 = scmp.ne.s32.totalorder %s7701_s21, %s10878_s12  ;;  %p10883_p2 = scmp.lt.u32.totalorder %s7701_s21, %s13909_s10 }
 0x71b   : > { %p10884_p6 = scmp.lt.u32.totalorder %s10882_s9, %s10878_s12  ;;  %p10886_p12 = scmp.lt.u32.totalorder %s10878_s12, %s7701_s21 }
 0x71c   : > { %p10880_p9 = pnand %p10879_p3, %p13910_p13 }
 0x71d   : > { %p10885_p8 = por %p10884_p6, %p10883_p2 }
 0x71e   : > { %p10881_p4 = pneg %p10880_p9 }
 0x71f   : > { %p10887_p1 = por %p10886_p12, %p10885_p8 }
 0x721   : > { %p10888_p7 = pnand %p10887_p1, %p10881_p4 }
 0x723   : > { %10891 = shalt.err (!%p10888_p7)
}
 0x724   : > { %9406 = dma.vmem_to_hbm [thread:$0]  (%p13910_p13), %s7704_s8, 64, %s7701_s21, %s13239_s15  }
 0x725 PF: > { %s13911_s30 = sld [smem:[#allocation26_spill]]  ;;  %s13912_s18 = sld [smem:[#allocation38_spill]] }
 0x726   : > { %p9438_p10 = scmp.ge.s32.totalorder %s11030_s29, 2 }
 0x72b   : > { %s7734_s20 = sand.u32 1, %s13911_s30   ;;  %p13913_p5 = scmp.ne.s32.totalorder %s13912_s18, 0 }
 0x72c   : > { %s7735_s13 = scalar_lea.sflag [#allocation10], %s7734_s20 }
 0x72d   : > { %p9425_p11 = pnand %p9438_p10, %p13913_p5 }
 0x72f   : > { %10985 = dma.done.wait (!%p9425_p11), %s7735_s13, 64  }
 0x730   : > { %10987 = vsyncadd (!%p9425_p11), %s7735_s13, 4294967232  ;;  %s34_s29 = sadd.s32 1, %s11030_s29   ;;  %s13914_s23 = sld [smem:[#allocation27_spill]] }
 0x731   : > { %p31_p0 = scmp.ge.s32.totalorder %s34_s29, 6   ;;  %s13915_s27 = sld [smem:[#allocation35_spill]] }
 0x732   : > { %s13916_s15 = sld [smem:[#allocation36_spill]]  ;;  %s13917_s7 = sld [smem:[#allocation30_spill]] }
 0x733   : > { %s13918_s26 = sld [smem:[#allocation31_spill]]  ;;  %s13919_s14 = sld [smem:[#allocation32_spill]] }
 0x734   : > { %s13920_s28 = sld [smem:[#allocation33_spill]]  ;;  %s13921_s21 = smov %s10994_s22 }
 0x735   : > { %s13924_s24 = smov %s11006_s0  ;;  %s13925_s0 = smov %s11010_s25 }
 0x736   : > { %s13922_s22 = smov %s13914_s23  ;;  %33 = sbr.rel (!%p31_p0) target bundleno = 18 (0x12), region = 243 }
 0x737   : > { %s13923_s23 = smov %s13915_s27 }
 0x738   : > { %s13926_s25 = smov %s13916_s15 }
 0x739   : > { %s13927_s27 = smov %s13919_s14 }
 0x73d   :  { %7740 = vsyncpa [#allocation9], 1 }
 0x73e   :  { %7742 = vsyncpa [#allocation9 + $0x1], 1 }
 0x73f   :  { %7743 = vsyncpa [#allocation12], 1 }
 0x740   :  { %7744 = vsyncpa [#allocation15], 1 }
 0x741   :  { %7745 = vsyncpa [#allocation18], 1 }
 0x742   :  { %7746 = vsyncpa [#allocation10], 1 }
 0x743   :  { %7748 = vsyncpa [#allocation10 + $0x1], 1 }

</bundles_post_ra>
